<compile_context>
chip_gen: v7x
topology: tpu7x:2x2x1
jax: 0.10.0
libtpu: 0.0.40
codegen_flags: <defaults>
</compile_context>

<pallas_src>
import jax
import jax.numpy as jnp
from jax import lax
from jax.experimental import pallas as pl
from jax.experimental.pallas import tpu as pltpu


# -----------------------------------------------------------------------------
# Fused kernel: input projection + LSTM recurrence + fc projection.
#   x_ref   : (T, Bp, Dp)   time-major padded input
#   wih_ref : (Dp, 4*Hp)    input weight  (f32)
#   bias_ref: (1, 4*Hp)     b_ih + b_hh   (f32)
#   whh_ref : (Hp, 4*Hp)    recurrent weight (bf16)
#   fcw_ref : (Hp, Vp)      fc weight (f32)
#   fcb_ref : (1, Vp)       fc bias   (f32)
#   out_ref : (T, Bp, Vp)   logits (lane-dense Vp=128)
#   pre_ref : VMEM scratch (T, Bp, 4*Hp) pre-gates
#   hs_ref  : VMEM scratch (T, Bp, Hp)   hidden states
# -----------------------------------------------------------------------------
def _lipsync_kernel(x_ref, wih_ref, bias_ref, whh_ref, fcw_ref, fcb_ref,
                    out_ref, pre_ref, hs_ref):
    T, Bp, Dp = x_ref.shape
    Hp = hs_ref.shape[2]
    Vp = out_ref.shape[2]

    # ---- Hoisted input projection: one MXU pass for all T steps. ----
    x2d = x_ref[...].reshape(T * Bp, Dp)
    pre = jnp.dot(x2d, wih_ref[...],
                  preferred_element_type=jnp.float32) + bias_ref[...]
    pre_ref[...] = pre.reshape(T, Bp, 4 * Hp)

    def sigmoid(v):
        # sigma(x) = 0.5*tanh(0.5*x) + 0.5  -> single EUP op per vreg.
        return 0.5 * jnp.tanh(0.5 * v) + 0.5

    # ---- Serial LSTM recurrence (only h @ W_hh^T on the critical path). ----
    # TODO(synk): on v6e/v7x, stage the 4 (256x256) gate blocks of W_hh in the
    # MXU weight registers via pltpu.matmul_push_rhs/matmul_acc_lhs so W_hh is
    # never re-streamed per timestep.
    def body(t, carry):
        h, c = carry
        # bf16 MXU operands, f32 accumulate; whh read from VMEM inside the
        # body (never pinned across the unrolled loop in vregs).
        gates = pre_ref[t] + jnp.dot(h.astype(jnp.bfloat16), whh_ref[...],
                                     preferred_element_type=jnp.float32)
        # PyTorch gate order i, f, g, o; Hp=256 -> 128-lane aligned slices.
        i_g = sigmoid(gates[:, 0 * Hp:1 * Hp])
        f_g = sigmoid(gates[:, 1 * Hp:2 * Hp])
        g_g = jnp.tanh(gates[:, 2 * Hp:3 * Hp])
        o_g = sigmoid(gates[:, 3 * Hp:4 * Hp])
        c_new = f_g * c + i_g * g_g
        h_new = o_g * jnp.tanh(c_new)
        hs_ref[t] = h_new                       # lane-wide (Bp, Hp) store
        return (h_new, c_new)

    h0 = jnp.zeros((Bp, Hp), jnp.float32)
    c0 = jnp.zeros((Bp, Hp), jnp.float32)
    lax.fori_loop(0, T, body, (h0, c0), unroll=True)

    # ---- Hoisted fc projection: one matmul over all hidden states. ----
    hs2d = hs_ref[...].reshape(T * Bp, Hp)
    logits = jnp.dot(hs2d, fcw_ref[...],
                     preferred_element_type=jnp.float32) + fcb_ref[...]
    out_ref[...] = logits.reshape(T, Bp, Vp)    # lane-dense (Vp=128) store


def lipsync_pallas(x_btd, wih_t, whh_t, bias, fc_w, fc_b):
    """Forward pass of LipsyncModel.

    x_btd : (B, T, Din) float32, batch_first like the PyTorch module.
    wih_t : (Din, 4H)   = lstm.weight_ih_l0.T
    whh_t : (H, 4H)     = lstm.weight_hh_l0.T
    bias  : (1, 4H)     = (b_ih + b_hh)
    fc_w  : (H, V)      = fc.weight.T
    fc_b  : (1, V)
    returns logits (B, T, V).
    """
    B, T, Din = x_btd.shape
    H = whh_t.shape[0]
    V = fc_w.shape[1]

    Hp = ((H + 127) // 128) * 128          # 200 -> 256 (lane-aligned gates)
    Bp = ((B + 7) // 8) * 8                # 2   -> 8   (full sublanes)
    Dp = ((Din + 127) // 128) * 128        # 32  -> 128 (lane-aligned K)
    Vp = ((V + 127) // 128) * 128          # 16  -> 128 (lane-dense logits)

    def pad_gate_cols(w):                  # (rows, 4H) -> (rows, 4Hp), zero pad
        rows = w.shape[0]
        w4 = w.reshape(rows, 4, H)
        return jnp.pad(w4, ((0, 0), (0, 0), (0, Hp - H))).reshape(rows, 4 * Hp)

    wih_p = jnp.pad(pad_gate_cols(wih_t), ((0, Dp - Din), (0, 0)))   # (Dp, 4Hp)
    whh_p = jnp.pad(pad_gate_cols(whh_t),
                    ((0, Hp - H), (0, 0))).astype(jnp.bfloat16)      # (Hp, 4Hp) bf16
    bias_p = pad_gate_cols(bias)                                     # (1, 4Hp)
    fcw_p = jnp.pad(fc_w, ((0, Hp - H), (0, Vp - V)))                # (Hp, Vp)
    fcb_p = jnp.pad(fc_b, ((0, 0), (0, Vp - V)))                     # (1, Vp)

    # Time-major padded input (tiny; fused by XLA with the pads).
    x_p = jnp.pad(x_btd, ((0, Bp - B), (0, 0), (0, Dp - Din)))       # (Bp, T, Dp)
    x_tbd = jnp.transpose(x_p, (1, 0, 2)).astype(jnp.float32)        # (T, Bp, Dp)

    # TODO(synk): at production T/H on v7x (64 MiB VMEM), single-buffer the
    # grid-invariant weight blocks (pipeline_mode=pl.Buffered(1)), chunk
    # pre_gates along T, and set vmem_limit_bytes explicitly.
    out_tbv = pl.pallas_call(
        _lipsync_kernel,
        out_shape=jax.ShapeDtypeStruct((T, Bp, Vp), jnp.float32),
        grid_spec=pltpu.PrefetchScalarGridSpec(
            num_scalar_prefetch=0,
            grid=(1,),
            in_specs=[
                pl.BlockSpec((T, Bp, Dp), lambda i: (0, 0, 0)),   # x (time-major)
                pl.BlockSpec((Dp, 4 * Hp), lambda i: (0, 0)),     # W_ih^T
                pl.BlockSpec((1, 4 * Hp), lambda i: (0, 0)),      # bias
                pl.BlockSpec((Hp, 4 * Hp), lambda i: (0, 0)),     # W_hh^T (bf16)
                pl.BlockSpec((Hp, Vp), lambda i: (0, 0)),         # fc weight
                pl.BlockSpec((1, Vp), lambda i: (0, 0)),          # fc bias
            ],
            out_specs=pl.BlockSpec((T, Bp, Vp), lambda i: (0, 0, 0)),
            scratch_shapes=[
                pltpu.VMEM((T, Bp, 4 * Hp), jnp.float32),         # pre-gates
                pltpu.VMEM((T, Bp, Hp), jnp.float32),             # hidden states
            ]),
        compiler_params=pltpu.CompilerParams(
            dimension_semantics=("arbitrary",)),
    )(x_tbd, wih_p, bias_p, whh_p, fcw_p, fcb_p)                     # (T, Bp, Vp)

    # Slice off padding, return batch-first logits (tiny XLA epilogue).
    return jnp.transpose(out_tbv[:, :B, :V], (1, 0, 2))              # (B, T, V)


# -----------------------------------------------------------------------------
# Pure-JAX reference (lax.scan LSTM) for correctness checking.
# -----------------------------------------------------------------------------
def lipsync_ref(x_btd, wih_t, whh_t, bias, fc_w, fc_b):
    B, T, Din = x_btd.shape
    H = whh_t.shape[0]

    def step(carry, x_t):
        h, c = carry
        gates = x_t @ wih_t + h @ whh_t + bias
        i_g = jax.nn.sigmoid(gates[:, 0 * H:1 * H])
        f_g = jax.nn.sigmoid(gates[:, 1 * H:2 * H])
        g_g = jnp.tanh(gates[:, 2 * H:3 * H])
        o_g = jax.nn.sigmoid(gates[:, 3 * H:4 * H])
        c_new = f_g * c + i_g * g_g
        h_new = o_g * jnp.tanh(c_new)
        return (h_new, c_new), h_new

    x_tbd = jnp.transpose(x_btd, (1, 0, 2))
    h0 = jnp.zeros((B, H), jnp.float32)
    c0 = jnp.zeros((B, H), jnp.float32)
    _, hs = lax.scan(step, (h0, c0), x_tbd)       # (T, B, H)
    logits = hs @ fc_w + fc_b                     # (T, B, V)
    return jnp.transpose(logits, (1, 0, 2))


if __name__ == "__main__":
    # Small shapes consistent with the module.
    B, T = 2, 8
    INPUT_SIZE = 32
    HIDDEN = 200                 # fixed by the module: nn.LSTM(input_size, 200)
    NUM_VISEMES = 16
    label_mapping = {i: f"viseme_{i}" for i in range(NUM_VISEMES)}

    key = jax.random.PRNGKey(0)
    keys = jax.random.split(key, 8)
    k = 1.0 / jnp.sqrt(HIDDEN)   # PyTorch default uniform(-1/sqrt(H), 1/sqrt(H))

    # Parameters (stored already transposed for row-major matmul).
    wih_t = jax.random.uniform(keys[0], (INPUT_SIZE, 4 * HIDDEN),
                               jnp.float32, -k, k)        # W_ih^T
    whh_t = jax.random.uniform(keys[1], (HIDDEN, 4 * HIDDEN),
                               jnp.float32, -k, k)        # W_hh^T
    b_ih = jax.random.uniform(keys[2], (4 * HIDDEN,), jnp.float32, -k, k)
    b_hh = jax.random.uniform(keys[3], (4 * HIDDEN,), jnp.float32, -k, k)
    bias = (b_ih + b_hh).reshape(1, 4 * HIDDEN)
    fc_w = jax.random.uniform(keys[4], (HIDDEN, NUM_VISEMES),
                              jnp.float32, -k, k)          # fc.weight^T
    fc_b = jax.random.uniform(keys[5], (NUM_VISEMES,),
                              jnp.float32, -k, k).reshape(1, NUM_VISEMES)

    # Input: batch_first (B, T, input_size), like the PyTorch module.
    x = jax.random.normal(keys[6], (B, T, INPUT_SIZE), jnp.float32)

    logits = jax.block_until_ready(
        jax.jit(lipsync_pallas)(x, wih_t, whh_t, bias, fc_w, fc_b))  # (B, T, V)

    ref = lipsync_ref(x, wih_t, whh_t, bias, fc_w, fc_b)
    assert logits.shape == (B, T, NUM_VISEMES)
    # bf16 MXU operands for the recurrent dot -> relaxed tolerance.
    assert jnp.allclose(logits, ref, atol=2e-2, rtol=2e-2), "mismatch vs reference"

    # decode=True path: argmax over viseme dim, then DecodingLayer's python
    # label lookup (host-side; no tensor equivalent).
    labels = jnp.argmax(logits, axis=2)                      # (B, T) int
    decoded = [[label_mapping[int(l)] for l in time_step]
               for time_step in labels]
    assert len(decoded) == B and len(decoded[0]) == T

    print("KERNEL_OK")
</pallas_src>

<mosaic_0001>
module attributes {stable_mosaic.version = 11 : i64} {
  func.func @_lipsync_kernel(%arg0: i32, %arg1: memref<8x8x128xf32, #tpu.memory_space<vmem>>, %arg2: memref<128x1024xf32, #tpu.memory_space<vmem>>, %arg3: memref<1x1024xf32, #tpu.memory_space<vmem>>, %arg4: memref<256x1024xbf16, #tpu.memory_space<vmem>>, %arg5: memref<256x128xf32, #tpu.memory_space<vmem>>, %arg6: memref<1x128xf32, #tpu.memory_space<vmem>>, %arg7: memref<8x8x128xf32, #tpu.memory_space<vmem>>, %arg8: memref<8x8x1024xf32, #tpu.memory_space<vmem>>, %arg9: memref<8x8x256xf32, #tpu.memory_space<vmem>>) attributes {dimension_semantics = [#tpu.dimension_semantics<arbitrary>], iteration_bounds = array<i64: 1>, scalar_prefetch = 0 : i64, scratch_operands = 2 : i64, tpu.core_type = #tpu.core_type<tc>, window_params = [{pipeline_mode = #tpu.pipeline_mode<synchronous>, transform_indices = @transform_0, window_bounds = array<i64: 8, 8, 128>}, {pipeline_mode = #tpu.pipeline_mode<synchronous>, transform_indices = @transform_1, window_bounds = array<i64: 128, 1024>}, {pipeline_mode = #tpu.pipeline_mode<synchronous>, transform_indices = @transform_2, window_bounds = array<i64: 1, 1024>}, {pipeline_mode = #tpu.pipeline_mode<synchronous>, transform_indices = @transform_3, window_bounds = array<i64: 256, 1024>}, {pipeline_mode = #tpu.pipeline_mode<synchronous>, transform_indices = @transform_4, window_bounds = array<i64: 256, 128>}, {pipeline_mode = #tpu.pipeline_mode<synchronous>, transform_indices = @transform_5, window_bounds = array<i64: 1, 128>}, {pipeline_mode = #tpu.pipeline_mode<synchronous>, transform_indices = @transform_6, window_bounds = array<i64: 8, 8, 128>}]} {
    %c0 = arith.constant 0 : index
    %c0_0 = arith.constant 0 : index
    %c0_1 = arith.constant 0 : index
    %0 = vector.load %arg1[%c0, %c0_0, %c0_1] : memref<8x8x128xf32, #tpu.memory_space<vmem>>, vector<8x8x128xf32>
    %1 = vector.shape_cast %0 : vector<8x8x128xf32> to vector<64x128xf32>
    %c0_2 = arith.constant 0 : index
    %c0_3 = arith.constant 0 : index
    %2 = vector.load %arg2[%c0_2, %c0_3] : memref<128x1024xf32, #tpu.memory_space<vmem>>, vector<128x1024xf32>
    %cst = arith.constant dense<0.000000e+00> : vector<64x1024xf32>
    %3 = tpu.matmul %1, %2, %cst {dimension_numbers = #tpu.dot_dimension_numbers<[1], [0], [0], [1], [0, 0, 1, 1], [], []>} : vector<64x128xf32>, vector<128x1024xf32>, vector<64x1024xf32> -> vector<64x1024xf32>
    %c0_4 = arith.constant 0 : index
    %c0_5 = arith.constant 0 : index
    %4 = vector.load %arg3[%c0_4, %c0_5] : memref<1x1024xf32, #tpu.memory_space<vmem>>, vector<1x1024xf32>
    %5 = vector.broadcast %4 : vector<1x1024xf32> to vector<64x1024xf32>
    %6 = arith.addf %3, %5 : vector<64x1024xf32>
    %7 = vector.shape_cast %6 : vector<64x1024xf32> to vector<8x8x1024xf32>
    %c0_6 = arith.constant 0 : index
    %c0_7 = arith.constant 0 : index
    %c0_8 = arith.constant 0 : index
    %8 = vector.load %arg8[%c0_6, %c0_7, %c0_8] : memref<8x8x1024xf32, #tpu.memory_space<vmem>>, vector<8x8x1024xf32>
    tpu.vector_store %arg8[%c0_6, %c0_7, %c0_8], %7 {strides = array<i32>} : memref<8x8x1024xf32, #tpu.memory_space<vmem>>, vector<8x8x1024xf32>,
    %cst_9 = arith.constant 0.000000e+00 : f32
    %9 = vector.broadcast %cst_9 : f32 to vector<8x256xf32>
    %cst_10 = arith.constant 0.000000e+00 : f32
    %10 = vector.broadcast %cst_10 : f32 to vector<8x256xf32>
    %c0_i32 = arith.constant 0 : i32
    %11 = arith.index_cast %c0_i32 : i32 to index
    %c0_11 = arith.constant 0 : index
    %c0_12 = arith.constant 0 : index
    %12 = vector.load %arg8[%11, %c0_11, %c0_12] : memref<8x8x1024xf32, #tpu.memory_space<vmem>>, vector<1x8x1024xf32>
    %13 = vector.shape_cast %12 : vector<1x8x1024xf32> to vector<8x1024xf32>
    %14 = arith.truncf %9 : vector<8x256xf32> to vector<8x256xbf16>
    %c0_13 = arith.constant 0 : index
    %c0_14 = arith.constant 0 : index
    %15 = vector.load %arg4[%c0_13, %c0_14] : memref<256x1024xbf16, #tpu.memory_space<vmem>>, vector<256x1024xbf16>
    %cst_15 = arith.constant dense<0.000000e+00> : vector<8x1024xf32>
    %16 = tpu.matmul %14, %15, %cst_15 {dimension_numbers = #tpu.dot_dimension_numbers<[1], [0], [0], [1], [0, 0, 1, 1], [], []>} : vector<8x256xbf16>, vector<256x1024xbf16>, vector<8x1024xf32> -> vector<8x1024xf32>
    %17 = arith.addf %13, %16 : vector<8x1024xf32>
    %18 = vector.extract_strided_slice %17 {offsets = [0, 0], sizes = [8, 256], strides = [1, 1]} : vector<8x1024xf32> to vector<8x256xf32>
    %cst_16 = arith.constant 5.000000e-01 : f32
    %19 = vector.broadcast %cst_16 : f32 to vector<8x256xf32>
    %20 = arith.mulf %19, %18 : vector<8x256xf32>
    %21 = math.tanh %20 : vector<8x256xf32>
    %cst_17 = arith.constant 5.000000e-01 : f32
    %22 = vector.broadcast %cst_17 : f32 to vector<8x256xf32>
    %23 = arith.mulf %22, %21 : vector<8x256xf32>
    %cst_18 = arith.constant 5.000000e-01 : f32
    %24 = vector.broadcast %cst_18 : f32 to vector<8x256xf32>
    %25 = arith.addf %23, %24 : vector<8x256xf32>
    %26 = vector.extract_strided_slice %17 {offsets = [0, 256], sizes = [8, 256], strides = [1, 1]} : vector<8x1024xf32> to vector<8x256xf32>
    %cst_19 = arith.constant 5.000000e-01 : f32
    %27 = vector.broadcast %cst_19 : f32 to vector<8x256xf32>
    %28 = arith.mulf %27, %26 : vector<8x256xf32>
    %29 = math.tanh %28 : vector<8x256xf32>
    %cst_20 = arith.constant 5.000000e-01 : f32
    %30 = vector.broadcast %cst_20 : f32 to vector<8x256xf32>
    %31 = arith.mulf %30, %29 : vector<8x256xf32>
    %cst_21 = arith.constant 5.000000e-01 : f32
    %32 = vector.broadcast %cst_21 : f32 to vector<8x256xf32>
    %33 = arith.addf %31, %32 : vector<8x256xf32>
    %34 = vector.extract_strided_slice %17 {offsets = [0, 512], sizes = [8, 256], strides = [1, 1]} : vector<8x1024xf32> to vector<8x256xf32>
    %35 = math.tanh %34 : vector<8x256xf32>
    %36 = vector.extract_strided_slice %17 {offsets = [0, 768], sizes = [8, 256], strides = [1, 1]} : vector<8x1024xf32> to vector<8x256xf32>
    %cst_22 = arith.constant 5.000000e-01 : f32
    %37 = vector.broadcast %cst_22 : f32 to vector<8x256xf32>
    %38 = arith.mulf %37, %36 : vector<8x256xf32>
    %39 = math.tanh %38 : vector<8x256xf32>
    %cst_23 = arith.constant 5.000000e-01 : f32
    %40 = vector.broadcast %cst_23 : f32 to vector<8x256xf32>
    %41 = arith.mulf %40, %39 : vector<8x256xf32>
    %cst_24 = arith.constant 5.000000e-01 : f32
    %42 = vector.broadcast %cst_24 : f32 to vector<8x256xf32>
    %43 = arith.addf %41, %42 : vector<8x256xf32>
    %44 = arith.mulf %33, %10 : vector<8x256xf32>
    %45 = arith.mulf %25, %35 : vector<8x256xf32>
    %46 = arith.addf %44, %45 : vector<8x256xf32>
    %47 = math.tanh %46 : vector<8x256xf32>
    %48 = arith.mulf %43, %47 : vector<8x256xf32>
    %49 = arith.index_cast %c0_i32 : i32 to index
    %c0_25 = arith.constant 0 : index
    %c0_26 = arith.constant 0 : index
    %50 = vector.load %arg9[%49, %c0_25, %c0_26] : memref<8x8x256xf32, #tpu.memory_space<vmem>>, vector<1x8x256xf32>
    %51 = vector.shape_cast %50 : vector<1x8x256xf32> to vector<8x256xf32>
    %52 = vector.shape_cast %48 : vector<8x256xf32> to vector<1x8x256xf32>
    tpu.vector_store %arg9[%49, %c0_25, %c0_26], %52 {strides = array<i32>} : memref<8x8x256xf32, #tpu.memory_space<vmem>>, vector<1x8x256xf32>,
    %c1_i32 = arith.constant 1 : i32
    %53 = arith.index_cast %c1_i32 : i32 to index
    %c0_27 = arith.constant 0 : index
    %c0_28 = arith.constant 0 : index
    %54 = vector.load %arg8[%53, %c0_27, %c0_28] : memref<8x8x1024xf32, #tpu.memory_space<vmem>>, vector<1x8x1024xf32>
    %55 = vector.shape_cast %54 : vector<1x8x1024xf32> to vector<8x1024xf32>
    %56 = arith.truncf %48 : vector<8x256xf32> to vector<8x256xbf16>
    %c0_29 = arith.constant 0 : index
    %c0_30 = arith.constant 0 : index
    %57 = vector.load %arg4[%c0_29, %c0_30] : memref<256x1024xbf16, #tpu.memory_space<vmem>>, vector<256x1024xbf16>
    %cst_31 = arith.constant dense<0.000000e+00> : vector<8x1024xf32>
    %58 = tpu.matmul %56, %57, %cst_31 {dimension_numbers = #tpu.dot_dimension_numbers<[1], [0], [0], [1], [0, 0, 1, 1], [], []>} : vector<8x256xbf16>, vector<256x1024xbf16>, vector<8x1024xf32> -> vector<8x1024xf32>
    %59 = arith.addf %55, %58 : vector<8x1024xf32>
    %60 = vector.extract_strided_slice %59 {offsets = [0, 0], sizes = [8, 256], strides = [1, 1]} : vector<8x1024xf32> to vector<8x256xf32>
    %cst_32 = arith.constant 5.000000e-01 : f32
    %61 = vector.broadcast %cst_32 : f32 to vector<8x256xf32>
    %62 = arith.mulf %61, %60 : vector<8x256xf32>
    %63 = math.tanh %62 : vector<8x256xf32>
    %cst_33 = arith.constant 5.000000e-01 : f32
    %64 = vector.broadcast %cst_33 : f32 to vector<8x256xf32>
    %65 = arith.mulf %64, %63 : vector<8x256xf32>
    %cst_34 = arith.constant 5.000000e-01 : f32
    %66 = vector.broadcast %cst_34 : f32 to vector<8x256xf32>
    %67 = arith.addf %65, %66 : vector<8x256xf32>
    %68 = vector.extract_strided_slice %59 {offsets = [0, 256], sizes = [8, 256], strides = [1, 1]} : vector<8x1024xf32> to vector<8x256xf32>
    %cst_35 = arith.constant 5.000000e-01 : f32
    %69 = vector.broadcast %cst_35 : f32 to vector<8x256xf32>
    %70 = arith.mulf %69, %68 : vector<8x256xf32>
    %71 = math.tanh %70 : vector<8x256xf32>
    %cst_36 = arith.constant 5.000000e-01 : f32
    %72 = vector.broadcast %cst_36 : f32 to vector<8x256xf32>
    %73 = arith.mulf %72, %71 : vector<8x256xf32>
    %cst_37 = arith.constant 5.000000e-01 : f32
    %74 = vector.broadcast %cst_37 : f32 to vector<8x256xf32>
    %75 = arith.addf %73, %74 : vector<8x256xf32>
    %76 = vector.extract_strided_slice %59 {offsets = [0, 512], sizes = [8, 256], strides = [1, 1]} : vector<8x1024xf32> to vector<8x256xf32>
    %77 = math.tanh %76 : vector<8x256xf32>
    %78 = vector.extract_strided_slice %59 {offsets = [0, 768], sizes = [8, 256], strides = [1, 1]} : vector<8x1024xf32> to vector<8x256xf32>
    %cst_38 = arith.constant 5.000000e-01 : f32
    %79 = vector.broadcast %cst_38 : f32 to vector<8x256xf32>
    %80 = arith.mulf %79, %78 : vector<8x256xf32>
    %81 = math.tanh %80 : vector<8x256xf32>
    %cst_39 = arith.constant 5.000000e-01 : f32
    %82 = vector.broadcast %cst_39 : f32 to vector<8x256xf32>
    %83 = arith.mulf %82, %81 : vector<8x256xf32>
    %cst_40 = arith.constant 5.000000e-01 : f32
    %84 = vector.broadcast %cst_40 : f32 to vector<8x256xf32>
    %85 = arith.addf %83, %84 : vector<8x256xf32>
    %86 = arith.mulf %75, %46 : vector<8x256xf32>
    %87 = arith.mulf %67, %77 : vector<8x256xf32>
    %88 = arith.addf %86, %87 : vector<8x256xf32>
    %89 = math.tanh %88 : vector<8x256xf32>
    %90 = arith.mulf %85, %89 : vector<8x256xf32>
    %91 = arith.index_cast %c1_i32 : i32 to index
    %c0_41 = arith.constant 0 : index
    %c0_42 = arith.constant 0 : index
    %92 = vector.load %arg9[%91, %c0_41, %c0_42] : memref<8x8x256xf32, #tpu.memory_space<vmem>>, vector<1x8x256xf32>
    %93 = vector.shape_cast %92 : vector<1x8x256xf32> to vector<8x256xf32>
    %94 = vector.shape_cast %90 : vector<8x256xf32> to vector<1x8x256xf32>
    tpu.vector_store %arg9[%91, %c0_41, %c0_42], %94 {strides = array<i32>} : memref<8x8x256xf32, #tpu.memory_space<vmem>>, vector<1x8x256xf32>,
    %c2_i32 = arith.constant 2 : i32
    %95 = arith.index_cast %c2_i32 : i32 to index
    %c0_43 = arith.constant 0 : index
    %c0_44 = arith.constant 0 : index
    %96 = vector.load %arg8[%95, %c0_43, %c0_44] : memref<8x8x1024xf32, #tpu.memory_space<vmem>>, vector<1x8x1024xf32>
    %97 = vector.shape_cast %96 : vector<1x8x1024xf32> to vector<8x1024xf32>
    %98 = arith.truncf %90 : vector<8x256xf32> to vector<8x256xbf16>
    %c0_45 = arith.constant 0 : index
    %c0_46 = arith.constant 0 : index
    %99 = vector.load %arg4[%c0_45, %c0_46] : memref<256x1024xbf16, #tpu.memory_space<vmem>>, vector<256x1024xbf16>
    %cst_47 = arith.constant dense<0.000000e+00> : vector<8x1024xf32>
    %100 = tpu.matmul %98, %99, %cst_47 {dimension_numbers = #tpu.dot_dimension_numbers<[1], [0], [0], [1], [0, 0, 1, 1], [], []>} : vector<8x256xbf16>, vector<256x1024xbf16>, vector<8x1024xf32> -> vector<8x1024xf32>
    %101 = arith.addf %97, %100 : vector<8x1024xf32>
    %102 = vector.extract_strided_slice %101 {offsets = [0, 0], sizes = [8, 256], strides = [1, 1]} : vector<8x1024xf32> to vector<8x256xf32>
    %cst_48 = arith.constant 5.000000e-01 : f32
    %103 = vector.broadcast %cst_48 : f32 to vector<8x256xf32>
    %104 = arith.mulf %103, %102 : vector<8x256xf32>
    %105 = math.tanh %104 : vector<8x256xf32>
    %cst_49 = arith.constant 5.000000e-01 : f32
    %106 = vector.broadcast %cst_49 : f32 to vector<8x256xf32>
    %107 = arith.mulf %106, %105 : vector<8x256xf32>
    %cst_50 = arith.constant 5.000000e-01 : f32
    %108 = vector.broadcast %cst_50 : f32 to vector<8x256xf32>
    %109 = arith.addf %107, %108 : vector<8x256xf32>
    %110 = vector.extract_strided_slice %101 {offsets = [0, 256], sizes = [8, 256], strides = [1, 1]} : vector<8x1024xf32> to vector<8x256xf32>
    %cst_51 = arith.constant 5.000000e-01 : f32
    %111 = vector.broadcast %cst_51 : f32 to vector<8x256xf32>
    %112 = arith.mulf %111, %110 : vector<8x256xf32>
    %113 = math.tanh %112 : vector<8x256xf32>
    %cst_52 = arith.constant 5.000000e-01 : f32
    %114 = vector.broadcast %cst_52 : f32 to vector<8x256xf32>
    %115 = arith.mulf %114, %113 : vector<8x256xf32>
    %cst_53 = arith.constant 5.000000e-01 : f32
    %116 = vector.broadcast %cst_53 : f32 to vector<8x256xf32>
    %117 = arith.addf %115, %116 : vector<8x256xf32>
    %118 = vector.extract_strided_slice %101 {offsets = [0, 512], sizes = [8, 256], strides = [1, 1]} : vector<8x1024xf32> to vector<8x256xf32>
    %119 = math.tanh %118 : vector<8x256xf32>
    %120 = vector.extract_strided_slice %101 {offsets = [0, 768], sizes = [8, 256], strides = [1, 1]} : vector<8x1024xf32> to vector<8x256xf32>
    %cst_54 = arith.constant 5.000000e-01 : f32
    %121 = vector.broadcast %cst_54 : f32 to vector<8x256xf32>
    %122 = arith.mulf %121, %120 : vector<8x256xf32>
    %123 = math.tanh %122 : vector<8x256xf32>
    %cst_55 = arith.constant 5.000000e-01 : f32
    %124 = vector.broadcast %cst_55 : f32 to vector<8x256xf32>
    %125 = arith.mulf %124, %123 : vector<8x256xf32>
    %cst_56 = arith.constant 5.000000e-01 : f32
    %126 = vector.broadcast %cst_56 : f32 to vector<8x256xf32>
    %127 = arith.addf %125, %126 : vector<8x256xf32>
    %128 = arith.mulf %117, %88 : vector<8x256xf32>
    %129 = arith.mulf %109, %119 : vector<8x256xf32>
    %130 = arith.addf %128, %129 : vector<8x256xf32>
    %131 = math.tanh %130 : vector<8x256xf32>
    %132 = arith.mulf %127, %131 : vector<8x256xf32>
    %133 = arith.index_cast %c2_i32 : i32 to index
    %c0_57 = arith.constant 0 : index
    %c0_58 = arith.constant 0 : index
    %134 = vector.load %arg9[%133, %c0_57, %c0_58] : memref<8x8x256xf32, #tpu.memory_space<vmem>>, vector<1x8x256xf32>
    %135 = vector.shape_cast %134 : vector<1x8x256xf32> to vector<8x256xf32>
    %136 = vector.shape_cast %132 : vector<8x256xf32> to vector<1x8x256xf32>
    tpu.vector_store %arg9[%133, %c0_57, %c0_58], %136 {strides = array<i32>} : memref<8x8x256xf32, #tpu.memory_space<vmem>>, vector<1x8x256xf32>,
    %c3_i32 = arith.constant 3 : i32
    %137 = arith.index_cast %c3_i32 : i32 to index
    %c0_59 = arith.constant 0 : index
    %c0_60 = arith.constant 0 : index
    %138 = vector.load %arg8[%137, %c0_59, %c0_60] : memref<8x8x1024xf32, #tpu.memory_space<vmem>>, vector<1x8x1024xf32>
    %139 = vector.shape_cast %138 : vector<1x8x1024xf32> to vector<8x1024xf32>
    %140 = arith.truncf %132 : vector<8x256xf32> to vector<8x256xbf16>
    %c0_61 = arith.constant 0 : index
    %c0_62 = arith.constant 0 : index
    %141 = vector.load %arg4[%c0_61, %c0_62] : memref<256x1024xbf16, #tpu.memory_space<vmem>>, vector<256x1024xbf16>
    %cst_63 = arith.constant dense<0.000000e+00> : vector<8x1024xf32>
    %142 = tpu.matmul %140, %141, %cst_63 {dimension_numbers = #tpu.dot_dimension_numbers<[1], [0], [0], [1], [0, 0, 1, 1], [], []>} : vector<8x256xbf16>, vector<256x1024xbf16>, vector<8x1024xf32> -> vector<8x1024xf32>
    %143 = arith.addf %139, %142 : vector<8x1024xf32>
    %144 = vector.extract_strided_slice %143 {offsets = [0, 0], sizes = [8, 256], strides = [1, 1]} : vector<8x1024xf32> to vector<8x256xf32>
    %cst_64 = arith.constant 5.000000e-01 : f32
    %145 = vector.broadcast %cst_64 : f32 to vector<8x256xf32>
    %146 = arith.mulf %145, %144 : vector<8x256xf32>
    %147 = math.tanh %146 : vector<8x256xf32>
    %cst_65 = arith.constant 5.000000e-01 : f32
    %148 = vector.broadcast %cst_65 : f32 to vector<8x256xf32>
    %149 = arith.mulf %148, %147 : vector<8x256xf32>
    %cst_66 = arith.constant 5.000000e-01 : f32
    %150 = vector.broadcast %cst_66 : f32 to vector<8x256xf32>
    %151 = arith.addf %149, %150 : vector<8x256xf32>
    %152 = vector.extract_strided_slice %143 {offsets = [0, 256], sizes = [8, 256], strides = [1, 1]} : vector<8x1024xf32> to vector<8x256xf32>
    %cst_67 = arith.constant 5.000000e-01 : f32
    %153 = vector.broadcast %cst_67 : f32 to vector<8x256xf32>
    %154 = arith.mulf %153, %152 : vector<8x256xf32>
    %155 = math.tanh %154 : vector<8x256xf32>
    %cst_68 = arith.constant 5.000000e-01 : f32
    %156 = vector.broadcast %cst_68 : f32 to vector<8x256xf32>
    %157 = arith.mulf %156, %155 : vector<8x256xf32>
    %cst_69 = arith.constant 5.000000e-01 : f32
    %158 = vector.broadcast %cst_69 : f32 to vector<8x256xf32>
    %159 = arith.addf %157, %158 : vector<8x256xf32>
    %160 = vector.extract_strided_slice %143 {offsets = [0, 512], sizes = [8, 256], strides = [1, 1]} : vector<8x1024xf32> to vector<8x256xf32>
    %161 = math.tanh %160 : vector<8x256xf32>
    %162 = vector.extract_strided_slice %143 {offsets = [0, 768], sizes = [8, 256], strides = [1, 1]} : vector<8x1024xf32> to vector<8x256xf32>
    %cst_70 = arith.constant 5.000000e-01 : f32
    %163 = vector.broadcast %cst_70 : f32 to vector<8x256xf32>
    %164 = arith.mulf %163, %162 : vector<8x256xf32>
    %165 = math.tanh %164 : vector<8x256xf32>
    %cst_71 = arith.constant 5.000000e-01 : f32
    %166 = vector.broadcast %cst_71 : f32 to vector<8x256xf32>
    %167 = arith.mulf %166, %165 : vector<8x256xf32>
    %cst_72 = arith.constant 5.000000e-01 : f32
    %168 = vector.broadcast %cst_72 : f32 to vector<8x256xf32>
    %169 = arith.addf %167, %168 : vector<8x256xf32>
    %170 = arith.mulf %159, %130 : vector<8x256xf32>
    %171 = arith.mulf %151, %161 : vector<8x256xf32>
    %172 = arith.addf %170, %171 : vector<8x256xf32>
    %173 = math.tanh %172 : vector<8x256xf32>
    %174 = arith.mulf %169, %173 : vector<8x256xf32>
    %175 = arith.index_cast %c3_i32 : i32 to index
    %c0_73 = arith.constant 0 : index
    %c0_74 = arith.constant 0 : index
    %176 = vector.load %arg9[%175, %c0_73, %c0_74] : memref<8x8x256xf32, #tpu.memory_space<vmem>>, vector<1x8x256xf32>
    %177 = vector.shape_cast %176 : vector<1x8x256xf32> to vector<8x256xf32>
    %178 = vector.shape_cast %174 : vector<8x256xf32> to vector<1x8x256xf32>
    tpu.vector_store %arg9[%175, %c0_73, %c0_74], %178 {strides = array<i32>} : memref<8x8x256xf32, #tpu.memory_space<vmem>>, vector<1x8x256xf32>,
    %c4_i32 = arith.constant 4 : i32
    %179 = arith.index_cast %c4_i32 : i32 to index
    %c0_75 = arith.constant 0 : index
    %c0_76 = arith.constant 0 : index
    %180 = vector.load %arg8[%179, %c0_75, %c0_76] : memref<8x8x1024xf32, #tpu.memory_space<vmem>>, vector<1x8x1024xf32>
    %181 = vector.shape_cast %180 : vector<1x8x1024xf32> to vector<8x1024xf32>
    %182 = arith.truncf %174 : vector<8x256xf32> to vector<8x256xbf16>
    %c0_77 = arith.constant 0 : index
    %c0_78 = arith.constant 0 : index
    %183 = vector.load %arg4[%c0_77, %c0_78] : memref<256x1024xbf16, #tpu.memory_space<vmem>>, vector<256x1024xbf16>
    %cst_79 = arith.constant dense<0.000000e+00> : vector<8x1024xf32>
    %184 = tpu.matmul %182, %183, %cst_79 {dimension_numbers = #tpu.dot_dimension_numbers<[1], [0], [0], [1], [0, 0, 1, 1], [], []>} : vector<8x256xbf16>, vector<256x1024xbf16>, vector<8x1024xf32> -> vector<8x1024xf32>
    %185 = arith.addf %181, %184 : vector<8x1024xf32>
    %186 = vector.extract_strided_slice %185 {offsets = [0, 0], sizes = [8, 256], strides = [1, 1]} : vector<8x1024xf32> to vector<8x256xf32>
    %cst_80 = arith.constant 5.000000e-01 : f32
    %187 = vector.broadcast %cst_80 : f32 to vector<8x256xf32>
    %188 = arith.mulf %187, %186 : vector<8x256xf32>
    %189 = math.tanh %188 : vector<8x256xf32>
    %cst_81 = arith.constant 5.000000e-01 : f32
    %190 = vector.broadcast %cst_81 : f32 to vector<8x256xf32>
    %191 = arith.mulf %190, %189 : vector<8x256xf32>
    %cst_82 = arith.constant 5.000000e-01 : f32
    %192 = vector.broadcast %cst_82 : f32 to vector<8x256xf32>
    %193 = arith.addf %191, %192 : vector<8x256xf32>
    %194 = vector.extract_strided_slice %185 {offsets = [0, 256], sizes = [8, 256], strides = [1, 1]} : vector<8x1024xf32> to vector<8x256xf32>
    %cst_83 = arith.constant 5.000000e-01 : f32
    %195 = vector.broadcast %cst_83 : f32 to vector<8x256xf32>
    %196 = arith.mulf %195, %194 : vector<8x256xf32>
    %197 = math.tanh %196 : vector<8x256xf32>
    %cst_84 = arith.constant 5.000000e-01 : f32
    %198 = vector.broadcast %cst_84 : f32 to vector<8x256xf32>
    %199 = arith.mulf %198, %197 : vector<8x256xf32>
    %cst_85 = arith.constant 5.000000e-01 : f32
    %200 = vector.broadcast %cst_85 : f32 to vector<8x256xf32>
    %201 = arith.addf %199, %200 : vector<8x256xf32>
    %202 = vector.extract_strided_slice %185 {offsets = [0, 512], sizes = [8, 256], strides = [1, 1]} : vector<8x1024xf32> to vector<8x256xf32>
    %203 = math.tanh %202 : vector<8x256xf32>
    %204 = vector.extract_strided_slice %185 {offsets = [0, 768], sizes = [8, 256], strides = [1, 1]} : vector<8x1024xf32> to vector<8x256xf32>
    %cst_86 = arith.constant 5.000000e-01 : f32
    %205 = vector.broadcast %cst_86 : f32 to vector<8x256xf32>
    %206 = arith.mulf %205, %204 : vector<8x256xf32>
    %207 = math.tanh %206 : vector<8x256xf32>
    %cst_87 = arith.constant 5.000000e-01 : f32
    %208 = vector.broadcast %cst_87 : f32 to vector<8x256xf32>
    %209 = arith.mulf %208, %207 : vector<8x256xf32>
    %cst_88 = arith.constant 5.000000e-01 : f32
    %210 = vector.broadcast %cst_88 : f32 to vector<8x256xf32>
    %211 = arith.addf %209, %210 : vector<8x256xf32>
    %212 = arith.mulf %201, %172 : vector<8x256xf32>
    %213 = arith.mulf %193, %203 : vector<8x256xf32>
    %214 = arith.addf %212, %213 : vector<8x256xf32>
    %215 = math.tanh %214 : vector<8x256xf32>
    %216 = arith.mulf %211, %215 : vector<8x256xf32>
    %217 = arith.index_cast %c4_i32 : i32 to index
    %c0_89 = arith.constant 0 : index
    %c0_90 = arith.constant 0 : index
    %218 = vector.load %arg9[%217, %c0_89, %c0_90] : memref<8x8x256xf32, #tpu.memory_space<vmem>>, vector<1x8x256xf32>
    %219 = vector.shape_cast %218 : vector<1x8x256xf32> to vector<8x256xf32>
    %220 = vector.shape_cast %216 : vector<8x256xf32> to vector<1x8x256xf32>
    tpu.vector_store %arg9[%217, %c0_89, %c0_90], %220 {strides = array<i32>} : memref<8x8x256xf32, #tpu.memory_space<vmem>>, vector<1x8x256xf32>,
    %c5_i32 = arith.constant 5 : i32
    %221 = arith.index_cast %c5_i32 : i32 to index
    %c0_91 = arith.constant 0 : index
    %c0_92 = arith.constant 0 : index
    %222 = vector.load %arg8[%221, %c0_91, %c0_92] : memref<8x8x1024xf32, #tpu.memory_space<vmem>>, vector<1x8x1024xf32>
    %223 = vector.shape_cast %222 : vector<1x8x1024xf32> to vector<8x1024xf32>
    %224 = arith.truncf %216 : vector<8x256xf32> to vector<8x256xbf16>
    %c0_93 = arith.constant 0 : index
    %c0_94 = arith.constant 0 : index
    %225 = vector.load %arg4[%c0_93, %c0_94] : memref<256x1024xbf16, #tpu.memory_space<vmem>>, vector<256x1024xbf16>
    %cst_95 = arith.constant dense<0.000000e+00> : vector<8x1024xf32>
    %226 = tpu.matmul %224, %225, %cst_95 {dimension_numbers = #tpu.dot_dimension_numbers<[1], [0], [0], [1], [0, 0, 1, 1], [], []>} : vector<8x256xbf16>, vector<256x1024xbf16>, vector<8x1024xf32> -> vector<8x1024xf32>
    %227 = arith.addf %223, %226 : vector<8x1024xf32>
    %228 = vector.extract_strided_slice %227 {offsets = [0, 0], sizes = [8, 256], strides = [1, 1]} : vector<8x1024xf32> to vector<8x256xf32>
    %cst_96 = arith.constant 5.000000e-01 : f32
    %229 = vector.broadcast %cst_96 : f32 to vector<8x256xf32>
    %230 = arith.mulf %229, %228 : vector<8x256xf32>
    %231 = math.tanh %230 : vector<8x256xf32>
    %cst_97 = arith.constant 5.000000e-01 : f32
    %232 = vector.broadcast %cst_97 : f32 to vector<8x256xf32>
    %233 = arith.mulf %232, %231 : vector<8x256xf32>
    %cst_98 = arith.constant 5.000000e-01 : f32
    %234 = vector.broadcast %cst_98 : f32 to vector<8x256xf32>
    %235 = arith.addf %233, %234 : vector<8x256xf32>
    %236 = vector.extract_strided_slice %227 {offsets = [0, 256], sizes = [8, 256], strides = [1, 1]} : vector<8x1024xf32> to vector<8x256xf32>
    %cst_99 = arith.constant 5.000000e-01 : f32
    %237 = vector.broadcast %cst_99 : f32 to vector<8x256xf32>
    %238 = arith.mulf %237, %236 : vector<8x256xf32>
    %239 = math.tanh %238 : vector<8x256xf32>
    %cst_100 = arith.constant 5.000000e-01 : f32
    %240 = vector.broadcast %cst_100 : f32 to vector<8x256xf32>
    %241 = arith.mulf %240, %239 : vector<8x256xf32>
    %cst_101 = arith.constant 5.000000e-01 : f32
    %242 = vector.broadcast %cst_101 : f32 to vector<8x256xf32>
    %243 = arith.addf %241, %242 : vector<8x256xf32>
    %244 = vector.extract_strided_slice %227 {offsets = [0, 512], sizes = [8, 256], strides = [1, 1]} : vector<8x1024xf32> to vector<8x256xf32>
    %245 = math.tanh %244 : vector<8x256xf32>
    %246 = vector.extract_strided_slice %227 {offsets = [0, 768], sizes = [8, 256], strides = [1, 1]} : vector<8x1024xf32> to vector<8x256xf32>
    %cst_102 = arith.constant 5.000000e-01 : f32
    %247 = vector.broadcast %cst_102 : f32 to vector<8x256xf32>
    %248 = arith.mulf %247, %246 : vector<8x256xf32>
    %249 = math.tanh %248 : vector<8x256xf32>
    %cst_103 = arith.constant 5.000000e-01 : f32
    %250 = vector.broadcast %cst_103 : f32 to vector<8x256xf32>
    %251 = arith.mulf %250, %249 : vector<8x256xf32>
    %cst_104 = arith.constant 5.000000e-01 : f32
    %252 = vector.broadcast %cst_104 : f32 to vector<8x256xf32>
    %253 = arith.addf %251, %252 : vector<8x256xf32>
    %254 = arith.mulf %243, %214 : vector<8x256xf32>
    %255 = arith.mulf %235, %245 : vector<8x256xf32>
    %256 = arith.addf %254, %255 : vector<8x256xf32>
    %257 = math.tanh %256 : vector<8x256xf32>
    %258 = arith.mulf %253, %257 : vector<8x256xf32>
    %259 = arith.index_cast %c5_i32 : i32 to index
    %c0_105 = arith.constant 0 : index
    %c0_106 = arith.constant 0 : index
    %260 = vector.load %arg9[%259, %c0_105, %c0_106] : memref<8x8x256xf32, #tpu.memory_space<vmem>>, vector<1x8x256xf32>
    %261 = vector.shape_cast %260 : vector<1x8x256xf32> to vector<8x256xf32>
    %262 = vector.shape_cast %258 : vector<8x256xf32> to vector<1x8x256xf32>
    tpu.vector_store %arg9[%259, %c0_105, %c0_106], %262 {strides = array<i32>} : memref<8x8x256xf32, #tpu.memory_space<vmem>>, vector<1x8x256xf32>,
    %c6_i32 = arith.constant 6 : i32
    %263 = arith.index_cast %c6_i32 : i32 to index
    %c0_107 = arith.constant 0 : index
    %c0_108 = arith.constant 0 : index
    %264 = vector.load %arg8[%263, %c0_107, %c0_108] : memref<8x8x1024xf32, #tpu.memory_space<vmem>>, vector<1x8x1024xf32>
    %265 = vector.shape_cast %264 : vector<1x8x1024xf32> to vector<8x1024xf32>
    %266 = arith.truncf %258 : vector<8x256xf32> to vector<8x256xbf16>
    %c0_109 = arith.constant 0 : index
    %c0_110 = arith.constant 0 : index
    %267 = vector.load %arg4[%c0_109, %c0_110] : memref<256x1024xbf16, #tpu.memory_space<vmem>>, vector<256x1024xbf16>
    %cst_111 = arith.constant dense<0.000000e+00> : vector<8x1024xf32>
    %268 = tpu.matmul %266, %267, %cst_111 {dimension_numbers = #tpu.dot_dimension_numbers<[1], [0], [0], [1], [0, 0, 1, 1], [], []>} : vector<8x256xbf16>, vector<256x1024xbf16>, vector<8x1024xf32> -> vector<8x1024xf32>
    %269 = arith.addf %265, %268 : vector<8x1024xf32>
    %270 = vector.extract_strided_slice %269 {offsets = [0, 0], sizes = [8, 256], strides = [1, 1]} : vector<8x1024xf32> to vector<8x256xf32>
    %cst_112 = arith.constant 5.000000e-01 : f32
    %271 = vector.broadcast %cst_112 : f32 to vector<8x256xf32>
    %272 = arith.mulf %271, %270 : vector<8x256xf32>
    %273 = math.tanh %272 : vector<8x256xf32>
    %cst_113 = arith.constant 5.000000e-01 : f32
    %274 = vector.broadcast %cst_113 : f32 to vector<8x256xf32>
    %275 = arith.mulf %274, %273 : vector<8x256xf32>
    %cst_114 = arith.constant 5.000000e-01 : f32
    %276 = vector.broadcast %cst_114 : f32 to vector<8x256xf32>
    %277 = arith.addf %275, %276 : vector<8x256xf32>
    %278 = vector.extract_strided_slice %269 {offsets = [0, 256], sizes = [8, 256], strides = [1, 1]} : vector<8x1024xf32> to vector<8x256xf32>
    %cst_115 = arith.constant 5.000000e-01 : f32
    %279 = vector.broadcast %cst_115 : f32 to vector<8x256xf32>
    %280 = arith.mulf %279, %278 : vector<8x256xf32>
    %281 = math.tanh %280 : vector<8x256xf32>
    %cst_116 = arith.constant 5.000000e-01 : f32
    %282 = vector.broadcast %cst_116 : f32 to vector<8x256xf32>
    %283 = arith.mulf %282, %281 : vector<8x256xf32>
    %cst_117 = arith.constant 5.000000e-01 : f32
    %284 = vector.broadcast %cst_117 : f32 to vector<8x256xf32>
    %285 = arith.addf %283, %284 : vector<8x256xf32>
    %286 = vector.extract_strided_slice %269 {offsets = [0, 512], sizes = [8, 256], strides = [1, 1]} : vector<8x1024xf32> to vector<8x256xf32>
    %287 = math.tanh %286 : vector<8x256xf32>
    %288 = vector.extract_strided_slice %269 {offsets = [0, 768], sizes = [8, 256], strides = [1, 1]} : vector<8x1024xf32> to vector<8x256xf32>
    %cst_118 = arith.constant 5.000000e-01 : f32
    %289 = vector.broadcast %cst_118 : f32 to vector<8x256xf32>
    %290 = arith.mulf %289, %288 : vector<8x256xf32>
    %291 = math.tanh %290 : vector<8x256xf32>
    %cst_119 = arith.constant 5.000000e-01 : f32
    %292 = vector.broadcast %cst_119 : f32 to vector<8x256xf32>
    %293 = arith.mulf %292, %291 : vector<8x256xf32>
    %cst_120 = arith.constant 5.000000e-01 : f32
    %294 = vector.broadcast %cst_120 : f32 to vector<8x256xf32>
    %295 = arith.addf %293, %294 : vector<8x256xf32>
    %296 = arith.mulf %285, %256 : vector<8x256xf32>
    %297 = arith.mulf %277, %287 : vector<8x256xf32>
    %298 = arith.addf %296, %297 : vector<8x256xf32>
    %299 = math.tanh %298 : vector<8x256xf32>
    %300 = arith.mulf %295, %299 : vector<8x256xf32>
    %301 = arith.index_cast %c6_i32 : i32 to index
    %c0_121 = arith.constant 0 : index
    %c0_122 = arith.constant 0 : index
    %302 = vector.load %arg9[%301, %c0_121, %c0_122] : memref<8x8x256xf32, #tpu.memory_space<vmem>>, vector<1x8x256xf32>
    %303 = vector.shape_cast %302 : vector<1x8x256xf32> to vector<8x256xf32>
    %304 = vector.shape_cast %300 : vector<8x256xf32> to vector<1x8x256xf32>
    tpu.vector_store %arg9[%301, %c0_121, %c0_122], %304 {strides = array<i32>} : memref<8x8x256xf32, #tpu.memory_space<vmem>>, vector<1x8x256xf32>,
    %c7_i32 = arith.constant 7 : i32
    %305 = arith.index_cast %c7_i32 : i32 to index
    %c0_123 = arith.constant 0 : index
    %c0_124 = arith.constant 0 : index
    %306 = vector.load %arg8[%305, %c0_123, %c0_124] : memref<8x8x1024xf32, #tpu.memory_space<vmem>>, vector<1x8x1024xf32>
    %307 = vector.shape_cast %306 : vector<1x8x1024xf32> to vector<8x1024xf32>
    %308 = arith.truncf %300 : vector<8x256xf32> to vector<8x256xbf16>
    %c0_125 = arith.constant 0 : index
    %c0_126 = arith.constant 0 : index
    %309 = vector.load %arg4[%c0_125, %c0_126] : memref<256x1024xbf16, #tpu.memory_space<vmem>>, vector<256x1024xbf16>
    %cst_127 = arith.constant dense<0.000000e+00> : vector<8x1024xf32>
    %310 = tpu.matmul %308, %309, %cst_127 {dimension_numbers = #tpu.dot_dimension_numbers<[1], [0], [0], [1], [0, 0, 1, 1], [], []>} : vector<8x256xbf16>, vector<256x1024xbf16>, vector<8x1024xf32> -> vector<8x1024xf32>
    %311 = arith.addf %307, %310 : vector<8x1024xf32>
    %312 = vector.extract_strided_slice %311 {offsets = [0, 0], sizes = [8, 256], strides = [1, 1]} : vector<8x1024xf32> to vector<8x256xf32>
    %cst_128 = arith.constant 5.000000e-01 : f32
    %313 = vector.broadcast %cst_128 : f32 to vector<8x256xf32>
    %314 = arith.mulf %313, %312 : vector<8x256xf32>
    %315 = math.tanh %314 : vector<8x256xf32>
    %cst_129 = arith.constant 5.000000e-01 : f32
    %316 = vector.broadcast %cst_129 : f32 to vector<8x256xf32>
    %317 = arith.mulf %316, %315 : vector<8x256xf32>
    %cst_130 = arith.constant 5.000000e-01 : f32
    %318 = vector.broadcast %cst_130 : f32 to vector<8x256xf32>
    %319 = arith.addf %317, %318 : vector<8x256xf32>
    %320 = vector.extract_strided_slice %311 {offsets = [0, 256], sizes = [8, 256], strides = [1, 1]} : vector<8x1024xf32> to vector<8x256xf32>
    %cst_131 = arith.constant 5.000000e-01 : f32
    %321 = vector.broadcast %cst_131 : f32 to vector<8x256xf32>
    %322 = arith.mulf %321, %320 : vector<8x256xf32>
    %323 = math.tanh %322 : vector<8x256xf32>
    %cst_132 = arith.constant 5.000000e-01 : f32
    %324 = vector.broadcast %cst_132 : f32 to vector<8x256xf32>
    %325 = arith.mulf %324, %323 : vector<8x256xf32>
    %cst_133 = arith.constant 5.000000e-01 : f32
    %326 = vector.broadcast %cst_133 : f32 to vector<8x256xf32>
    %327 = arith.addf %325, %326 : vector<8x256xf32>
    %328 = vector.extract_strided_slice %311 {offsets = [0, 512], sizes = [8, 256], strides = [1, 1]} : vector<8x1024xf32> to vector<8x256xf32>
    %329 = math.tanh %328 : vector<8x256xf32>
    %330 = vector.extract_strided_slice %311 {offsets = [0, 768], sizes = [8, 256], strides = [1, 1]} : vector<8x1024xf32> to vector<8x256xf32>
    %cst_134 = arith.constant 5.000000e-01 : f32
    %331 = vector.broadcast %cst_134 : f32 to vector<8x256xf32>
    %332 = arith.mulf %331, %330 : vector<8x256xf32>
    %333 = math.tanh %332 : vector<8x256xf32>
    %cst_135 = arith.constant 5.000000e-01 : f32
    %334 = vector.broadcast %cst_135 : f32 to vector<8x256xf32>
    %335 = arith.mulf %334, %333 : vector<8x256xf32>
    %cst_136 = arith.constant 5.000000e-01 : f32
    %336 = vector.broadcast %cst_136 : f32 to vector<8x256xf32>
    %337 = arith.addf %335, %336 : vector<8x256xf32>
    %338 = arith.mulf %327, %298 : vector<8x256xf32>
    %339 = arith.mulf %319, %329 : vector<8x256xf32>
    %340 = arith.addf %338, %339 : vector<8x256xf32>
    %341 = math.tanh %340 : vector<8x256xf32>
    %342 = arith.mulf %337, %341 : vector<8x256xf32>
    %343 = arith.index_cast %c7_i32 : i32 to index
    %c0_137 = arith.constant 0 : index
    %c0_138 = arith.constant 0 : index
    %344 = vector.load %arg9[%343, %c0_137, %c0_138] : memref<8x8x256xf32, #tpu.memory_space<vmem>>, vector<1x8x256xf32>
    %345 = vector.shape_cast %344 : vector<1x8x256xf32> to vector<8x256xf32>
    %346 = vector.shape_cast %342 : vector<8x256xf32> to vector<1x8x256xf32>
    tpu.vector_store %arg9[%343, %c0_137, %c0_138], %346 {strides = array<i32>} : memref<8x8x256xf32, #tpu.memory_space<vmem>>, vector<1x8x256xf32>,
    %c8_i32 = arith.constant 8 : i32
    %c0_139 = arith.constant 0 : index
    %c0_140 = arith.constant 0 : index
    %c0_141 = arith.constant 0 : index
    %347 = vector.load %arg9[%c0_139, %c0_140, %c0_141] : memref<8x8x256xf32, #tpu.memory_space<vmem>>, vector<8x8x256xf32>
    %348 = vector.shape_cast %347 : vector<8x8x256xf32> to vector<64x256xf32>
    %c0_142 = arith.constant 0 : index
    %c0_143 = arith.constant 0 : index
    %349 = vector.load %arg5[%c0_142, %c0_143] : memref<256x128xf32, #tpu.memory_space<vmem>>, vector<256x128xf32>
    %cst_144 = arith.constant dense<0.000000e+00> : vector<64x128xf32>
    %350 = tpu.matmul %348, %349, %cst_144 {dimension_numbers = #tpu.dot_dimension_numbers<[1], [0], [0], [1], [0, 0, 1, 1], [], []>} : vector<64x256xf32>, vector<256x128xf32>, vector<64x128xf32> -> vector<64x128xf32>
    %c0_145 = arith.constant 0 : index
    %c0_146 = arith.constant 0 : index
    %351 = vector.load %arg6[%c0_145, %c0_146] : memref<1x128xf32, #tpu.memory_space<vmem>>, vector<1x128xf32>
    %352 = vector.broadcast %351 : vector<1x128xf32> to vector<64x128xf32>
    %353 = arith.addf %350, %352 : vector<64x128xf32>
    %354 = vector.shape_cast %353 : vector<64x128xf32> to vector<8x8x128xf32>
    %c0_147 = arith.constant 0 : index
    %c0_148 = arith.constant 0 : index
    %c0_149 = arith.constant 0 : index
    %355 = vector.load %arg7[%c0_147, %c0_148, %c0_149] : memref<8x8x128xf32, #tpu.memory_space<vmem>>, vector<8x8x128xf32>
    tpu.vector_store %arg7[%c0_147, %c0_148, %c0_149], %354 {strides = array<i32>} : memref<8x8x128xf32, #tpu.memory_space<vmem>>, vector<8x8x128xf32>,
    return
  }
  func.func @transform_0(%arg0: i32) -> (i32, i32, i32) {
    %c0_i32 = arith.constant 0 : i32
    %c0_i32_0 = arith.constant 0 : i32
    %c0_i32_1 = arith.constant 0 : i32
    %c0_i32_2 = arith.constant 0 : i32
    return %c0_i32, %c0_i32_0, %c0_i32_1 : i32, i32, i32
  }
  func.func @transform_1(%arg0: i32) -> (i32, i32) {
    %c0_i32 = arith.constant 0 : i32
    %c0_i32_0 = arith.constant 0 : i32
    %c0_i32_1 = arith.constant 0 : i32
    return %c0_i32, %c0_i32_0 : i32, i32
  }
  func.func @transform_2(%arg0: i32) -> (i32, i32) {
    %c0_i32 = arith.constant 0 : i32
    %c0_i32_0 = arith.constant 0 : i32
    %c0_i32_1 = arith.constant 0 : i32
    return %c0_i32, %c0_i32_0 : i32, i32
  }
  func.func @transform_3(%arg0: i32) -> (i32, i32) {
    %c0_i32 = arith.constant 0 : i32
    %c0_i32_0 = arith.constant 0 : i32
    %c0_i32_1 = arith.constant 0 : i32
    return %c0_i32, %c0_i32_0 : i32, i32
  }
  func.func @transform_4(%arg0: i32) -> (i32, i32) {
    %c0_i32 = arith.constant 0 : i32
    %c0_i32_0 = arith.constant 0 : i32
    %c0_i32_1 = arith.constant 0 : i32
    return %c0_i32, %c0_i32_0 : i32, i32
  }
  func.func @transform_5(%arg0: i32) -> (i32, i32) {
    %c0_i32 = arith.constant 0 : i32
    %c0_i32_0 = arith.constant 0 : i32
    %c0_i32_1 = arith.constant 0 : i32
    return %c0_i32, %c0_i32_0 : i32, i32
  }
  func.func @transform_6(%arg0: i32) -> (i32, i32, i32) {
    %c0_i32 = arith.constant 0 : i32
    %c0_i32_0 = arith.constant 0 : i32
    %c0_i32_1 = arith.constant 0 : i32
    %c0_i32_2 = arith.constant 0 : i32
    return %c0_i32, %c0_i32_0, %c0_i32_1 : i32, i32, i32
  }
}

</mosaic_0001>

<bundles_post_ra>
// kernel: lipsync_pallas.1
= control target key start
LH: loop header
LB: loop body
LE: loop exit
PB: predicated region body
PF: predicated region fallthrough
CT: control target
= control target key end

     0   :  { %v10209_v3 = vmov 0.0   ;;  %s14829_s1 = inlined_call_operand.vmem [shape: f32[128,1024], index: 1, kind: input, shape index: {}]   ;;  %s14830_s3 = inlined_call_operand.vmem [shape: bf16[256,1024], index: 3, kind: input, shape index: {}]   ;;  %s14831_s0 = inlined_call_operand.vmem [shape: f32[8,8,128], index: 0, kind: input, shape index: {}]   ;;  %s14832_s2 = inlined_call_operand.vmem [shape: f32[1,1024], index: 2, kind: input, shape index: {}]   ;;  %s14833_s4 = inlined_call_operand.vmem [shape: f32[256,128], index: 4, kind: input, shape index: {}]   ;;  %s14834_s5 = inlined_call_operand.vmem [shape: f32[1,128], index: 5, kind: input, shape index: {}]   ;;  %s14835_s6 = inlined_call_operand.vmem [shape: f32[8,8,128], index: 6, kind: output, shape index: {}]  }
   0x1   :  { %v33_v0 = vld [vmem:[%s14829_s1 + $0x8] sm:$0xff]  ;;  %266 = vmatprep.mubr.f32.mxu1 %v10209_v3  ;;  %492 = vmatprep.mubr.f32.mxu0 %v10209_v3  ;;  %v32_v6 = vld [vmem:[%s14829_s1] sm:$0xff] }
   0x2   :  { %v41_v1 = vld [vmem:[%s14829_s1 + $0x48] sm:$0xff]  ;;  %v40_v7 = vld [vmem:[%s14829_s1 + $0x40] sm:$0xff] }
   0x3   :  { %v37_v2 = vld [vmem:[%s14829_s1 + $0x28] sm:$0xff]  ;;  %v9887_v4 = vpack.c.bf16 %v41_v1, %v33_v0  ;;  %v9889_v9 = vpack.c.bf16 %v40_v7, %v32_v6  ;;  %v36_v10 = vld [vmem:[%s14829_s1 + $0x20] sm:$0xff] }
   0x4   :  { %v45_v5 = vld [vmem:[%s14829_s1 + $0x68] sm:$0xff]  ;;  %v44_v11 = vld [vmem:[%s14829_s1 + $0x60] sm:$0xff] }
   0x5   :  { %v9951_v8 = vpack.c.bf16 %v45_v5, %v37_v2  ;;  %v49_v12 = vld [vmem:[%s14829_s1 + $0x88] sm:$0xff]  ;;  %9888 = vmatprep.subr.bf16.mxu1 %v9887_v4  ;;  %v9953_v13 = vpack.c.bf16 %v44_v11, %v36_v10  ;;  %v48_v19 = vld [vmem:[%s14829_s1 + $0x80] sm:$0xff] }
   0x6   :  { %v57_v14 = vld [vmem:[%s14829_s1 + $0xc8] sm:$0xff]  ;;  %9890 = vmatpush1.bf16.msra.mxu1 %v9889_v9  ;;  %v56_v20 = vld [vmem:[%s14829_s1 + $0xc0] sm:$0xff] }
   0x7   :  { %v53_v15 = vld [vmem:[%s14829_s1 + $0xa8] sm:$0xff]  ;;  %9952 = vmatprep.subr.bf16.mxu0 %v9951_v8  ;;  %v9891_v17 = vpack.c.bf16 %v57_v14, %v49_v12  ;;  %v52_v21 = vld [vmem:[%s14829_s1 + $0xa0] sm:$0xff]  ;;  %v9893_v22 = vpack.c.bf16 %v56_v20, %v48_v19 }
   0x8   :  { %v61_v16 = vld [vmem:[%s14829_s1 + $0xe8] sm:$0xff]  ;;  %9954 = vmatpush1.bf16.msra.mxu0 %v9953_v13  ;;  %v60_v23 = vld [vmem:[%s14829_s1 + $0xe0] sm:$0xff] }
   0x9   :  { %v9955_v18 = vpack.c.bf16 %v61_v16, %v53_v15  ;;  %v65_v24 = vld [vmem:[%s14829_s1 + $0x108] sm:$0xff]  ;;  %9892 = vmatprep.subr.bf16.mxu1 %v9891_v17  ;;  %v9957_v26 = vpack.c.bf16 %v60_v23, %v52_v21  ;;  %v64_v30 = vld [vmem:[%s14829_s1 + $0x100] sm:$0xff] }
   0xa   :  { %v73_v25 = vld [vmem:[%s14829_s1 + $0x148] sm:$0xff]  ;;  %v72_v32 = vld [vmem:[%s14829_s1 + $0x140] sm:$0xff]  ;;  %9894 = vmatpush1.bf16.msra.mxu1 %v9893_v22 }
   0xb   :  { %9956 = vmatprep.subr.bf16.mxu0 %v9955_v18  ;;  %v9895_v27 = vpack.c.bf16 %v73_v25, %v65_v24  ;;  %v69_v28 = vld [vmem:[%s14829_s1 + $0x128] sm:$0xff]  ;;  %v68_v33 = vld [vmem:[%s14829_s1 + $0x120] sm:$0xff]  ;;  %v9897_v35 = vpack.c.bf16 %v72_v32, %v64_v30  ;;  %v35_v32 = vld [vmem:[%s14829_s1 + $0x18] sm:$0xff] }
   0xc   :  { %v77_v29 = vld [vmem:[%s14829_s1 + $0x168] sm:$0xff]  ;;  %v76_v34 = vld [vmem:[%s14829_s1 + $0x160] sm:$0xff]  ;;  %9958 = vmatpush1.bf16.msra.mxu0 %v9957_v26 }
   0xd   :  { %v9959_v31 = vpack.c.bf16 %v77_v29, %v69_v28  ;;  %v81_v36 = vld [vmem:[%s14829_s1 + $0x188] sm:$0xff]  ;;  %9896 = vmatprep.subr.bf16.mxu1 %v9895_v27  ;;  %v9961_v39 = vpack.c.bf16 %v76_v34, %v68_v33  ;;  %v80_v42 = vld [vmem:[%s14829_s1 + $0x180] sm:$0xff]  ;;  %v43_v33 = vld [vmem:[%s14829_s1 + $0x58] sm:$0xff] }
   0xe   :  { %v89_v37 = vld [vmem:[%s14829_s1 + $0x1c8] sm:$0xff]  ;;  %v88_v43 = vld [vmem:[%s14829_s1 + $0x1c0] sm:$0xff]  ;;  %9898 = vmatpush1.bf16.msra.mxu1 %v9897_v35 }
   0xf   :  { %v85_v38 = vld [vmem:[%s14829_s1 + $0x1a8] sm:$0xff]  ;;  %v9899_v40 = vpack.c.bf16 %v89_v37, %v81_v36  ;;  %9960 = vmatprep.subr.bf16.mxu0 %v9959_v31  ;;  %v84_v45 = vld [vmem:[%s14829_s1 + $0x1a0] sm:$0xff]  ;;  %v9901_v51 = vpack.c.bf16 %v88_v43, %v80_v42  ;;  %v51_v42 = vld [vmem:[%s14829_s1 + $0x98] sm:$0xff] }
  0x10   :  { %v93_v41 = vld [vmem:[%s14829_s1 + $0x1e8] sm:$0xff]  ;;  %v92_v46 = vld [vmem:[%s14829_s1 + $0x1e0] sm:$0xff]  ;;  %9962 = vmatpush1.bf16.msra.mxu0 %v9961_v39  ;;  %v34_v39 = vld [vmem:[%s14829_s1 + $0x10] sm:$0xff] }
  0x11   :  { %v9963_v44 = vpack.c.bf16 %v93_v41, %v85_v38  ;;  %v97_v47 = vld [vmem:[%s14829_s1 + $0x208] sm:$0xff]  ;;  %9900 = vmatprep.subr.bf16.mxu1 %v9899_v40  ;;  %v9965_v52 = vpack.c.bf16 %v92_v46, %v84_v45  ;;  %v96_v54 = vld [vmem:[%s14829_s1 + $0x200] sm:$0xff]  ;;  %v9919_v38 = vpack.c.bf16 %v43_v33, %v35_v32  ;;  %v42_v40 = vld [vmem:[%s14829_s1 + $0x50] sm:$0xff] }
  0x12   :  { %v105_v48 = vld [vmem:[%s14829_s1 + $0x248] sm:$0xff]  ;;  %v104_v55 = vld [vmem:[%s14829_s1 + $0x240] sm:$0xff]  ;;  %9902 = vmatpush1.bf16.msra.mxu1 %v9901_v51  ;;  %v59_v43 = vld [vmem:[%s14829_s1 + $0xd8] sm:$0xff] }
  0x13   :  { %v101_v49 = vld [vmem:[%s14829_s1 + $0x228] sm:$0xff]  ;;  %v9903_v53 = vpack.c.bf16 %v105_v48, %v97_v47  ;;  %v100_v56 = vld [vmem:[%s14829_s1 + $0x220] sm:$0xff]  ;;  %9964 = vmatprep.subr.bf16.mxu0 %v9963_v44  ;;  %v9905_v63 = vpack.c.bf16 %v104_v55, %v96_v54  ;;  %v9921_v47 = vpack.c.bf16 %v42_v40, %v34_v39  ;;  %v9923_v51 = vpack.c.bf16 %v59_v43, %v51_v42  ;;  %v75_v54 = vld [vmem:[%s14829_s1 + $0x158] sm:$0xff] }
  0x14   :  { %v109_v50 = vld [vmem:[%s14829_s1 + $0x268] sm:$0xff]  ;;  %v108_v58 = vld [vmem:[%s14829_s1 + $0x260] sm:$0xff]  ;;  %9966 = vmatpush1.bf16.msra.mxu0 %v9965_v52  ;;  %v122_v32 = vld [vmem:[%s14829_s1 + $0x2d0] sm:$0xff] }
  0x15   :  { %v9967_v57 = vpack.c.bf16 %v109_v50, %v101_v49  ;;  %v113_v59 = vld [vmem:[%s14829_s1 + $0x288] sm:$0xff]  ;;  %9904 = vmatprep.subr.bf16.mxu1 %v9903_v53  ;;  %v9969_v0 = vpack.c.bf16 %v108_v58, %v100_v56  ;;  %v112_v2 = vld [vmem:[%s14829_s1 + $0x280] sm:$0xff]  ;;  %v50_v49 = vld [vmem:[%s14829_s1 + $0x90] sm:$0xff] }
  0x16   :  { %v121_v60 = vld [vmem:[%s14829_s1 + $0x2c8] sm:$0xff]  ;;  %v120_v4 = vld [vmem:[%s14829_s1 + $0x2c0] sm:$0xff]  ;;  %9906 = vmatpush1.bf16.msra.mxu1 %v9905_v63  ;;  %v58_v50 = vld [vmem:[%s14829_s1 + $0xd0] sm:$0xff] }
  0x17   :  { %v117_v61 = vld [vmem:[%s14829_s1 + $0x2a8] sm:$0xff]  ;;  %v9907_v1 = vpack.c.bf16 %v121_v60, %v113_v59  ;;  %v116_v5 = vld [vmem:[%s14829_s1 + $0x2a0] sm:$0xff]  ;;  %9968 = vmatprep.subr.bf16.mxu0 %v9967_v57  ;;  %v9909_v12 = vpack.c.bf16 %v120_v4, %v112_v2  ;;  %v67_v53 = vld [vmem:[%s14829_s1 + $0x118] sm:$0xff]  ;;  %v9925_v58 = vpack.c.bf16 %v58_v50, %v50_v49 }
  0x18   :  { %v125_v62 = vld [vmem:[%s14829_s1 + $0x2e8] sm:$0xff]  ;;  %v124_v7 = vld [vmem:[%s14829_s1 + $0x2e0] sm:$0xff]  ;;  %9970 = vmatpush1.bf16.msra.mxu0 %v9969_v0  ;;  %v9927_v60 = vpack.c.bf16 %v75_v54, %v67_v53  ;;  %v83_v0 = vld [vmem:[%s14829_s1 + $0x198] sm:$0xff] }
  0x19   :  { %v9971_v6 = vpack.c.bf16 %v125_v62, %v117_v61  ;;  %v129_v8 = vld [vmem:[%s14829_s1 + $0x308] sm:$0xff]  ;;  %9908 = vmatprep.subr.bf16.mxu1 %v9907_v1  ;;  %v9973_v13 = vpack.c.bf16 %v124_v7, %v116_v5  ;;  %v128_v15 = vld [vmem:[%s14829_s1 + $0x300] sm:$0xff]  ;;  %v66_v61 = vld [vmem:[%s14829_s1 + $0x110] sm:$0xff] }
  0x1a   :  { %v137_v9 = vld [vmem:[%s14829_s1 + $0x348] sm:$0xff]  ;;  %v136_v16 = vld [vmem:[%s14829_s1 + $0x340] sm:$0xff]  ;;  %9910 = vmatpush1.bf16.msra.mxu1 %v9909_v12  ;;  %v74_v62 = vld [vmem:[%s14829_s1 + $0x150] sm:$0xff] }
  0x1b   :  { %v133_v10 = vld [vmem:[%s14829_s1 + $0x328] sm:$0xff]  ;;  %v9911_v14 = vpack.c.bf16 %v137_v9, %v129_v8  ;;  %v132_v17 = vld [vmem:[%s14829_s1 + $0x320] sm:$0xff]  ;;  %9972 = vmatprep.subr.bf16.mxu0 %v9971_v6  ;;  %v9913_v24 = vpack.c.bf16 %v136_v16, %v128_v15  ;;  %v91_v1 = vld [vmem:[%s14829_s1 + $0x1d8] sm:$0xff]  ;;  %v9929_v6 = vpack.c.bf16 %v74_v62, %v66_v61 }
  0x1c   :  { %v141_v11 = vld [vmem:[%s14829_s1 + $0x368] sm:$0xff]  ;;  %v140_v19 = vld [vmem:[%s14829_s1 + $0x360] sm:$0xff]  ;;  %9974 = vmatpush1.bf16.msra.mxu0 %v9973_v13  ;;  %v10525_v5 = vld [vmem:[%s14831_s0 + $0x10] sm:$0xff]  ;;  %v9931_v8 = vpack.c.bf16 %v91_v1, %v83_v0 }
  0x1d   :  { %v9975_v18 = vpack.c.bf16 %v141_v11, %v133_v10  ;;  %v145_v20 = vld [vmem:[%s14829_s1 + $0x388] sm:$0xff]  ;;  %9912 = vmatprep.subr.bf16.mxu1 %v9911_v14  ;;  %v9977_v25 = vpack.c.bf16 %v140_v19, %v132_v17  ;;  %v144_v27 = vld [vmem:[%s14829_s1 + $0x380] sm:$0xff]  ;;  %v82_v9 = vld [vmem:[%s14829_s1 + $0x190] sm:$0xff] }
  0x1e   :  { %v153_v21 = vld [vmem:[%s14829_s1 + $0x3c8] sm:$0xff]  ;;  %v152_v28 = vld [vmem:[%s14829_s1 + $0x3c0] sm:$0xff]  ;;  %9914 = vmatpush1.bf16.msra.mxu1 %v9913_v24  ;;  %v90_v10 = vld [vmem:[%s14829_s1 + $0x1d0] sm:$0xff] }
  0x1f   :  { %v149_v22 = vld [vmem:[%s14829_s1 + $0x3a8] sm:$0xff]  ;;  %v9915_v26 = vpack.c.bf16 %v153_v21, %v145_v20  ;;  %v148_v29 = vld [vmem:[%s14829_s1 + $0x3a0] sm:$0xff]  ;;  %9976 = vmatprep.subr.bf16.mxu0 %v9975_v18  ;;  %v9917_v36 = vpack.c.bf16 %v152_v28, %v144_v27  ;;  %v99_v12 = vld [vmem:[%s14829_s1 + $0x218] sm:$0xff]  ;;  %v9933_v17 = vpack.c.bf16 %v90_v10, %v82_v9 }
  0x20   :  { %v157_v23 = vld [vmem:[%s14829_s1 + $0x3e8] sm:$0xff]  ;;  %v156_v31 = vld [vmem:[%s14829_s1 + $0x3e0] sm:$0xff]  ;;  %9978 = vmatpush1.bf16.msra.mxu0 %v9977_v25  ;;  %v107_v13 = vld [vmem:[%s14829_s1 + $0x258] sm:$0xff] }
  0x21   :  { %v9979_v30 = vpack.c.bf16 %v157_v23, %v149_v22  ;;  %v726_v34 = vld [vmem:[%s14830_s3] sm:$0xff]  ;;  %9916 = vmatprep.subr.bf16.mxu1 %v9915_v26  ;;  %v9981_v37 = vpack.c.bf16 %v156_v31, %v148_v29  ;;  %v10498_v57 = vld [vmem:[%s14831_s0 + $0x8] sm:$0xff]  ;;  %v10552_v16 = vld [vmem:[%s14831_s0 + $0x18] sm:$0xff]  ;;  %v9935_v19 = vpack.c.bf16 %v107_v13, %v99_v12 }
  0x22   :  { %v730_v35 = vld [vmem:[%s14830_s3 + $0x20] sm:$0xff]  ;;  %9918 = vmatpush1.bf16.msra.mxu1 %v9917_v36  ;;  %v98_v20 = vld [vmem:[%s14829_s1 + $0x210] sm:$0xff]  ;;  %v115_v23 = vld [vmem:[%s14829_s1 + $0x298] sm:$0xff] }
  0x23   :  { %9980 = vmatprep.subr.bf16.mxu0 %v9979_v30  ;;  %v8807_v41 = vcombine.high %v726_v34, %v730_v35  ;;  %v734_v44 = vld [vmem:[%s14830_s3 + $0x40] sm:$0xff]  ;;  %9920 = vmatprep.subr.bf16.mxu1 %v9919_v38  ;;  %v8806_v48 = vcombine.low %v726_v34, %v730_v35  ;;  %v106_v21 = vld [vmem:[%s14829_s1 + $0x250] sm:$0xff]  ;;  %v123_v24 = vld [vmem:[%s14829_s1 + $0x2d8] sm:$0xff] }
  0x24   :  { %v738_v45 = vld [vmem:[%s14830_s3 + $0x60] sm:$0xff]  ;;  %9982 = vmatpush1.bf16.msra.mxu0 %v9981_v37  ;;  %v9937_v28 = vpack.c.bf16 %v106_v21, %v98_v20  ;;  %v9939_v30 = vpack.c.bf16 %v123_v24, %v115_v23  ;;  %v114_v31 = vld [vmem:[%s14829_s1 + $0x290] sm:$0xff]  ;;  %v131_v34 = vld [vmem:[%s14829_s1 + $0x318] sm:$0xff] }
  0x25   :  { %v10473_v46 = vld [vmem:[%s14831_s0] sm:$0xff]  ;;  %1494 = vmatprep.subr.bf16.mxu0 %v8807_v41  ;;  %v8815_v52 = vcombine.high %v734_v44, %v738_v45  ;;  %v8814_v59 = vcombine.low %v734_v44, %v738_v45  ;;  %v139_v35 = vld [vmem:[%s14829_s1 + $0x358] sm:$0xff]  ;;  %v10606_v38 = vld [vmem:[%s14831_s0 + $0x28] sm:$0xff]  ;;  %v9941_v39 = vpack.c.bf16 %v122_v32, %v114_v31 }
  0x26   :  { %267 = vmatmul.mubr.f32.vlgmr.msra.gmra.mrb[0].mxu1 %v10473_v46  ;;  %v742_v55 = vld [vmem:[%s14830_s3 + $0x80] sm:$0xff]  ;;  %v9943_v41 = vpack.c.bf16 %v139_v35, %v131_v34  ;;  %v130_v42 = vld [vmem:[%s14829_s1 + $0x310] sm:$0xff]  ;;  %v147_v45 = vld [vmem:[%s14829_s1 + $0x398] sm:$0xff] }
  0x27   :  { %v746_v56 = vld [vmem:[%s14830_s3 + $0xa0] sm:$0xff]  ;;  %9922 = vmatpush1.bf16.msra.mxu1 %v9921_v47  ;;  %493 = vmatmul.mubr.f32.vlgmr.msra.gmra.mrb[0].mxu0 %v10473_v46  ;;  %v138_v43 = vld [vmem:[%s14829_s1 + $0x350] sm:$0xff]  ;;  %v155_v47 = vld [vmem:[%s14829_s1 + $0x3d8] sm:$0xff] }
  0x28   :  { %1495 = vmatpush1.bf16.msra.mxu0 %v8806_v48  ;;  %272 = vmatprep.mubr.f32.mxu1 %v10209_v3  ;;  %v8823_v63 = vcombine.high %v742_v55, %v746_v56  ;;  %v750_v2 = vld [vmem:[%s14830_s3 + $0xc0] sm:$0xff]  ;;  %v8822_v7 = vcombine.low %v742_v55, %v746_v56  ;;  %v10633_v50 = vld [vmem:[%s14831_s0 + $0x30] sm:$0xff]  ;;  %v9947_v53 = vpack.c.bf16 %v155_v47, %v147_v45  ;;  %v10660_v62 = vld [vmem:[%s14831_s0 + $0x38] sm:$0xff] }
  0x29   :  { %9924 = vmatprep.subr.bf16.mxu1 %v9923_v51  ;;  %1496 = vmatprep.subr.bf16.mxu0 %v8815_v52  ;;  %v754_v4 = vld [vmem:[%s14830_s3 + $0xe0] sm:$0xff]  ;;  %v9945_v51 = vpack.c.bf16 %v138_v43, %v130_v42  ;;  %v146_v54 = vld [vmem:[%s14829_s1 + $0x390] sm:$0xff]  ;;  %v95_v31 = vld [vmem:[%s14829_s1 + $0x1f8] sm:$0xff] }
  0x2a   :  { %273 = vmatmul.mubr.f32.gmra.mrb[2].mxu1 %v10498_v57  ;;  %498 = vmatprep.mubr.f32.mxu0 %v10209_v3  ;;  %v8831_v11 = vcombine.high %v750_v2, %v754_v4  ;;  %v758_v14 = vld [vmem:[%s14830_s3 + $0x100] sm:$0xff]  ;;  %v8830_v18 = vcombine.low %v750_v2, %v754_v4  ;;  %v154_v55 = vld [vmem:[%s14829_s1 + $0x3d0] sm:$0xff]  ;;  %v111_v42 = vld [vmem:[%s14829_s1 + $0x278] sm:$0xff] }
  0x2b   :  { %9926 = vmatpush1.bf16.msra.mxu1 %v9925_v58  ;;  %278 = vmatprep.mubr.f32.mxu1 %v10209_v3  ;;  %v762_v15 = vld [vmem:[%s14830_s3 + $0x120] sm:$0xff]  ;;  %v39_v58 = vld [vmem:[%s14829_s1 + $0x38] sm:$0xff]  ;;  %v38_v2 = vld [vmem:[%s14829_s1 + $0x30] sm:$0xff] }
  0x2c   :  { %1497 = vmatpush1.bf16.msra.mxu0 %v8814_v59  ;;  %9928 = vmatprep.subr.bf16.mxu1 %v9927_v60  ;;  %v8839_v22 = vcombine.high %v758_v14, %v762_v15  ;;  %v766_v25 = vld [vmem:[%s14830_s3 + $0x140] sm:$0xff]  ;;  %v8838_v29 = vcombine.low %v758_v14, %v762_v15  ;;  %v47_v59 = vld [vmem:[%s14829_s1 + $0x78] sm:$0xff]  ;;  %v46_v4 = vld [vmem:[%s14829_s1 + $0x70] sm:$0xff] }
  0x2d   :  { %1498 = vmatprep.subr.bf16.mxu0 %v8823_v63  ;;  %499 = vmatmul.mubr.f32.gmra.mrb[2].mxu0 %v10498_v57  ;;  %v770_v26 = vld [vmem:[%s14830_s3 + $0x160] sm:$0xff]  ;;  %v9949_v63 = vpack.c.bf16 %v154_v55, %v146_v54  ;;  %v9983_v1 = vpack.c.bf16 %v47_v59, %v39_v58  ;;  %v54_v14 = vld [vmem:[%s14829_s1 + $0xb0] sm:$0xff]  ;;  %v127_v54 = vld [vmem:[%s14829_s1 + $0x2f8] sm:$0xff] }
  0x2e   :  { %279 = vmatmul.mubr.f32.gmra.mrb[4].mxu1 %v10525_v5  ;;  %504 = vmatprep.mubr.f32.mxu0 %v10209_v3  ;;  %v10579_v27 = vld [vmem:[%s14831_s0 + $0x20] sm:$0xff]  ;;  %v8847_v33 = vcombine.high %v766_v25, %v770_v26  ;;  %v8846_v40 = vcombine.low %v766_v25, %v770_v26  ;;  %v62_v15 = vld [vmem:[%s14829_s1 + $0xf0] sm:$0xff] }
  0x2f   :  { %9930 = vmatpush1.bf16.msra.mxu1 %v9929_v6  ;;  %284 = vmatprep.mubr.f32.mxu1 %v10209_v3  ;;  %v774_v36 = vld [vmem:[%s14830_s3 + $0x180] sm:$0xff]  ;;  %v9989_v23 = vpack.c.bf16 %v62_v15, %v54_v14  ;;  %v70_v26 = vld [vmem:[%s14829_s1 + $0x130] sm:$0xff]  ;;  %v159_v14 = vld [vmem:[%s14829_s1 + $0x3f8] sm:$0xff] }
  0x30   :  { %1499 = vmatpush1.bf16.msra.mxu0 %v8822_v7  ;;  %9932 = vmatprep.subr.bf16.mxu1 %v9931_v8  ;;  %v778_v37 = vld [vmem:[%s14830_s3 + $0x1a0] sm:$0xff]  ;;  %v55_v7 = vld [vmem:[%s14829_s1 + $0xb8] sm:$0xff] }
  0x31   :  { %1500 = vmatprep.subr.bf16.mxu0 %v8831_v11  ;;  %505 = vmatmul.mubr.f32.gmra.mrb[4].mxu0 %v10525_v5  ;;  %v8855_v44 = vcombine.high %v774_v36, %v778_v37  ;;  %v782_v48 = vld [vmem:[%s14830_s3 + $0x1c0] sm:$0xff]  ;;  %v8854_v52 = vcombine.low %v774_v36, %v778_v37  ;;  %v63_v8 = vld [vmem:[%s14829_s1 + $0xf8] sm:$0xff]  ;;  %v9985_v11 = vpack.c.bf16 %v46_v4, %v38_v2  ;;  %v86_v37 = vld [vmem:[%s14829_s1 + $0x1b0] sm:$0xff] }
  0x32   :  { %285 = vmatmul.mubr.f32.gmra.mrb[6].mxu1 %v10552_v16  ;;  %510 = vmatprep.mubr.f32.mxu0 %v10209_v3  ;;  %v786_v49 = vld [vmem:[%s14830_s3 + $0x1e0] sm:$0xff]  ;;  %v9987_v13 = vpack.c.bf16 %v63_v8, %v55_v7  ;;  %v143_v2 = vld [vmem:[%s14829_s1 + $0x378] sm:$0xff] }
  0x33   :  { %9934 = vmatpush1.bf16.msra.mxu1 %v9933_v17  ;;  %290 = vmatprep.mubr.f32.mxu1 %v10209_v3  ;;  %v8863_v56 = vcombine.high %v782_v48, %v786_v49  ;;  %v790_v60 = vld [vmem:[%s14830_s3 + $0x200] sm:$0xff]  ;;  %v8862_v0 = vcombine.low %v782_v48, %v786_v49  ;;  %v102_v49 = vld [vmem:[%s14829_s1 + $0x230] sm:$0xff] }
  0x34   :  { %1501 = vmatpush1.bf16.msra.mxu0 %v8830_v18  ;;  %9936 = vmatprep.subr.bf16.mxu1 %v9935_v19  ;;  %v794_v61 = vld [vmem:[%s14830_s3 + $0x220] sm:$0xff]  ;;  %v71_v18 = vld [vmem:[%s14829_s1 + $0x138] sm:$0xff] }
  0x35   :  { %1502 = vmatprep.subr.bf16.mxu0 %v8839_v22  ;;  %511 = vmatmul.mubr.f32.gmra.mrb[6].mxu0 %v10552_v16  ;;  %v8871_v6 = vcombine.high %v790_v60, %v794_v61  ;;  %v798_v9 = vld [vmem:[%s14830_s3 + $0x240] sm:$0xff]  ;;  %v8870_v12 = vcombine.low %v790_v60, %v794_v61  ;;  %v79_v19 = vld [vmem:[%s14829_s1 + $0x178] sm:$0xff]  ;;  %v10210_v22 = vmov 0   ;;  %v118_v61 = vld [vmem:[%s14829_s1 + $0x2b0] sm:$0xff] }
  0x36   :  { %291 = vmatmul.mubr.f32.gmra.mrb[8].mxu1 %v10579_v27  ;;  %516 = vmatprep.mubr.f32.mxu0 %v10209_v3  ;;  %v802_v10 = vld [vmem:[%s14830_s3 + $0x260] sm:$0xff]  ;;  %v9991_v25 = vpack.c.bf16 %v79_v19, %v71_v18 }
  0x37   :  { %9938 = vmatpush1.bf16.msra.mxu1 %v9937_v28  ;;  %296 = vmatprep.mubr.f32.mxu1 %v10209_v3  ;;  %v8879_v17 = vcombine.high %v798_v9, %v802_v10  ;;  %v806_v20 = vld [vmem:[%s14830_s3 + $0x280] sm:$0xff]  ;;  %v8878_v24 = vcombine.low %v798_v9, %v802_v10  ;;  %v78_v28 = vld [vmem:[%s14829_s1 + $0x170] sm:$0xff] }
  0x38   :  { %1503 = vmatpush1.bf16.msra.mxu0 %v8838_v29  ;;  %9940 = vmatprep.subr.bf16.mxu1 %v9939_v30  ;;  %v810_v21 = vld [vmem:[%s14830_s3 + $0x2a0] sm:$0xff]  ;;  %v87_v30 = vld [vmem:[%s14829_s1 + $0x1b8] sm:$0xff]  ;;  %v9993_v34 = vpack.c.bf16 %v78_v28, %v70_v26  ;;  %v134_v10 = vld [vmem:[%s14829_s1 + $0x330] sm:$0xff] }
  0x39   :  { %1504 = vmatprep.subr.bf16.mxu0 %v8847_v33  ;;  %517 = vmatmul.mubr.f32.gmra.mrb[8].mxu0 %v10579_v27  ;;  %v8887_v29 = vcombine.high %v806_v20, %v810_v21  ;;  %v814_v32 = vld [vmem:[%s14830_s3 + $0x2c0] sm:$0xff]  ;;  %v8886_v35 = vcombine.low %v806_v20, %v810_v21  ;;  %v9995_v36 = vpack.c.bf16 %v95_v31, %v87_v30  ;;  %v150_v21 = vld [vmem:[%s14829_s1 + $0x3b0] sm:$0xff]  ;;  %v731_v26 = vld [vmem:[%s14830_s3 + $0x28] sm:$0xff] }
  0x3a   :  { %297 = vmatmul.mubr.f32.gmra.mrb[10].mxu1 %v10606_v38  ;;  %522 = vmatprep.mubr.f32.mxu0 %v10209_v3  ;;  %v818_v33 = vld [vmem:[%s14830_s3 + $0x2e0] sm:$0xff]  ;;  %v728_v28 = vld [vmem:[%s14830_s3 + $0x10] sm:$0xff] }
  0x3b   :  { %9942 = vmatpush1.bf16.msra.mxu1 %v9941_v39  ;;  %302 = vmatprep.mubr.f32.mxu1 %v10209_v3  ;;  %v94_v39 = vld [vmem:[%s14829_s1 + $0x1f0] sm:$0xff]  ;;  %v822_v43 = vld [vmem:[%s14830_s3 + $0x300] sm:$0xff]  ;;  %v8894_v47 = vcombine.low %v814_v32, %v818_v33 }
  0x3c   :  { %1505 = vmatpush1.bf16.msra.mxu0 %v8846_v40  ;;  %9944 = vmatprep.subr.bf16.mxu1 %v9943_v41  ;;  %v8895_v40 = vcombine.high %v814_v32, %v818_v33  ;;  %v103_v41 = vld [vmem:[%s14829_s1 + $0x238] sm:$0xff]  ;;  %v9997_v45 = vpack.c.bf16 %v94_v39, %v86_v37  ;;  %v830_v55 = vld [vmem:[%s14830_s3 + $0x340] sm:$0xff]  ;;  %v740_v37 = vld [vmem:[%s14830_s3 + $0x70] sm:$0xff] }
  0x3d   :  { %1506 = vmatprep.subr.bf16.mxu0 %v8855_v44  ;;  %523 = vmatmul.mubr.f32.gmra.mrb[10].mxu0 %v10606_v38  ;;  %v826_v44 = vld [vmem:[%s14830_s3 + $0x320] sm:$0xff]  ;;  %v9999_v48 = vpack.c.bf16 %v111_v42, %v103_v41 }
  0x3e   :  { %303 = vmatmul.mubr.f32.gmra.mrb[12].mxu1 %v10633_v50  ;;  %528 = vmatprep.mubr.f32.mxu0 %v10209_v3  ;;  %v8902_v59 = vcombine.low %v822_v43, %v826_v44  ;;  %v838_v4 = vld [vmem:[%s14830_s3 + $0x380] sm:$0xff] }
  0x3f   :  { %9946 = vmatpush1.bf16.msra.mxu1 %v9945_v51  ;;  %308 = vmatprep.mubr.f32.mxu1 %v10209_v3  ;;  %v110_v51 = vld [vmem:[%s14829_s1 + $0x270] sm:$0xff]  ;;  %v846_v15 = vld [vmem:[%s14830_s3 + $0x3c0] sm:$0xff] }
  0x40   :  { %1507 = vmatpush1.bf16.msra.mxu0 %v8854_v52  ;;  %9948 = vmatprep.subr.bf16.mxu1 %v9947_v53  ;;  %v8903_v52 = vcombine.high %v822_v43, %v826_v44  ;;  %v119_v53 = vld [vmem:[%s14829_s1 + $0x2b8] sm:$0xff]  ;;  %v10001_v58 = vpack.c.bf16 %v110_v51, %v102_v49  ;;  %v743_v43 = vld [vmem:[%s14830_s3 + $0x88] sm:$0xff] }
  0x41   :  { %1508 = vmatprep.subr.bf16.mxu0 %v8863_v56  ;;  %529 = vmatmul.mubr.f32.gmra.mrb[12].mxu0 %v10633_v50  ;;  %v834_v56 = vld [vmem:[%s14830_s3 + $0x360] sm:$0xff]  ;;  %v10003_v60 = vpack.c.bf16 %v127_v54, %v119_v53  ;;  %v747_v44 = vld [vmem:[%s14830_s3 + $0xa8] sm:$0xff]  ;;  %v752_v54 = vld [vmem:[%s14830_s3 + $0xd0] sm:$0xff] }
  0x42   :  { %309 = vmatmul.mubr.f32.gmra.mrb[14].mxu1 %v10660_v62  ;;  %534 = vmatprep.mubr.f32.mxu0 %v10209_v3  ;;  %v8910_v8 = vcombine.low %v830_v55, %v834_v56  ;;  %v10865_v51 = vcombine.high %v743_v43, %v747_v44  ;;  %v755_v53 = vld [vmem:[%s14830_s3 + $0xe8] sm:$0xff] }
  0x43   :  { %9950 = vmatpush1.bf16.msra.mxu1 %v9949_v63  ;;  %379 = vmatprep.mubr.f32.mxu1 %v10209_v3  ;;  %v126_v63 = vld [vmem:[%s14829_s1 + $0x2f0] sm:$0xff] }
  0x44   :  { %1509 = vmatpush1.bf16.msra.mxu0 %v8862_v0  ;;  %9984 = vmatprep.subr.bf16.mxu1 %v9983_v1  ;;  %v8911_v0 = vcombine.high %v830_v55, %v834_v56  ;;  %v135_v1 = vld [vmem:[%s14829_s1 + $0x338] sm:$0xff]  ;;  %v10005_v7 = vpack.c.bf16 %v126_v63, %v118_v61  ;;  %v756_v55 = vld [vmem:[%s14830_s3 + $0xf0] sm:$0xff]  ;;  %v10883_v56 = vcombine.low %v743_v43, %v747_v44  ;;  %v763_v61 = vld [vmem:[%s14830_s3 + $0x128] sm:$0xff] }
  0x45   :  { %1510 = vmatprep.subr.bf16.mxu0 %v8871_v6  ;;  %535 = vmatmul.mubr.f32.gmra.mrb[14].mxu0 %v10660_v62  ;;  %v842_v6 = vld [vmem:[%s14830_s3 + $0x3a0] sm:$0xff]  ;;  %v10007_v9 = vpack.c.bf16 %v143_v2, %v135_v1  ;;  %v760_v63 = vld [vmem:[%s14830_s3 + $0x110] sm:$0xff]  ;;  %v8834_v2 = vcombine.low %v752_v54, %v756_v55 }
  0x46   :  { %380 = vmatmul.mubr.f32.vlgmr.msra.gmra.mrb[16].mxu1 %v10473_v46  ;;  %1526 = vmatprep.mubr.bf16.mxu0 %v10210_v22  ;;  %v8918_v19 = vcombine.low %v838_v4, %v842_v6  ;;  %v804_v43 = vld [vmem:[%s14830_s3 + $0x270] sm:$0xff] }
  0x47   :  { %9986 = vmatpush1.bf16.msra.mxu1 %v9985_v11  ;;  %385 = vmatprep.mubr.f32.mxu1 %v10209_v3  ;;  %v142_v11 = vld [vmem:[%s14829_s1 + $0x370] sm:$0xff] }
  0x48   :  { %1511 = vmatpush1.bf16.msra.mxu0 %v8870_v12  ;;  %9988 = vmatprep.subr.bf16.mxu1 %v9987_v13  ;;  %v8919_v12 = vcombine.high %v838_v4, %v842_v6  ;;  %v151_v13 = vld [vmem:[%s14829_s1 + $0x3b8] sm:$0xff]  ;;  %v10009_v18 = vpack.c.bf16 %v142_v11, %v134_v10 }
  0x49   :  { %1512 = vmatprep.subr.bf16.mxu0 %v8879_v17  ;;  %v850_v17 = vld [vmem:[%s14830_s3 + $0x3e0] sm:$0xff]  ;;  %v10011_v20 = vpack.c.bf16 %v159_v14, %v151_v13  ;;  %v775_v14 = vld [vmem:[%s14830_s3 + $0x188] sm:$0xff] }
  0x4a   :  { %386 = vmatmul.mubr.f32.gmra.mrb[18].mxu1 %v10498_v57  ;;  %v8926_v31 = vcombine.low %v846_v15, %v850_v17 }
  0x4b   :  { %9990 = vmatpush1.bf16.msra.mxu1 %v9989_v23  ;;  %391 = vmatprep.mubr.f32.mxu1 %v10209_v3  ;;  %v158_v23 = vld [vmem:[%s14829_s1 + $0x3f0] sm:$0xff] }
  0x4c   :  { %1513 = vmatpush1.bf16.msra.mxu0 %v8878_v24  ;;  %9992 = vmatprep.subr.bf16.mxu1 %v9991_v25  ;;  %v8927_v24 = vcombine.high %v846_v15, %v850_v17  ;;  %v727_v25 = vld [vmem:[%s14830_s3 + $0x8] sm:$0xff]  ;;  %v10013_v30 = vpack.c.bf16 %v158_v23, %v150_v21  ;;  %v776_v15 = vld [vmem:[%s14830_s3 + $0x190] sm:$0xff] }
  0x4d   :  { %1514 = vmatprep.subr.bf16.mxu0 %v8887_v29  ;;  %v732_v29 = vld [vmem:[%s14830_s3 + $0x30] sm:$0xff]  ;;  %v10826_v32 = vcombine.high %v727_v25, %v731_v26  ;;  %v10842_v39 = vcombine.low %v727_v25, %v731_v26  ;;  %v783_v23 = vld [vmem:[%s14830_s3 + $0x1c8] sm:$0xff] }
  0x4e   :  { %392 = vmatmul.mubr.f32.gmra.mrb[20].mxu1 %v10525_v5  ;;  %v8811_v33 = vcombine.high %v728_v28, %v732_v29  ;;  %v780_v17 = vld [vmem:[%s14830_s3 + $0x1b0] sm:$0xff] }
  0x4f   :  { %9994 = vmatpush1.bf16.msra.mxu1 %v9993_v34  ;;  %397 = vmatprep.mubr.f32.mxu1 %v10209_v3  ;;  %v735_v34 = vld [vmem:[%s14830_s3 + $0x48] sm:$0xff]  ;;  %v8859_v21 = vcombine.high %v776_v15, %v780_v17  ;;  %v788_v25 = vld [vmem:[%s14830_s3 + $0x1f0] sm:$0xff] }
  0x50   :  { %1515 = vmatpush1.bf16.msra.mxu0 %v8886_v35  ;;  %9996 = vmatprep.subr.bf16.mxu1 %v9995_v36  ;;  %v739_v35 = vld [vmem:[%s14830_s3 + $0x68] sm:$0xff]  ;;  %v736_v36 = vld [vmem:[%s14830_s3 + $0x50] sm:$0xff] }
  0x51   :  { %1516 = vmatprep.subr.bf16.mxu0 %v8895_v40  ;;  %v8810_v40 = vcombine.low %v728_v28, %v732_v29  ;;  %v10845_v41 = vcombine.high %v735_v34, %v739_v35  ;;  %v8819_v42 = vcombine.high %v736_v36, %v740_v37  ;;  %v8818_v49 = vcombine.low %v736_v36, %v740_v37 }
  0x52   :  { %398 = vmatmul.mubr.f32.gmra.mrb[22].mxu1 %v10552_v16  ;;  %v8858_v28 = vcombine.low %v776_v15, %v780_v17 }
  0x53   :  { %9998 = vmatpush1.bf16.msra.mxu1 %v9997_v45  ;;  %403 = vmatprep.mubr.f32.mxu1 %v10209_v3  ;;  %v744_v45 = vld [vmem:[%s14830_s3 + $0x90] sm:$0xff] }
  0x54   :  { %1517 = vmatpush1.bf16.msra.mxu0 %v8894_v47  ;;  %10000 = vmatprep.subr.bf16.mxu1 %v9999_v48  ;;  %v748_v47 = vld [vmem:[%s14830_s3 + $0xb0] sm:$0xff]  ;;  %v10862_v48 = vcombine.low %v735_v34, %v739_v35 }
  0x55   :  { %1518 = vmatprep.subr.bf16.mxu0 %v8903_v52  ;;  %v751_v52 = vld [vmem:[%s14830_s3 + $0xc8] sm:$0xff]  ;;  %v796_v34 = vld [vmem:[%s14830_s3 + $0x230] sm:$0xff] }
  0x56   :  { %404 = vmatmul.mubr.f32.gmra.mrb[24].mxu1 %v10579_v27  ;;  %v10903_v1 = vcombine.low %v751_v52, %v755_v53 }
  0x57   :  { %10002 = vmatpush1.bf16.msra.mxu1 %v10001_v58  ;;  %409 = vmatprep.mubr.f32.mxu1 %v10209_v3  ;;  %v8826_v58 = vcombine.low %v744_v45, %v748_v47 }
  0x58   :  { %1519 = vmatpush1.bf16.msra.mxu0 %v8902_v59  ;;  %10004 = vmatprep.subr.bf16.mxu1 %v10003_v60  ;;  %v10887_v59 = vcombine.high %v751_v52, %v755_v53  ;;  %v8835_v60 = vcombine.high %v752_v54, %v756_v55  ;;  %v808_v52 = vld [vmem:[%s14830_s3 + $0x290] sm:$0xff] }
  0x59   :  { %1520 = vmatprep.subr.bf16.mxu0 %v8911_v0  ;;  %v764_v0 = vld [vmem:[%s14830_s3 + $0x130] sm:$0xff] }
  0x5a   :  { %410 = vmatmul.mubr.f32.gmra.mrb[26].mxu1 %v10606_v38  ;;  %v8843_v6 = vcombine.high %v760_v63, %v764_v0  ;;  %v8842_v11 = vcombine.low %v760_v63, %v764_v0  ;;  %v812_v53 = vld [vmem:[%s14830_s3 + $0x2b0] sm:$0xff] }
  0x5b   :  { %10006 = vmatpush1.bf16.msra.mxu1 %v10005_v7  ;;  %415 = vmatprep.mubr.f32.mxu1 %v10209_v3  ;;  %v767_v7 = vld [vmem:[%s14830_s3 + $0x148] sm:$0xff]  ;;  %v816_v63 = vld [vmem:[%s14830_s3 + $0x2d0] sm:$0xff] }
  0x5c   :  { %1521 = vmatpush1.bf16.msra.mxu0 %v8910_v8  ;;  %10008 = vmatprep.subr.bf16.mxu1 %v10007_v9  ;;  %v768_v8 = vld [vmem:[%s14830_s3 + $0x150] sm:$0xff] }
  0x5d   :  { %1522 = vmatprep.subr.bf16.mxu0 %v8919_v12  ;;  %v772_v9 = vld [vmem:[%s14830_s3 + $0x170] sm:$0xff] }
  0x5e   :  { %416 = vmatmul.mubr.f32.gmra.mrb[28].mxu1 %v10633_v50  ;;  %v8851_v13 = vcombine.high %v768_v8, %v772_v9  ;;  %v820_v0 = vld [vmem:[%s14830_s3 + $0x2f0] sm:$0xff] }
  0x5f   :  { %10010 = vmatpush1.bf16.msra.mxu1 %v10009_v18  ;;  %421 = vmatprep.mubr.f32.mxu1 %v10209_v3 }
  0x60   :  { %1523 = vmatpush1.bf16.msra.mxu0 %v8918_v19  ;;  %10012 = vmatprep.subr.bf16.mxu1 %v10011_v20  ;;  %v8850_v19 = vcombine.low %v768_v8, %v772_v9  ;;  %v823_v8 = vld [vmem:[%s14830_s3 + $0x308] sm:$0xff] }
  0x61   :  { %1524 = vmatprep.subr.bf16.mxu0 %v8927_v24  ;;  %v784_v24 = vld [vmem:[%s14830_s3 + $0x1d0] sm:$0xff]  ;;  %v827_v9 = vld [vmem:[%s14830_s3 + $0x328] sm:$0xff] }
  0x62   :  { %422 = vmatmul.mubr.f32.gmra.mrb[30].mxu1 %v10660_v62  ;;  %v8866_v36 = vcombine.low %v784_v24, %v788_v25  ;;  %v8905_v15 = vcombine.high %v823_v8, %v827_v9 }
  0x63   :  { %10014 = vmatpush1.bf16.msra.mxu1 %v10013_v30  ;;  %605 = vmatprep.mubr.f32.mxu1 %v10209_v3  ;;  %v8867_v30 = vcombine.high %v784_v24, %v788_v25  ;;  %v8904_v24 = vcombine.low %v823_v8, %v827_v9 }
  0x64   :  { %1525 = vmatpush1.bf16.msra.mxu0 %v8926_v31  ;;  %1535 = vmatprep.subr.bf16.mxu1 %v10826_v32  ;;  %v791_v31 = vld [vmem:[%s14830_s3 + $0x208] sm:$0xff] }
  0x65   :  { %1576 = vmatprep.subr.bf16.mxu0 %v8811_v33  ;;  %v792_v33 = vld [vmem:[%s14830_s3 + $0x210] sm:$0xff] }
  0x66   :  { %606 = vmatmul.mubr.f32.vlgmr.msra.gmra.mrb[32].mxu1 %v10473_v46  ;;  %v8827_v46 = vcombine.high %v744_v45, %v748_v47  ;;  %v8874_v45 = vcombine.low %v792_v33, %v796_v34 }
  0x67   :  { %1527 = vmatmul.mubr.bf16.vlgmr.msra.gmra.mrb[16].mxu0 %v10210_v22  ;;  %1536 = vmatpush1.bf16.msra.mxu1 %v10842_v39 }
  0x68   :  { %1577 = vmatpush1.bf16.msra.mxu0 %v8810_v40  ;;  %1537 = vmatprep.subr.bf16.mxu1 %v10845_v41  ;;  %v8875_v40 = vcombine.high %v792_v33, %v796_v34  ;;  %v840_v33 = vld [vmem:[%s14830_s3 + $0x390] sm:$0xff] }
  0x69   :  { %1578 = vmatprep.subr.bf16.mxu0 %v8819_v42  ;;  %611 = vmatprep.mubr.f32.mxu1 %v10209_v3  ;;  %v799_v42 = vld [vmem:[%s14830_s3 + $0x248] sm:$0xff]  ;;  %v844_v34 = vld [vmem:[%s14830_s3 + $0x3b0] sm:$0xff] }
  0x6a   :  { %612 = vmatmul.mubr.f32.gmra.mrb[34].mxu1 %v10498_v57  ;;  %1608 = vmatprep.mubr.bf16.mxu0 %v10210_v22  ;;  %v759_v57 = vld [vmem:[%s14830_s3 + $0x108] sm:$0xff] }
  0x6b   :  { %1538 = vmatpush1.bf16.msra.mxu1 %v10862_v48  ;;  %617 = vmatprep.mubr.f32.mxu1 %v10209_v3  ;;  %v10907_v4 = vcombine.high %v759_v57, %v763_v61  ;;  %v10923_v10 = vcombine.low %v759_v57, %v763_v61  ;;  %v815_v57 = vld [vmem:[%s14830_s3 + $0x2c8] sm:$0xff] }
  0x6c   :  { %1579 = vmatpush1.bf16.msra.mxu0 %v8818_v49  ;;  %1539 = vmatprep.subr.bf16.mxu1 %v10865_v51  ;;  %v819_v61 = vld [vmem:[%s14830_s3 + $0x2e8] sm:$0xff] }
  0x6d   :  { %1580 = vmatprep.subr.bf16.mxu0 %v8827_v46  ;;  %v807_v46 = vld [vmem:[%s14830_s3 + $0x288] sm:$0xff] }
  0x6e   :  { %618 = vmatmul.mubr.f32.gmra.mrb[36].mxu1 %v10525_v5  ;;  %v771_v5 = vld [vmem:[%s14830_s3 + $0x168] sm:$0xff] }
  0x6f   :  { %1540 = vmatpush1.bf16.msra.mxu1 %v10883_v56  ;;  %623 = vmatprep.mubr.f32.mxu1 %v10209_v3  ;;  %v10927_v12 = vcombine.high %v767_v7, %v771_v5  ;;  %v10943_v18 = vcombine.low %v767_v7, %v771_v5  ;;  %v8897_v7 = vcombine.high %v815_v57, %v819_v61 }
  0x70   :  { %1581 = vmatpush1.bf16.msra.mxu0 %v8826_v58  ;;  %1541 = vmatprep.subr.bf16.mxu1 %v10887_v59  ;;  %v8899_v5 = vcombine.high %v816_v63, %v820_v0 }
  0x71   :  { %1582 = vmatprep.subr.bf16.mxu0 %v8835_v60  ;;  %v8891_v60 = vcombine.high %v808_v52, %v812_v53 }
  0x72   :  { %624 = vmatmul.mubr.f32.gmra.mrb[38].mxu1 %v10552_v16  ;;  %v779_v16 = vld [vmem:[%s14830_s3 + $0x1a8] sm:$0xff] }
  0x73   :  { %1542 = vmatpush1.bf16.msra.mxu1 %v10903_v1  ;;  %629 = vmatprep.mubr.f32.mxu1 %v10209_v3  ;;  %v10947_v20 = vcombine.high %v775_v14, %v779_v16  ;;  %v10963_v26 = vcombine.low %v775_v14, %v779_v16  ;;  %v8896_v14 = vcombine.low %v815_v57, %v819_v61 }
  0x74   :  { %1583 = vmatpush1.bf16.msra.mxu0 %v8834_v2  ;;  %1543 = vmatprep.subr.bf16.mxu1 %v10907_v4  ;;  %v8898_v16 = vcombine.low %v816_v63, %v820_v0  ;;  %v737_v63 = vld [vmem:[%s14830_s3 + $0x58] sm:$0xff] }
  0x75   :  { %1584 = vmatprep.subr.bf16.mxu0 %v8843_v6  ;;  %v8890_v6 = vcombine.low %v808_v52, %v812_v53  ;;  %v741_v0 = vld [vmem:[%s14830_s3 + $0x78] sm:$0xff] }
  0x76   :  { %630 = vmatmul.mubr.f32.gmra.mrb[40].mxu1 %v10579_v27  ;;  %v787_v27 = vld [vmem:[%s14830_s3 + $0x1e8] sm:$0xff]  ;;  %v8820_v8 = vcombine.low %v737_v63, %v741_v0 }
  0x77   :  { %1544 = vmatpush1.bf16.msra.mxu1 %v10923_v10  ;;  %635 = vmatprep.mubr.f32.mxu1 %v10209_v3  ;;  %v10967_v29 = vcombine.high %v783_v23, %v787_v27  ;;  %v10983_v35 = vcombine.low %v783_v23, %v787_v27  ;;  %v832_v23 = vld [vmem:[%s14830_s3 + $0x350] sm:$0xff] }
  0x78   :  { %1585 = vmatpush1.bf16.msra.mxu0 %v8842_v11  ;;  %1545 = vmatprep.subr.bf16.mxu1 %v10927_v12  ;;  %v824_v11 = vld [vmem:[%s14830_s3 + $0x310] sm:$0xff] }
  0x79   :  { %1586 = vmatprep.subr.bf16.mxu0 %v8851_v13  ;;  %v828_v13 = vld [vmem:[%s14830_s3 + $0x330] sm:$0xff] }
  0x7a   :  { %636 = vmatmul.mubr.f32.gmra.mrb[42].mxu1 %v10606_v38  ;;  %v795_v38 = vld [vmem:[%s14830_s3 + $0x228] sm:$0xff]  ;;  %v8907_v17 = vcombine.high %v824_v11, %v828_v13  ;;  %v836_v27 = vld [vmem:[%s14830_s3 + $0x370] sm:$0xff]  ;;  %v8906_v25 = vcombine.low %v824_v11, %v828_v13  ;;  %v753_v11 = vld [vmem:[%s14830_s3 + $0xd8] sm:$0xff] }
  0x7b   :  { %1546 = vmatpush1.bf16.msra.mxu1 %v10943_v18  ;;  %641 = vmatprep.mubr.f32.mxu1 %v10209_v3  ;;  %v10987_v37 = vcombine.high %v791_v31, %v795_v38  ;;  %v11003_v44 = vcombine.low %v791_v31, %v795_v38  ;;  %v839_v31 = vld [vmem:[%s14830_s3 + $0x388] sm:$0xff]  ;;  %v757_v13 = vld [vmem:[%s14830_s3 + $0xf8] sm:$0xff] }
  0x7c   :  { %1587 = vmatpush1.bf16.msra.mxu0 %v8850_v19  ;;  %1547 = vmatprep.subr.bf16.mxu1 %v10947_v20  ;;  %v831_v19 = vld [vmem:[%s14830_s3 + $0x348] sm:$0xff] }
  0x7d   :  { %1588 = vmatprep.subr.bf16.mxu0 %v8859_v21  ;;  %v835_v21 = vld [vmem:[%s14830_s3 + $0x368] sm:$0xff] }
  0x7e   :  { %642 = vmatmul.mubr.f32.gmra.mrb[44].mxu1 %v10633_v50  ;;  %v803_v50 = vld [vmem:[%s14830_s3 + $0x268] sm:$0xff] }
  0x7f   :  { %1548 = vmatpush1.bf16.msra.mxu1 %v10963_v26  ;;  %647 = vmatprep.mubr.f32.mxu1 %v10209_v3  ;;  %v800_v3 = vld [vmem:[%s14830_s3 + $0x250] sm:$0xff]  ;;  %v11007_v47 = vcombine.high %v799_v42, %v803_v50  ;;  %v11022_v54 = vcombine.low %v799_v42, %v803_v50  ;;  %v843_v38 = vld [vmem:[%s14830_s3 + $0x3a8] sm:$0xff]  ;;  %v8923_v50 = vcombine.high %v840_v33, %v844_v34 }
  0x80   :  { %1589 = vmatpush1.bf16.msra.mxu0 %v8858_v28  ;;  %1549 = vmatprep.subr.bf16.mxu1 %v10967_v29  ;;  %v8883_v49 = vcombine.high %v800_v3, %v804_v43  ;;  %v8882_v55 = vcombine.low %v800_v3, %v804_v43  ;;  %v11062_v28 = vcombine.high %v831_v19, %v835_v21  ;;  %v847_v3 = vld [vmem:[%s14830_s3 + $0x3c8] sm:$0xff] }
  0x81   :  { %1590 = vmatprep.subr.bf16.mxu0 %v8867_v30  ;;  %v8915_v30 = vcombine.high %v832_v23, %v836_v27  ;;  %v11079_v42 = vcombine.high %v839_v31, %v843_v38  ;;  %v851_v43 = vld [vmem:[%s14830_s3 + $0x3e8] sm:$0xff] }
  0x82   :  { %648 = vmatmul.mubr.f32.gmra.mrb[46].mxu1 %v10660_v62  ;;  %v811_v62 = vld [vmem:[%s14830_s3 + $0x2a8] sm:$0xff]  ;;  %v11097_v52 = vcombine.high %v847_v3, %v851_v43 }
  0x83   :  { %1550 = vmatpush1.bf16.msra.mxu1 %v10983_v35  ;;  %1567 = vmatprep.mubr.bf16.mxu1 %v10210_v22  ;;  %v8889_v58 = vcombine.high %v807_v46, %v811_v62  ;;  %v8888_v2 = vcombine.low %v807_v46, %v811_v62  ;;  %v11094_v46 = vcombine.low %v839_v31, %v843_v38  ;;  %v781_v31 = vld [vmem:[%s14830_s3 + $0x1b8] sm:$0xff] }
  0x84   :  { %1591 = vmatpush1.bf16.msra.mxu0 %v8866_v36  ;;  %1551 = vmatprep.subr.bf16.mxu1 %v10987_v37  ;;  %v11076_v36 = vcombine.low %v831_v19, %v835_v21  ;;  %v8922_v62 = vcombine.low %v840_v33, %v844_v34  ;;  %v8836_v19 = vcombine.low %v753_v11, %v757_v13  ;;  %v785_v34 = vld [vmem:[%s14830_s3 + $0x1d8] sm:$0xff] }
  0x85   :  { %1592 = vmatprep.subr.bf16.mxu0 %v8875_v40  ;;  %v8914_v40 = vcombine.low %v832_v23, %v836_v27  ;;  %v769_v23 = vld [vmem:[%s14830_s3 + $0x158] sm:$0xff] }
  0x86   :  { %v773_v27 = vld [vmem:[%s14830_s3 + $0x178] sm:$0xff] }
  0x87   :  { %1552 = vmatpush1.bf16.msra.mxu1 %v11003_v44  ;;  %v8852_v38 = vcombine.low %v769_v23, %v773_v27 }
  0x88   :  { %1593 = vmatpush1.bf16.msra.mxu0 %v8874_v45  ;;  %1553 = vmatprep.subr.bf16.mxu1 %v11007_v47  ;;  %v848_v45 = vld [vmem:[%s14830_s3 + $0x3d0] sm:$0xff] }
  0x89   :  { %1594 = vmatprep.subr.bf16.mxu0 %v8883_v49  ;;  %v852_v49 = vld [vmem:[%s14830_s3 + $0x3f0] sm:$0xff] }
  0x8a   :  { %v8931_v53 = vcombine.high %v848_v45, %v852_v49  ;;  %v8930_v57 = vcombine.low %v848_v45, %v852_v49  ;;  %v797_v45 = vld [vmem:[%s14830_s3 + $0x238] sm:$0xff] }
  0x8b   :  { %1554 = vmatpush1.bf16.msra.mxu1 %v11022_v54 }
  0x8c   :  { %1595 = vmatpush1.bf16.msra.mxu0 %v8882_v55  ;;  %1555 = vmatprep.subr.bf16.mxu1 %v8889_v58  ;;  %v729_v55 = vld [vmem:[%s14830_s3 + $0x18] sm:$0xff] }
  0x8d   :  { %1596 = vmatprep.subr.bf16.mxu0 %v8891_v60  ;;  %v733_v58 = vld [vmem:[%s14830_s3 + $0x38] sm:$0xff]  ;;  %v11106_v60 = vcombine.low %v847_v3, %v851_v43 }
  0x8e   :  { %v11109_v61 = vcombine.high %v729_v55, %v733_v58  ;;  %v793_v43 = vld [vmem:[%s14830_s3 + $0x218] sm:$0xff] }
  0x8f   :  { %1556 = vmatpush1.bf16.msra.mxu1 %v8888_v2  ;;  %v11118_v2 = vcombine.low %v729_v55, %v733_v58  ;;  %v805_v55 = vld [vmem:[%s14830_s3 + $0x278] sm:$0xff]  ;;  %v8876_v58 = vcombine.low %v793_v43, %v797_v45 }
  0x90   :  { %1597 = vmatpush1.bf16.msra.mxu0 %v8890_v6  ;;  %1557 = vmatprep.subr.bf16.mxu1 %v8897_v7  ;;  %v8821_v6 = vcombine.high %v737_v63, %v741_v0  ;;  %v745_v7 = vld [vmem:[%s14830_s3 + $0x98] sm:$0xff] }
  0x91   :  { %1598 = vmatprep.subr.bf16.mxu0 %v8899_v5  ;;  %v749_v5 = vld [vmem:[%s14830_s3 + $0xb8] sm:$0xff] }
  0x92   :  { %v8829_v9 = vcombine.high %v745_v7, %v749_v5  ;;  %v809_v63 = vld [vmem:[%s14830_s3 + $0x298] sm:$0xff] }
  0x93   :  { %1558 = vmatpush1.bf16.msra.mxu1 %v8896_v14  ;;  %v8828_v14 = vcombine.low %v745_v7, %v749_v5  ;;  %v813_v0 = vld [vmem:[%s14830_s3 + $0x2b8] sm:$0xff] }
  0x94   :  { %1599 = vmatpush1.bf16.msra.mxu0 %v8898_v16  ;;  %1559 = vmatprep.subr.bf16.mxu1 %v8905_v15  ;;  %v8837_v16 = vcombine.high %v753_v11, %v757_v13  ;;  %v761_v15 = vld [vmem:[%s14830_s3 + $0x118] sm:$0xff]  ;;  %v8893_v7 = vcombine.high %v809_v63, %v813_v0 }
  0x95   :  { %1600 = vmatprep.subr.bf16.mxu0 %v8907_v17  ;;  %v765_v17 = vld [vmem:[%s14830_s3 + $0x138] sm:$0xff] }
  0x96   :  { %v8845_v21 = vcombine.high %v761_v15, %v765_v17  ;;  %v817_v5 = vld [vmem:[%s14830_s3 + $0x2d8] sm:$0xff] }
  0x97   :  { %1560 = vmatpush1.bf16.msra.mxu1 %v8904_v24  ;;  %v8844_v24 = vcombine.low %v761_v15, %v765_v17  ;;  %v825_v13 = vld [vmem:[%s14830_s3 + $0x318] sm:$0xff] }
  0x98   :  { %1601 = vmatpush1.bf16.msra.mxu0 %v8906_v25  ;;  %1561 = vmatprep.subr.bf16.mxu1 %v11062_v28  ;;  %v8853_v25 = vcombine.high %v769_v23, %v773_v27  ;;  %v833_v17 = vld [vmem:[%s14830_s3 + $0x358] sm:$0xff] }
  0x99   :  { %1602 = vmatprep.subr.bf16.mxu0 %v8915_v30  ;;  %v777_v30 = vld [vmem:[%s14830_s3 + $0x198] sm:$0xff] }
  0x9a   :  { %v8861_v33 = vcombine.high %v777_v30, %v781_v31  ;;  %v841_v27 = vld [vmem:[%s14830_s3 + $0x398] sm:$0xff] }
  0x9b   :  { %1562 = vmatpush1.bf16.msra.mxu1 %v11076_v36 }
  0x9c   :  { %1603 = vmatpush1.bf16.msra.mxu0 %v8914_v40  ;;  %1563 = vmatprep.subr.bf16.mxu1 %v11079_v42  ;;  %v789_v40 = vld [vmem:[%s14830_s3 + $0x1f8] sm:$0xff] }
  0x9d   :  { %1604 = vmatprep.subr.bf16.mxu0 %v8923_v50  ;;  %v8860_v50 = vcombine.low %v777_v30, %v781_v31  ;;  %v8869_v3 = vcombine.high %v785_v34, %v789_v40  ;;  %v8868_v49 = vcombine.low %v785_v34, %v789_v40  ;;  %v849_v31 = vld [vmem:[%s14830_s3 + $0x3d8] sm:$0xff] }
  0x9f   :  { %1564 = vmatpush1.bf16.msra.mxu1 %v11094_v46 }
  0xa0   :  { %1605 = vmatpush1.bf16.msra.mxu0 %v8922_v62  ;;  %1565 = vmatprep.subr.bf16.mxu1 %v11097_v52  ;;  %v8877_v62 = vcombine.high %v793_v43, %v797_v45 }
  0xa1   :  { %1606 = vmatprep.subr.bf16.mxu0 %v8931_v53  ;;  %v801_v53 = vld [vmem:[%s14830_s3 + $0x258] sm:$0xff] }
  0xa3   :  { %1566 = vmatpush1.bf16.msra.mxu1 %v11106_v60 }
  0xa4   :  { %1607 = vmatpush1.bf16.msra.mxu0 %v8930_v57  ;;  %1617 = vmatprep.subr.bf16.mxu1 %v11109_v61  ;;  %v8885_v57 = vcombine.high %v801_v53, %v805_v55 }
  0xa6   :  { %1568 = vmatmul.mubr.bf16.vlgmr.msra.gmra.mrb[48].mxu1 %v10210_v22 }
  0xa7   :  { %1609 = vmatmul.mubr.bf16.vlgmr.msra.gmra.mrb[20].mxu0 %v10210_v22  ;;  %1618 = vmatpush1.bf16.msra.mxu1 %v11118_v2 }
  0xa8   :  { %1619 = vmatprep.subr.bf16.mxu1 %v8821_v6  ;;  %1649 = vmatprep.mubr.bf16.mxu1 %v10210_v22  ;;  %v8884_v6 = vcombine.low %v801_v53, %v805_v55 }
  0xab   :  { %1620 = vmatpush1.bf16.msra.mxu1 %v8820_v8  ;;  %v821_v8 = vld [vmem:[%s14830_s3 + $0x2f8] sm:$0xff] }
  0xac   :  { %1621 = vmatprep.subr.bf16.mxu1 %v8829_v9  ;;  %v8892_v9 = vcombine.low %v809_v63, %v813_v0  ;;  %v8901_v11 = vcombine.high %v817_v5, %v821_v8 }
  0xaf   :  { %1622 = vmatpush1.bf16.msra.mxu1 %v8828_v14  ;;  %v829_v14 = vld [vmem:[%s14830_s3 + $0x338] sm:$0xff] }
  0xb0   :  { %1623 = vmatprep.subr.bf16.mxu1 %v8837_v16  ;;  %v8900_v16 = vcombine.low %v817_v5, %v821_v8  ;;  %v8909_v15 = vcombine.high %v825_v13, %v829_v14 }
  0xb3   :  { %1624 = vmatpush1.bf16.msra.mxu1 %v8836_v19  ;;  %v837_v19 = vld [vmem:[%s14830_s3 + $0x378] sm:$0xff] }
  0xb4   :  { %1625 = vmatprep.subr.bf16.mxu1 %v8845_v21  ;;  %v8908_v21 = vcombine.low %v825_v13, %v829_v14  ;;  %v8917_v23 = vcombine.high %v833_v17, %v837_v19 }
  0xb7   :  { %1626 = vmatpush1.bf16.msra.mxu1 %v8844_v24  ;;  %v845_v24 = vld [vmem:[%s14830_s3 + $0x3b8] sm:$0xff] }
  0xb8   :  { %1627 = vmatprep.subr.bf16.mxu1 %v8853_v25  ;;  %v8916_v25 = vcombine.low %v833_v17, %v837_v19  ;;  %v8925_v30 = vcombine.high %v841_v27, %v845_v24 }
  0xbb   :  { %1628 = vmatpush1.bf16.msra.mxu1 %v8852_v38  ;;  %v853_v38 = vld [vmem:[%s14830_s3 + $0x3f8] sm:$0xff] }
  0xbc   :  { %1629 = vmatprep.subr.bf16.mxu1 %v8861_v33  ;;  %v8924_v33 = vcombine.low %v841_v27, %v845_v24  ;;  %v8933_v34 = vcombine.high %v849_v31, %v853_v38  ;;  %v8932_v40 = vcombine.low %v849_v31, %v853_v38 }
  0xbf   :  { %1630 = vmatpush1.bf16.msra.mxu1 %v8860_v50  ;;  %v162_v50 = vlaneseq }
  0xc0   :  { %1631 = vmatprep.subr.bf16.mxu1 %v8869_v3 }
  0xc1   :  { %v11218_v3 = vshrl.u32 %v162_v50, 7 }
  0xc3   :  { %1632 = vmatpush1.bf16.msra.mxu1 %v8868_v49 }
  0xc4   :  { %1633 = vmatprep.subr.bf16.mxu1 %v8877_v62 }
  0xc7   :  { %1634 = vmatpush1.bf16.msra.mxu1 %v8876_v58 }
  0xc8   :  { %1635 = vmatprep.subr.bf16.mxu1 %v8885_v57 }
  0xcb   :  { %1636 = vmatpush1.bf16.msra.mxu1 %v8884_v6 }
  0xcc   :  { %1637 = vmatprep.subr.bf16.mxu1 %v8893_v7 }
  0xcf   :  { %1638 = vmatpush1.bf16.msra.mxu1 %v8892_v9 }
  0xd0   :  { %1639 = vmatprep.subr.bf16.mxu1 %v8901_v11 }
  0xd3   :  { %1640 = vmatpush1.bf16.msra.mxu1 %v8900_v16 }
  0xd4   :  { %1641 = vmatprep.subr.bf16.mxu1 %v8909_v15 }
  0xd7   :  { %1642 = vmatpush1.bf16.msra.mxu1 %v8908_v21 }
  0xd8   :  { %1643 = vmatprep.subr.bf16.mxu1 %v8917_v23 }
  0xdb   :  { %1644 = vmatpush1.bf16.msra.mxu1 %v8916_v25 }
  0xdc   :  { %1645 = vmatprep.subr.bf16.mxu1 %v8925_v30 }
  0xdf   :  { %1646 = vmatpush1.bf16.msra.mxu1 %v8924_v33 }
  0xe0   :  { %1647 = vmatprep.subr.bf16.mxu1 %v8933_v34 }
  0xe3   :  { %1648 = vmatpush1.bf16.msra.mxu1 %v8932_v40 }
  0xe4   :  { %2524 = vmatprep.subr.bf16.mxu1 %v10826_v32  ;;  %v11227_v32 = vld [vmem:[%s14832_s2] sm:$0xff] }
  0xe6   :  { %1650 = vmatmul.mubr.bf16.vlgmr.msra.gmra.mrb[52].mxu1 %v10210_v22  ;;  %v164_v22 = vsub.s32 0, %v11218_v3 }
  0xe7   :  { %2525 = vmatpush1.bf16.msra.mxu1 %v10842_v39 }
  0xe8   :  { %2526 = vmatprep.subr.bf16.mxu1 %v10845_v41  ;;  %v168_v41 = vsub.s32 1, %v11218_v3 }
  0xeb   :  { %2527 = vmatpush1.bf16.msra.mxu1 %v10862_v48 }
  0xec   :  { %2528 = vmatprep.subr.bf16.mxu1 %v10865_v51 }
  0xef   :  { %2529 = vmatpush1.bf16.msra.mxu1 %v10883_v56  ;;  %v180_v56 = vsub.s32 4, %v11218_v3 }
  0xf0   :  { %2530 = vmatprep.subr.bf16.mxu1 %v10887_v59 }
  0xf3   :  { %2531 = vmatpush1.bf16.msra.mxu1 %v10903_v1  ;;  %v11241_v1 = vrot.slane %v11227_v32, %v164_v22 }
  0xf4   :  { %2532 = vmatprep.subr.bf16.mxu1 %v10907_v4  ;;  %v184_v4 = vsub.s32 5, %v11218_v3 }
  0xf6   :  { %v11259_v62 = vrot.slane %v11227_v32, %v184_v4  ;;  %v1723_v4 = vld [vmem:[%s14830_s3 + $0x40] sm:$0xff] }
  0xf7   :  { %2533 = vmatpush1.bf16.msra.mxu1 %v10923_v10  ;;  %v11246_v10 = vrot.slane %v11227_v32, %v168_v41  ;;  %v1715_v41 = vld [vmem:[%s14830_s3] sm:$0xff] }
  0xf8   :  { %2534 = vmatprep.subr.bf16.mxu1 %v10927_v12 }
  0xf9   :  { %v11229_v39 = vpop.f32.mrb[0].mxu1 }
  0xfa   :  { %v11232_v48 = vpop.f32.mrb[1].mxu1  ;;  %v11234_v51 = vpop.f32.mrb[0].mxu0 }
  0xfb   :  { %v11237_v59 = vpop.f32.mrb[1].mxu0  ;;  %2535 = vmatpush1.bf16.msra.mxu1 %v10943_v18  ;;  %v11255_v18 = vrot.slane %v11227_v32, %v180_v56  ;;  %v1719_v56 = vld [vmem:[%s14830_s3 + $0x20] sm:$0xff] }
  0xfc   :  { %2536 = vmatprep.subr.bf16.mxu1 %v10947_v20 }
  0xfd   :  { %v274_v12 = vpop.f32.mrb[2].mxu1 }
  0xfe   :  { %v11249_v43 = vadd.f32 %v274_v12, %v11241_v1  ;;  %v276_v45 = vpop.f32.mrb[3].mxu1 }
  0xff   :  { %v11252_v49 = vadd.f32 %v276_v45, %v11246_v10  ;;  %2537 = vmatpush1.bf16.msra.mxu1 %v10963_v26  ;;  %v11336_v45 = vcombine.low %v1715_v41, %v1719_v56 }
 0x100   :  { %15003 = vst [vmem:[#allocation4_spill] sm:$0xff] %v11249_v43  ;;  %v500_v20 = vpop.f32.mrb[2].mxu0  ;;  %2538 = vmatprep.subr.bf16.mxu1 %v10967_v29 }
 0x101   :  { %15004 = vst [vmem:[#allocation5_spill] sm:$0xff] %v11252_v49  ;;  %v280_v53 = vpop.f32.mrb[4].mxu1  ;;  %v11263_v55 = vadd.f32 %v500_v20, %v11255_v18  ;;  %v502_v58 = vpop.f32.mrb[3].mxu0  ;;  %v11338_v20 = vcombine.high %v1715_v41, %v1719_v56  ;;  %v176_v41 = vsub.s32 3, %v11218_v3 }
 0x102   :  { %v11266_v57 = vadd.f32 %v280_v53, %v11241_v1  ;;  %v282_v63 = vpop.f32.mrb[5].mxu1  ;;  %v11269_v0 = vadd.f32 %v502_v58, %v11259_v62  ;;  %v1727_v53 = vld [vmem:[%s14830_s3 + $0x60] sm:$0xff] }
 0x103   :  { %15005 = vst [vmem:[#allocation6_spill] sm:$0xff] %v11263_v55  ;;  %v11272_v26 = vadd.f32 %v282_v63, %v11246_v10  ;;  %2539 = vmatpush1.bf16.msra.mxu1 %v10983_v35  ;;  %v11343_v63 = vcombine.high %v1723_v4, %v1727_v53  ;;  %2483 = vmatprep.subr.bf16.mxu0 %v11338_v20 }
 0x104   :  { %15006 = vst [vmem:[#allocation7_spill] sm:$0xff] %v11266_v57  ;;  %15007 = vst [vmem:[#allocation8_spill] sm:$0xff] %v11269_v0  ;;  %v506_v6 = vpop.f32.mrb[4].mxu0  ;;  %2540 = vmatprep.subr.bf16.mxu1 %v10987_v37  ;;  %2484 = vmatpush1.bf16.msra.mxu0 %v11336_v45 }
 0x105   :  { %15008 = vst [vmem:[#allocation9_spill] sm:$0xff] %v11272_v26  ;;  %v286_v29 = vpop.f32.mrb[6].mxu1  ;;  %v11277_v7 = vadd.f32 %v506_v6, %v11255_v18  ;;  %v508_v5 = vpop.f32.mrb[5].mxu0  ;;  %v1731_v6 = vld [vmem:[%s14830_s3 + $0x80] sm:$0xff]  ;;  %2485 = vmatprep.subr.bf16.mxu0 %v11343_v63 }
 0x106   :  { %v11280_v8 = vadd.f32 %v286_v29, %v11241_v1  ;;  %v288_v9 = vpop.f32.mrb[7].mxu1  ;;  %v11283_v11 = vadd.f32 %v508_v5, %v11259_v62  ;;  %v1735_v29 = vld [vmem:[%s14830_s3 + $0xa0] sm:$0xff] }
 0x107   :  { %15009 = vst [vmem:[#allocation10_spill] sm:$0xff] %v11277_v7  ;;  %v11286_v13 = vadd.f32 %v288_v9, %v11246_v10  ;;  %2541 = vmatpush1.bf16.msra.mxu1 %v11003_v44 }
 0x108   :  { %15010 = vst [vmem:[#allocation11_spill] sm:$0xff] %v11280_v8  ;;  %15011 = vst [vmem:[#allocation12_spill] sm:$0xff] %v11283_v11  ;;  %v512_v35 = vpop.f32.mrb[6].mxu0  ;;  %2542 = vmatprep.subr.bf16.mxu1 %v11007_v47 }
 0x109   :  { %15012 = vst [vmem:[#allocation13_spill] sm:$0xff] %v11286_v13  ;;  %v292_v37 = vpop.f32.mrb[8].mxu1  ;;  %v11291_v14 = vadd.f32 %v512_v35, %v11255_v18  ;;  %v514_v16 = vpop.f32.mrb[7].mxu0 }
 0x10a   :  { %v11294_v15 = vadd.f32 %v292_v37, %v11241_v1  ;;  %v294_v17 = vpop.f32.mrb[9].mxu1  ;;  %v11297_v19 = vadd.f32 %v514_v16, %v11259_v62 }
 0x10b   :  { %15013 = vst [vmem:[#allocation14_spill] sm:$0xff] %v11291_v14  ;;  %v11300_v21 = vadd.f32 %v294_v17, %v11246_v10  ;;  %2543 = vmatpush1.bf16.msra.mxu1 %v11022_v54  ;;  %v1787_v14 = vld [vmem:[%s14830_s3 + $0x240] sm:$0xff] }
 0x10c   :  { %15014 = vst [vmem:[#allocation15_spill] sm:$0xff] %v11294_v15  ;;  %15015 = vst [vmem:[#allocation16_spill] sm:$0xff] %v11297_v19  ;;  %v518_v44 = vpop.f32.mrb[8].mxu0  ;;  %v1779_v15 = vld [vmem:[%s14830_s3 + $0x200] sm:$0xff] }
 0x10d   :  { %15016 = vst [vmem:[#allocation17_spill] sm:$0xff] %v11300_v21  ;;  %v298_v23 = vpop.f32.mrb[10].mxu1  ;;  %v11304_v47 = vadd.f32 %v518_v44, %v11255_v18  ;;  %v520_v27 = vpop.f32.mrb[9].mxu0  ;;  %v11362_v44 = vcombine.low %v1723_v4, %v1727_v53 }
 0x10e   :  { %v11307_v24 = vadd.f32 %v298_v23, %v11241_v1  ;;  %v300_v25 = vpop.f32.mrb[11].mxu1  ;;  %v11310_v30 = vadd.f32 %v520_v27, %v11259_v62  ;;  %v11368_v27 = vcombine.high %v1731_v6, %v1735_v29 }
 0x10f   :  { %15017 = vst [vmem:[#allocation18_spill] sm:$0xff] %v11304_v47  ;;  %v11313_v31 = vadd.f32 %v300_v25, %v11246_v10  ;;  %v172_v25 = vsub.s32 2, %v11218_v3  ;;  %2486 = vmatpush1.bf16.msra.mxu0 %v11362_v44 }
 0x110   :  { %15018 = vst [vmem:[#allocation19_spill] sm:$0xff] %v11307_v24  ;;  %15019 = vst [vmem:[#allocation20_spill] sm:$0xff] %v11310_v30  ;;  %v524_v38 = vpop.f32.mrb[10].mxu0  ;;  %2487 = vmatprep.subr.bf16.mxu0 %v11368_v27  ;;  %v1771_v24 = vld [vmem:[%s14830_s3 + $0x1c0] sm:$0xff] }
 0x111   :  { %15020 = vst [vmem:[#allocation21_spill] sm:$0xff] %v11313_v31  ;;  %v304_v33 = vpop.f32.mrb[12].mxu1  ;;  %v11316_v54 = vadd.f32 %v524_v38, %v11255_v18  ;;  %v526_v34 = vpop.f32.mrb[11].mxu0 }
 0x112   :  { %v11319_v40 = vadd.f32 %v304_v33, %v11241_v1  ;;  %v306_v50 = vpop.f32.mrb[13].mxu1  ;;  %v11322_v22 = vadd.f32 %v526_v34, %v11259_v62  ;;  %v1739_v33 = vld [vmem:[%s14830_s3 + $0xc0] sm:$0xff] }
 0x113   :  { %15021 = vst [vmem:[#allocation22_spill] sm:$0xff] %v11316_v54  ;;  %v11334_v12 = vadd.f32 %v306_v50, %v11246_v10  ;;  %v1743_v34 = vld [vmem:[%s14830_s3 + $0xe0] sm:$0xff] }
 0x114   :  { %15022 = vst [vmem:[#allocation23_spill] sm:$0xff] %v11319_v40  ;;  %15023 = vst [vmem:[#allocation24_spill] sm:$0xff] %v11322_v22  ;;  %v530_v58 = vpop.f32.mrb[12].mxu0  ;;  %v1763_v40 = vld [vmem:[%s14830_s3 + $0x180] sm:$0xff] }
 0x115   :  { %15024 = vst [vmem:[#allocation25_spill] sm:$0xff] %v11334_v12  ;;  %v310_v5 = vpop.f32.mrb[14].mxu1  ;;  %v11352_v9 = vadd.f32 %v530_v58, %v11255_v18  ;;  %v532_v35 = vpop.f32.mrb[13].mxu0 }
 0x116   :  { %v11356_v37 = vadd.f32 %v310_v5, %v11241_v1  ;;  %v312_v16 = vpop.f32.mrb[15].mxu1  ;;  %v11359_v17 = vadd.f32 %v532_v35, %v11259_v62  ;;  %v11389_v5 = vcombine.low %v1731_v6, %v1735_v29  ;;  %v11392_v35 = vcombine.high %v1739_v33, %v1743_v34 }
 0x117   :  { %15025 = vst [vmem:[#allocation26_spill] sm:$0xff] %v11352_v9  ;;  %v11365_v23 = vadd.f32 %v312_v16, %v11246_v10  ;;  %v11395_v16 = vrot.slane %v11227_v32, %v172_v25  ;;  %v11410_v25 = vcombine.low %v1739_v33, %v1743_v34 }
 0x118   :  { %15026 = vst [vmem:[#allocation27_spill] sm:$0xff] %v11356_v37  ;;  %15027 = vst [vmem:[#allocation28_spill] sm:$0xff] %v11359_v17  ;;  %v536_v38 = vpop.f32.mrb[14].mxu0  ;;  %2488 = vmatpush1.bf16.msra.mxu0 %v11389_v5 }
 0x119   :  { %15028 = vst [vmem:[#allocation29_spill] sm:$0xff] %v11365_v23  ;;  %v11377_v50 = vpop.f32.mrb[16].mxu1  ;;  %v11381_v56 = vadd.f32 %v536_v38, %v11255_v18  ;;  %v538_v4 = vpop.f32.mrb[15].mxu0  ;;  %v1747_v38 = vld [vmem:[%s14830_s3 + $0x100] sm:$0xff]  ;;  %2489 = vmatprep.subr.bf16.mxu0 %v11392_v35 }
 0x11a   :  { %v11383_v53 = vpop.f32.mrb[17].mxu1  ;;  %v11386_v58 = vadd.f32 %v538_v4, %v11259_v62  ;;  %v1751_v4 = vld [vmem:[%s14830_s3 + $0x120] sm:$0xff] }
 0x11b   :  { %15029 = vst [vmem:[#allocation30_spill] sm:$0xff] %v11381_v56  ;;  %v11416_v37 = vcombine.high %v1747_v38, %v1751_v4  ;;  %v11428_v34 = vcombine.low %v1747_v38, %v1751_v4 }
 0x11c   :  { %15030 = vst [vmem:[#allocation31_spill] sm:$0xff] %v11386_v58  ;;  %v11404_v58 = vrot.slane %v11227_v32, %v176_v41  ;;  %v1755_v41 = vld [vmem:[%s14830_s3 + $0x140] sm:$0xff]  ;;  %2490 = vmatpush1.bf16.msra.mxu0 %v11410_v25 }
 0x11d   :  { %v387_v6 = vpop.f32.mrb[18].mxu1  ;;  %2491 = vmatprep.subr.bf16.mxu0 %v11416_v37 }
 0x11e   :  { %v11407_v29 = vadd.f32 %v387_v6, %v11395_v16  ;;  %v389_v56 = vpop.f32.mrb[19].mxu1  ;;  %v1759_v6 = vld [vmem:[%s14830_s3 + $0x160] sm:$0xff] }
 0x11f   :  { %v11413_v23 = vadd.f32 %v389_v56, %v11404_v58  ;;  %v11434_v12 = vcombine.high %v1755_v41, %v1759_v6  ;;  %v11446_v4 = vcombine.low %v1755_v41, %v1759_v6 }
 0x120   :  { %15031 = vst [vmem:[#allocation32_spill] sm:$0xff] %v11407_v29  ;;  %2492 = vmatpush1.bf16.msra.mxu0 %v11428_v34 }
 0x121   :  { %15032 = vst [vmem:[#allocation33_spill] sm:$0xff] %v11413_v23  ;;  %v393_v17 = vpop.f32.mrb[20].mxu1  ;;  %2493 = vmatprep.subr.bf16.mxu0 %v11434_v12 }
 0x122   :  { %v11425_v9 = vadd.f32 %v393_v17, %v11395_v16  ;;  %v395_v33 = vpop.f32.mrb[21].mxu1  ;;  %v1767_v17 = vld [vmem:[%s14830_s3 + $0x1a0] sm:$0xff] }
 0x123   :  { %v11431_v56 = vadd.f32 %v395_v33, %v11404_v58  ;;  %v11452_v31 = vcombine.high %v1763_v40, %v1767_v17  ;;  %v11464_v6 = vcombine.low %v1763_v40, %v1767_v17 }
 0x124   :  { %15033 = vst [vmem:[#allocation34_spill] sm:$0xff] %v11425_v9  ;;  %2494 = vmatpush1.bf16.msra.mxu0 %v11446_v4 }
 0x125   :  { %15034 = vst [vmem:[#allocation35_spill] sm:$0xff] %v11431_v56  ;;  %v399_v22 = vpop.f32.mrb[22].mxu1  ;;  %2495 = vmatprep.subr.bf16.mxu0 %v11452_v31 }
 0x126   :  { %v11443_v54 = vadd.f32 %v399_v22, %v11395_v16  ;;  %v401_v38 = vpop.f32.mrb[23].mxu1  ;;  %v1775_v22 = vld [vmem:[%s14830_s3 + $0x1e0] sm:$0xff] }
 0x127   :  { %v11449_v33 = vadd.f32 %v401_v38, %v11404_v58  ;;  %v11470_v21 = vcombine.high %v1771_v24, %v1775_v22  ;;  %v11482_v17 = vcombine.low %v1771_v24, %v1775_v22 }
 0x128   :  { %15035 = vst [vmem:[#allocation36_spill] sm:$0xff] %v11443_v54  ;;  %2496 = vmatpush1.bf16.msra.mxu0 %v11464_v6 }
 0x129   :  { %15036 = vst [vmem:[#allocation37_spill] sm:$0xff] %v11449_v33  ;;  %v405_v30 = vpop.f32.mrb[24].mxu1  ;;  %2497 = vmatprep.subr.bf16.mxu0 %v11470_v21 }
 0x12a   :  { %v11461_v47 = vadd.f32 %v405_v30, %v11395_v16  ;;  %v407_v41 = vpop.f32.mrb[25].mxu1  ;;  %v1783_v30 = vld [vmem:[%s14830_s3 + $0x220] sm:$0xff] }
 0x12b   :  { %v11467_v38 = vadd.f32 %v407_v41, %v11404_v58  ;;  %v11500_v22 = vcombine.low %v1779_v15, %v1783_v30 }
 0x12c   :  { %15037 = vst [vmem:[#allocation38_spill] sm:$0xff] %v11461_v47  ;;  %2498 = vmatpush1.bf16.msra.mxu0 %v11482_v17 }
 0x12d   :  { %15038 = vst [vmem:[#allocation39_spill] sm:$0xff] %v11467_v38  ;;  %v411_v47 = vpop.f32.mrb[26].mxu1  ;;  %v11488_v38 = vcombine.high %v1779_v15, %v1783_v30  ;;  %v188_v15 = vsub.s32 6, %v11218_v3  ;;  %v269_v30 = vadd.f32 %v11229_v39, %v11241_v1  ;;  %v1799_v39 = vld [vmem:[%s14830_s3 + $0x2a0] sm:$0xff] }
 0x12e   :  { %v11479_v19 = vadd.f32 %v411_v47, %v11395_v16  ;;  %v413_v40 = vpop.f32.mrb[27].mxu1  ;;  %v1791_v47 = vld [vmem:[%s14830_s3 + $0x260] sm:$0xff] }
 0x12f   :  { %v11485_v41 = vadd.f32 %v413_v40, %v11404_v58  ;;  %2499 = vmatprep.subr.bf16.mxu0 %v11488_v38  ;;  %v11539_v1 = vrot.slane %v11227_v32, %v188_v15 }
 0x130   :  { %15039 = vst [vmem:[#allocation40_spill] sm:$0xff] %v11479_v19  ;;  %2500 = vmatpush1.bf16.msra.mxu0 %v11500_v22 }
 0x131   :  { %15040 = vst [vmem:[#allocation41_spill] sm:$0xff] %v11485_v41  ;;  %v417_v19 = vpop.f32.mrb[28].mxu1  ;;  %v11506_v41 = vcombine.high %v1787_v14, %v1791_v47 }
 0x132   :  { %v11497_v33 = vadd.f32 %v417_v19, %v11395_v16  ;;  %v419_v24 = vpop.f32.mrb[29].mxu1  ;;  %v11512_v19 = vcombine.low %v1787_v14, %v1791_v47 }
 0x133   :  { %v11503_v40 = vadd.f32 %v419_v24, %v11404_v58  ;;  %2501 = vmatprep.subr.bf16.mxu0 %v11506_v41 }
 0x134   :  { %15041 = vst [vmem:[#allocation42_spill] sm:$0xff] %v11497_v33  ;;  %2502 = vmatpush1.bf16.msra.mxu0 %v11512_v19 }
 0x135   :  { %15042 = vst [vmem:[#allocation43_spill] sm:$0xff] %v11503_v40  ;;  %v423_v13 = vpop.f32.mrb[30].mxu1 }
 0x136   :  { %v11509_v54 = vadd.f32 %v423_v13, %v11395_v16  ;;  %v425_v8 = vpop.f32.mrb[31].mxu1  ;;  %v192_v13 = vsub.s32 7, %v11218_v3  ;;  %v1796_v3 = vld [vmem:[%s14830_s3 + $0x288] sm:$0xff] }
 0x137   :  { %v11515_v33 = vadd.f32 %v425_v8, %v11404_v58  ;;  %v1795_v8 = vld [vmem:[%s14830_s3 + $0x280] sm:$0xff] }
 0x138   :  { %15043 = vst [vmem:[#allocation44_spill] sm:$0xff] %v11509_v54  ;;  %v271_v54 = vadd.f32 %v11232_v48, %v11246_v10  ;;  %v11543_v47 = vcombine.high %v1795_v8, %v1799_v39  ;;  %v11550_v56 = vcombine.low %v1795_v8, %v1799_v39  ;;  %v11557_v15 = vrot.slane %v11227_v32, %v192_v13  ;;  %v1807_v32 = vld [vmem:[%s14830_s3 + $0x2e0] sm:$0xff]  ;;  %v1808_v8 = vld [vmem:[%s14830_s3 + $0x2e8] sm:$0xff] }
 0x139   :  { %15044 = vst [vmem:[#allocation45_spill] sm:$0xff] %v11515_v33  ;;  %v11521_v24 = vpop.f32.mrb[32].mxu1  ;;  %v1800_v33 = vld [vmem:[%s14830_s3 + $0x2a8] sm:$0xff] }
 0x13a   :  { %v1528_v40 = vpop.f32.mrb[16].mxu0  ;;  %v11526_v14 = vpop.f32.mrb[33].mxu1  ;;  %v11552_v26 = vcombine.low %v1796_v3, %v1800_v33  ;;  %v11554_v9 = vcombine.high %v1796_v3, %v1800_v33  ;;  %2503 = vmatprep.subr.bf16.mxu0 %v11543_v47 }
 0x13b   :  { %v11541_v48 = vadd.f32 %v1528_v40, %v269_v30  ;;  %v1530_v10 = vpop.f32.mrb[17].mxu0  ;;  %2504 = vmatpush1.bf16.msra.mxu0 %v11550_v56 }
 0x13c   :  { %v11548_v11 = vadd.f32 %v1530_v10, %v271_v54  ;;  %v1532_v7 = vpop.f32.mrb[18].mxu0  ;;  %2544 = vmatprep.subr.bf16.mxu1 %v11554_v9  ;;  %v1804_v54 = vld [vmem:[%s14830_s3 + $0x2c8] sm:$0xff] }
 0x13d   :  { %v613_v40 = vpop.f32.mrb[34].mxu1  ;;  %v1533_v30 = vpop.f32.mrb[19].mxu0  ;;  %v1803_v7 = vld [vmem:[%s14830_s3 + $0x2c0] sm:$0xff]  ;;  %2545 = vmatpush1.bf16.msra.mxu1 %v11552_v26  ;;  %v11585_v3 = vcombine.low %v1804_v54, %v1808_v8  ;;  %v11587_v10 = vcombine.high %v1804_v54, %v1808_v8  ;;  %v1812_v54 = vld [vmem:[%s14830_s3 + $0x308] sm:$0xff] }
 0x13e   :  { %v11561_v57 = vadd.f32 %v613_v40, %v11539_v1  ;;  %v615_v0 = vpop.f32.mrb[35].mxu1  ;;  %v11578_v13 = vcombine.high %v1803_v7, %v1807_v32  ;;  %v11583_v39 = vcombine.low %v1803_v7, %v1807_v32  ;;  %v1811_v7 = vld [vmem:[%s14830_s3 + $0x300] sm:$0xff] }
 0x13f   :  { %v11575_v33 = vadd.f32 %v615_v0, %v11557_v15  ;;  %15047 = vst [vmem:[#allocation48_spill] sm:$0xff] %v11585_v3  ;;  %2546 = vmatprep.subr.bf16.mxu1 %v11587_v10  ;;  %v1815_v32 = vld [vmem:[%s14830_s3 + $0x320] sm:$0xff] }
 0x140   :  { %15045 = vst [vmem:[#allocation46_spill] sm:$0xff] %v11561_v57  ;;  %2505 = vmatprep.subr.bf16.mxu0 %v11578_v13 }
 0x141   :  { %15046 = vst [vmem:[#allocation47_spill] sm:$0xff] %v11575_v33  ;;  %v619_v40 = vpop.f32.mrb[36].mxu1  ;;  %2506 = vmatpush1.bf16.msra.mxu0 %v11583_v39  ;;  %2547 = vmatpush1.bf16.msra.mxu1 %v11585_v3  ;;  %v11613_v33 = vcombine.low %v1811_v7, %v1815_v32 }
 0x142   :  { %v11591_v0 = vadd.f32 %v619_v40, %v11539_v1  ;;  %v621_v30 = vpop.f32.mrb[37].mxu1  ;;  %v11608_v40 = vcombine.high %v1811_v7, %v1815_v32  ;;  %v1819_v7 = vld [vmem:[%s14830_s3 + $0x340] sm:$0xff] }
 0x143   :  { %v11605_v8 = vadd.f32 %v621_v30, %v11557_v15 }
 0x144   :  { %15048 = vst [vmem:[#allocation49_spill] sm:$0xff] %v11591_v0  ;;  %v1816_v0 = vld [vmem:[%s14830_s3 + $0x328] sm:$0xff]  ;;  %2507 = vmatprep.subr.bf16.mxu0 %v11608_v40 }
 0x145   :  { %15049 = vst [vmem:[#allocation50_spill] sm:$0xff] %v11605_v8  ;;  %v11615_v57 = vcombine.low %v1812_v54, %v1816_v0  ;;  %v11617_v55 = vcombine.high %v1812_v54, %v1816_v0  ;;  %v625_v23 = vpop.f32.mrb[38].mxu1  ;;  %2508 = vmatpush1.bf16.msra.mxu0 %v11613_v33  ;;  %v1823_v0 = vld [vmem:[%s14830_s3 + $0x360] sm:$0xff] }
 0x146   :  { %v11621_v30 = vadd.f32 %v625_v23, %v11539_v1  ;;  %v627_v8 = vpop.f32.mrb[39].mxu1  ;;  %v11635_v23 = vcombine.high %v1819_v7, %v1823_v0  ;;  %v11637_v54 = vcombine.low %v1819_v7, %v1823_v0  ;;  %v1831_v7 = vld [vmem:[%s14830_s3 + $0x3a0] sm:$0xff] }
 0x147   :  { %15050 = vst [vmem:[#allocation51_spill] sm:$0xff] %v11615_v57  ;;  %15051 = vst [vmem:[#allocation52_spill] sm:$0xff] %v11617_v55  ;;  %2548 = vmatprep.subr.bf16.mxu1 %v11617_v55  ;;  %v11632_v32 = vadd.f32 %v627_v8, %v11557_v15  ;;  %v1827_v8 = vld [vmem:[%s14830_s3 + $0x380] sm:$0xff] }
 0x148   :  { %15052 = vst [vmem:[#allocation53_spill] sm:$0xff] %v11621_v30  ;;  %2549 = vmatpush1.bf16.msra.mxu1 %v11615_v57  ;;  %2509 = vmatprep.subr.bf16.mxu0 %v11635_v23 }
 0x149   :  { %15053 = vst [vmem:[#allocation54_spill] sm:$0xff] %v11632_v32  ;;  %2550 = vmatprep.subr.bf16.mxu1 %v11062_v28  ;;  %v631_v30 = vpop.f32.mrb[40].mxu1  ;;  %2510 = vmatpush1.bf16.msra.mxu0 %v11637_v54  ;;  %v11655_v28 = vcombine.high %v1827_v8, %v1831_v7 }
 0x14a   :  { %v11642_v49 = vadd.f32 %v631_v30, %v11539_v1  ;;  %v633_v29 = vpop.f32.mrb[41].mxu1  ;;  %v11657_v30 = vcombine.low %v1827_v8, %v1831_v7 }
 0x14b   :  { %v11652_v0 = vadd.f32 %v633_v29, %v11557_v15  ;;  %2511 = vmatprep.subr.bf16.mxu0 %v11655_v28  ;;  %v1835_v29 = vld [vmem:[%s14830_s3 + $0x3c0] sm:$0xff] }
 0x14c   :  { %15054 = vst [vmem:[#allocation55_spill] sm:$0xff] %v11642_v49  ;;  %2551 = vmatpush1.bf16.msra.mxu1 %v11076_v36  ;;  %v1839_v36 = vld [vmem:[%s14830_s3 + $0x3e0] sm:$0xff] }
 0x14d   :  { %15055 = vst [vmem:[#allocation56_spill] sm:$0xff] %v11652_v0  ;;  %2552 = vmatprep.subr.bf16.mxu1 %v11079_v42  ;;  %v637_v49 = vpop.f32.mrb[42].mxu1  ;;  %2512 = vmatpush1.bf16.msra.mxu0 %v11657_v30  ;;  %v11675_v42 = vcombine.low %v1835_v29, %v1839_v36 }
 0x14e   :  { %v11662_v32 = vadd.f32 %v637_v49, %v11539_v1  ;;  %v639_v43 = vpop.f32.mrb[43].mxu1  ;;  %v11677_v49 = vcombine.high %v1835_v29, %v1839_v36 }
 0x14f   :  { %v11672_v8 = vadd.f32 %v639_v43, %v11557_v15  ;;  %v1717_v43 = vld [vmem:[%s14830_s3 + $0x10] sm:$0xff] }
 0x150   :  { %15056 = vst [vmem:[#allocation57_spill] sm:$0xff] %v11662_v32  ;;  %2553 = vmatpush1.bf16.msra.mxu1 %v11094_v46  ;;  %2513 = vmatprep.subr.bf16.mxu0 %v11677_v49  ;;  %v1721_v46 = vld [vmem:[%s14830_s3 + $0x30] sm:$0xff] }
 0x151   :  { %15057 = vst [vmem:[#allocation58_spill] sm:$0xff] %v11672_v8  ;;  %2554 = vmatprep.subr.bf16.mxu1 %v11097_v52  ;;  %v643_v7 = vpop.f32.mrb[44].mxu1  ;;  %2514 = vmatpush1.bf16.msra.mxu0 %v11675_v42  ;;  %v11695_v52 = vcombine.low %v1717_v43, %v1721_v46  ;;  %v11697_v36 = vcombine.high %v1717_v43, %v1721_v46 }
 0x152   :  { %v11682_v32 = vadd.f32 %v643_v7, %v11539_v1  ;;  %v645_v0 = vpop.f32.mrb[45].mxu1  ;;  %v382_v43 = vadd.f32 %v11377_v50, %v11395_v16  ;;  %v495_v46 = vadd.f32 %v11234_v51, %v11255_v18 }
 0x153   :  { %v11692_v29 = vadd.f32 %v645_v0, %v11557_v15  ;;  %2565 = vmatprep.subr.bf16.mxu0 %v11697_v36  ;;  %v1666_v0 = vmul.f32 0.5, %v11541_v48 }
 0x154   :  { %15058 = vst [vmem:[#allocation59_spill] sm:$0xff] %v11682_v32  ;;  %2555 = vmatpush1.bf16.msra.mxu1 %v11106_v60  ;;  %v1667_v60 = vmul.f32 0.5, %v11548_v11 }
 0x155   :  { %15059 = vst [vmem:[#allocation60_spill] sm:$0xff] %v11692_v29  ;;  %2606 = vmatprep.subr.bf16.mxu1 %v11109_v61  ;;  %v649_v7 = vpop.f32.mrb[46].mxu1  ;;  %10049 = vtanh.f32 %v1666_v0  ;;  %v384_v61 = vadd.f32 %v11383_v53, %v11404_v58 }
 0x156   :  { %v11702_v32 = vadd.f32 %v649_v7, %v11539_v1  ;;  %v651_v8 = vpop.f32.mrb[47].mxu1  ;;  %10051 = vtanh.f32 %v1667_v60 }
 0x157   :  { %v11705_v57 = vadd.f32 %v651_v8, %v11557_v15  ;;  %v497_v8 = vadd.f32 %v11237_v59, %v11259_v62 }
 0x158   :  { %15060 = vst [vmem:[#allocation61_spill] sm:$0xff] %v11702_v32 }
 0x159   :  { %15061 = vst [vmem:[#allocation62_spill] sm:$0xff] %v11705_v57 }
 0x15f   :  { %v10050_v51 = vpop.eup %10049 }
 0x160   :  { %v10052_v18 = vpop.eup %10051  ;;  %v1670_v59 = vmul.f32 0.5, %v10050_v51 }
 0x161   :  { %v1671_v62 = vmul.f32 0.5, %v10052_v18 }
 0x179   :  { %v1569_v7 = vpop.f32.mrb[48].mxu1 }
 0x17a   :  { %v1660_v57 = vadd.f32 %v1569_v7, %v382_v43  ;;  %v1610_v32 = vpop.f32.mrb[20].mxu0  ;;  %v1571_v48 = vpop.f32.mrb[49].mxu1  ;;  %v1672_v43 = vadd.f32 0.5, %v1670_v59 }
 0x17b   :  { %v1662_v29 = vadd.f32 %v1610_v32, %v495_v46  ;;  %v1661_v11 = vadd.f32 %v1571_v48, %v384_v61  ;;  %v1612_v0 = vpop.f32.mrb[21].mxu0  ;;  %v1573_v55 = vpop.f32.mrb[50].mxu1 }
 0x17c   :  { %v1674_v3 = vmul.f32 0.5, %v1660_v57  ;;  %v1663_v50 = vadd.f32 %v1612_v0, %v497_v8  ;;  %v1574_v16 = vpop.f32.mrb[51].mxu1  ;;  %v1614_v60 = vpop.f32.mrb[22].mxu0  ;;  %v1673_v55 = vadd.f32 0.5, %v1671_v62 }
 0x17d   :  { %10053 = vtanh.f32 %v1662_v29  ;;  %v1675_v53 = vmul.f32 0.5, %v1661_v11  ;;  %v1615_v58 = vpop.f32.mrb[23].mxu0 }
 0x17e   :  { %10055 = vtanh.f32 %v1674_v3  ;;  %v610_v58 = vadd.f32 %v11526_v14, %v11557_v15 }
 0x17f   :  { %10057 = vtanh.f32 %v1675_v53  ;;  %v608_v53 = vadd.f32 %v11521_v24, %v11539_v1 }
 0x180   :  { %10059 = vtanh.f32 %v1663_v50 }
 0x187   :  { %v10054_v7 = vpop.eup %10053 }
 0x188   :  { %v10056_v32 = vpop.eup %10055  ;;  %v1694_v61 = vmul.f32 %v10054_v7, %v1672_v43 }
 0x189   :  { %v10058_v46 = vpop.eup %10057  ;;  %v1678_v57 = vmul.f32 0.5, %v10056_v32 }
 0x18a   :  { %v10060_v8 = vpop.eup %10059  ;;  %v1679_v48 = vmul.f32 0.5, %v10058_v46 }
 0x18b   :  { %v1680_v0 = vadd.f32 0.5, %v1678_v57  ;;  %v1695_v29 = vmul.f32 %v10060_v8, %v1673_v55 }
 0x18c   :  { %v1681_v11 = vadd.f32 0.5, %v1679_v48 }
 0x18d   :  { %v1692_v16 = vmul.f32 0.0, %v1680_v0 }
 0x18e   :  { %v1693_v3 = vmul.f32 0.0, %v1681_v11  ;;  %v1729_v11 = vld [vmem:[%s14830_s3 + $0x70] sm:$0xff] }
 0x18f   :  { %v11717_v60 = vadd.f32 %v1694_v61, %v1692_v16  ;;  %v1726_v16 = vld [vmem:[%s14830_s3 + $0x58] sm:$0xff] }
 0x190   :  { %v11719_v50 = vadd.f32 %v1695_v29, %v1693_v3  ;;  %v1725_v29 = vld [vmem:[%s14830_s3 + $0x50] sm:$0xff]  ;;  %v1730_v3 = vld [vmem:[%s14830_s3 + $0x78] sm:$0xff] }
 0x1b9   :  { %v1651_v51 = vpop.f32.mrb[52].mxu1 }
 0x1ba   :  { %v1664_v18 = vadd.f32 %v1651_v51, %v608_v53  ;;  %v1653_v59 = vpop.f32.mrb[53].mxu1  ;;  %v1733_v51 = vld [vmem:[%s14830_s3 + $0x90] sm:$0xff] }
 0x1bb   :  { %v1665_v62 = vadd.f32 %v1653_v59, %v610_v58  ;;  %v1655_v43 = vpop.f32.mrb[54].mxu1  ;;  %v11754_v59 = vcombine.high %v1726_v16, %v1730_v3 }
 0x1bc   :  { %v1684_v7 = vmul.f32 0.5, %v1664_v18  ;;  %v1656_v32 = vpop.f32.mrb[55].mxu1  ;;  %v11752_v18 = vcombine.high %v1725_v29, %v1729_v11  ;;  %v1734_v43 = vld [vmem:[%s14830_s3 + $0x98] sm:$0xff] }
 0x1bd   :  { %v1685_v46 = vmul.f32 0.5, %v1665_v62  ;;  %v1737_v62 = vld [vmem:[%s14830_s3 + $0xb0] sm:$0xff]  ;;  %v11769_v32 = vcombine.low %v1725_v29, %v1729_v11 }
 0x1be   :  { %10061 = vtanh.f32 %v1684_v7  ;;  %v1738_v7 = vld [vmem:[%s14830_s3 + $0xb8] sm:$0xff]  ;;  %v1749_v11 = vld [vmem:[%s14830_s3 + $0x110] sm:$0xff] }
 0x1bf   :  { %10063 = vtanh.f32 %v1685_v46  ;;  %v11771_v46 = vcombine.low %v1726_v16, %v1730_v3  ;;  %v1753_v16 = vld [vmem:[%s14830_s3 + $0x130] sm:$0xff]  ;;  %v1750_v3 = vld [vmem:[%s14830_s3 + $0x118] sm:$0xff] }
 0x1c0   :  { %10065 = vtanh.f32 %v11717_v60 }
 0x1c1   :  { %10067 = vtanh.f32 %v11719_v50 }
 0x1c8   :  { %v10062_v61 = vpop.eup %10061 }
 0x1c9   :  { %v10064_v55 = vpop.eup %10063  ;;  %v1688_v24 = vmul.f32 0.5, %v10062_v61  ;;  %v11773_v61 = vcombine.high %v1733_v51, %v1737_v62 }
 0x1ca   :  { %v1689_v1 = vmul.f32 0.5, %v10064_v55  ;;  %v10066_v14 = vpop.eup %10065  ;;  %v11775_v55 = vcombine.high %v1734_v43, %v1738_v7 }
 0x1cb   :  { %v1690_v57 = vadd.f32 0.5, %v1688_v24  ;;  %v10068_v8 = vpop.eup %10067  ;;  %v1741_v24 = vld [vmem:[%s14830_s3 + $0xd0] sm:$0xff] }
 0x1cc   :  { %v1691_v15 = vadd.f32 0.5, %v1689_v1  ;;  %v1742_v1 = vld [vmem:[%s14830_s3 + $0xd8] sm:$0xff] }
 0x1cd   :  { %v11727_v48 = vmul.f32 %v10066_v14, %v1690_v57  ;;  %v1746_v57 = vld [vmem:[%s14830_s3 + $0xf8] sm:$0xff]  ;;  %v11793_v14 = vcombine.low %v1733_v51, %v1737_v62 }
 0x1ce   :  { %v11729_v0 = vmul.f32 %v10068_v8, %v1691_v15  ;;  %v11795_v15 = vcombine.low %v1734_v43, %v1738_v7  ;;  %v11801_v29 = vcombine.high %v1742_v1, %v1746_v57  ;;  %v11819_v62 = vcombine.low %v1742_v1, %v1746_v57 }
 0x1cf   :  { %15062 = vst [vmem:[#allocation63_spill] sm:$0xff] %v11727_v48  ;;  %v11747_v58 = vpack.c.bf16 %v11727_v48, %v11727_v48  ;;  %v11823_v43 = vcombine.high %v1749_v11, %v1753_v16  ;;  %v1757_v48 = vld [vmem:[%s14830_s3 + $0x150] sm:$0xff]  ;;  %v11841_v1 = vcombine.low %v1749_v11, %v1753_v16  ;;  %v1766_v11 = vld [vmem:[%s14830_s3 + $0x198] sm:$0xff] }
 0x1d0   :  { %15063 = vst [vmem:[#allocation64_spill] sm:$0xff] %v11729_v0  ;;  %v1714_v53 = vpack.c.bf16 %v11729_v0, %v11729_v0  ;;  %15064 = vst [vmem:[#allocation65_spill] sm:$0xff] %v11795_v15  ;;  %v1761_v0 = vld [vmem:[%s14830_s3 + $0x170] sm:$0xff]  ;;  %v1770_v16 = vld [vmem:[%s14830_s3 + $0x1b8] sm:$0xff] }
 0x1d1   :  { %15066 = vst [vmem:[#allocation67_spill] sm:$0xff] %v11801_v29  ;;  %15068 = vst [vmem:[#allocation69_spill] sm:$0xff] %v11819_v62 }
 0x1d2   :  { %2515 = vmatprep.mubr.bf16.mxu0 %v1714_v53  ;;  %2556 = vmatprep.mubr.bf16.mxu1 %v1714_v53  ;;  %15069 = vst [vmem:[#allocation70_spill] sm:$0xff] %v11823_v43  ;;  %15071 = vst [vmem:[#allocation72_spill] sm:$0xff] %v11841_v1 }
 0x1d3   :  { %2516 = vmatmul.mubr.bf16.vlgmr.msra.gmra.mrb[24].mxu0 %v11747_v58  ;;  %2557 = vmatmul.mubr.bf16.vlgmr.msra.gmra.mrb[56].mxu1 %v11747_v58 }
 0x1d4   :  { %2566 = vmatpush1.bf16.msra.mxu0 %v11695_v52  ;;  %2607 = vmatpush1.bf16.msra.mxu1 %v11118_v2  ;;  %v1745_v2 = vld [vmem:[%s14830_s3 + $0xf0] sm:$0xff] }
 0x1d5   :  { %2597 = vmatprep.mubr.bf16.mxu0 %v1714_v53  ;;  %2638 = vmatprep.mubr.bf16.mxu1 %v1714_v53  ;;  %v11799_v8 = vcombine.high %v1741_v24, %v1745_v2  ;;  %v1754_v53 = vld [vmem:[%s14830_s3 + $0x138] sm:$0xff]  ;;  %v11817_v51 = vcombine.low %v1741_v24, %v1745_v2 }
 0x1d6   :  { %2567 = vmatprep.subr.bf16.mxu0 %v11752_v18  ;;  %2608 = vmatprep.subr.bf16.mxu1 %v11754_v59  ;;  %v11825_v7 = vcombine.high %v1750_v3, %v1754_v53  ;;  %v1758_v24 = vld [vmem:[%s14830_s3 + $0x158] sm:$0xff]  ;;  %v11843_v57 = vcombine.low %v1750_v3, %v1754_v53  ;;  %v11865_v3 = vcombine.low %v1757_v48, %v1761_v0 }
 0x1d7   :  { %15065 = vst [vmem:[#allocation66_spill] sm:$0xff] %v11799_v8  ;;  %15067 = vst [vmem:[#allocation68_spill] sm:$0xff] %v11817_v51  ;;  %v1762_v2 = vld [vmem:[%s14830_s3 + $0x178] sm:$0xff] }
 0x1d8   :  { %2568 = vmatpush1.bf16.msra.mxu0 %v11769_v32  ;;  %2609 = vmatpush1.bf16.msra.mxu1 %v11771_v46  ;;  %15070 = vst [vmem:[#allocation71_spill] sm:$0xff] %v11825_v7  ;;  %15072 = vst [vmem:[#allocation73_spill] sm:$0xff] %v11843_v57  ;;  %v11867_v53 = vcombine.low %v1758_v24, %v1762_v2 }
 0x1d9   :  { %2569 = vmatprep.subr.bf16.mxu0 %v11773_v61  ;;  %2610 = vmatprep.subr.bf16.mxu1 %v11775_v55  ;;  %15075 = vst [vmem:[#allocation76_spill] sm:$0xff] %v11865_v3 }
 0x1da   :  { %15076 = vst [vmem:[#allocation77_spill] sm:$0xff] %v11867_v53 }
 0x1dc   :  { %2570 = vmatpush1.bf16.msra.mxu0 %v11793_v14  ;;  %2611 = vmatpush1.bf16.msra.mxu1 %v11795_v15  ;;  %v1765_v15 = vld [vmem:[%s14830_s3 + $0x190] sm:$0xff] }
 0x1dd   :  { %2571 = vmatprep.subr.bf16.mxu0 %v11799_v8  ;;  %2612 = vmatprep.subr.bf16.mxu1 %v11801_v29  ;;  %v11847_v29 = vcombine.high %v1757_v48, %v1761_v0  ;;  %v11849_v8 = vcombine.high %v1758_v24, %v1762_v2  ;;  %v1774_v48 = vld [vmem:[%s14830_s3 + $0x1d8] sm:$0xff]  ;;  %v11891_v2 = vcombine.low %v1766_v11, %v1770_v16 }
 0x1de   :  { %v1778_v0 = vld [vmem:[%s14830_s3 + $0x1f8] sm:$0xff] }
 0x1df   :  { %15073 = vst [vmem:[#allocation74_spill] sm:$0xff] %v11847_v29  ;;  %15074 = vst [vmem:[#allocation75_spill] sm:$0xff] %v11849_v8 }
 0x1e0   :  { %2572 = vmatpush1.bf16.msra.mxu0 %v11817_v51  ;;  %2613 = vmatpush1.bf16.msra.mxu1 %v11819_v62  ;;  %v1769_v62 = vld [vmem:[%s14830_s3 + $0x1b0] sm:$0xff]  ;;  %15080 = vst [vmem:[#allocation81_spill] sm:$0xff] %v11891_v2 }
 0x1e1   :  { %2573 = vmatprep.subr.bf16.mxu0 %v11823_v43  ;;  %2614 = vmatprep.subr.bf16.mxu1 %v11825_v7  ;;  %v11871_v7 = vcombine.high %v1765_v15, %v1769_v62  ;;  %v11873_v43 = vcombine.high %v1766_v11, %v1770_v16  ;;  %v1773_v51 = vld [vmem:[%s14830_s3 + $0x1d0] sm:$0xff]  ;;  %v11889_v24 = vcombine.low %v1765_v15, %v1769_v62  ;;  %v1782_v15 = vld [vmem:[%s14830_s3 + $0x218] sm:$0xff] }
 0x1e2   :  { %v1786_v62 = vld [vmem:[%s14830_s3 + $0x238] sm:$0xff]  ;;  %v11915_v16 = vcombine.low %v1774_v48, %v1778_v0 }
 0x1e3   :  { %15077 = vst [vmem:[#allocation78_spill] sm:$0xff] %v11871_v7  ;;  %15078 = vst [vmem:[#allocation79_spill] sm:$0xff] %v11873_v43 }
 0x1e4   :  { %2574 = vmatpush1.bf16.msra.mxu0 %v11841_v1  ;;  %2615 = vmatpush1.bf16.msra.mxu1 %v11843_v57  ;;  %v1777_v57 = vld [vmem:[%s14830_s3 + $0x1f0] sm:$0xff]  ;;  %15079 = vst [vmem:[#allocation80_spill] sm:$0xff] %v11889_v24  ;;  %15084 = vst [vmem:[#allocation85_spill] sm:$0xff] %v11915_v16 }
 0x1e5   :  { %2575 = vmatprep.subr.bf16.mxu0 %v11847_v29  ;;  %2616 = vmatprep.subr.bf16.mxu1 %v11849_v8  ;;  %v11895_v8 = vcombine.high %v1773_v51, %v1777_v57  ;;  %v11897_v29 = vcombine.high %v1774_v48, %v1778_v0  ;;  %v1781_v1 = vld [vmem:[%s14830_s3 + $0x210] sm:$0xff]  ;;  %v11913_v11 = vcombine.low %v1773_v51, %v1777_v57  ;;  %v1790_v51 = vld [vmem:[%s14830_s3 + $0x258] sm:$0xff] }
 0x1e6   :  { %v1794_v57 = vld [vmem:[%s14830_s3 + $0x278] sm:$0xff]  ;;  %v11939_v0 = vcombine.low %v1782_v15, %v1786_v62 }
 0x1e7   :  { %15081 = vst [vmem:[#allocation82_spill] sm:$0xff] %v11895_v8  ;;  %15082 = vst [vmem:[#allocation83_spill] sm:$0xff] %v11897_v29 }
 0x1e8   :  { %2576 = vmatpush1.bf16.msra.mxu0 %v11865_v3  ;;  %2617 = vmatpush1.bf16.msra.mxu1 %v11867_v53  ;;  %v1785_v53 = vld [vmem:[%s14830_s3 + $0x230] sm:$0xff]  ;;  %15083 = vst [vmem:[#allocation84_spill] sm:$0xff] %v11913_v11  ;;  %15088 = vst [vmem:[#allocation89_spill] sm:$0xff] %v11939_v0 }
 0x1e9   :  { %2577 = vmatprep.subr.bf16.mxu0 %v11871_v7  ;;  %2618 = vmatprep.subr.bf16.mxu1 %v11873_v43  ;;  %v11919_v43 = vcombine.high %v1781_v1, %v1785_v53  ;;  %v11921_v7 = vcombine.high %v1782_v15, %v1786_v62  ;;  %v1789_v3 = vld [vmem:[%s14830_s3 + $0x250] sm:$0xff]  ;;  %v11937_v48 = vcombine.low %v1781_v1, %v1785_v53  ;;  %v1798_v1 = vld [vmem:[%s14830_s3 + $0x298] sm:$0xff] }
 0x1ea   :  { %v1802_v53 = vld [vmem:[%s14830_s3 + $0x2b8] sm:$0xff]  ;;  %v11963_v62 = vcombine.low %v1790_v51, %v1794_v57 }
 0x1eb   :  { %15085 = vst [vmem:[#allocation86_spill] sm:$0xff] %v11919_v43  ;;  %15086 = vst [vmem:[#allocation87_spill] sm:$0xff] %v11921_v7 }
 0x1ec   :  { %2578 = vmatpush1.bf16.msra.mxu0 %v11889_v24  ;;  %2619 = vmatpush1.bf16.msra.mxu1 %v11891_v2  ;;  %v1793_v2 = vld [vmem:[%s14830_s3 + $0x270] sm:$0xff]  ;;  %15087 = vst [vmem:[#allocation88_spill] sm:$0xff] %v11937_v48  ;;  %15092 = vst [vmem:[#allocation93_spill] sm:$0xff] %v11963_v62 }
 0x1ed   :  { %2579 = vmatprep.subr.bf16.mxu0 %v11895_v8  ;;  %2620 = vmatprep.subr.bf16.mxu1 %v11897_v29  ;;  %v11943_v29 = vcombine.high %v1789_v3, %v1793_v2  ;;  %v11945_v8 = vcombine.high %v1790_v51, %v1794_v57  ;;  %v1797_v24 = vld [vmem:[%s14830_s3 + $0x290] sm:$0xff]  ;;  %v11961_v15 = vcombine.low %v1789_v3, %v1793_v2  ;;  %v1806_v3 = vld [vmem:[%s14830_s3 + $0x2d8] sm:$0xff] }
 0x1ee   :  { %v1810_v2 = vld [vmem:[%s14830_s3 + $0x2f8] sm:$0xff]  ;;  %v11987_v57 = vcombine.low %v1798_v1, %v1802_v53 }
 0x1ef   :  { %15089 = vst [vmem:[#allocation90_spill] sm:$0xff] %v11943_v29  ;;  %15090 = vst [vmem:[#allocation91_spill] sm:$0xff] %v11945_v8 }
 0x1f0   :  { %2580 = vmatpush1.bf16.msra.mxu0 %v11913_v11  ;;  %2621 = vmatpush1.bf16.msra.mxu1 %v11915_v16  ;;  %v1801_v16 = vld [vmem:[%s14830_s3 + $0x2b0] sm:$0xff]  ;;  %15091 = vst [vmem:[#allocation92_spill] sm:$0xff] %v11961_v15  ;;  %15096 = vst [vmem:[#allocation97_spill] sm:$0xff] %v11987_v57 }
 0x1f1   :  { %2581 = vmatprep.subr.bf16.mxu0 %v11919_v43  ;;  %2622 = vmatprep.subr.bf16.mxu1 %v11921_v7  ;;  %v11967_v7 = vcombine.high %v1797_v24, %v1801_v16  ;;  %v11969_v43 = vcombine.high %v1798_v1, %v1802_v53  ;;  %v1805_v11 = vld [vmem:[%s14830_s3 + $0x2d0] sm:$0xff]  ;;  %v11985_v51 = vcombine.low %v1797_v24, %v1801_v16  ;;  %v1814_v24 = vld [vmem:[%s14830_s3 + $0x318] sm:$0xff] }
 0x1f2   :  { %v1818_v16 = vld [vmem:[%s14830_s3 + $0x338] sm:$0xff]  ;;  %v12011_v53 = vcombine.low %v1806_v3, %v1810_v2 }
 0x1f3   :  { %15093 = vst [vmem:[#allocation94_spill] sm:$0xff] %v11967_v7  ;;  %15094 = vst [vmem:[#allocation95_spill] sm:$0xff] %v11969_v43 }
 0x1f4   :  { %2582 = vmatpush1.bf16.msra.mxu0 %v11937_v48  ;;  %2623 = vmatpush1.bf16.msra.mxu1 %v11939_v0  ;;  %v1809_v0 = vld [vmem:[%s14830_s3 + $0x2f0] sm:$0xff]  ;;  %15095 = vst [vmem:[#allocation96_spill] sm:$0xff] %v11985_v51  ;;  %15100 = vst [vmem:[#allocation101_spill] sm:$0xff] %v12011_v53 }
 0x1f5   :  { %2583 = vmatprep.subr.bf16.mxu0 %v11943_v29  ;;  %2624 = vmatprep.subr.bf16.mxu1 %v11945_v8  ;;  %v11991_v8 = vcombine.high %v1805_v11, %v1809_v0  ;;  %v11993_v29 = vcombine.high %v1806_v3, %v1810_v2  ;;  %v1813_v48 = vld [vmem:[%s14830_s3 + $0x310] sm:$0xff]  ;;  %v12009_v1 = vcombine.low %v1805_v11, %v1809_v0  ;;  %v1822_v11 = vld [vmem:[%s14830_s3 + $0x358] sm:$0xff] }
 0x1f6   :  { %v1826_v0 = vld [vmem:[%s14830_s3 + $0x378] sm:$0xff]  ;;  %v12035_v2 = vcombine.low %v1814_v24, %v1818_v16 }
 0x1f7   :  { %15097 = vst [vmem:[#allocation98_spill] sm:$0xff] %v11991_v8  ;;  %15098 = vst [vmem:[#allocation99_spill] sm:$0xff] %v11993_v29 }
 0x1f8   :  { %2584 = vmatpush1.bf16.msra.mxu0 %v11961_v15  ;;  %2625 = vmatpush1.bf16.msra.mxu1 %v11963_v62  ;;  %v1817_v62 = vld [vmem:[%s14830_s3 + $0x330] sm:$0xff]  ;;  %15099 = vst [vmem:[#allocation100_spill] sm:$0xff] %v12009_v1  ;;  %15104 = vst [vmem:[#allocation105_spill] sm:$0xff] %v12035_v2 }
 0x1f9   :  { %2585 = vmatprep.subr.bf16.mxu0 %v11967_v7  ;;  %2626 = vmatprep.subr.bf16.mxu1 %v11969_v43  ;;  %v12015_v43 = vcombine.high %v1813_v48, %v1817_v62  ;;  %v12017_v7 = vcombine.high %v1814_v24, %v1818_v16  ;;  %v1821_v15 = vld [vmem:[%s14830_s3 + $0x350] sm:$0xff]  ;;  %v12033_v3 = vcombine.low %v1813_v48, %v1817_v62  ;;  %v1830_v48 = vld [vmem:[%s14830_s3 + $0x398] sm:$0xff] }
 0x1fa   :  { %v1834_v62 = vld [vmem:[%s14830_s3 + $0x3b8] sm:$0xff]  ;;  %v12059_v16 = vcombine.low %v1822_v11, %v1826_v0 }
 0x1fb   :  { %15101 = vst [vmem:[#allocation102_spill] sm:$0xff] %v12015_v43  ;;  %15102 = vst [vmem:[#allocation103_spill] sm:$0xff] %v12017_v7 }
 0x1fc   :  { %2586 = vmatpush1.bf16.msra.mxu0 %v11985_v51  ;;  %2627 = vmatpush1.bf16.msra.mxu1 %v11987_v57  ;;  %v1825_v57 = vld [vmem:[%s14830_s3 + $0x370] sm:$0xff]  ;;  %15103 = vst [vmem:[#allocation104_spill] sm:$0xff] %v12033_v3 }
 0x1fd   :  { %2587 = vmatprep.subr.bf16.mxu0 %v11991_v8  ;;  %2628 = vmatprep.subr.bf16.mxu1 %v11993_v29  ;;  %v12039_v29 = vcombine.high %v1821_v15, %v1825_v57  ;;  %v12041_v8 = vcombine.high %v1822_v11, %v1826_v0  ;;  %v1829_v51 = vld [vmem:[%s14830_s3 + $0x390] sm:$0xff]  ;;  %v12057_v24 = vcombine.low %v1821_v15, %v1825_v57  ;;  %v1838_v15 = vld [vmem:[%s14830_s3 + $0x3d8] sm:$0xff] }
 0x1fe   :  { %v1842_v57 = vld [vmem:[%s14830_s3 + $0x3f8] sm:$0xff]  ;;  %v12083_v0 = vcombine.low %v1830_v48, %v1834_v62 }
 0x1ff   :  { %15105 = vst [vmem:[#allocation106_spill] sm:$0xff] %v12039_v29  ;;  %15106 = vst [vmem:[#allocation107_spill] sm:$0xff] %v12041_v8 }
 0x200   :  { %2588 = vmatpush1.bf16.msra.mxu0 %v12009_v1  ;;  %2629 = vmatpush1.bf16.msra.mxu1 %v12011_v53  ;;  %v1833_v53 = vld [vmem:[%s14830_s3 + $0x3b0] sm:$0xff]  ;;  %15107 = vst [vmem:[#allocation108_spill] sm:$0xff] %v12057_v24 }
 0x201   :  { %2589 = vmatprep.subr.bf16.mxu0 %v12015_v43  ;;  %2630 = vmatprep.subr.bf16.mxu1 %v12017_v7  ;;  %v12063_v7 = vcombine.high %v1829_v51, %v1833_v53  ;;  %v12065_v43 = vcombine.high %v1830_v48, %v1834_v62  ;;  %v1837_v1 = vld [vmem:[%s14830_s3 + $0x3d0] sm:$0xff]  ;;  %v12081_v11 = vcombine.low %v1829_v51, %v1833_v53  ;;  %v2778_v53 = vld [vmem:[%s14830_s3 + $0x248] sm:$0xff] }
 0x204   :  { %2590 = vmatpush1.bf16.msra.mxu0 %v12033_v3  ;;  %2631 = vmatpush1.bf16.msra.mxu1 %v12035_v2  ;;  %v1841_v2 = vld [vmem:[%s14830_s3 + $0x3f0] sm:$0xff] }
 0x205   :  { %2591 = vmatprep.subr.bf16.mxu0 %v12039_v29  ;;  %2632 = vmatprep.subr.bf16.mxu1 %v12041_v8  ;;  %v12087_v8 = vcombine.high %v1837_v1, %v1841_v2  ;;  %v12089_v29 = vcombine.high %v1838_v15, %v1842_v57  ;;  %v12093_v3 = vcombine.low %v1837_v1, %v1841_v2  ;;  %v2782_v2 = vld [vmem:[%s14830_s3 + $0x268] sm:$0xff] }
 0x206   :  { %v12250_v48 = vcombine.high %v2778_v53, %v2782_v2  ;;  %v12252_v62 = vcombine.low %v2778_v53, %v2782_v2  ;;  %v15118_v53 = vld [vmem:[#allocation32_spill] sm:$0xff] }
 0x208   :  { %2592 = vmatpush1.bf16.msra.mxu0 %v12057_v24  ;;  %2633 = vmatpush1.bf16.msra.mxu1 %v12059_v16  ;;  %v12095_v24 = vcombine.low %v1838_v15, %v1842_v57  ;;  %v15108_v15 = vld [vmem:[#allocation48_spill] sm:$0xff] }
 0x209   :  { %2593 = vmatprep.subr.bf16.mxu0 %v12063_v7  ;;  %2634 = vmatprep.subr.bf16.mxu1 %v12065_v43  ;;  %v15109_v57 = vld [vmem:[#allocation52_spill] sm:$0xff] }
 0x20c   :  { %2594 = vmatpush1.bf16.msra.mxu0 %v12081_v11  ;;  %2635 = vmatpush1.bf16.msra.mxu1 %v12083_v0 }
 0x20d   :  { %2595 = vmatprep.subr.bf16.mxu0 %v12087_v8  ;;  %2636 = vmatprep.subr.bf16.mxu1 %v12089_v29 }
 0x210   :  { %2596 = vmatpush1.bf16.msra.mxu0 %v12093_v3  ;;  %2637 = vmatpush1.bf16.msra.mxu1 %v12095_v24 }
 0x211   :  { %3473 = vmatprep.subr.bf16.mxu0 %v11338_v20 }
 0x213   :  { %2598 = vmatmul.mubr.bf16.vlgmr.msra.gmra.mrb[28].mxu0 %v11747_v58  ;;  %2639 = vmatmul.mubr.bf16.vlgmr.msra.gmra.mrb[60].mxu1 %v11747_v58  ;;  %v2774_v58 = vld [vmem:[%s14830_s3 + $0x228] sm:$0xff] }
 0x214   :  { %3474 = vmatpush1.bf16.msra.mxu0 %v11336_v45 }
 0x215   :  { %3475 = vmatprep.subr.bf16.mxu0 %v11343_v63  ;;  %v2718_v63 = vld [vmem:[%s14830_s3 + $0x68] sm:$0xff] }
 0x218   :  { %3476 = vmatpush1.bf16.msra.mxu0 %v11362_v44  ;;  %v2722_v44 = vld [vmem:[%s14830_s3 + $0x88] sm:$0xff] }
 0x219   :  { %3477 = vmatprep.subr.bf16.mxu0 %v11368_v27  ;;  %v2726_v27 = vld [vmem:[%s14830_s3 + $0xa8] sm:$0xff] }
 0x21c   :  { %3478 = vmatpush1.bf16.msra.mxu0 %v11389_v5 }
 0x21d   :  { %3479 = vmatprep.subr.bf16.mxu0 %v11392_v35  ;;  %v12156_v35 = vcombine.high %v2722_v44, %v2726_v27 }
 0x220   :  { %3480 = vmatpush1.bf16.msra.mxu0 %v11410_v25  ;;  %v2730_v25 = vld [vmem:[%s14830_s3 + $0xc8] sm:$0xff] }
 0x221   :  { %3481 = vmatprep.subr.bf16.mxu0 %v11416_v37 }
 0x224   :  { %3482 = vmatpush1.bf16.msra.mxu0 %v11428_v34  ;;  %v2734_v34 = vld [vmem:[%s14830_s3 + $0xe8] sm:$0xff] }
 0x225   :  { %3483 = vmatprep.subr.bf16.mxu0 %v11434_v12  ;;  %v2714_v12 = vld [vmem:[%s14830_s3 + $0x48] sm:$0xff] }
 0x226   :  { %v12142_v37 = vcombine.high %v2714_v12, %v2718_v63  ;;  %v12153_v5 = vcombine.low %v2714_v12, %v2718_v63  ;;  %v2814_v12 = vld [vmem:[%s14830_s3 + $0x368] sm:$0xff] }
 0x228   :  { %3484 = vmatpush1.bf16.msra.mxu0 %v11446_v4  ;;  %v12171_v4 = vcombine.high %v2730_v25, %v2734_v34 }
 0x229   :  { %3485 = vmatprep.subr.bf16.mxu0 %v11452_v31  ;;  %v2706_v31 = vld [vmem:[%s14830_s3 + $0x8] sm:$0xff] }
 0x22c   :  { %3486 = vmatpush1.bf16.msra.mxu0 %v11464_v6  ;;  %v2738_v6 = vld [vmem:[%s14830_s3 + $0x108] sm:$0xff] }
 0x22d   :  { %3487 = vmatprep.subr.bf16.mxu0 %v11470_v21  ;;  %v2710_v21 = vld [vmem:[%s14830_s3 + $0x28] sm:$0xff] }
 0x22e   :  { %v12135_v45 = vcombine.low %v2706_v31, %v2710_v21  ;;  %v12137_v20 = vcombine.high %v2706_v31, %v2710_v21  ;;  %v15110_v31 = vld [vmem:[#allocation51_spill] sm:$0xff]  ;;  %v2810_v21 = vld [vmem:[%s14830_s3 + $0x348] sm:$0xff] }
 0x22f   :  { %v12268_v63 = vcombine.high %v2810_v21, %v2814_v12 }
 0x230   :  { %3488 = vmatpush1.bf16.msra.mxu0 %v11482_v17  ;;  %3514 = vmatprep.subr.bf16.mxu1 %v12137_v20  ;;  %v12181_v17 = vcombine.low %v2730_v25, %v2734_v34  ;;  %v2826_v25 = vld [vmem:[%s14830_s3 + $0x3c8] sm:$0xff] }
 0x231   :  { %3489 = vmatprep.subr.bf16.mxu0 %v11488_v38  ;;  %3515 = vmatpush1.bf16.msra.mxu1 %v12135_v45  ;;  %v2742_v38 = vld [vmem:[%s14830_s3 + $0x128] sm:$0xff] }
 0x232   :  { %3516 = vmatprep.subr.bf16.mxu1 %v12142_v37  ;;  %v2830_v34 = vld [vmem:[%s14830_s3 + $0x3e8] sm:$0xff] }
 0x234   :  { %3490 = vmatpush1.bf16.msra.mxu0 %v11500_v22  ;;  %v2746_v22 = vld [vmem:[%s14830_s3 + $0x148] sm:$0xff] }
 0x235   :  { %3491 = vmatprep.subr.bf16.mxu0 %v11506_v41  ;;  %3517 = vmatpush1.bf16.msra.mxu1 %v12153_v5  ;;  %v12185_v41 = vcombine.high %v2738_v6, %v2742_v38 }
 0x236   :  { %3518 = vmatprep.subr.bf16.mxu1 %v12156_v35 }
 0x238   :  { %3492 = vmatpush1.bf16.msra.mxu0 %v11512_v19  ;;  %v2750_v19 = vld [vmem:[%s14830_s3 + $0x168] sm:$0xff] }
 0x239   :  { %3493 = vmatprep.subr.bf16.mxu0 %v11543_v47  ;;  %v12195_v47 = vcombine.low %v2738_v6, %v2742_v38  ;;  %v12292_v6 = vcombine.low %v2826_v25, %v2830_v34  ;;  %v12294_v38 = vcombine.high %v2826_v25, %v2830_v34 }
 0x23b   :  { %15114 = vst [vmem:[#allocation109_spill] sm:$0xff] %v12292_v6  ;;  %15115 = vst [vmem:[#allocation110_spill] sm:$0xff] %v12294_v38 }
 0x23c   :  { %3494 = vmatpush1.bf16.msra.mxu0 %v11550_v56  ;;  %v12167_v56 = vcombine.low %v2722_v44, %v2726_v27 }
 0x23d   :  { %3495 = vmatprep.subr.bf16.mxu0 %v11578_v13  ;;  %v2754_v13 = vld [vmem:[%s14830_s3 + $0x188] sm:$0xff] }
 0x23e   :  { %3519 = vmatpush1.bf16.msra.mxu1 %v12167_v56 }
 0x23f   :  { %3520 = vmatprep.subr.bf16.mxu1 %v12171_v4 }
 0x240   :  { %3496 = vmatpush1.bf16.msra.mxu0 %v11583_v39  ;;  %v2758_v39 = vld [vmem:[%s14830_s3 + $0x1a8] sm:$0xff] }
 0x241   :  { %3497 = vmatprep.subr.bf16.mxu0 %v11608_v40  ;;  %v12209_v40 = vcombine.low %v2746_v22, %v2750_v19 }
 0x242   :  { %3521 = vmatpush1.bf16.msra.mxu1 %v12181_v17 }
 0x243   :  { %3522 = vmatprep.subr.bf16.mxu1 %v12185_v41 }
 0x244   :  { %3498 = vmatpush1.bf16.msra.mxu0 %v11613_v33  ;;  %v12199_v33 = vcombine.high %v2746_v22, %v2750_v19  ;;  %v2708_v22 = vld [vmem:[%s14830_s3 + $0x18] sm:$0xff] }
 0x245   :  { %3499 = vmatprep.subr.bf16.mxu0 %v11635_v23  ;;  %v12213_v23 = vcombine.high %v2754_v13, %v2758_v39  ;;  %v2712_v19 = vld [vmem:[%s14830_s3 + $0x38] sm:$0xff] }
 0x246   :  { %3523 = vmatpush1.bf16.msra.mxu1 %v12195_v47 }
 0x247   :  { %3524 = vmatprep.subr.bf16.mxu1 %v12199_v33 }
 0x248   :  { %3500 = vmatpush1.bf16.msra.mxu0 %v11637_v54  ;;  %v2762_v54 = vld [vmem:[%s14830_s3 + $0x1c8] sm:$0xff] }
 0x249   :  { %3501 = vmatprep.subr.bf16.mxu0 %v11655_v28  ;;  %v2766_v28 = vld [vmem:[%s14830_s3 + $0x1e8] sm:$0xff] }
 0x24a   :  { %3525 = vmatpush1.bf16.msra.mxu1 %v12209_v40 }
 0x24b   :  { %3526 = vmatprep.subr.bf16.mxu1 %v12213_v23 }
 0x24c   :  { %3502 = vmatpush1.bf16.msra.mxu0 %v11657_v30  ;;  %v12222_v30 = vcombine.low %v2754_v13, %v2758_v39  ;;  %v12304_v13 = vcombine.low %v2708_v22, %v2712_v19  ;;  %v12306_v39 = vcombine.high %v2708_v22, %v2712_v19 }
 0x24d   :  { %3503 = vmatprep.subr.bf16.mxu0 %v11677_v49  ;;  %v12228_v49 = vcombine.low %v2762_v54, %v2766_v28 }
 0x24e   :  { %3527 = vmatpush1.bf16.msra.mxu1 %v12222_v30  ;;  %15116 = vst [vmem:[#allocation111_spill] sm:$0xff] %v12306_v39 }
 0x250   :  { %3504 = vmatpush1.bf16.msra.mxu0 %v11675_v42  ;;  %v12225_v42 = vcombine.high %v2762_v54, %v2766_v28 }
 0x251   :  { %3555 = vmatprep.subr.bf16.mxu0 %v11697_v36  ;;  %v2770_v36 = vld [vmem:[%s14830_s3 + $0x208] sm:$0xff] }
 0x252   :  { %3528 = vmatprep.subr.bf16.mxu1 %v12225_v42  ;;  %v12238_v51 = vcombine.high %v2770_v36, %v2774_v58  ;;  %v12240_v1 = vcombine.low %v2770_v36, %v2774_v58  ;;  %v15117_v36 = vld [vmem:[#allocation4_spill] sm:$0xff] }
 0x253   :  { %3529 = vmatpush1.bf16.msra.mxu1 %v12228_v49 }
 0x254   :  { %3530 = vmatprep.subr.bf16.mxu1 %v12238_v51 }
 0x257   :  { %3531 = vmatpush1.bf16.msra.mxu1 %v12240_v1 }
 0x258   :  { %3532 = vmatprep.subr.bf16.mxu1 %v12250_v48 }
 0x25b   :  { %3533 = vmatpush1.bf16.msra.mxu1 %v12252_v62 }
 0x25c   :  { %3534 = vmatprep.subr.bf16.mxu1 %v11554_v9  ;;  %v12270_v9 = vcombine.low %v2810_v21, %v2814_v12  ;;  %v15120_v12 = vld [vmem:[#allocation33_spill] sm:$0xff] }
 0x25e   :  { %15111 = vst [vmem:[#allocation48_spill] sm:$0xff] %v12270_v9 }
 0x25f   :  { %3535 = vmatpush1.bf16.msra.mxu1 %v11552_v26  ;;  %v2818_v26 = vld [vmem:[%s14830_s3 + $0x388] sm:$0xff] }
 0x260   :  { %3536 = vmatprep.subr.bf16.mxu1 %v11587_v10  ;;  %v2822_v10 = vld [vmem:[%s14830_s3 + $0x3a8] sm:$0xff] }
 0x261   :  { %v12280_v44 = vcombine.high %v2818_v26, %v2822_v10  ;;  %v12282_v27 = vcombine.low %v2818_v26, %v2822_v10 }
 0x263   :  { %3537 = vmatpush1.bf16.msra.mxu1 %v15108_v15  ;;  %15112 = vst [vmem:[#allocation52_spill] sm:$0xff] %v12280_v44  ;;  %15113 = vst [vmem:[#allocation51_spill] sm:$0xff] %v12282_v27 }
 0x264   :  { %3538 = vmatprep.subr.bf16.mxu1 %v15109_v57 }
 0x267   :  { %3539 = vmatpush1.bf16.msra.mxu1 %v15110_v31  ;;  %v15119_v31 = vld [vmem:[#allocation5_spill] sm:$0xff] }
 0x268   :  { %3540 = vmatprep.subr.bf16.mxu1 %v12268_v63 }
 0x26b   :  { %3541 = vmatpush1.bf16.msra.mxu1 %v12270_v9 }
 0x26c   :  { %3542 = vmatprep.subr.bf16.mxu1 %v12280_v44 }
 0x26f   :  { %3543 = vmatpush1.bf16.msra.mxu1 %v12282_v27  ;;  %v15122_v27 = vld [vmem:[#allocation46_spill] sm:$0xff] }
 0x270   :  { %3544 = vmatprep.subr.bf16.mxu1 %v12294_v38 }
 0x273   :  { %3545 = vmatpush1.bf16.msra.mxu1 %v12292_v6 }
 0x274   :  { %3596 = vmatprep.subr.bf16.mxu1 %v12306_v39 }
 0x2a6   :  { %v2517_v54 = vpop.f32.mrb[24].mxu0  ;;  %v2558_v28 = vpop.f32.mrb[56].mxu1 }
 0x2a7   :  { %v2647_v58 = vadd.f32 %v2517_v54, %v15117_v36  ;;  %v2649_v2 = vadd.f32 %v2558_v28, %v15118_v53  ;;  %v2519_v15 = vpop.f32.mrb[25].mxu0  ;;  %v2560_v57 = vpop.f32.mrb[57].mxu1  ;;  %v15121_v36 = vld [vmem:[#allocation6_spill] sm:$0xff] }
 0x2a8   :  { %v2648_v21 = vadd.f32 %v2519_v15, %v15119_v31  ;;  %v2650_v26 = vadd.f32 %v2560_v57, %v15120_v12  ;;  %v2521_v10 = vpop.f32.mrb[26].mxu0  ;;  %v2562_v25 = vpop.f32.mrb[58].mxu1  ;;  %v15123_v12 = vld [vmem:[#allocation8_spill] sm:$0xff] }
 0x2a9   :  { %v2522_v34 = vpop.f32.mrb[27].mxu0  ;;  %v2563_v6 = vpop.f32.mrb[59].mxu1  ;;  %v2663_v22 = vmul.f32 0.5, %v2649_v2  ;;  %v2655_v38 = vmul.f32 0.5, %v2647_v58  ;;  %v15124_v25 = vld [vmem:[#allocation47_spill] sm:$0xff] }
 0x2aa   :  { %v2664_v19 = vmul.f32 0.5, %v2650_v26  ;;  %v2656_v39 = vmul.f32 0.5, %v2648_v21 }
 0x2ab   :  { %10069 = vtanh.f32 %v2663_v22 }
 0x2ac   :  { %10071 = vtanh.f32 %v2664_v19 }
 0x2ad   :  { %10073 = vtanh.f32 %v2655_v38 }
 0x2ae   :  { %10075 = vtanh.f32 %v2656_v39 }
 0x2b5   :  { %v10070_v58 = vpop.eup %10069 }
 0x2b6   :  { %v10072_v38 = vpop.eup %10071  ;;  %v2667_v19 = vmul.f32 0.5, %v10070_v58 }
 0x2b7   :  { %v10074_v39 = vpop.eup %10073 }
 0x2b8   :  { %v10076_v22 = vpop.eup %10075  ;;  %v2669_v9 = vadd.f32 0.5, %v2667_v19 }
 0x2b9   :  { %v2660_v44 = vmul.f32 0.5, %v10076_v22 }
 0x2e6   :  { %v2599_v54 = vpop.f32.mrb[28].mxu0  ;;  %v2640_v28 = vpop.f32.mrb[60].mxu1 }
 0x2e7   :  { %v2651_v53 = vadd.f32 %v2599_v54, %v15121_v36  ;;  %v2653_v15 = vadd.f32 %v2640_v28, %v15122_v27  ;;  %v2601_v31 = vpop.f32.mrb[29].mxu0  ;;  %v2642_v57 = vpop.f32.mrb[61].mxu1  ;;  %v2668_v36 = vmul.f32 0.5, %v10072_v38  ;;  %v2659_v28 = vmul.f32 0.5, %v10074_v39 }
 0x2e8   :  { %v2652_v10 = vadd.f32 %v2601_v31, %v15123_v12  ;;  %v2654_v6 = vadd.f32 %v2642_v57, %v15124_v25  ;;  %v2603_v2 = vpop.f32.mrb[30].mxu0  ;;  %v2644_v26 = vpop.f32.mrb[62].mxu1  ;;  %v2662_v25 = vadd.f32 0.5, %v2660_v44 }
 0x2e9   :  { %10077 = vtanh.f32 %v2651_v53  ;;  %v2604_v21 = vpop.f32.mrb[31].mxu0  ;;  %v2645_v34 = vpop.f32.mrb[63].mxu1  ;;  %v2673_v54 = vmul.f32 0.5, %v2653_v15  ;;  %v2670_v31 = vadd.f32 0.5, %v2668_v36  ;;  %v2661_v57 = vadd.f32 0.5, %v2659_v28  ;;  %v15129_v28 = vld [vmem:[#allocation67_spill] sm:$0xff] }
 0x2ea   :  { %10079 = vtanh.f32 %v2652_v10  ;;  %v2674_v27 = vmul.f32 0.5, %v2654_v6  ;;  %v2681_v2 = vmul.f32 %v2669_v9, %v11717_v60 }
 0x2eb   :  { %10081 = vtanh.f32 %v2673_v54  ;;  %v2682_v10 = vmul.f32 %v2670_v31, %v11719_v50  ;;  %v15130_v31 = vld [vmem:[#allocation68_spill] sm:$0xff] }
 0x2ec   :  { %10083 = vtanh.f32 %v2674_v27  ;;  %v15127_v27 = vld [vmem:[#allocation65_spill] sm:$0xff] }
 0x2f3   :  { %v10078_v12 = vpop.eup %10077 }
 0x2f4   :  { %v10080_v53 = vpop.eup %10079  ;;  %v2683_v26 = vmul.f32 %v10078_v12, %v2661_v57  ;;  %v15138_v57 = vld [vmem:[#allocation76_spill] sm:$0xff]  ;;  %v15139_v12 = vld [vmem:[#allocation77_spill] sm:$0xff] }
 0x2f5   :  { %v2684_v21 = vmul.f32 %v10080_v53, %v2662_v25  ;;  %v10082_v6 = vpop.eup %10081  ;;  %v15140_v25 = vld [vmem:[#allocation78_spill] sm:$0xff]  ;;  %v15141_v53 = vld [vmem:[#allocation79_spill] sm:$0xff] }
 0x2f6   :  { %v12319_v58 = vadd.f32 %v2683_v26, %v2681_v2  ;;  %v10084_v34 = vpop.eup %10083  ;;  %v2677_v38 = vmul.f32 0.5, %v10082_v6  ;;  %v15142_v2 = vld [vmem:[#allocation80_spill] sm:$0xff]  ;;  %v15143_v26 = vld [vmem:[#allocation81_spill] sm:$0xff] }
 0x2f7   :  { %v12321_v15 = vadd.f32 %v2684_v21, %v2682_v10  ;;  %v2678_v39 = vmul.f32 0.5, %v10084_v34  ;;  %v15144_v10 = vld [vmem:[#allocation82_spill] sm:$0xff]  ;;  %v15145_v21 = vld [vmem:[#allocation83_spill] sm:$0xff]  ;;  %v15146_v6 = vld [vmem:[#allocation84_spill] sm:$0xff] }
 0x2f8   :  { %10085 = vtanh.f32 %v12319_v58  ;;  %v2679_v44 = vadd.f32 0.5, %v2677_v38  ;;  %v15147_v34 = vld [vmem:[#allocation85_spill] sm:$0xff]  ;;  %v15148_v38 = vld [vmem:[#allocation86_spill] sm:$0xff] }
 0x2f9   :  { %10087 = vtanh.f32 %v12321_v15  ;;  %v2680_v19 = vadd.f32 0.5, %v2678_v39  ;;  %v15149_v39 = vld [vmem:[#allocation87_spill] sm:$0xff] }
 0x302   :  { %v10086_v22 = vpop.eup %10085 }
 0x303   :  { %v10088_v60 = vpop.eup %10087  ;;  %v12325_v9 = vmul.f32 %v10086_v22, %v2679_v44  ;;  %v15150_v44 = vld [vmem:[#allocation88_spill] sm:$0xff]  ;;  %v15151_v22 = vld [vmem:[#allocation89_spill] sm:$0xff] }
 0x304   :  { %v12327_v50 = vmul.f32 %v10088_v60, %v2680_v19  ;;  %v15152_v19 = vld [vmem:[#allocation90_spill] sm:$0xff]  ;;  %v15153_v60 = vld [vmem:[#allocation91_spill] sm:$0xff] }
 0x305   :  { %15125 = vst [vmem:[#allocation4_spill] sm:$0xff] %v12325_v9  ;;  %v12333_v36 = vpack.c.bf16 %v12325_v9, %v12325_v9 }
 0x306   :  { %15126 = vst [vmem:[#allocation32_spill] sm:$0xff] %v12327_v50  ;;  %v2704_v54 = vpack.c.bf16 %v12327_v50, %v12327_v50  ;;  %v15184_v50 = vld [vmem:[#allocation49_spill] sm:$0xff] }
 0x308   :  { %3505 = vmatprep.mubr.bf16.mxu0 %v2704_v54  ;;  %3546 = vmatprep.mubr.bf16.mxu1 %v2704_v54 }
 0x309   :  { %3506 = vmatmul.mubr.bf16.vlgmr.msra.gmra.mrb[32].mxu0 %v12333_v36  ;;  %3547 = vmatmul.mubr.bf16.vlgmr.msra.gmra.mrb[64].mxu1 %v12333_v36 }
 0x30a   :  { %3556 = vmatpush1.bf16.msra.mxu0 %v11695_v52  ;;  %3597 = vmatpush1.bf16.msra.mxu1 %v12304_v13  ;;  %v15128_v52 = vld [vmem:[#allocation66_spill] sm:$0xff] }
 0x30b   :  { %3587 = vmatprep.mubr.bf16.mxu0 %v2704_v54  ;;  %3628 = vmatprep.mubr.bf16.mxu1 %v2704_v54  ;;  %v15154_v54 = vld [vmem:[#allocation92_spill] sm:$0xff] }
 0x30c   :  { %3557 = vmatprep.subr.bf16.mxu0 %v11752_v18  ;;  %3598 = vmatprep.subr.bf16.mxu1 %v11754_v59  ;;  %v15131_v18 = vld [vmem:[#allocation69_spill] sm:$0xff]  ;;  %v15132_v59 = vld [vmem:[#allocation70_spill] sm:$0xff] }
 0x30e   :  { %3558 = vmatpush1.bf16.msra.mxu0 %v11769_v32  ;;  %3599 = vmatpush1.bf16.msra.mxu1 %v11771_v46  ;;  %v15133_v32 = vld [vmem:[#allocation71_spill] sm:$0xff]  ;;  %v15134_v46 = vld [vmem:[#allocation72_spill] sm:$0xff] }
 0x30f   :  { %3559 = vmatprep.subr.bf16.mxu0 %v11773_v61  ;;  %3600 = vmatprep.subr.bf16.mxu1 %v11775_v55  ;;  %v15135_v61 = vld [vmem:[#allocation73_spill] sm:$0xff]  ;;  %v15136_v55 = vld [vmem:[#allocation74_spill] sm:$0xff] }
 0x312   :  { %3560 = vmatpush1.bf16.msra.mxu0 %v11793_v14  ;;  %3601 = vmatpush1.bf16.msra.mxu1 %v15127_v27  ;;  %v15137_v14 = vld [vmem:[#allocation75_spill] sm:$0xff]  ;;  %v15155_v27 = vld [vmem:[#allocation93_spill] sm:$0xff] }
 0x313   :  { %3561 = vmatprep.subr.bf16.mxu0 %v15128_v52  ;;  %3602 = vmatprep.subr.bf16.mxu1 %v15129_v28  ;;  %v15156_v52 = vld [vmem:[#allocation94_spill] sm:$0xff]  ;;  %v15157_v28 = vld [vmem:[#allocation95_spill] sm:$0xff] }
 0x316   :  { %3562 = vmatpush1.bf16.msra.mxu0 %v15130_v31  ;;  %3603 = vmatpush1.bf16.msra.mxu1 %v15131_v18  ;;  %v15158_v31 = vld [vmem:[#allocation96_spill] sm:$0xff]  ;;  %v15159_v18 = vld [vmem:[#allocation97_spill] sm:$0xff] }
 0x317   :  { %3563 = vmatprep.subr.bf16.mxu0 %v15132_v59  ;;  %3604 = vmatprep.subr.bf16.mxu1 %v15133_v32  ;;  %v15160_v59 = vld [vmem:[#allocation98_spill] sm:$0xff]  ;;  %v15161_v32 = vld [vmem:[#allocation99_spill] sm:$0xff] }
 0x31a   :  { %3564 = vmatpush1.bf16.msra.mxu0 %v15134_v46  ;;  %3605 = vmatpush1.bf16.msra.mxu1 %v15135_v61  ;;  %v15162_v46 = vld [vmem:[#allocation100_spill] sm:$0xff]  ;;  %v15163_v61 = vld [vmem:[#allocation101_spill] sm:$0xff] }
 0x31b   :  { %3565 = vmatprep.subr.bf16.mxu0 %v15136_v55  ;;  %3606 = vmatprep.subr.bf16.mxu1 %v15137_v14  ;;  %v15164_v55 = vld [vmem:[#allocation102_spill] sm:$0xff]  ;;  %v15165_v14 = vld [vmem:[#allocation103_spill] sm:$0xff] }
 0x31e   :  { %3566 = vmatpush1.bf16.msra.mxu0 %v15138_v57  ;;  %3607 = vmatpush1.bf16.msra.mxu1 %v15139_v12  ;;  %v15166_v57 = vld [vmem:[#allocation104_spill] sm:$0xff]  ;;  %v15167_v12 = vld [vmem:[#allocation105_spill] sm:$0xff] }
 0x31f   :  { %3567 = vmatprep.subr.bf16.mxu0 %v15140_v25  ;;  %3608 = vmatprep.subr.bf16.mxu1 %v15141_v53  ;;  %v15168_v25 = vld [vmem:[#allocation106_spill] sm:$0xff]  ;;  %v15169_v53 = vld [vmem:[#allocation107_spill] sm:$0xff] }
 0x322   :  { %3568 = vmatpush1.bf16.msra.mxu0 %v15142_v2  ;;  %3609 = vmatpush1.bf16.msra.mxu1 %v15143_v26  ;;  %v15170_v2 = vld [vmem:[#allocation108_spill] sm:$0xff] }
 0x323   :  { %3569 = vmatprep.subr.bf16.mxu0 %v15144_v10  ;;  %3610 = vmatprep.subr.bf16.mxu1 %v15145_v21  ;;  %v3759_v21 = vld [vmem:[%s14830_s3 + $0x200] sm:$0xff] }
 0x326   :  { %3570 = vmatpush1.bf16.msra.mxu0 %v15146_v6  ;;  %3611 = vmatpush1.bf16.msra.mxu1 %v15147_v34  ;;  %v3763_v6 = vld [vmem:[%s14830_s3 + $0x220] sm:$0xff] }
 0x327   :  { %3571 = vmatprep.subr.bf16.mxu0 %v15148_v38  ;;  %3612 = vmatprep.subr.bf16.mxu1 %v15149_v39  ;;  %v12523_v34 = vcombine.high %v3759_v21, %v3763_v6  ;;  %v12525_v38 = vcombine.low %v3759_v21, %v3763_v6  ;;  %v3767_v39 = vld [vmem:[%s14830_s3 + $0x240] sm:$0xff]  ;;  %v15175_v6 = vld [vmem:[#allocation51_spill] sm:$0xff] }
 0x328   :  { %v3819_v21 = vld [vmem:[%s14830_s3 + $0x3e0] sm:$0xff] }
 0x32a   :  { %3572 = vmatpush1.bf16.msra.mxu0 %v15150_v44  ;;  %3613 = vmatpush1.bf16.msra.mxu1 %v15151_v22  ;;  %v3771_v44 = vld [vmem:[%s14830_s3 + $0x260] sm:$0xff] }
 0x32b   :  { %3573 = vmatprep.subr.bf16.mxu0 %v15152_v19  ;;  %3614 = vmatprep.subr.bf16.mxu1 %v15153_v60  ;;  %v12535_v22 = vcombine.high %v3767_v39, %v3771_v44  ;;  %v12537_v19 = vcombine.low %v3767_v39, %v3771_v44  ;;  %v3775_v60 = vld [vmem:[%s14830_s3 + $0x280] sm:$0xff] }
 0x32e   :  { %3574 = vmatpush1.bf16.msra.mxu0 %v15154_v54  ;;  %3615 = vmatpush1.bf16.msra.mxu1 %v15155_v27  ;;  %v3779_v54 = vld [vmem:[%s14830_s3 + $0x2a0] sm:$0xff]  ;;  %v3776_v27 = vld [vmem:[%s14830_s3 + $0x288] sm:$0xff] }
 0x32f   :  { %3575 = vmatprep.subr.bf16.mxu0 %v15156_v52  ;;  %3616 = vmatprep.subr.bf16.mxu1 %v15157_v28  ;;  %v12550_v52 = vcombine.high %v3775_v60, %v3779_v54  ;;  %v3780_v28 = vld [vmem:[%s14830_s3 + $0x2a8] sm:$0xff] }
 0x332   :  { %3576 = vmatpush1.bf16.msra.mxu0 %v15158_v31  ;;  %3617 = vmatpush1.bf16.msra.mxu1 %v15159_v18  ;;  %v12555_v31 = vcombine.low %v3775_v60, %v3779_v54  ;;  %v12557_v18 = vcombine.low %v3776_v27, %v3780_v28  ;;  %v15176_v60 = vld [vmem:[#allocation110_spill] sm:$0xff] }
 0x333   :  { %3577 = vmatprep.subr.bf16.mxu0 %v15160_v59  ;;  %3618 = vmatprep.subr.bf16.mxu1 %v15161_v32  ;;  %v12559_v59 = vcombine.high %v3776_v27, %v3780_v28  ;;  %v3783_v32 = vld [vmem:[%s14830_s3 + $0x2c0] sm:$0xff]  ;;  %v3697_v54 = vld [vmem:[%s14830_s3 + $0x10] sm:$0xff]  ;;  %v15177_v28 = vld [vmem:[#allocation109_spill] sm:$0xff] }
 0x334   :  { %v3701_v27 = vld [vmem:[%s14830_s3 + $0x30] sm:$0xff] }
 0x336   :  { %3578 = vmatpush1.bf16.msra.mxu0 %v15162_v46  ;;  %3619 = vmatpush1.bf16.msra.mxu1 %v15163_v61  ;;  %v3787_v46 = vld [vmem:[%s14830_s3 + $0x2e0] sm:$0xff]  ;;  %v3784_v61 = vld [vmem:[%s14830_s3 + $0x2c8] sm:$0xff] }
 0x337   :  { %3579 = vmatprep.subr.bf16.mxu0 %v15164_v55  ;;  %3620 = vmatprep.subr.bf16.mxu1 %v15165_v14  ;;  %v12574_v55 = vcombine.high %v3783_v32, %v3787_v46  ;;  %v3788_v14 = vld [vmem:[%s14830_s3 + $0x2e8] sm:$0xff] }
 0x33a   :  { %3580 = vmatpush1.bf16.msra.mxu0 %v15166_v57  ;;  %3621 = vmatpush1.bf16.msra.mxu1 %v15167_v12  ;;  %v12579_v57 = vcombine.low %v3783_v32, %v3787_v46  ;;  %v12581_v12 = vcombine.low %v3784_v61, %v3788_v14  ;;  %v12661_v32 = vcombine.high %v3697_v54, %v3701_v27 }
 0x33b   :  { %3581 = vmatprep.subr.bf16.mxu0 %v15168_v25  ;;  %3622 = vmatprep.subr.bf16.mxu1 %v15169_v53  ;;  %v12583_v25 = vcombine.high %v3784_v61, %v3788_v14  ;;  %v3791_v53 = vld [vmem:[%s14830_s3 + $0x300] sm:$0xff]  ;;  %v12663_v46 = vcombine.low %v3697_v54, %v3701_v27  ;;  %v15178_v61 = vld [vmem:[#allocation111_spill] sm:$0xff] }
 0x33e   :  { %3582 = vmatpush1.bf16.msra.mxu0 %v15170_v2  ;;  %3623 = vmatpush1.bf16.msra.mxu1 %v12059_v16  ;;  %v3795_v2 = vld [vmem:[%s14830_s3 + $0x320] sm:$0xff] }
 0x33f   :  { %3583 = vmatprep.subr.bf16.mxu0 %v12063_v7  ;;  %3624 = vmatprep.subr.bf16.mxu1 %v12065_v43  ;;  %v3703_v43 = vld [vmem:[%s14830_s3 + $0x40] sm:$0xff] }
 0x342   :  { %3584 = vmatpush1.bf16.msra.mxu0 %v12081_v11  ;;  %3625 = vmatpush1.bf16.msra.mxu1 %v12083_v0  ;;  %v3711_v11 = vld [vmem:[%s14830_s3 + $0x80] sm:$0xff] }
 0x343   :  { %3585 = vmatprep.subr.bf16.mxu0 %v12087_v8  ;;  %3626 = vmatprep.subr.bf16.mxu1 %v12089_v29  ;;  %v3695_v8 = vld [vmem:[%s14830_s3] sm:$0xff] }
 0x344   :  { %v3699_v29 = vld [vmem:[%s14830_s3 + $0x20] sm:$0xff] }
 0x345   :  { %v12430_v7 = vcombine.low %v3695_v8, %v3699_v29  ;;  %v3715_v0 = vld [vmem:[%s14830_s3 + $0xa0] sm:$0xff] }
 0x346   :  { %3586 = vmatpush1.bf16.msra.mxu0 %v12093_v3  ;;  %3627 = vmatpush1.bf16.msra.mxu1 %v12095_v24  ;;  %v12432_v3 = vcombine.high %v3695_v8, %v3699_v29  ;;  %v3707_v24 = vld [vmem:[%s14830_s3 + $0x60] sm:$0xff]  ;;  %v3792_v8 = vld [vmem:[%s14830_s3 + $0x308] sm:$0xff]  ;;  %v12598_v29 = vcombine.high %v3791_v53, %v3795_v2 }
 0x347   :  { %4504 = vmatprep.subr.bf16.mxu1 %v12137_v20  ;;  %v12437_v16 = vcombine.high %v3703_v43, %v3707_v24  ;;  %v12450_v20 = vcombine.high %v3711_v11, %v3715_v0 }
 0x348   :  { %4463 = vmatprep.subr.bf16.mxu0 %v12432_v3 }
 0x349   :  { %3588 = vmatmul.mubr.bf16.vlgmr.msra.gmra.mrb[36].mxu0 %v12333_v36  ;;  %3629 = vmatmul.mubr.bf16.vlgmr.msra.gmra.mrb[68].mxu1 %v12333_v36 }
 0x34a   :  { %4505 = vmatpush1.bf16.msra.mxu1 %v12135_v45  ;;  %4464 = vmatpush1.bf16.msra.mxu0 %v12430_v7  ;;  %v12447_v45 = vcombine.low %v3703_v43, %v3707_v24  ;;  %v3796_v43 = vld [vmem:[%s14830_s3 + $0x328] sm:$0xff]  ;;  %v12603_v24 = vcombine.low %v3791_v53, %v3795_v2  ;;  %v15179_v2 = vld [vmem:[#allocation7_spill] sm:$0xff] }
 0x34b   :  { %4506 = vmatprep.subr.bf16.mxu1 %v12142_v37  ;;  %4465 = vmatprep.subr.bf16.mxu0 %v12437_v16  ;;  %v3719_v37 = vld [vmem:[%s14830_s3 + $0xc0] sm:$0xff] }
 0x34e   :  { %4507 = vmatpush1.bf16.msra.mxu1 %v12153_v5  ;;  %v3723_v5 = vld [vmem:[%s14830_s3 + $0xe0] sm:$0xff]  ;;  %4466 = vmatpush1.bf16.msra.mxu0 %v12447_v45 }
 0x34f   :  { %4508 = vmatprep.subr.bf16.mxu1 %v12156_v35  ;;  %v12459_v35 = vcombine.low %v3711_v11, %v3715_v0  ;;  %4467 = vmatprep.subr.bf16.mxu0 %v12450_v20  ;;  %v12605_v11 = vcombine.low %v3792_v8, %v3796_v43  ;;  %v12607_v0 = vcombine.high %v3792_v8, %v3796_v43  ;;  %v15180_v43 = vld [vmem:[#allocation34_spill] sm:$0xff] }
 0x351   :  { %15171 = vst [vmem:[#allocation5_spill] sm:$0xff] %v12605_v11  ;;  %15172 = vst [vmem:[#allocation33_spill] sm:$0xff] %v12607_v0 }
 0x352   :  { %4509 = vmatpush1.bf16.msra.mxu1 %v12167_v56  ;;  %v12462_v56 = vcombine.high %v3719_v37, %v3723_v5  ;;  %4468 = vmatpush1.bf16.msra.mxu0 %v12459_v35 }
 0x353   :  { %4510 = vmatprep.subr.bf16.mxu1 %v12171_v4  ;;  %v3727_v4 = vld [vmem:[%s14830_s3 + $0x100] sm:$0xff] }
 0x354   :  { %4469 = vmatprep.subr.bf16.mxu0 %v12462_v56 }
 0x356   :  { %4511 = vmatpush1.bf16.msra.mxu1 %v12181_v17  ;;  %v3731_v17 = vld [vmem:[%s14830_s3 + $0x120] sm:$0xff] }
 0x357   :  { %4512 = vmatprep.subr.bf16.mxu1 %v12185_v41  ;;  %v12471_v41 = vcombine.low %v3719_v37, %v3723_v5  ;;  %v3799_v37 = vld [vmem:[%s14830_s3 + $0x340] sm:$0xff] }
 0x358   :  { %v3803_v5 = vld [vmem:[%s14830_s3 + $0x360] sm:$0xff] }
 0x359   :  { %4470 = vmatpush1.bf16.msra.mxu0 %v12471_v41 }
 0x35a   :  { %4513 = vmatpush1.bf16.msra.mxu1 %v12195_v47  ;;  %v12474_v47 = vcombine.high %v3727_v4, %v3731_v17 }
 0x35b   :  { %4514 = vmatprep.subr.bf16.mxu1 %v12199_v33  ;;  %v3735_v33 = vld [vmem:[%s14830_s3 + $0x140] sm:$0xff] }
 0x35c   :  { %4471 = vmatprep.subr.bf16.mxu0 %v12474_v47 }
 0x35e   :  { %4515 = vmatpush1.bf16.msra.mxu1 %v12209_v40  ;;  %v3739_v40 = vld [vmem:[%s14830_s3 + $0x160] sm:$0xff] }
 0x35f   :  { %4516 = vmatprep.subr.bf16.mxu1 %v12213_v23  ;;  %v12483_v23 = vcombine.low %v3727_v4, %v3731_v17  ;;  %v12619_v4 = vcombine.high %v3799_v37, %v3803_v5  ;;  %v12621_v17 = vcombine.low %v3799_v37, %v3803_v5 }
 0x361   :  { %4472 = vmatpush1.bf16.msra.mxu0 %v12483_v23 }
 0x362   :  { %4517 = vmatpush1.bf16.msra.mxu1 %v12222_v30  ;;  %v12486_v30 = vcombine.high %v3735_v33, %v3739_v40 }
 0x363   :  { %4518 = vmatprep.subr.bf16.mxu1 %v12225_v42  ;;  %v3743_v42 = vld [vmem:[%s14830_s3 + $0x180] sm:$0xff] }
 0x364   :  { %4473 = vmatprep.subr.bf16.mxu0 %v12486_v30 }
 0x366   :  { %4519 = vmatpush1.bf16.msra.mxu1 %v12228_v49  ;;  %v3747_v49 = vld [vmem:[%s14830_s3 + $0x1a0] sm:$0xff] }
 0x367   :  { %4520 = vmatprep.subr.bf16.mxu1 %v12238_v51  ;;  %v12495_v51 = vcombine.low %v3735_v33, %v3739_v40  ;;  %v12507_v36 = vcombine.low %v3743_v42, %v3747_v49  ;;  %v3807_v33 = vld [vmem:[%s14830_s3 + $0x380] sm:$0xff] }
 0x368   :  { %v3811_v40 = vld [vmem:[%s14830_s3 + $0x3a0] sm:$0xff] }
 0x369   :  { %4474 = vmatpush1.bf16.msra.mxu0 %v12495_v51 }
 0x36a   :  { %4521 = vmatpush1.bf16.msra.mxu1 %v12240_v1  ;;  %v12498_v1 = vcombine.high %v3743_v42, %v3747_v49  ;;  %v15173_v42 = vld [vmem:[#allocation48_spill] sm:$0xff]  ;;  %v12633_v49 = vcombine.high %v3807_v33, %v3811_v40 }
 0x36b   :  { %4522 = vmatprep.subr.bf16.mxu1 %v12250_v48  ;;  %v3751_v48 = vld [vmem:[%s14830_s3 + $0x1c0] sm:$0xff] }
 0x36c   :  { %4475 = vmatprep.subr.bf16.mxu0 %v12498_v1 }
 0x36d   :  { %4476 = vmatpush1.bf16.msra.mxu0 %v12507_v36 }
 0x36e   :  { %4523 = vmatpush1.bf16.msra.mxu1 %v12252_v62  ;;  %v3755_v62 = vld [vmem:[%s14830_s3 + $0x1e0] sm:$0xff] }
 0x36f   :  { %v12510_v26 = vcombine.high %v3751_v48, %v3755_v62  ;;  %v12513_v10 = vcombine.low %v3751_v48, %v3755_v62  ;;  %4524 = vmatprep.subr.bf16.mxu1 %v12559_v59  ;;  %v12635_v48 = vcombine.low %v3807_v33, %v3811_v40  ;;  %v15174_v62 = vld [vmem:[#allocation52_spill] sm:$0xff]  ;;  %v15181_v40 = vld [vmem:[#allocation9_spill] sm:$0xff] }
 0x371   :  { %4477 = vmatprep.subr.bf16.mxu0 %v12510_v26 }
 0x372   :  { %4478 = vmatpush1.bf16.msra.mxu0 %v12513_v10  ;;  %4525 = vmatpush1.bf16.msra.mxu1 %v12557_v18 }
 0x373   :  { %4479 = vmatprep.subr.bf16.mxu0 %v12523_v34  ;;  %4526 = vmatprep.subr.bf16.mxu1 %v12583_v25 }
 0x376   :  { %4480 = vmatpush1.bf16.msra.mxu0 %v12525_v38  ;;  %4527 = vmatpush1.bf16.msra.mxu1 %v12581_v12 }
 0x377   :  { %4481 = vmatprep.subr.bf16.mxu0 %v12535_v22  ;;  %4528 = vmatprep.subr.bf16.mxu1 %v12607_v0 }
 0x37a   :  { %4482 = vmatpush1.bf16.msra.mxu0 %v12537_v19  ;;  %4529 = vmatpush1.bf16.msra.mxu1 %v12605_v11 }
 0x37b   :  { %4483 = vmatprep.subr.bf16.mxu0 %v12550_v52  ;;  %4530 = vmatprep.subr.bf16.mxu1 %v12268_v63  ;;  %v3815_v63 = vld [vmem:[%s14830_s3 + $0x3c0] sm:$0xff] }
 0x37c   :  { %v12647_v39 = vcombine.high %v3815_v63, %v3819_v21  ;;  %v12649_v44 = vcombine.low %v3815_v63, %v3819_v21 }
 0x37e   :  { %4484 = vmatpush1.bf16.msra.mxu0 %v12555_v31  ;;  %4531 = vmatpush1.bf16.msra.mxu1 %v15173_v42 }
 0x37f   :  { %4485 = vmatprep.subr.bf16.mxu0 %v12574_v55  ;;  %4532 = vmatprep.subr.bf16.mxu1 %v15174_v62  ;;  %v15182_v62 = vld [vmem:[#allocation35_spill] sm:$0xff] }
 0x382   :  { %4486 = vmatpush1.bf16.msra.mxu0 %v12579_v57  ;;  %4533 = vmatpush1.bf16.msra.mxu1 %v15175_v6 }
 0x383   :  { %4487 = vmatprep.subr.bf16.mxu0 %v12598_v29  ;;  %4534 = vmatprep.subr.bf16.mxu1 %v15176_v60 }
 0x386   :  { %4488 = vmatpush1.bf16.msra.mxu0 %v12603_v24  ;;  %4535 = vmatpush1.bf16.msra.mxu1 %v15177_v28 }
 0x387   :  { %4489 = vmatprep.subr.bf16.mxu0 %v12619_v4  ;;  %4586 = vmatprep.subr.bf16.mxu1 %v15178_v61 }
 0x38a   :  { %4490 = vmatpush1.bf16.msra.mxu0 %v12621_v17 }
 0x38b   :  { %4491 = vmatprep.subr.bf16.mxu0 %v12633_v49 }
 0x38e   :  { %4492 = vmatpush1.bf16.msra.mxu0 %v12635_v48 }
 0x38f   :  { %4493 = vmatprep.subr.bf16.mxu0 %v12647_v39 }
 0x392   :  { %4494 = vmatpush1.bf16.msra.mxu0 %v12649_v44 }
 0x393   :  { %4545 = vmatprep.subr.bf16.mxu0 %v12661_v32 }
 0x3dc   :  { %v3507_v14 = vpop.f32.mrb[32].mxu0  ;;  %v3548_v53 = vpop.f32.mrb[64].mxu1 }
 0x3dd   :  { %v3637_v8 = vadd.f32 %v3507_v14, %v15179_v2  ;;  %v3639_v37 = vadd.f32 %v3548_v53, %v15180_v43  ;;  %v3509_v5 = vpop.f32.mrb[33].mxu0  ;;  %v3550_v33 = vpop.f32.mrb[65].mxu1  ;;  %v15183_v2 = vld [vmem:[#allocation10_spill] sm:$0xff] }
 0x3de   :  { %v3638_v42 = vadd.f32 %v3509_v5, %v15181_v40  ;;  %v3640_v63 = vadd.f32 %v3550_v33, %v15182_v62  ;;  %v3511_v21 = vpop.f32.mrb[34].mxu0  ;;  %v3552_v6 = vpop.f32.mrb[66].mxu1  ;;  %v15185_v62 = vld [vmem:[#allocation12_spill] sm:$0xff] }
 0x3df   :  { %v3512_v60 = vpop.f32.mrb[35].mxu0  ;;  %v3553_v54 = vpop.f32.mrb[67].mxu1  ;;  %v3653_v27 = vmul.f32 0.5, %v3639_v37  ;;  %v3645_v61 = vmul.f32 0.5, %v3637_v8  ;;  %v15186_v6 = vld [vmem:[#allocation50_spill] sm:$0xff] }
 0x3e0   :  { %v3654_v28 = vmul.f32 0.5, %v3640_v63  ;;  %v3646_v9 = vmul.f32 0.5, %v3638_v42 }
 0x3e1   :  { %10089 = vtanh.f32 %v3653_v27 }
 0x3e2   :  { %10091 = vtanh.f32 %v3654_v28 }
 0x3e3   :  { %10093 = vtanh.f32 %v3645_v61 }
 0x3e4   :  { %10095 = vtanh.f32 %v3646_v9 }
 0x3eb   :  { %v10090_v8 = vpop.eup %10089 }
 0x3ec   :  { %v10092_v27 = vpop.eup %10091  ;;  %v3657_v61 = vmul.f32 0.5, %v10090_v8 }
 0x3ed   :  { %v10094_v9 = vpop.eup %10093 }
 0x3ee   :  { %v10096_v28 = vpop.eup %10095  ;;  %v3659_v0 = vadd.f32 0.5, %v3657_v61 }
 0x3ef   :  { %v3650_v11 = vmul.f32 0.5, %v10096_v28 }
 0x41c   :  { %v3589_v14 = vpop.f32.mrb[36].mxu0  ;;  %v3630_v53 = vpop.f32.mrb[68].mxu1 }
 0x41d   :  { %v3641_v43 = vadd.f32 %v3589_v14, %v15183_v2  ;;  %v3643_v5 = vadd.f32 %v3630_v53, %v15184_v50  ;;  %v3591_v40 = vpop.f32.mrb[37].mxu0  ;;  %v3632_v33 = vpop.f32.mrb[69].mxu1  ;;  %v3658_v2 = vmul.f32 0.5, %v10092_v27  ;;  %v3649_v53 = vmul.f32 0.5, %v10094_v9 }
 0x41e   :  { %v3642_v21 = vadd.f32 %v3591_v40, %v15185_v62  ;;  %v3644_v60 = vadd.f32 %v3632_v33, %v15186_v6  ;;  %v3593_v37 = vpop.f32.mrb[38].mxu0  ;;  %v3634_v63 = vpop.f32.mrb[70].mxu1  ;;  %v3652_v6 = vadd.f32 0.5, %v3650_v11 }
 0x41f   :  { %10097 = vtanh.f32 %v3641_v43  ;;  %v3594_v42 = vpop.f32.mrb[39].mxu0  ;;  %v3635_v54 = vpop.f32.mrb[71].mxu1  ;;  %v3663_v14 = vmul.f32 0.5, %v3643_v5  ;;  %v3660_v40 = vadd.f32 0.5, %v3658_v2  ;;  %v3651_v33 = vadd.f32 0.5, %v3649_v53  ;;  %v3709_v2 = vld [vmem:[%s14830_s3 + $0x70] sm:$0xff] }
 0x420   :  { %10099 = vtanh.f32 %v3642_v21  ;;  %v3664_v50 = vmul.f32 0.5, %v3644_v60  ;;  %v3671_v37 = vmul.f32 %v3659_v0, %v12319_v58  ;;  %v3710_v53 = vld [vmem:[%s14830_s3 + $0x78] sm:$0xff] }
 0x421   :  { %10101 = vtanh.f32 %v3663_v14  ;;  %v3672_v21 = vmul.f32 %v3660_v40, %v12321_v15  ;;  %v3705_v14 = vld [vmem:[%s14830_s3 + $0x50] sm:$0xff] }
 0x422   :  { %10103 = vtanh.f32 %v3664_v50  ;;  %v3706_v50 = vld [vmem:[%s14830_s3 + $0x58] sm:$0xff] }
 0x429   :  { %v10098_v62 = vpop.eup %10097 }
 0x42a   :  { %v10100_v43 = vpop.eup %10099  ;;  %v3673_v63 = vmul.f32 %v10098_v62, %v3651_v33  ;;  %v3713_v62 = vld [vmem:[%s14830_s3 + $0x90] sm:$0xff] }
 0x42b   :  { %v3674_v42 = vmul.f32 %v10100_v43, %v3652_v6  ;;  %v10102_v60 = vpop.eup %10101  ;;  %v12708_v6 = vcombine.high %v3705_v14, %v3709_v2  ;;  %v12710_v43 = vcombine.high %v3706_v50, %v3710_v53 }
 0x42c   :  { %v12677_v8 = vadd.f32 %v3673_v63, %v3671_v37  ;;  %v10104_v54 = vpop.eup %10103  ;;  %v3667_v27 = vmul.f32 0.5, %v10102_v60  ;;  %v3717_v37 = vld [vmem:[%s14830_s3 + $0xb0] sm:$0xff]  ;;  %v3714_v63 = vld [vmem:[%s14830_s3 + $0x98] sm:$0xff]  ;;  %v12727_v60 = vcombine.low %v3706_v50, %v3710_v53 }
 0x42d   :  { %v12679_v5 = vadd.f32 %v3674_v42, %v3672_v21  ;;  %v3668_v9 = vmul.f32 0.5, %v10104_v54  ;;  %v3718_v21 = vld [vmem:[%s14830_s3 + $0xb8] sm:$0xff]  ;;  %v12725_v42 = vcombine.low %v3705_v14, %v3709_v2  ;;  %v12729_v54 = vcombine.high %v3713_v62, %v3717_v37  ;;  %v3729_v50 = vld [vmem:[%s14830_s3 + $0x110] sm:$0xff] }
 0x42e   :  { %10105 = vtanh.f32 %v12677_v8  ;;  %v3669_v11 = vadd.f32 0.5, %v3667_v27  ;;  %v12731_v27 = vcombine.high %v3714_v63, %v3718_v21  ;;  %v3733_v53 = vld [vmem:[%s14830_s3 + $0x130] sm:$0xff] }
 0x42f   :  { %10107 = vtanh.f32 %v12679_v5  ;;  %v3670_v61 = vadd.f32 0.5, %v3668_v9  ;;  %v3721_v9 = vld [vmem:[%s14830_s3 + $0xd0] sm:$0xff] }
 0x438   :  { %v10106_v28 = vpop.eup %10105 }
 0x439   :  { %v10108_v58 = vpop.eup %10107  ;;  %v12683_v0 = vmul.f32 %v10106_v28, %v3669_v11  ;;  %v3722_v11 = vld [vmem:[%s14830_s3 + $0xd8] sm:$0xff] }
 0x43a   :  { %v12685_v15 = vmul.f32 %v10108_v58, %v3670_v61  ;;  %v3726_v28 = vld [vmem:[%s14830_s3 + $0xf8] sm:$0xff]  ;;  %v12749_v61 = vcombine.low %v3713_v62, %v3717_v37  ;;  %v12751_v58 = vcombine.low %v3714_v63, %v3718_v21  ;;  %v12779_v21 = vcombine.high %v3729_v50, %v3733_v53 }
 0x43b   :  { %15187 = vst [vmem:[#allocation6_spill] sm:$0xff] %v12683_v0  ;;  %v12703_v33 = vpack.c.bf16 %v12683_v0, %v12683_v0  ;;  %v12757_v2 = vcombine.high %v3722_v11, %v3726_v28  ;;  %v3734_v62 = vld [vmem:[%s14830_s3 + $0x138] sm:$0xff]  ;;  %v12775_v63 = vcombine.low %v3722_v11, %v3726_v28  ;;  %v12797_v11 = vcombine.low %v3729_v50, %v3733_v53 }
 0x43c   :  { %15188 = vst [vmem:[#allocation46_spill] sm:$0xff] %v12685_v15  ;;  %v3694_v40 = vpack.c.bf16 %v12685_v15, %v12685_v15  ;;  %15189 = vst [vmem:[#allocation8_spill] sm:$0xff] %v12749_v61  ;;  %v3737_v15 = vld [vmem:[%s14830_s3 + $0x150] sm:$0xff]  ;;  %v3746_v50 = vld [vmem:[%s14830_s3 + $0x198] sm:$0xff] }
 0x43d   :  { %15190 = vst [vmem:[#allocation47_spill] sm:$0xff] %v12751_v58  ;;  %15192 = vst [vmem:[#allocation66_spill] sm:$0xff] %v12757_v2  ;;  %v3750_v53 = vld [vmem:[%s14830_s3 + $0x1b8] sm:$0xff] }
 0x43e   :  { %4495 = vmatprep.mubr.bf16.mxu0 %v3694_v40  ;;  %4536 = vmatprep.mubr.bf16.mxu1 %v3694_v40  ;;  %15194 = vst [vmem:[#allocation68_spill] sm:$0xff] %v12775_v63  ;;  %15195 = vst [vmem:[#allocation69_spill] sm:$0xff] %v12779_v21 }
 0x43f   :  { %4496 = vmatmul.mubr.bf16.vlgmr.msra.gmra.mrb[40].mxu0 %v12703_v33  ;;  %4537 = vmatmul.mubr.bf16.vlgmr.msra.gmra.mrb[72].mxu1 %v12703_v33  ;;  %15197 = vst [vmem:[#allocation71_spill] sm:$0xff] %v12797_v11 }
 0x440   :  { %4546 = vmatpush1.bf16.msra.mxu0 %v12663_v46  ;;  %4587 = vmatpush1.bf16.msra.mxu1 %v12304_v13  ;;  %v3725_v13 = vld [vmem:[%s14830_s3 + $0xf0] sm:$0xff] }
 0x441   :  { %4577 = vmatprep.mubr.bf16.mxu0 %v3694_v40  ;;  %4618 = vmatprep.mubr.bf16.mxu1 %v3694_v40  ;;  %v12755_v14 = vcombine.high %v3721_v9, %v3725_v13  ;;  %v3730_v40 = vld [vmem:[%s14830_s3 + $0x118] sm:$0xff]  ;;  %v12773_v37 = vcombine.low %v3721_v9, %v3725_v13 }
 0x442   :  { %4547 = vmatprep.subr.bf16.mxu0 %v12708_v6  ;;  %4588 = vmatprep.subr.bf16.mxu1 %v12710_v43  ;;  %v12781_v0 = vcombine.high %v3730_v40, %v3734_v62  ;;  %v3738_v9 = vld [vmem:[%s14830_s3 + $0x158] sm:$0xff]  ;;  %v12799_v28 = vcombine.low %v3730_v40, %v3734_v62 }
 0x443   :  { %15191 = vst [vmem:[#allocation65_spill] sm:$0xff] %v12755_v14  ;;  %15193 = vst [vmem:[#allocation67_spill] sm:$0xff] %v12773_v37  ;;  %v3742_v13 = vld [vmem:[%s14830_s3 + $0x178] sm:$0xff] }
 0x444   :  { %4548 = vmatpush1.bf16.msra.mxu0 %v12725_v42  ;;  %4589 = vmatpush1.bf16.msra.mxu1 %v12727_v60  ;;  %15196 = vst [vmem:[#allocation70_spill] sm:$0xff] %v12781_v0  ;;  %15198 = vst [vmem:[#allocation72_spill] sm:$0xff] %v12799_v28  ;;  %v12823_v62 = vcombine.low %v3738_v9, %v3742_v13 }
 0x445   :  { %4549 = vmatprep.subr.bf16.mxu0 %v12729_v54  ;;  %4590 = vmatprep.subr.bf16.mxu1 %v12731_v27 }
 0x446   :  { %15202 = vst [vmem:[#allocation76_spill] sm:$0xff] %v12823_v62 }
 0x448   :  { %4550 = vmatpush1.bf16.msra.mxu0 %v12749_v61  ;;  %4591 = vmatpush1.bf16.msra.mxu1 %v12751_v58  ;;  %v3741_v58 = vld [vmem:[%s14830_s3 + $0x170] sm:$0xff] }
 0x449   :  { %4551 = vmatprep.subr.bf16.mxu0 %v12755_v14  ;;  %4592 = vmatprep.subr.bf16.mxu1 %v12757_v2  ;;  %v12803_v2 = vcombine.high %v3737_v15, %v3741_v58  ;;  %v12805_v14 = vcombine.high %v3738_v9, %v3742_v13  ;;  %v3745_v61 = vld [vmem:[%s14830_s3 + $0x190] sm:$0xff]  ;;  %v12821_v40 = vcombine.low %v3737_v15, %v3741_v58  ;;  %v3754_v15 = vld [vmem:[%s14830_s3 + $0x1d8] sm:$0xff] }
 0x44a   :  { %v3758_v58 = vld [vmem:[%s14830_s3 + $0x1f8] sm:$0xff]  ;;  %v12847_v13 = vcombine.low %v3746_v50, %v3750_v53 }
 0x44b   :  { %15199 = vst [vmem:[#allocation73_spill] sm:$0xff] %v12803_v2  ;;  %15200 = vst [vmem:[#allocation74_spill] sm:$0xff] %v12805_v14 }
 0x44c   :  { %4552 = vmatpush1.bf16.msra.mxu0 %v12773_v37  ;;  %4593 = vmatpush1.bf16.msra.mxu1 %v12775_v63  ;;  %v3749_v63 = vld [vmem:[%s14830_s3 + $0x1b0] sm:$0xff]  ;;  %15201 = vst [vmem:[#allocation75_spill] sm:$0xff] %v12821_v40  ;;  %15206 = vst [vmem:[#allocation80_spill] sm:$0xff] %v12847_v13 }
 0x44d   :  { %4553 = vmatprep.subr.bf16.mxu0 %v12779_v21  ;;  %4594 = vmatprep.subr.bf16.mxu1 %v12781_v0  ;;  %v12827_v0 = vcombine.high %v3745_v61, %v3749_v63  ;;  %v12829_v21 = vcombine.high %v3746_v50, %v3750_v53  ;;  %v3753_v37 = vld [vmem:[%s14830_s3 + $0x1d0] sm:$0xff]  ;;  %v12845_v9 = vcombine.low %v3745_v61, %v3749_v63  ;;  %v3762_v61 = vld [vmem:[%s14830_s3 + $0x218] sm:$0xff] }
 0x44e   :  { %v3766_v63 = vld [vmem:[%s14830_s3 + $0x238] sm:$0xff]  ;;  %v12871_v53 = vcombine.low %v3754_v15, %v3758_v58 }
 0x44f   :  { %15203 = vst [vmem:[#allocation77_spill] sm:$0xff] %v12827_v0  ;;  %15204 = vst [vmem:[#allocation78_spill] sm:$0xff] %v12829_v21 }
 0x450   :  { %4554 = vmatpush1.bf16.msra.mxu0 %v12797_v11  ;;  %4595 = vmatpush1.bf16.msra.mxu1 %v12799_v28  ;;  %v3757_v28 = vld [vmem:[%s14830_s3 + $0x1f0] sm:$0xff]  ;;  %15205 = vst [vmem:[#allocation79_spill] sm:$0xff] %v12845_v9  ;;  %15210 = vst [vmem:[#allocation84_spill] sm:$0xff] %v12871_v53 }
 0x451   :  { %4555 = vmatprep.subr.bf16.mxu0 %v12803_v2  ;;  %4596 = vmatprep.subr.bf16.mxu1 %v12805_v14  ;;  %v12851_v14 = vcombine.high %v3753_v37, %v3757_v28  ;;  %v12853_v2 = vcombine.high %v3754_v15, %v3758_v58  ;;  %v3761_v11 = vld [vmem:[%s14830_s3 + $0x210] sm:$0xff]  ;;  %v12869_v50 = vcombine.low %v3753_v37, %v3757_v28  ;;  %v3770_v37 = vld [vmem:[%s14830_s3 + $0x258] sm:$0xff] }
 0x452   :  { %v3774_v28 = vld [vmem:[%s14830_s3 + $0x278] sm:$0xff]  ;;  %v12895_v58 = vcombine.low %v3762_v61, %v3766_v63 }
 0x453   :  { %15207 = vst [vmem:[#allocation81_spill] sm:$0xff] %v12851_v14  ;;  %15208 = vst [vmem:[#allocation82_spill] sm:$0xff] %v12853_v2 }
 0x454   :  { %4556 = vmatpush1.bf16.msra.mxu0 %v12821_v40  ;;  %4597 = vmatpush1.bf16.msra.mxu1 %v12823_v62  ;;  %v3765_v62 = vld [vmem:[%s14830_s3 + $0x230] sm:$0xff]  ;;  %15209 = vst [vmem:[#allocation83_spill] sm:$0xff] %v12869_v50  ;;  %15214 = vst [vmem:[#allocation88_spill] sm:$0xff] %v12895_v58 }
 0x455   :  { %4557 = vmatprep.subr.bf16.mxu0 %v12827_v0  ;;  %4598 = vmatprep.subr.bf16.mxu1 %v12829_v21  ;;  %v12875_v21 = vcombine.high %v3761_v11, %v3765_v62  ;;  %v12877_v0 = vcombine.high %v3762_v61, %v3766_v63  ;;  %v3769_v40 = vld [vmem:[%s14830_s3 + $0x250] sm:$0xff]  ;;  %v12893_v15 = vcombine.low %v3761_v11, %v3765_v62  ;;  %v3778_v11 = vld [vmem:[%s14830_s3 + $0x298] sm:$0xff] }
 0x456   :  { %v3782_v62 = vld [vmem:[%s14830_s3 + $0x2b8] sm:$0xff]  ;;  %v12919_v63 = vcombine.low %v3770_v37, %v3774_v28 }
 0x457   :  { %15211 = vst [vmem:[#allocation85_spill] sm:$0xff] %v12875_v21  ;;  %15212 = vst [vmem:[#allocation86_spill] sm:$0xff] %v12877_v0 }
 0x458   :  { %4558 = vmatpush1.bf16.msra.mxu0 %v12845_v9  ;;  %4599 = vmatpush1.bf16.msra.mxu1 %v12847_v13  ;;  %v3773_v13 = vld [vmem:[%s14830_s3 + $0x270] sm:$0xff]  ;;  %15213 = vst [vmem:[#allocation87_spill] sm:$0xff] %v12893_v15  ;;  %15218 = vst [vmem:[#allocation92_spill] sm:$0xff] %v12919_v63 }
 0x459   :  { %4559 = vmatprep.subr.bf16.mxu0 %v12851_v14  ;;  %4600 = vmatprep.subr.bf16.mxu1 %v12853_v2  ;;  %v12899_v2 = vcombine.high %v3769_v40, %v3773_v13  ;;  %v12901_v14 = vcombine.high %v3770_v37, %v3774_v28  ;;  %v3777_v9 = vld [vmem:[%s14830_s3 + $0x290] sm:$0xff]  ;;  %v12917_v61 = vcombine.low %v3769_v40, %v3773_v13  ;;  %v3786_v40 = vld [vmem:[%s14830_s3 + $0x2d8] sm:$0xff] }
 0x45a   :  { %v3790_v13 = vld [vmem:[%s14830_s3 + $0x2f8] sm:$0xff]  ;;  %v12943_v28 = vcombine.low %v3778_v11, %v3782_v62 }
 0x45b   :  { %15215 = vst [vmem:[#allocation89_spill] sm:$0xff] %v12899_v2  ;;  %15216 = vst [vmem:[#allocation90_spill] sm:$0xff] %v12901_v14 }
 0x45c   :  { %4560 = vmatpush1.bf16.msra.mxu0 %v12869_v50  ;;  %4601 = vmatpush1.bf16.msra.mxu1 %v12871_v53  ;;  %v3781_v53 = vld [vmem:[%s14830_s3 + $0x2b0] sm:$0xff]  ;;  %15217 = vst [vmem:[#allocation91_spill] sm:$0xff] %v12917_v61  ;;  %15222 = vst [vmem:[#allocation96_spill] sm:$0xff] %v12943_v28 }
 0x45d   :  { %4561 = vmatprep.subr.bf16.mxu0 %v12875_v21  ;;  %4602 = vmatprep.subr.bf16.mxu1 %v12877_v0  ;;  %v12923_v0 = vcombine.high %v3777_v9, %v3781_v53  ;;  %v12925_v21 = vcombine.high %v3778_v11, %v3782_v62  ;;  %v3785_v50 = vld [vmem:[%s14830_s3 + $0x2d0] sm:$0xff]  ;;  %v12941_v37 = vcombine.low %v3777_v9, %v3781_v53  ;;  %v3794_v9 = vld [vmem:[%s14830_s3 + $0x318] sm:$0xff] }
 0x45e   :  { %v3798_v53 = vld [vmem:[%s14830_s3 + $0x338] sm:$0xff]  ;;  %v12967_v62 = vcombine.low %v3786_v40, %v3790_v13 }
 0x45f   :  { %15219 = vst [vmem:[#allocation93_spill] sm:$0xff] %v12923_v0  ;;  %15220 = vst [vmem:[#allocation94_spill] sm:$0xff] %v12925_v21 }
 0x460   :  { %4562 = vmatpush1.bf16.msra.mxu0 %v12893_v15  ;;  %4603 = vmatpush1.bf16.msra.mxu1 %v12895_v58  ;;  %v3789_v58 = vld [vmem:[%s14830_s3 + $0x2f0] sm:$0xff]  ;;  %15221 = vst [vmem:[#allocation95_spill] sm:$0xff] %v12941_v37  ;;  %15226 = vst [vmem:[#allocation100_spill] sm:$0xff] %v12967_v62 }
 0x461   :  { %4563 = vmatprep.subr.bf16.mxu0 %v12899_v2  ;;  %4604 = vmatprep.subr.bf16.mxu1 %v12901_v14  ;;  %v12947_v14 = vcombine.high %v3785_v50, %v3789_v58  ;;  %v12949_v2 = vcombine.high %v3786_v40, %v3790_v13  ;;  %v3793_v15 = vld [vmem:[%s14830_s3 + $0x310] sm:$0xff]  ;;  %v12965_v11 = vcombine.low %v3785_v50, %v3789_v58  ;;  %v3802_v50 = vld [vmem:[%s14830_s3 + $0x358] sm:$0xff] }
 0x462   :  { %v3806_v58 = vld [vmem:[%s14830_s3 + $0x378] sm:$0xff]  ;;  %v12991_v13 = vcombine.low %v3794_v9, %v3798_v53 }
 0x463   :  { %15223 = vst [vmem:[#allocation97_spill] sm:$0xff] %v12947_v14  ;;  %15224 = vst [vmem:[#allocation98_spill] sm:$0xff] %v12949_v2 }
 0x464   :  { %4564 = vmatpush1.bf16.msra.mxu0 %v12917_v61  ;;  %4605 = vmatpush1.bf16.msra.mxu1 %v12919_v63  ;;  %v3797_v63 = vld [vmem:[%s14830_s3 + $0x330] sm:$0xff]  ;;  %15225 = vst [vmem:[#allocation99_spill] sm:$0xff] %v12965_v11  ;;  %15230 = vst [vmem:[#allocation104_spill] sm:$0xff] %v12991_v13 }
 0x465   :  { %4565 = vmatprep.subr.bf16.mxu0 %v12923_v0  ;;  %4606 = vmatprep.subr.bf16.mxu1 %v12925_v21  ;;  %v12971_v21 = vcombine.high %v3793_v15, %v3797_v63  ;;  %v12973_v0 = vcombine.high %v3794_v9, %v3798_v53  ;;  %v3801_v61 = vld [vmem:[%s14830_s3 + $0x350] sm:$0xff]  ;;  %v12989_v40 = vcombine.low %v3793_v15, %v3797_v63  ;;  %v3810_v15 = vld [vmem:[%s14830_s3 + $0x398] sm:$0xff] }
 0x466   :  { %v3814_v63 = vld [vmem:[%s14830_s3 + $0x3b8] sm:$0xff]  ;;  %v13015_v53 = vcombine.low %v3802_v50, %v3806_v58 }
 0x467   :  { %15227 = vst [vmem:[#allocation101_spill] sm:$0xff] %v12971_v21  ;;  %15228 = vst [vmem:[#allocation102_spill] sm:$0xff] %v12973_v0 }
 0x468   :  { %4566 = vmatpush1.bf16.msra.mxu0 %v12941_v37  ;;  %4607 = vmatpush1.bf16.msra.mxu1 %v12943_v28  ;;  %v3805_v28 = vld [vmem:[%s14830_s3 + $0x370] sm:$0xff]  ;;  %15229 = vst [vmem:[#allocation103_spill] sm:$0xff] %v12989_v40 }
 0x469   :  { %4567 = vmatprep.subr.bf16.mxu0 %v12947_v14  ;;  %4608 = vmatprep.subr.bf16.mxu1 %v12949_v2  ;;  %v12995_v2 = vcombine.high %v3801_v61, %v3805_v28  ;;  %v12997_v14 = vcombine.high %v3802_v50, %v3806_v58  ;;  %v3809_v37 = vld [vmem:[%s14830_s3 + $0x390] sm:$0xff]  ;;  %v13013_v9 = vcombine.low %v3801_v61, %v3805_v28  ;;  %v3818_v61 = vld [vmem:[%s14830_s3 + $0x3d8] sm:$0xff] }
 0x46a   :  { %v3822_v28 = vld [vmem:[%s14830_s3 + $0x3f8] sm:$0xff]  ;;  %v13039_v58 = vcombine.low %v3810_v15, %v3814_v63 }
 0x46b   :  { %15231 = vst [vmem:[#allocation105_spill] sm:$0xff] %v12995_v2  ;;  %15232 = vst [vmem:[#allocation106_spill] sm:$0xff] %v12997_v14 }
 0x46c   :  { %4568 = vmatpush1.bf16.msra.mxu0 %v12965_v11  ;;  %4609 = vmatpush1.bf16.msra.mxu1 %v12967_v62  ;;  %v3813_v62 = vld [vmem:[%s14830_s3 + $0x3b0] sm:$0xff]  ;;  %15233 = vst [vmem:[#allocation107_spill] sm:$0xff] %v13013_v9 }
 0x46d   :  { %4569 = vmatprep.subr.bf16.mxu0 %v12971_v21  ;;  %4610 = vmatprep.subr.bf16.mxu1 %v12973_v0  ;;  %v13019_v0 = vcombine.high %v3809_v37, %v3813_v62  ;;  %v13021_v21 = vcombine.high %v3810_v15, %v3814_v63  ;;  %v3817_v11 = vld [vmem:[%s14830_s3 + $0x3d0] sm:$0xff]  ;;  %v13037_v50 = vcombine.low %v3809_v37, %v3813_v62  ;;  %v4758_v62 = vld [vmem:[%s14830_s3 + $0x248] sm:$0xff] }
 0x470   :  { %4570 = vmatpush1.bf16.msra.mxu0 %v12989_v40  ;;  %4611 = vmatpush1.bf16.msra.mxu1 %v12991_v13  ;;  %v3821_v13 = vld [vmem:[%s14830_s3 + $0x3f0] sm:$0xff] }
 0x471   :  { %4571 = vmatprep.subr.bf16.mxu0 %v12995_v2  ;;  %4612 = vmatprep.subr.bf16.mxu1 %v12997_v14  ;;  %v13043_v14 = vcombine.high %v3817_v11, %v3821_v13  ;;  %v13045_v2 = vcombine.high %v3818_v61, %v3822_v28  ;;  %v13049_v40 = vcombine.low %v3817_v11, %v3821_v13  ;;  %v4762_v13 = vld [vmem:[%s14830_s3 + $0x268] sm:$0xff] }
 0x472   :  { %v13206_v15 = vcombine.high %v4758_v62, %v4762_v13  ;;  %v13208_v63 = vcombine.low %v4758_v62, %v4762_v13 }
 0x474   :  { %4572 = vmatpush1.bf16.msra.mxu0 %v13013_v9  ;;  %4613 = vmatpush1.bf16.msra.mxu1 %v13015_v53  ;;  %v13051_v9 = vcombine.low %v3818_v61, %v3822_v28  ;;  %v15234_v61 = vld [vmem:[#allocation33_spill] sm:$0xff] }
 0x475   :  { %4573 = vmatprep.subr.bf16.mxu0 %v13019_v0  ;;  %4614 = vmatprep.subr.bf16.mxu1 %v13021_v21  ;;  %v15235_v28 = vld [vmem:[#allocation5_spill] sm:$0xff] }
 0x478   :  { %4574 = vmatpush1.bf16.msra.mxu0 %v13037_v50  ;;  %4615 = vmatpush1.bf16.msra.mxu1 %v13039_v58 }
 0x479   :  { %4575 = vmatprep.subr.bf16.mxu0 %v13043_v14  ;;  %4616 = vmatprep.subr.bf16.mxu1 %v13045_v2 }
 0x47c   :  { %4576 = vmatpush1.bf16.msra.mxu0 %v13049_v40  ;;  %4617 = vmatpush1.bf16.msra.mxu1 %v13051_v9 }
 0x47d   :  { %5453 = vmatprep.subr.bf16.mxu0 %v12432_v3  ;;  %v4690_v3 = vld [vmem:[%s14830_s3 + $0x28] sm:$0xff] }
 0x47f   :  { %4578 = vmatmul.mubr.bf16.vlgmr.msra.gmra.mrb[44].mxu0 %v12703_v33  ;;  %4619 = vmatmul.mubr.bf16.vlgmr.msra.gmra.mrb[76].mxu1 %v12703_v33  ;;  %v4754_v33 = vld [vmem:[%s14830_s3 + $0x228] sm:$0xff] }
 0x480   :  { %5454 = vmatpush1.bf16.msra.mxu0 %v12430_v7  ;;  %v4686_v7 = vld [vmem:[%s14830_s3 + $0x8] sm:$0xff] }
 0x481   :  { %5455 = vmatprep.subr.bf16.mxu0 %v12437_v16  ;;  %v4694_v16 = vld [vmem:[%s14830_s3 + $0x48] sm:$0xff] }
 0x484   :  { %5456 = vmatpush1.bf16.msra.mxu0 %v12447_v45  ;;  %v13091_v45 = vcombine.low %v4686_v7, %v4690_v3 }
 0x485   :  { %5457 = vmatprep.subr.bf16.mxu0 %v12450_v20  ;;  %v13093_v20 = vcombine.high %v4686_v7, %v4690_v3  ;;  %v4790_v7 = vld [vmem:[%s14830_s3 + $0x348] sm:$0xff] }
 0x486   :  { %v4794_v3 = vld [vmem:[%s14830_s3 + $0x368] sm:$0xff] }
 0x487   :  { %5494 = vmatprep.subr.bf16.mxu1 %v13093_v20 }
 0x488   :  { %5458 = vmatpush1.bf16.msra.mxu0 %v12459_v35  ;;  %v4698_v35 = vld [vmem:[%s14830_s3 + $0x68] sm:$0xff]  ;;  %5495 = vmatpush1.bf16.msra.mxu1 %v13091_v45 }
 0x489   :  { %5459 = vmatprep.subr.bf16.mxu0 %v12462_v56  ;;  %v13098_v56 = vcombine.high %v4694_v16, %v4698_v35 }
 0x48b   :  { %5496 = vmatprep.subr.bf16.mxu1 %v13098_v56 }
 0x48c   :  { %5460 = vmatpush1.bf16.msra.mxu0 %v12471_v41  ;;  %v4702_v41 = vld [vmem:[%s14830_s3 + $0x88] sm:$0xff] }
 0x48d   :  { %5461 = vmatprep.subr.bf16.mxu0 %v12474_v47  ;;  %v4706_v47 = vld [vmem:[%s14830_s3 + $0xa8] sm:$0xff] }
 0x490   :  { %5462 = vmatpush1.bf16.msra.mxu0 %v12483_v23  ;;  %v13109_v23 = vcombine.low %v4694_v16, %v4698_v35  ;;  %v13224_v16 = vcombine.high %v4790_v7, %v4794_v3 }
 0x491   :  { %5463 = vmatprep.subr.bf16.mxu0 %v12486_v30  ;;  %v13112_v30 = vcombine.high %v4702_v41, %v4706_v47 }
 0x492   :  { %5497 = vmatpush1.bf16.msra.mxu1 %v13109_v23 }
 0x493   :  { %5498 = vmatprep.subr.bf16.mxu1 %v13112_v30 }
 0x494   :  { %5464 = vmatpush1.bf16.msra.mxu0 %v12495_v51  ;;  %v4710_v51 = vld [vmem:[%s14830_s3 + $0xc8] sm:$0xff] }
 0x495   :  { %5465 = vmatprep.subr.bf16.mxu0 %v12498_v1  ;;  %v4714_v1 = vld [vmem:[%s14830_s3 + $0xe8] sm:$0xff] }
 0x498   :  { %5466 = vmatpush1.bf16.msra.mxu0 %v12507_v36  ;;  %v13123_v36 = vcombine.low %v4702_v41, %v4706_v47  ;;  %v4806_v41 = vld [vmem:[%s14830_s3 + $0x3c8] sm:$0xff] }
 0x499   :  { %5467 = vmatprep.subr.bf16.mxu0 %v12510_v26  ;;  %v13127_v26 = vcombine.high %v4710_v51, %v4714_v1  ;;  %v4810_v47 = vld [vmem:[%s14830_s3 + $0x3e8] sm:$0xff] }
 0x49a   :  { %5499 = vmatpush1.bf16.msra.mxu1 %v13123_v36 }
 0x49b   :  { %5500 = vmatprep.subr.bf16.mxu1 %v13127_v26 }
 0x49c   :  { %5468 = vmatpush1.bf16.msra.mxu0 %v12513_v10  ;;  %v4718_v10 = vld [vmem:[%s14830_s3 + $0x108] sm:$0xff] }
 0x49d   :  { %5469 = vmatprep.subr.bf16.mxu0 %v12523_v34  ;;  %v4722_v34 = vld [vmem:[%s14830_s3 + $0x128] sm:$0xff] }
 0x4a0   :  { %5470 = vmatpush1.bf16.msra.mxu0 %v12525_v38  ;;  %v13137_v38 = vcombine.low %v4710_v51, %v4714_v1  ;;  %v13248_v51 = vcombine.high %v4806_v41, %v4810_v47  ;;  %v13250_v1 = vcombine.low %v4806_v41, %v4810_v47 }
 0x4a1   :  { %5471 = vmatprep.subr.bf16.mxu0 %v12535_v22  ;;  %v13141_v22 = vcombine.high %v4718_v10, %v4722_v34 }
 0x4a2   :  { %5501 = vmatpush1.bf16.msra.mxu1 %v13137_v38  ;;  %15238 = vst [vmem:[#allocation52_spill] sm:$0xff] %v13248_v51  ;;  %15239 = vst [vmem:[#allocation51_spill] sm:$0xff] %v13250_v1 }
 0x4a3   :  { %5502 = vmatprep.subr.bf16.mxu1 %v13141_v22 }
 0x4a4   :  { %5472 = vmatpush1.bf16.msra.mxu0 %v12537_v19  ;;  %v4726_v19 = vld [vmem:[%s14830_s3 + $0x148] sm:$0xff] }
 0x4a5   :  { %5473 = vmatprep.subr.bf16.mxu0 %v12550_v52  ;;  %v4730_v52 = vld [vmem:[%s14830_s3 + $0x168] sm:$0xff] }
 0x4a8   :  { %5474 = vmatpush1.bf16.msra.mxu0 %v12555_v31  ;;  %v13151_v31 = vcombine.low %v4718_v10, %v4722_v34  ;;  %v4688_v10 = vld [vmem:[%s14830_s3 + $0x18] sm:$0xff] }
 0x4a9   :  { %5475 = vmatprep.subr.bf16.mxu0 %v12574_v55  ;;  %v13155_v55 = vcombine.high %v4726_v19, %v4730_v52  ;;  %v4692_v34 = vld [vmem:[%s14830_s3 + $0x38] sm:$0xff] }
 0x4aa   :  { %5503 = vmatpush1.bf16.msra.mxu1 %v13151_v31 }
 0x4ab   :  { %5504 = vmatprep.subr.bf16.mxu1 %v13155_v55 }
 0x4ac   :  { %5476 = vmatpush1.bf16.msra.mxu0 %v12579_v57  ;;  %v4734_v57 = vld [vmem:[%s14830_s3 + $0x188] sm:$0xff] }
 0x4ad   :  { %5477 = vmatprep.subr.bf16.mxu0 %v12598_v29  ;;  %v4738_v29 = vld [vmem:[%s14830_s3 + $0x1a8] sm:$0xff] }
 0x4b0   :  { %5478 = vmatpush1.bf16.msra.mxu0 %v12603_v24  ;;  %v13165_v24 = vcombine.low %v4726_v19, %v4730_v52  ;;  %v13260_v19 = vcombine.high %v4688_v10, %v4692_v34  ;;  %v13262_v52 = vcombine.low %v4688_v10, %v4692_v34 }
 0x4b1   :  { %5479 = vmatprep.subr.bf16.mxu0 %v12619_v4  ;;  %v13169_v4 = vcombine.high %v4734_v57, %v4738_v29 }
 0x4b2   :  { %5505 = vmatpush1.bf16.msra.mxu1 %v13165_v24  ;;  %15240 = vst [vmem:[#allocation110_spill] sm:$0xff] %v13260_v19 }
 0x4b3   :  { %5506 = vmatprep.subr.bf16.mxu1 %v13169_v4 }
 0x4b4   :  { %5480 = vmatpush1.bf16.msra.mxu0 %v12621_v17  ;;  %v4742_v17 = vld [vmem:[%s14830_s3 + $0x1c8] sm:$0xff] }
 0x4b5   :  { %5481 = vmatprep.subr.bf16.mxu0 %v12633_v49  ;;  %v4746_v49 = vld [vmem:[%s14830_s3 + $0x1e8] sm:$0xff] }
 0x4b8   :  { %5482 = vmatpush1.bf16.msra.mxu0 %v12635_v48  ;;  %v13178_v48 = vcombine.low %v4734_v57, %v4738_v29 }
 0x4b9   :  { %5483 = vmatprep.subr.bf16.mxu0 %v12647_v39  ;;  %v13181_v39 = vcombine.high %v4742_v17, %v4746_v49 }
 0x4ba   :  { %5507 = vmatpush1.bf16.msra.mxu1 %v13178_v48 }
 0x4bb   :  { %5508 = vmatprep.subr.bf16.mxu1 %v13181_v39 }
 0x4bc   :  { %5484 = vmatpush1.bf16.msra.mxu0 %v12649_v44  ;;  %v13184_v44 = vcombine.low %v4742_v17, %v4746_v49  ;;  %v15241_v17 = vld [vmem:[#allocation11_spill] sm:$0xff] }
 0x4bd   :  { %5535 = vmatprep.subr.bf16.mxu0 %v12661_v32  ;;  %v4750_v32 = vld [vmem:[%s14830_s3 + $0x208] sm:$0xff] }
 0x4be   :  { %5509 = vmatpush1.bf16.msra.mxu1 %v13184_v44  ;;  %v13194_v37 = vcombine.high %v4750_v32, %v4754_v33  ;;  %v13196_v11 = vcombine.low %v4750_v32, %v4754_v33  ;;  %v15242_v32 = vld [vmem:[#allocation36_spill] sm:$0xff] }
 0x4c0   :  { %5510 = vmatprep.subr.bf16.mxu1 %v13194_v37 }
 0x4c2   :  { %5511 = vmatpush1.bf16.msra.mxu1 %v13196_v11 }
 0x4c3   :  { %5512 = vmatprep.subr.bf16.mxu1 %v13206_v15 }
 0x4c6   :  { %5513 = vmatpush1.bf16.msra.mxu1 %v13208_v63 }
 0x4c7   :  { %5514 = vmatprep.subr.bf16.mxu1 %v12559_v59  ;;  %v13226_v59 = vcombine.low %v4790_v7, %v4794_v3  ;;  %v15244_v7 = vld [vmem:[#allocation37_spill] sm:$0xff] }
 0x4ca   :  { %5515 = vmatpush1.bf16.msra.mxu1 %v12557_v18  ;;  %v4798_v18 = vld [vmem:[%s14830_s3 + $0x388] sm:$0xff] }
 0x4cb   :  { %5516 = vmatprep.subr.bf16.mxu1 %v12583_v25 }
 0x4ce   :  { %5517 = vmatpush1.bf16.msra.mxu1 %v12581_v12  ;;  %v4802_v12 = vld [vmem:[%s14830_s3 + $0x3a8] sm:$0xff] }
 0x4cf   :  { %5518 = vmatprep.subr.bf16.mxu1 %v15234_v61  ;;  %v13236_v25 = vcombine.high %v4798_v18, %v4802_v12  ;;  %v13238_v35 = vcombine.low %v4798_v18, %v4802_v12  ;;  %v15243_v61 = vld [vmem:[#allocation13_spill] sm:$0xff] }
 0x4d1   :  { %15236 = vst [vmem:[#allocation108_spill] sm:$0xff] %v13236_v25  ;;  %15237 = vst [vmem:[#allocation48_spill] sm:$0xff] %v13238_v35 }
 0x4d2   :  { %5519 = vmatpush1.bf16.msra.mxu1 %v15235_v28 }
 0x4d3   :  { %5520 = vmatprep.subr.bf16.mxu1 %v13224_v16 }
 0x4d6   :  { %5521 = vmatpush1.bf16.msra.mxu1 %v13226_v59 }
 0x4d7   :  { %5522 = vmatprep.subr.bf16.mxu1 %v13236_v25 }
 0x4da   :  { %5523 = vmatpush1.bf16.msra.mxu1 %v13238_v35 }
 0x4db   :  { %5524 = vmatprep.subr.bf16.mxu1 %v13248_v51  ;;  %v15246_v51 = vld [vmem:[#allocation53_spill] sm:$0xff] }
 0x4de   :  { %5525 = vmatpush1.bf16.msra.mxu1 %v13250_v1 }
 0x4df   :  { %5576 = vmatprep.subr.bf16.mxu1 %v13260_v19 }
 0x512   :  { %v4497_v57 = vpop.f32.mrb[40].mxu0  ;;  %v4538_v29 = vpop.f32.mrb[72].mxu1 }
 0x513   :  { %v4627_v49 = vadd.f32 %v4497_v57, %v15241_v17  ;;  %v4629_v33 = vadd.f32 %v4538_v29, %v15242_v32  ;;  %v4499_v62 = vpop.f32.mrb[41].mxu0  ;;  %v4540_v13 = vpop.f32.mrb[73].mxu1  ;;  %v15245_v17 = vld [vmem:[#allocation14_spill] sm:$0xff] }
 0x514   :  { %v4628_v28 = vadd.f32 %v4499_v62, %v15243_v61  ;;  %v4630_v3 = vadd.f32 %v4540_v13, %v15244_v7  ;;  %v4501_v18 = vpop.f32.mrb[42].mxu0  ;;  %v4542_v12 = vpop.f32.mrb[74].mxu1  ;;  %v15247_v7 = vld [vmem:[#allocation16_spill] sm:$0xff] }
 0x515   :  { %v4502_v41 = vpop.f32.mrb[43].mxu0  ;;  %v4543_v47 = vpop.f32.mrb[75].mxu1  ;;  %v4643_v10 = vmul.f32 0.5, %v4629_v33  ;;  %v4635_v1 = vmul.f32 0.5, %v4627_v49  ;;  %v15248_v12 = vld [vmem:[#allocation54_spill] sm:$0xff] }
 0x516   :  { %v4644_v34 = vmul.f32 0.5, %v4630_v3  ;;  %v4636_v19 = vmul.f32 0.5, %v4628_v28 }
 0x517   :  { %10109 = vtanh.f32 %v4643_v10 }
 0x518   :  { %10111 = vtanh.f32 %v4644_v34 }
 0x519   :  { %10113 = vtanh.f32 %v4635_v1 }
 0x51a   :  { %10115 = vtanh.f32 %v4636_v19 }
 0x521   :  { %v10110_v49 = vpop.eup %10109 }
 0x522   :  { %v10112_v1 = vpop.eup %10111  ;;  %v4647_v34 = vmul.f32 0.5, %v10110_v49 }
 0x523   :  { %v10114_v19 = vpop.eup %10113 }
 0x524   :  { %v10116_v10 = vpop.eup %10115  ;;  %v4649_v25 = vadd.f32 0.5, %v4647_v34 }
 0x525   :  { %v4640_v35 = vmul.f32 0.5, %v10116_v10 }
 0x552   :  { %v4579_v57 = vpop.f32.mrb[44].mxu0  ;;  %v4620_v29 = vpop.f32.mrb[76].mxu1 }
 0x553   :  { %v4631_v32 = vadd.f32 %v4579_v57, %v15245_v17  ;;  %v4633_v62 = vadd.f32 %v4620_v29, %v15246_v51  ;;  %v4581_v61 = vpop.f32.mrb[45].mxu0  ;;  %v4622_v13 = vpop.f32.mrb[77].mxu1  ;;  %v4648_v17 = vmul.f32 0.5, %v10112_v1  ;;  %v4639_v29 = vmul.f32 0.5, %v10114_v19 }
 0x554   :  { %v4632_v18 = vadd.f32 %v4581_v61, %v15247_v7  ;;  %v4634_v41 = vadd.f32 %v4622_v13, %v15248_v12  ;;  %v4583_v33 = vpop.f32.mrb[46].mxu0  ;;  %v4624_v3 = vpop.f32.mrb[78].mxu1  ;;  %v4642_v12 = vadd.f32 0.5, %v4640_v35 }
 0x555   :  { %10117 = vtanh.f32 %v4631_v32  ;;  %v4584_v28 = vpop.f32.mrb[47].mxu0  ;;  %v4625_v47 = vpop.f32.mrb[79].mxu1  ;;  %v4653_v57 = vmul.f32 0.5, %v4633_v62  ;;  %v4650_v61 = vadd.f32 0.5, %v4648_v17  ;;  %v4641_v13 = vadd.f32 0.5, %v4639_v29  ;;  %v15252_v29 = vld [vmem:[#allocation47_spill] sm:$0xff] }
 0x556   :  { %10119 = vtanh.f32 %v4632_v18  ;;  %v4654_v51 = vmul.f32 0.5, %v4634_v41  ;;  %v4661_v33 = vmul.f32 %v4649_v25, %v12677_v8 }
 0x557   :  { %10121 = vtanh.f32 %v4653_v57  ;;  %v4662_v18 = vmul.f32 %v4650_v61, %v12679_v5  ;;  %v15254_v61 = vld [vmem:[#allocation66_spill] sm:$0xff] }
 0x558   :  { %10123 = vtanh.f32 %v4654_v51  ;;  %v15251_v51 = vld [vmem:[#allocation8_spill] sm:$0xff] }
 0x55f   :  { %v10118_v7 = vpop.eup %10117 }
 0x560   :  { %v10120_v32 = vpop.eup %10119  ;;  %v4663_v3 = vmul.f32 %v10118_v7, %v4641_v13  ;;  %v15255_v13 = vld [vmem:[#allocation67_spill] sm:$0xff]  ;;  %v15262_v7 = vld [vmem:[#allocation74_spill] sm:$0xff] }
 0x561   :  { %v4664_v28 = vmul.f32 %v10120_v32, %v4642_v12  ;;  %v10122_v41 = vpop.eup %10121  ;;  %v15263_v12 = vld [vmem:[#allocation75_spill] sm:$0xff]  ;;  %v15264_v32 = vld [vmem:[#allocation76_spill] sm:$0xff] }
 0x562   :  { %v13275_v49 = vadd.f32 %v4663_v3, %v4661_v33  ;;  %v10124_v47 = vpop.eup %10123  ;;  %v4657_v1 = vmul.f32 0.5, %v10122_v41  ;;  %v15265_v33 = vld [vmem:[#allocation77_spill] sm:$0xff]  ;;  %v15266_v3 = vld [vmem:[#allocation78_spill] sm:$0xff] }
 0x563   :  { %v13277_v62 = vadd.f32 %v4664_v28, %v4662_v18  ;;  %v4658_v19 = vmul.f32 0.5, %v10124_v47  ;;  %v15267_v18 = vld [vmem:[#allocation79_spill] sm:$0xff]  ;;  %v15268_v28 = vld [vmem:[#allocation80_spill] sm:$0xff]  ;;  %v15269_v41 = vld [vmem:[#allocation81_spill] sm:$0xff] }
 0x564   :  { %10125 = vtanh.f32 %v13275_v49  ;;  %v4659_v35 = vadd.f32 0.5, %v4657_v1  ;;  %v15270_v47 = vld [vmem:[#allocation82_spill] sm:$0xff]  ;;  %v15271_v1 = vld [vmem:[#allocation83_spill] sm:$0xff] }
 0x565   :  { %10127 = vtanh.f32 %v13277_v62  ;;  %v4660_v34 = vadd.f32 0.5, %v4658_v19  ;;  %v15272_v19 = vld [vmem:[#allocation84_spill] sm:$0xff] }
 0x56e   :  { %v10126_v10 = vpop.eup %10125 }
 0x56f   :  { %v10128_v8 = vpop.eup %10127  ;;  %v13281_v25 = vmul.f32 %v10126_v10, %v4659_v35  ;;  %v15273_v35 = vld [vmem:[#allocation85_spill] sm:$0xff]  ;;  %v15274_v10 = vld [vmem:[#allocation86_spill] sm:$0xff] }
 0x570   :  { %v13283_v5 = vmul.f32 %v10128_v8, %v4660_v34  ;;  %v15275_v34 = vld [vmem:[#allocation87_spill] sm:$0xff]  ;;  %v15276_v8 = vld [vmem:[#allocation88_spill] sm:$0xff] }
 0x571   :  { %15249 = vst [vmem:[#allocation109_spill] sm:$0xff] %v13281_v25  ;;  %v13289_v17 = vpack.c.bf16 %v13281_v25, %v13281_v25 }
 0x572   :  { %15250 = vst [vmem:[#allocation111_spill] sm:$0xff] %v13283_v5  ;;  %v4684_v57 = vpack.c.bf16 %v13283_v5, %v13283_v5  ;;  %v15308_v5 = vld [vmem:[#allocation55_spill] sm:$0xff] }
 0x574   :  { %5485 = vmatprep.mubr.bf16.mxu0 %v4684_v57  ;;  %5526 = vmatprep.mubr.bf16.mxu1 %v4684_v57 }
 0x575   :  { %5486 = vmatmul.mubr.bf16.vlgmr.msra.gmra.mrb[48].mxu0 %v13289_v17  ;;  %5527 = vmatmul.mubr.bf16.vlgmr.msra.gmra.mrb[80].mxu1 %v13289_v17 }
 0x576   :  { %5536 = vmatpush1.bf16.msra.mxu0 %v12663_v46  ;;  %5577 = vmatpush1.bf16.msra.mxu1 %v13262_v52  ;;  %v15253_v46 = vld [vmem:[#allocation65_spill] sm:$0xff] }
 0x577   :  { %5567 = vmatprep.mubr.bf16.mxu0 %v4684_v57  ;;  %5608 = vmatprep.mubr.bf16.mxu1 %v4684_v57  ;;  %v15277_v57 = vld [vmem:[#allocation89_spill] sm:$0xff] }
 0x578   :  { %5537 = vmatprep.subr.bf16.mxu0 %v12708_v6  ;;  %5578 = vmatprep.subr.bf16.mxu1 %v12710_v43  ;;  %v15256_v6 = vld [vmem:[#allocation68_spill] sm:$0xff]  ;;  %v15257_v43 = vld [vmem:[#allocation69_spill] sm:$0xff] }
 0x57a   :  { %5538 = vmatpush1.bf16.msra.mxu0 %v12725_v42  ;;  %5579 = vmatpush1.bf16.msra.mxu1 %v12727_v60  ;;  %v15258_v42 = vld [vmem:[#allocation70_spill] sm:$0xff]  ;;  %v15259_v60 = vld [vmem:[#allocation71_spill] sm:$0xff] }
 0x57b   :  { %5539 = vmatprep.subr.bf16.mxu0 %v12729_v54  ;;  %5580 = vmatprep.subr.bf16.mxu1 %v12731_v27  ;;  %v15260_v54 = vld [vmem:[#allocation72_spill] sm:$0xff]  ;;  %v15261_v27 = vld [vmem:[#allocation73_spill] sm:$0xff] }
 0x57e   :  { %5540 = vmatpush1.bf16.msra.mxu0 %v15251_v51  ;;  %5581 = vmatpush1.bf16.msra.mxu1 %v15252_v29  ;;  %v15278_v51 = vld [vmem:[#allocation90_spill] sm:$0xff]  ;;  %v15279_v29 = vld [vmem:[#allocation91_spill] sm:$0xff] }
 0x57f   :  { %5541 = vmatprep.subr.bf16.mxu0 %v15253_v46  ;;  %5582 = vmatprep.subr.bf16.mxu1 %v15254_v61  ;;  %v15280_v46 = vld [vmem:[#allocation92_spill] sm:$0xff]  ;;  %v15281_v61 = vld [vmem:[#allocation93_spill] sm:$0xff] }
 0x582   :  { %5542 = vmatpush1.bf16.msra.mxu0 %v15255_v13  ;;  %5583 = vmatpush1.bf16.msra.mxu1 %v15256_v6  ;;  %v15282_v13 = vld [vmem:[#allocation94_spill] sm:$0xff]  ;;  %v15283_v6 = vld [vmem:[#allocation95_spill] sm:$0xff] }
 0x583   :  { %5543 = vmatprep.subr.bf16.mxu0 %v15257_v43  ;;  %5584 = vmatprep.subr.bf16.mxu1 %v15258_v42  ;;  %v15284_v43 = vld [vmem:[#allocation96_spill] sm:$0xff]  ;;  %v15285_v42 = vld [vmem:[#allocation97_spill] sm:$0xff] }
 0x586   :  { %5544 = vmatpush1.bf16.msra.mxu0 %v15259_v60  ;;  %5585 = vmatpush1.bf16.msra.mxu1 %v15260_v54  ;;  %v15286_v60 = vld [vmem:[#allocation98_spill] sm:$0xff]  ;;  %v15287_v54 = vld [vmem:[#allocation99_spill] sm:$0xff] }
 0x587   :  { %5545 = vmatprep.subr.bf16.mxu0 %v15261_v27  ;;  %5586 = vmatprep.subr.bf16.mxu1 %v15262_v7  ;;  %v15288_v27 = vld [vmem:[#allocation100_spill] sm:$0xff]  ;;  %v15289_v7 = vld [vmem:[#allocation101_spill] sm:$0xff] }
 0x58a   :  { %5546 = vmatpush1.bf16.msra.mxu0 %v15263_v12  ;;  %5587 = vmatpush1.bf16.msra.mxu1 %v15264_v32  ;;  %v15290_v12 = vld [vmem:[#allocation102_spill] sm:$0xff]  ;;  %v15291_v32 = vld [vmem:[#allocation103_spill] sm:$0xff] }
 0x58b   :  { %5547 = vmatprep.subr.bf16.mxu0 %v15265_v33  ;;  %5588 = vmatprep.subr.bf16.mxu1 %v15266_v3  ;;  %v15292_v33 = vld [vmem:[#allocation104_spill] sm:$0xff]  ;;  %v15293_v3 = vld [vmem:[#allocation105_spill] sm:$0xff] }
 0x58e   :  { %5548 = vmatpush1.bf16.msra.mxu0 %v15267_v18  ;;  %5589 = vmatpush1.bf16.msra.mxu1 %v15268_v28  ;;  %v15294_v18 = vld [vmem:[#allocation106_spill] sm:$0xff]  ;;  %v15295_v28 = vld [vmem:[#allocation107_spill] sm:$0xff] }
 0x58f   :  { %5549 = vmatprep.subr.bf16.mxu0 %v15269_v41  ;;  %5590 = vmatprep.subr.bf16.mxu1 %v15270_v47 }
 0x592   :  { %5550 = vmatpush1.bf16.msra.mxu0 %v15271_v1  ;;  %5591 = vmatpush1.bf16.msra.mxu1 %v15272_v19  ;;  %v5739_v1 = vld [vmem:[%s14830_s3 + $0x200] sm:$0xff] }
 0x593   :  { %5551 = vmatprep.subr.bf16.mxu0 %v15273_v35  ;;  %5592 = vmatprep.subr.bf16.mxu1 %v15274_v10  ;;  %v5743_v19 = vld [vmem:[%s14830_s3 + $0x220] sm:$0xff] }
 0x594   :  { %v13479_v35 = vcombine.high %v5739_v1, %v5743_v19  ;;  %v13481_v10 = vcombine.low %v5739_v1, %v5743_v19  ;;  %v5799_v1 = vld [vmem:[%s14830_s3 + $0x3e0] sm:$0xff] }
 0x595   :  { %v15299_v19 = vld [vmem:[#allocation48_spill] sm:$0xff] }
 0x596   :  { %5552 = vmatpush1.bf16.msra.mxu0 %v15275_v34  ;;  %5593 = vmatpush1.bf16.msra.mxu1 %v15276_v8  ;;  %v5747_v34 = vld [vmem:[%s14830_s3 + $0x240] sm:$0xff] }
 0x597   :  { %5553 = vmatprep.subr.bf16.mxu0 %v15277_v57  ;;  %5594 = vmatprep.subr.bf16.mxu1 %v15278_v51  ;;  %v5751_v8 = vld [vmem:[%s14830_s3 + $0x260] sm:$0xff] }
 0x598   :  { %v13491_v57 = vcombine.high %v5747_v34, %v5751_v8  ;;  %v13493_v51 = vcombine.low %v5747_v34, %v5751_v8  ;;  %v15300_v8 = vld [vmem:[#allocation52_spill] sm:$0xff] }
 0x59a   :  { %5554 = vmatpush1.bf16.msra.mxu0 %v15279_v29  ;;  %5595 = vmatpush1.bf16.msra.mxu1 %v15280_v46  ;;  %v5755_v29 = vld [vmem:[%s14830_s3 + $0x280] sm:$0xff] }
 0x59b   :  { %5555 = vmatprep.subr.bf16.mxu0 %v15281_v61  ;;  %5596 = vmatprep.subr.bf16.mxu1 %v15282_v13  ;;  %v5759_v46 = vld [vmem:[%s14830_s3 + $0x2a0] sm:$0xff]  ;;  %v5756_v61 = vld [vmem:[%s14830_s3 + $0x288] sm:$0xff] }
 0x59c   :  { %v13506_v13 = vcombine.high %v5755_v29, %v5759_v46 }
 0x59e   :  { %5556 = vmatpush1.bf16.msra.mxu0 %v15283_v6  ;;  %5597 = vmatpush1.bf16.msra.mxu1 %v15284_v43  ;;  %v5760_v6 = vld [vmem:[%s14830_s3 + $0x2a8] sm:$0xff]  ;;  %v13511_v43 = vcombine.low %v5755_v29, %v5759_v46  ;;  %v5677_v29 = vld [vmem:[%s14830_s3 + $0x10] sm:$0xff] }
 0x59f   :  { %5557 = vmatprep.subr.bf16.mxu0 %v15285_v42  ;;  %5598 = vmatprep.subr.bf16.mxu1 %v15286_v60  ;;  %v13513_v42 = vcombine.low %v5756_v61, %v5760_v6  ;;  %v13515_v60 = vcombine.high %v5756_v61, %v5760_v6  ;;  %v5681_v46 = vld [vmem:[%s14830_s3 + $0x30] sm:$0xff]  ;;  %v15301_v61 = vld [vmem:[#allocation51_spill] sm:$0xff] }
 0x5a0   :  { %v13617_v6 = vcombine.high %v5677_v29, %v5681_v46 }
 0x5a2   :  { %5558 = vmatpush1.bf16.msra.mxu0 %v15287_v54  ;;  %5599 = vmatpush1.bf16.msra.mxu1 %v15288_v27  ;;  %v5763_v54 = vld [vmem:[%s14830_s3 + $0x2c0] sm:$0xff] }
 0x5a3   :  { %5559 = vmatprep.subr.bf16.mxu0 %v15289_v7  ;;  %5600 = vmatprep.subr.bf16.mxu1 %v15290_v12  ;;  %v5767_v27 = vld [vmem:[%s14830_s3 + $0x2e0] sm:$0xff]  ;;  %v5764_v7 = vld [vmem:[%s14830_s3 + $0x2c8] sm:$0xff] }
 0x5a4   :  { %v13530_v12 = vcombine.high %v5763_v54, %v5767_v27 }
 0x5a6   :  { %5560 = vmatpush1.bf16.msra.mxu0 %v15291_v32  ;;  %5601 = vmatpush1.bf16.msra.mxu1 %v15292_v33  ;;  %v5768_v32 = vld [vmem:[%s14830_s3 + $0x2e8] sm:$0xff]  ;;  %v13535_v33 = vcombine.low %v5763_v54, %v5767_v27  ;;  %v13619_v54 = vcombine.low %v5677_v29, %v5681_v46  ;;  %v15302_v27 = vld [vmem:[#allocation110_spill] sm:$0xff] }
 0x5a7   :  { %5561 = vmatprep.subr.bf16.mxu0 %v15293_v3  ;;  %5602 = vmatprep.subr.bf16.mxu1 %v15294_v18  ;;  %v13537_v3 = vcombine.low %v5764_v7, %v5768_v32  ;;  %v13539_v18 = vcombine.high %v5764_v7, %v5768_v32 }
 0x5aa   :  { %5562 = vmatpush1.bf16.msra.mxu0 %v15295_v28  ;;  %5603 = vmatpush1.bf16.msra.mxu1 %v13015_v53  ;;  %v5771_v28 = vld [vmem:[%s14830_s3 + $0x300] sm:$0xff] }
 0x5ab   :  { %5563 = vmatprep.subr.bf16.mxu0 %v13019_v0  ;;  %5604 = vmatprep.subr.bf16.mxu1 %v13021_v21  ;;  %v5675_v0 = vld [vmem:[%s14830_s3] sm:$0xff] }
 0x5ae   :  { %5564 = vmatpush1.bf16.msra.mxu0 %v13037_v50  ;;  %5605 = vmatpush1.bf16.msra.mxu1 %v13039_v58  ;;  %v5691_v50 = vld [vmem:[%s14830_s3 + $0x80] sm:$0xff] }
 0x5af   :  { %5565 = vmatprep.subr.bf16.mxu0 %v13043_v14  ;;  %5606 = vmatprep.subr.bf16.mxu1 %v13045_v2  ;;  %v5679_v14 = vld [vmem:[%s14830_s3 + $0x20] sm:$0xff] }
 0x5b0   :  { %v5683_v2 = vld [vmem:[%s14830_s3 + $0x40] sm:$0xff]  ;;  %v13386_v21 = vcombine.low %v5675_v0, %v5679_v14 }
 0x5b1   :  { %v5695_v58 = vld [vmem:[%s14830_s3 + $0xa0] sm:$0xff] }
 0x5b2   :  { %5566 = vmatpush1.bf16.msra.mxu0 %v13049_v40  ;;  %5607 = vmatpush1.bf16.msra.mxu1 %v13051_v9  ;;  %v13388_v40 = vcombine.high %v5675_v0, %v5679_v14  ;;  %v5687_v9 = vld [vmem:[%s14830_s3 + $0x60] sm:$0xff]  ;;  %v5772_v14 = vld [vmem:[%s14830_s3 + $0x308] sm:$0xff] }
 0x5b3   :  { %6484 = vmatprep.subr.bf16.mxu1 %v13093_v20  ;;  %v13393_v53 = vcombine.high %v5683_v2, %v5687_v9  ;;  %v13406_v20 = vcombine.high %v5691_v50, %v5695_v58  ;;  %v5775_v0 = vld [vmem:[%s14830_s3 + $0x320] sm:$0xff] }
 0x5b4   :  { %6443 = vmatprep.subr.bf16.mxu0 %v13388_v40 }
 0x5b5   :  { %5568 = vmatmul.mubr.bf16.vlgmr.msra.gmra.mrb[52].mxu0 %v13289_v17  ;;  %5609 = vmatmul.mubr.bf16.vlgmr.msra.gmra.mrb[84].mxu1 %v13289_v17 }
 0x5b6   :  { %6485 = vmatpush1.bf16.msra.mxu1 %v13091_v45  ;;  %6444 = vmatpush1.bf16.msra.mxu0 %v13386_v21  ;;  %v13403_v45 = vcombine.low %v5683_v2, %v5687_v9  ;;  %v13554_v2 = vcombine.high %v5771_v28, %v5775_v0  ;;  %v5776_v9 = vld [vmem:[%s14830_s3 + $0x328] sm:$0xff] }
 0x5b7   :  { %6486 = vmatprep.subr.bf16.mxu1 %v13098_v56  ;;  %6445 = vmatprep.subr.bf16.mxu0 %v13393_v53  ;;  %v5699_v56 = vld [vmem:[%s14830_s3 + $0xc0] sm:$0xff] }
 0x5ba   :  { %6487 = vmatpush1.bf16.msra.mxu1 %v13109_v23  ;;  %v5703_v23 = vld [vmem:[%s14830_s3 + $0xe0] sm:$0xff]  ;;  %6446 = vmatpush1.bf16.msra.mxu0 %v13403_v45 }
 0x5bb   :  { %6488 = vmatprep.subr.bf16.mxu1 %v13112_v30  ;;  %v13415_v30 = vcombine.low %v5691_v50, %v5695_v58  ;;  %6447 = vmatprep.subr.bf16.mxu0 %v13406_v20  ;;  %v13559_v50 = vcombine.low %v5771_v28, %v5775_v0  ;;  %v13561_v58 = vcombine.low %v5772_v14, %v5776_v9  ;;  %v15303_v28 = vld [vmem:[#allocation15_spill] sm:$0xff] }
 0x5bd   :  { %15296 = vst [vmem:[#allocation7_spill] sm:$0xff] %v13561_v58 }
 0x5be   :  { %6489 = vmatpush1.bf16.msra.mxu1 %v13123_v36  ;;  %v13418_v36 = vcombine.high %v5699_v56, %v5703_v23  ;;  %6448 = vmatpush1.bf16.msra.mxu0 %v13415_v30 }
 0x5bf   :  { %6490 = vmatprep.subr.bf16.mxu1 %v13127_v26  ;;  %v5707_v26 = vld [vmem:[%s14830_s3 + $0x100] sm:$0xff] }
 0x5c0   :  { %6449 = vmatprep.subr.bf16.mxu0 %v13418_v36 }
 0x5c2   :  { %6491 = vmatpush1.bf16.msra.mxu1 %v13137_v38  ;;  %v5711_v38 = vld [vmem:[%s14830_s3 + $0x120] sm:$0xff] }
 0x5c3   :  { %6492 = vmatprep.subr.bf16.mxu1 %v13141_v22  ;;  %v13427_v22 = vcombine.low %v5699_v56, %v5703_v23  ;;  %v13563_v56 = vcombine.high %v5772_v14, %v5776_v9  ;;  %v5779_v23 = vld [vmem:[%s14830_s3 + $0x340] sm:$0xff]  ;;  %v15304_v14 = vld [vmem:[#allocation38_spill] sm:$0xff] }
 0x5c5   :  { %6450 = vmatpush1.bf16.msra.mxu0 %v13427_v22  ;;  %15297 = vst [vmem:[#allocation34_spill] sm:$0xff] %v13563_v56 }
 0x5c6   :  { %6493 = vmatpush1.bf16.msra.mxu1 %v13151_v31  ;;  %v13430_v31 = vcombine.high %v5707_v26, %v5711_v38 }
 0x5c7   :  { %6494 = vmatprep.subr.bf16.mxu1 %v13155_v55  ;;  %v5715_v55 = vld [vmem:[%s14830_s3 + $0x140] sm:$0xff] }
 0x5c8   :  { %6451 = vmatprep.subr.bf16.mxu0 %v13430_v31 }
 0x5ca   :  { %6495 = vmatpush1.bf16.msra.mxu1 %v13165_v24  ;;  %v5719_v24 = vld [vmem:[%s14830_s3 + $0x160] sm:$0xff] }
 0x5cb   :  { %6496 = vmatprep.subr.bf16.mxu1 %v13169_v4  ;;  %v13439_v4 = vcombine.low %v5707_v26, %v5711_v38  ;;  %v5783_v26 = vld [vmem:[%s14830_s3 + $0x360] sm:$0xff] }
 0x5cc   :  { %v13575_v38 = vcombine.high %v5779_v23, %v5783_v26 }
 0x5cd   :  { %6452 = vmatpush1.bf16.msra.mxu0 %v13439_v4 }
 0x5ce   :  { %6497 = vmatpush1.bf16.msra.mxu1 %v13178_v48  ;;  %v13442_v48 = vcombine.high %v5715_v55, %v5719_v24 }
 0x5cf   :  { %6498 = vmatprep.subr.bf16.mxu1 %v13181_v39  ;;  %v5723_v39 = vld [vmem:[%s14830_s3 + $0x180] sm:$0xff] }
 0x5d0   :  { %6453 = vmatprep.subr.bf16.mxu0 %v13442_v48 }
 0x5d2   :  { %6499 = vmatpush1.bf16.msra.mxu1 %v13184_v44  ;;  %v5727_v44 = vld [vmem:[%s14830_s3 + $0x1a0] sm:$0xff] }
 0x5d3   :  { %6500 = vmatprep.subr.bf16.mxu1 %v13194_v37  ;;  %v13451_v37 = vcombine.low %v5715_v55, %v5719_v24  ;;  %v13463_v17 = vcombine.low %v5723_v39, %v5727_v44  ;;  %v13577_v55 = vcombine.low %v5779_v23, %v5783_v26  ;;  %v5787_v24 = vld [vmem:[%s14830_s3 + $0x380] sm:$0xff] }
 0x5d5   :  { %6454 = vmatpush1.bf16.msra.mxu0 %v13451_v37 }
 0x5d6   :  { %6501 = vmatpush1.bf16.msra.mxu1 %v13196_v11  ;;  %v13454_v11 = vcombine.high %v5723_v39, %v5727_v44  ;;  %v5791_v39 = vld [vmem:[%s14830_s3 + $0x3a0] sm:$0xff] }
 0x5d7   :  { %6502 = vmatprep.subr.bf16.mxu1 %v13206_v15  ;;  %v5731_v15 = vld [vmem:[%s14830_s3 + $0x1c0] sm:$0xff]  ;;  %v13589_v44 = vcombine.high %v5787_v24, %v5791_v39 }
 0x5d8   :  { %6455 = vmatprep.subr.bf16.mxu0 %v13454_v11 }
 0x5d9   :  { %6456 = vmatpush1.bf16.msra.mxu0 %v13463_v17 }
 0x5da   :  { %6503 = vmatpush1.bf16.msra.mxu1 %v13208_v63  ;;  %v5735_v63 = vld [vmem:[%s14830_s3 + $0x1e0] sm:$0xff] }
 0x5db   :  { %v13466_v41 = vcombine.high %v5731_v15, %v5735_v63  ;;  %v13469_v47 = vcombine.low %v5731_v15, %v5735_v63  ;;  %6504 = vmatprep.subr.bf16.mxu1 %v13515_v60  ;;  %v13591_v15 = vcombine.low %v5787_v24, %v5791_v39  ;;  %v15298_v63 = vld [vmem:[#allocation108_spill] sm:$0xff]  ;;  %v15305_v24 = vld [vmem:[#allocation17_spill] sm:$0xff] }
 0x5dd   :  { %6457 = vmatprep.subr.bf16.mxu0 %v13466_v41 }
 0x5de   :  { %6458 = vmatpush1.bf16.msra.mxu0 %v13469_v47  ;;  %6505 = vmatpush1.bf16.msra.mxu1 %v13513_v42 }
 0x5df   :  { %6459 = vmatprep.subr.bf16.mxu0 %v13479_v35  ;;  %6506 = vmatprep.subr.bf16.mxu1 %v13539_v18 }
 0x5e2   :  { %6460 = vmatpush1.bf16.msra.mxu0 %v13481_v10  ;;  %6507 = vmatpush1.bf16.msra.mxu1 %v13537_v3 }
 0x5e3   :  { %6461 = vmatprep.subr.bf16.mxu0 %v13491_v57  ;;  %6508 = vmatprep.subr.bf16.mxu1 %v13563_v56 }
 0x5e6   :  { %6462 = vmatpush1.bf16.msra.mxu0 %v13493_v51  ;;  %6509 = vmatpush1.bf16.msra.mxu1 %v13561_v58 }
 0x5e7   :  { %6463 = vmatprep.subr.bf16.mxu0 %v13506_v13  ;;  %6510 = vmatprep.subr.bf16.mxu1 %v13224_v16  ;;  %v5795_v16 = vld [vmem:[%s14830_s3 + $0x3c0] sm:$0xff] }
 0x5e8   :  { %v13605_v34 = vcombine.low %v5795_v16, %v5799_v1 }
 0x5ea   :  { %6464 = vmatpush1.bf16.msra.mxu0 %v13511_v43  ;;  %6511 = vmatpush1.bf16.msra.mxu1 %v13226_v59  ;;  %v13603_v59 = vcombine.high %v5795_v16, %v5799_v1 }
 0x5eb   :  { %6465 = vmatprep.subr.bf16.mxu0 %v13530_v12  ;;  %6512 = vmatprep.subr.bf16.mxu1 %v15298_v63  ;;  %v15306_v63 = vld [vmem:[#allocation39_spill] sm:$0xff] }
 0x5ee   :  { %6466 = vmatpush1.bf16.msra.mxu0 %v13535_v33  ;;  %6513 = vmatpush1.bf16.msra.mxu1 %v15299_v19 }
 0x5ef   :  { %6467 = vmatprep.subr.bf16.mxu0 %v13554_v2  ;;  %6514 = vmatprep.subr.bf16.mxu1 %v15300_v8 }
 0x5f2   :  { %6468 = vmatpush1.bf16.msra.mxu0 %v13559_v50  ;;  %6515 = vmatpush1.bf16.msra.mxu1 %v15301_v61 }
 0x5f3   :  { %6469 = vmatprep.subr.bf16.mxu0 %v13575_v38  ;;  %6566 = vmatprep.subr.bf16.mxu1 %v15302_v27 }
 0x5f6   :  { %6470 = vmatpush1.bf16.msra.mxu0 %v13577_v55 }
 0x5f7   :  { %6471 = vmatprep.subr.bf16.mxu0 %v13589_v44 }
 0x5fa   :  { %6472 = vmatpush1.bf16.msra.mxu0 %v13591_v15 }
 0x5fb   :  { %6473 = vmatprep.subr.bf16.mxu0 %v13603_v59 }
 0x5fe   :  { %6474 = vmatpush1.bf16.msra.mxu0 %v13605_v34 }
 0x5ff   :  { %6525 = vmatprep.subr.bf16.mxu0 %v13617_v6 }
 0x648   :  { %v5487_v7 = vpop.f32.mrb[48].mxu0  ;;  %v5528_v32 = vpop.f32.mrb[80].mxu1 }
 0x649   :  { %v5617_v0 = vadd.f32 %v5487_v7, %v15303_v28  ;;  %v5619_v9 = vadd.f32 %v5528_v32, %v15304_v14  ;;  %v5489_v23 = vpop.f32.mrb[49].mxu0  ;;  %v5530_v26 = vpop.f32.mrb[81].mxu1  ;;  %v15307_v28 = vld [vmem:[#allocation18_spill] sm:$0xff] }
 0x64a   :  { %v5618_v39 = vadd.f32 %v5489_v23, %v15305_v24  ;;  %v5620_v16 = vadd.f32 %v5530_v26, %v15306_v63  ;;  %v5491_v1 = vpop.f32.mrb[50].mxu0  ;;  %v5532_v19 = vpop.f32.mrb[82].mxu1  ;;  %v15309_v63 = vld [vmem:[#allocation20_spill] sm:$0xff] }
 0x64b   :  { %v5492_v8 = vpop.f32.mrb[51].mxu0  ;;  %v5533_v29 = vpop.f32.mrb[83].mxu1  ;;  %v5633_v46 = vmul.f32 0.5, %v5619_v9  ;;  %v5625_v27 = vmul.f32 0.5, %v5617_v0  ;;  %v15310_v19 = vld [vmem:[#allocation56_spill] sm:$0xff] }
 0x64c   :  { %v5634_v61 = vmul.f32 0.5, %v5620_v16  ;;  %v5626_v25 = vmul.f32 0.5, %v5618_v39 }
 0x64d   :  { %10129 = vtanh.f32 %v5633_v46 }
 0x64e   :  { %10131 = vtanh.f32 %v5634_v61 }
 0x64f   :  { %10133 = vtanh.f32 %v5625_v27 }
 0x650   :  { %10135 = vtanh.f32 %v5626_v25 }
 0x657   :  { %v10130_v0 = vpop.eup %10129 }
 0x658   :  { %v10132_v46 = vpop.eup %10131  ;;  %v5637_v27 = vmul.f32 0.5, %v10130_v0 }
 0x659   :  { %v10134_v25 = vpop.eup %10133 }
 0x65a   :  { %v10136_v61 = vpop.eup %10135  ;;  %v5639_v56 = vadd.f32 0.5, %v5637_v27 }
 0x65b   :  { %v5630_v58 = vmul.f32 0.5, %v10136_v61 }
 0x688   :  { %v5569_v7 = vpop.f32.mrb[52].mxu0  ;;  %v5610_v32 = vpop.f32.mrb[84].mxu1 }
 0x689   :  { %v5621_v14 = vadd.f32 %v5569_v7, %v15307_v28  ;;  %v5623_v23 = vadd.f32 %v5610_v32, %v15308_v5  ;;  %v5571_v24 = vpop.f32.mrb[53].mxu0  ;;  %v5612_v26 = vpop.f32.mrb[85].mxu1  ;;  %v5638_v28 = vmul.f32 0.5, %v10132_v46  ;;  %v5629_v32 = vmul.f32 0.5, %v10134_v25 }
 0x68a   :  { %v5622_v1 = vadd.f32 %v5571_v24, %v15309_v63  ;;  %v5624_v8 = vadd.f32 %v5612_v26, %v15310_v19  ;;  %v5573_v9 = vpop.f32.mrb[54].mxu0  ;;  %v5614_v16 = vpop.f32.mrb[86].mxu1  ;;  %v5632_v19 = vadd.f32 0.5, %v5630_v58 }
 0x68b   :  { %10137 = vtanh.f32 %v5621_v14  ;;  %v5574_v39 = vpop.f32.mrb[55].mxu0  ;;  %v5615_v29 = vpop.f32.mrb[87].mxu1  ;;  %v5643_v7 = vmul.f32 0.5, %v5623_v23  ;;  %v5640_v24 = vadd.f32 0.5, %v5638_v28  ;;  %v5631_v26 = vadd.f32 0.5, %v5629_v32  ;;  %v5689_v28 = vld [vmem:[%s14830_s3 + $0x70] sm:$0xff] }
 0x68c   :  { %10139 = vtanh.f32 %v5622_v1  ;;  %v5644_v5 = vmul.f32 0.5, %v5624_v8  ;;  %v5651_v9 = vmul.f32 %v5639_v56, %v13275_v49  ;;  %v5690_v32 = vld [vmem:[%s14830_s3 + $0x78] sm:$0xff] }
 0x68d   :  { %10141 = vtanh.f32 %v5643_v7  ;;  %v5652_v1 = vmul.f32 %v5640_v24, %v13277_v62  ;;  %v5685_v7 = vld [vmem:[%s14830_s3 + $0x50] sm:$0xff] }
 0x68e   :  { %10143 = vtanh.f32 %v5644_v5  ;;  %v5686_v5 = vld [vmem:[%s14830_s3 + $0x58] sm:$0xff] }
 0x695   :  { %v10138_v63 = vpop.eup %10137 }
 0x696   :  { %v10140_v14 = vpop.eup %10139  ;;  %v5653_v16 = vmul.f32 %v10138_v63, %v5631_v26  ;;  %v5693_v63 = vld [vmem:[%s14830_s3 + $0x90] sm:$0xff] }
 0x697   :  { %v5654_v39 = vmul.f32 %v10140_v14, %v5632_v19  ;;  %v10142_v8 = vpop.eup %10141  ;;  %v13664_v19 = vcombine.high %v5685_v7, %v5689_v28  ;;  %v13666_v14 = vcombine.high %v5686_v5, %v5690_v32 }
 0x698   :  { %v13633_v0 = vadd.f32 %v5653_v16, %v5651_v9  ;;  %v10144_v29 = vpop.eup %10143  ;;  %v5647_v46 = vmul.f32 0.5, %v10142_v8  ;;  %v5697_v9 = vld [vmem:[%s14830_s3 + $0xb0] sm:$0xff]  ;;  %v5694_v16 = vld [vmem:[%s14830_s3 + $0x98] sm:$0xff]  ;;  %v13683_v8 = vcombine.low %v5686_v5, %v5690_v32 }
 0x699   :  { %v13635_v23 = vadd.f32 %v5654_v39, %v5652_v1  ;;  %v5648_v25 = vmul.f32 0.5, %v10144_v29  ;;  %v5698_v1 = vld [vmem:[%s14830_s3 + $0xb8] sm:$0xff]  ;;  %v13681_v39 = vcombine.low %v5685_v7, %v5689_v28  ;;  %v13685_v29 = vcombine.high %v5693_v63, %v5697_v9  ;;  %v5709_v5 = vld [vmem:[%s14830_s3 + $0x110] sm:$0xff] }
 0x69a   :  { %10145 = vtanh.f32 %v13633_v0  ;;  %v5649_v58 = vadd.f32 0.5, %v5647_v46  ;;  %v13687_v46 = vcombine.high %v5694_v16, %v5698_v1  ;;  %v5713_v32 = vld [vmem:[%s14830_s3 + $0x130] sm:$0xff] }
 0x69b   :  { %10147 = vtanh.f32 %v13635_v23  ;;  %v5650_v27 = vadd.f32 0.5, %v5648_v25  ;;  %v5701_v25 = vld [vmem:[%s14830_s3 + $0xd0] sm:$0xff] }
 0x6a4   :  { %v10146_v61 = vpop.eup %10145 }
 0x6a5   :  { %v10148_v49 = vpop.eup %10147  ;;  %v13639_v56 = vmul.f32 %v10146_v61, %v5649_v58  ;;  %v5702_v58 = vld [vmem:[%s14830_s3 + $0xd8] sm:$0xff] }
 0x6a6   :  { %v13641_v62 = vmul.f32 %v10148_v49, %v5650_v27  ;;  %v5706_v61 = vld [vmem:[%s14830_s3 + $0xf8] sm:$0xff]  ;;  %v13705_v27 = vcombine.low %v5693_v63, %v5697_v9  ;;  %v13707_v49 = vcombine.low %v5694_v16, %v5698_v1  ;;  %v13735_v1 = vcombine.high %v5709_v5, %v5713_v32 }
 0x6a7   :  { %15311 = vst [vmem:[#allocation9_spill] sm:$0xff] %v13639_v56  ;;  %v13659_v26 = vpack.c.bf16 %v13639_v56, %v13639_v56  ;;  %v13713_v28 = vcombine.high %v5702_v58, %v5706_v61  ;;  %v5714_v63 = vld [vmem:[%s14830_s3 + $0x138] sm:$0xff]  ;;  %v13731_v16 = vcombine.low %v5702_v58, %v5706_v61  ;;  %v13753_v58 = vcombine.low %v5709_v5, %v5713_v32 }
 0x6a8   :  { %15312 = vst [vmem:[#allocation35_spill] sm:$0xff] %v13641_v62  ;;  %v5674_v24 = vpack.c.bf16 %v13641_v62, %v13641_v62  ;;  %15313 = vst [vmem:[#allocation10_spill] sm:$0xff] %v13705_v27  ;;  %v5717_v62 = vld [vmem:[%s14830_s3 + $0x150] sm:$0xff]  ;;  %v5726_v5 = vld [vmem:[%s14830_s3 + $0x198] sm:$0xff] }
 0x6a9   :  { %15314 = vst [vmem:[#allocation49_spill] sm:$0xff] %v13707_v49  ;;  %15316 = vst [vmem:[#allocation50_spill] sm:$0xff] %v13713_v28  ;;  %v5730_v32 = vld [vmem:[%s14830_s3 + $0x1b8] sm:$0xff] }
 0x6aa   :  { %6475 = vmatprep.mubr.bf16.mxu0 %v5674_v24  ;;  %6516 = vmatprep.mubr.bf16.mxu1 %v5674_v24  ;;  %15318 = vst [vmem:[#allocation5_spill] sm:$0xff] %v13731_v16  ;;  %15319 = vst [vmem:[#allocation11_spill] sm:$0xff] %v13735_v1 }
 0x6ab   :  { %6476 = vmatmul.mubr.bf16.vlgmr.msra.gmra.mrb[56].mxu0 %v13659_v26  ;;  %6517 = vmatmul.mubr.bf16.vlgmr.msra.gmra.mrb[88].mxu1 %v13659_v26  ;;  %15321 = vst [vmem:[#allocation13_spill] sm:$0xff] %v13753_v58 }
 0x6ac   :  { %6526 = vmatpush1.bf16.msra.mxu0 %v13619_v54  ;;  %6567 = vmatpush1.bf16.msra.mxu1 %v13262_v52  ;;  %v5705_v52 = vld [vmem:[%s14830_s3 + $0xf0] sm:$0xff] }
 0x6ad   :  { %6557 = vmatprep.mubr.bf16.mxu0 %v5674_v24  ;;  %6598 = vmatprep.mubr.bf16.mxu1 %v5674_v24  ;;  %v13711_v7 = vcombine.high %v5701_v25, %v5705_v52  ;;  %v5710_v24 = vld [vmem:[%s14830_s3 + $0x118] sm:$0xff]  ;;  %v13729_v9 = vcombine.low %v5701_v25, %v5705_v52 }
 0x6ae   :  { %6527 = vmatprep.subr.bf16.mxu0 %v13664_v19  ;;  %6568 = vmatprep.subr.bf16.mxu1 %v13666_v14  ;;  %v13737_v56 = vcombine.high %v5710_v24, %v5714_v63  ;;  %v5718_v25 = vld [vmem:[%s14830_s3 + $0x158] sm:$0xff]  ;;  %v13755_v61 = vcombine.low %v5710_v24, %v5714_v63 }
 0x6af   :  { %15315 = vst [vmem:[#allocation12_spill] sm:$0xff] %v13711_v7  ;;  %15317 = vst [vmem:[#allocation33_spill] sm:$0xff] %v13729_v9  ;;  %v5722_v52 = vld [vmem:[%s14830_s3 + $0x178] sm:$0xff] }
 0x6b0   :  { %6528 = vmatpush1.bf16.msra.mxu0 %v13681_v39  ;;  %6569 = vmatpush1.bf16.msra.mxu1 %v13683_v8  ;;  %15320 = vst [vmem:[#allocation36_spill] sm:$0xff] %v13737_v56  ;;  %15322 = vst [vmem:[#allocation37_spill] sm:$0xff] %v13755_v61  ;;  %v13779_v63 = vcombine.low %v5718_v25, %v5722_v52 }
 0x6b1   :  { %6529 = vmatprep.subr.bf16.mxu0 %v13685_v29  ;;  %6570 = vmatprep.subr.bf16.mxu1 %v13687_v46 }
 0x6b2   :  { %15326 = vst [vmem:[#allocation54_spill] sm:$0xff] %v13779_v63 }
 0x6b4   :  { %6530 = vmatpush1.bf16.msra.mxu0 %v13705_v27  ;;  %6571 = vmatpush1.bf16.msra.mxu1 %v13707_v49  ;;  %v5721_v49 = vld [vmem:[%s14830_s3 + $0x170] sm:$0xff] }
 0x6b5   :  { %6531 = vmatprep.subr.bf16.mxu0 %v13711_v7  ;;  %6572 = vmatprep.subr.bf16.mxu1 %v13713_v28  ;;  %v13759_v28 = vcombine.high %v5717_v62, %v5721_v49  ;;  %v13761_v7 = vcombine.high %v5718_v25, %v5722_v52  ;;  %v5725_v27 = vld [vmem:[%s14830_s3 + $0x190] sm:$0xff]  ;;  %v13777_v24 = vcombine.low %v5717_v62, %v5721_v49  ;;  %v5734_v62 = vld [vmem:[%s14830_s3 + $0x1d8] sm:$0xff] }
 0x6b6   :  { %v5738_v49 = vld [vmem:[%s14830_s3 + $0x1f8] sm:$0xff]  ;;  %v13803_v52 = vcombine.low %v5726_v5, %v5730_v32 }
 0x6b7   :  { %15323 = vst [vmem:[#allocation14_spill] sm:$0xff] %v13759_v28  ;;  %15324 = vst [vmem:[#allocation53_spill] sm:$0xff] %v13761_v7 }
 0x6b8   :  { %6532 = vmatpush1.bf16.msra.mxu0 %v13729_v9  ;;  %6573 = vmatpush1.bf16.msra.mxu1 %v13731_v16  ;;  %v5729_v16 = vld [vmem:[%s14830_s3 + $0x1b0] sm:$0xff]  ;;  %15325 = vst [vmem:[#allocation16_spill] sm:$0xff] %v13777_v24  ;;  %15330 = vst [vmem:[#allocation66_spill] sm:$0xff] %v13803_v52 }
 0x6b9   :  { %6533 = vmatprep.subr.bf16.mxu0 %v13735_v1  ;;  %6574 = vmatprep.subr.bf16.mxu1 %v13737_v56  ;;  %v13783_v56 = vcombine.high %v5725_v27, %v5729_v16  ;;  %v13785_v1 = vcombine.high %v5726_v5, %v5730_v32  ;;  %v5733_v9 = vld [vmem:[%s14830_s3 + $0x1d0] sm:$0xff]  ;;  %v13801_v25 = vcombine.low %v5725_v27, %v5729_v16  ;;  %v5742_v27 = vld [vmem:[%s14830_s3 + $0x218] sm:$0xff] }
 0x6ba   :  { %v5746_v16 = vld [vmem:[%s14830_s3 + $0x238] sm:$0xff]  ;;  %v13827_v32 = vcombine.low %v5734_v62, %v5738_v49 }
 0x6bb   :  { %15327 = vst [vmem:[#allocation8_spill] sm:$0xff] %v13783_v56  ;;  %15328 = vst [vmem:[#allocation47_spill] sm:$0xff] %v13785_v1 }
 0x6bc   :  { %6534 = vmatpush1.bf16.msra.mxu0 %v13753_v58  ;;  %6575 = vmatpush1.bf16.msra.mxu1 %v13755_v61  ;;  %v5737_v61 = vld [vmem:[%s14830_s3 + $0x1f0] sm:$0xff]  ;;  %15329 = vst [vmem:[#allocation65_spill] sm:$0xff] %v13801_v25  ;;  %15334 = vst [vmem:[#allocation70_spill] sm:$0xff] %v13827_v32 }
 0x6bd   :  { %6535 = vmatprep.subr.bf16.mxu0 %v13759_v28  ;;  %6576 = vmatprep.subr.bf16.mxu1 %v13761_v7  ;;  %v13807_v7 = vcombine.high %v5733_v9, %v5737_v61  ;;  %v13809_v28 = vcombine.high %v5734_v62, %v5738_v49  ;;  %v5741_v58 = vld [vmem:[%s14830_s3 + $0x210] sm:$0xff]  ;;  %v13825_v5 = vcombine.low %v5733_v9, %v5737_v61  ;;  %v5750_v9 = vld [vmem:[%s14830_s3 + $0x258] sm:$0xff] }
 0x6be   :  { %v5754_v61 = vld [vmem:[%s14830_s3 + $0x278] sm:$0xff]  ;;  %v13851_v49 = vcombine.low %v5742_v27, %v5746_v16 }
 0x6bf   :  { %15331 = vst [vmem:[#allocation67_spill] sm:$0xff] %v13807_v7  ;;  %15332 = vst [vmem:[#allocation68_spill] sm:$0xff] %v13809_v28 }
 0x6c0   :  { %6536 = vmatpush1.bf16.msra.mxu0 %v13777_v24  ;;  %6577 = vmatpush1.bf16.msra.mxu1 %v13779_v63  ;;  %v5745_v63 = vld [vmem:[%s14830_s3 + $0x230] sm:$0xff]  ;;  %15333 = vst [vmem:[#allocation69_spill] sm:$0xff] %v13825_v5  ;;  %15338 = vst [vmem:[#allocation74_spill] sm:$0xff] %v13851_v49 }
 0x6c1   :  { %6537 = vmatprep.subr.bf16.mxu0 %v13783_v56  ;;  %6578 = vmatprep.subr.bf16.mxu1 %v13785_v1  ;;  %v13831_v1 = vcombine.high %v5741_v58, %v5745_v63  ;;  %v13833_v56 = vcombine.high %v5742_v27, %v5746_v16  ;;  %v5749_v24 = vld [vmem:[%s14830_s3 + $0x250] sm:$0xff]  ;;  %v13849_v62 = vcombine.low %v5741_v58, %v5745_v63  ;;  %v5758_v58 = vld [vmem:[%s14830_s3 + $0x298] sm:$0xff] }
 0x6c2   :  { %v5762_v63 = vld [vmem:[%s14830_s3 + $0x2b8] sm:$0xff]  ;;  %v13875_v16 = vcombine.low %v5750_v9, %v5754_v61 }
 0x6c3   :  { %15335 = vst [vmem:[#allocation71_spill] sm:$0xff] %v13831_v1  ;;  %15336 = vst [vmem:[#allocation72_spill] sm:$0xff] %v13833_v56 }
 0x6c4   :  { %6538 = vmatpush1.bf16.msra.mxu0 %v13801_v25  ;;  %6579 = vmatpush1.bf16.msra.mxu1 %v13803_v52  ;;  %v5753_v52 = vld [vmem:[%s14830_s3 + $0x270] sm:$0xff]  ;;  %15337 = vst [vmem:[#allocation73_spill] sm:$0xff] %v13849_v62  ;;  %15342 = vst [vmem:[#allocation78_spill] sm:$0xff] %v13875_v16 }
 0x6c5   :  { %6539 = vmatprep.subr.bf16.mxu0 %v13807_v7  ;;  %6580 = vmatprep.subr.bf16.mxu1 %v13809_v28  ;;  %v13855_v28 = vcombine.high %v5749_v24, %v5753_v52  ;;  %v13857_v7 = vcombine.high %v5750_v9, %v5754_v61  ;;  %v5757_v25 = vld [vmem:[%s14830_s3 + $0x290] sm:$0xff]  ;;  %v13873_v27 = vcombine.low %v5749_v24, %v5753_v52  ;;  %v5766_v24 = vld [vmem:[%s14830_s3 + $0x2d8] sm:$0xff] }
 0x6c6   :  { %v5770_v52 = vld [vmem:[%s14830_s3 + $0x2f8] sm:$0xff]  ;;  %v13899_v61 = vcombine.low %v5758_v58, %v5762_v63 }
 0x6c7   :  { %15339 = vst [vmem:[#allocation75_spill] sm:$0xff] %v13855_v28  ;;  %15340 = vst [vmem:[#allocation76_spill] sm:$0xff] %v13857_v7 }
 0x6c8   :  { %6540 = vmatpush1.bf16.msra.mxu0 %v13825_v5  ;;  %6581 = vmatpush1.bf16.msra.mxu1 %v13827_v32  ;;  %v5761_v32 = vld [vmem:[%s14830_s3 + $0x2b0] sm:$0xff]  ;;  %15341 = vst [vmem:[#allocation77_spill] sm:$0xff] %v13873_v27  ;;  %15346 = vst [vmem:[#allocation82_spill] sm:$0xff] %v13899_v61 }
 0x6c9   :  { %6541 = vmatprep.subr.bf16.mxu0 %v13831_v1  ;;  %6582 = vmatprep.subr.bf16.mxu1 %v13833_v56  ;;  %v13879_v56 = vcombine.high %v5757_v25, %v5761_v32  ;;  %v13881_v1 = vcombine.high %v5758_v58, %v5762_v63  ;;  %v5765_v5 = vld [vmem:[%s14830_s3 + $0x2d0] sm:$0xff]  ;;  %v13897_v9 = vcombine.low %v5757_v25, %v5761_v32  ;;  %v5774_v25 = vld [vmem:[%s14830_s3 + $0x318] sm:$0xff] }
 0x6ca   :  { %v5778_v32 = vld [vmem:[%s14830_s3 + $0x338] sm:$0xff]  ;;  %v13923_v63 = vcombine.low %v5766_v24, %v5770_v52 }
 0x6cb   :  { %15343 = vst [vmem:[#allocation79_spill] sm:$0xff] %v13879_v56  ;;  %15344 = vst [vmem:[#allocation80_spill] sm:$0xff] %v13881_v1 }
 0x6cc   :  { %6542 = vmatpush1.bf16.msra.mxu0 %v13849_v62  ;;  %6583 = vmatpush1.bf16.msra.mxu1 %v13851_v49  ;;  %v5769_v49 = vld [vmem:[%s14830_s3 + $0x2f0] sm:$0xff]  ;;  %15345 = vst [vmem:[#allocation81_spill] sm:$0xff] %v13897_v9  ;;  %15350 = vst [vmem:[#allocation86_spill] sm:$0xff] %v13923_v63 }
 0x6cd   :  { %6543 = vmatprep.subr.bf16.mxu0 %v13855_v28  ;;  %6584 = vmatprep.subr.bf16.mxu1 %v13857_v7  ;;  %v13903_v7 = vcombine.high %v5765_v5, %v5769_v49  ;;  %v13905_v28 = vcombine.high %v5766_v24, %v5770_v52  ;;  %v5773_v62 = vld [vmem:[%s14830_s3 + $0x310] sm:$0xff]  ;;  %v13921_v58 = vcombine.low %v5765_v5, %v5769_v49  ;;  %v5782_v5 = vld [vmem:[%s14830_s3 + $0x358] sm:$0xff] }
 0x6ce   :  { %v5786_v49 = vld [vmem:[%s14830_s3 + $0x378] sm:$0xff]  ;;  %v13947_v52 = vcombine.low %v5774_v25, %v5778_v32 }
 0x6cf   :  { %15347 = vst [vmem:[#allocation83_spill] sm:$0xff] %v13903_v7  ;;  %15348 = vst [vmem:[#allocation84_spill] sm:$0xff] %v13905_v28 }
 0x6d0   :  { %6544 = vmatpush1.bf16.msra.mxu0 %v13873_v27  ;;  %6585 = vmatpush1.bf16.msra.mxu1 %v13875_v16  ;;  %v5777_v16 = vld [vmem:[%s14830_s3 + $0x330] sm:$0xff]  ;;  %15349 = vst [vmem:[#allocation85_spill] sm:$0xff] %v13921_v58  ;;  %15354 = vst [vmem:[#allocation90_spill] sm:$0xff] %v13947_v52 }
 0x6d1   :  { %6545 = vmatprep.subr.bf16.mxu0 %v13879_v56  ;;  %6586 = vmatprep.subr.bf16.mxu1 %v13881_v1  ;;  %v13927_v1 = vcombine.high %v5773_v62, %v5777_v16  ;;  %v13929_v56 = vcombine.high %v5774_v25, %v5778_v32  ;;  %v5781_v27 = vld [vmem:[%s14830_s3 + $0x350] sm:$0xff]  ;;  %v13945_v24 = vcombine.low %v5773_v62, %v5777_v16  ;;  %v5790_v62 = vld [vmem:[%s14830_s3 + $0x398] sm:$0xff] }
 0x6d2   :  { %v5794_v16 = vld [vmem:[%s14830_s3 + $0x3b8] sm:$0xff]  ;;  %v13971_v32 = vcombine.low %v5782_v5, %v5786_v49 }
 0x6d3   :  { %15351 = vst [vmem:[#allocation87_spill] sm:$0xff] %v13927_v1  ;;  %15352 = vst [vmem:[#allocation88_spill] sm:$0xff] %v13929_v56 }
 0x6d4   :  { %6546 = vmatpush1.bf16.msra.mxu0 %v13897_v9  ;;  %6587 = vmatpush1.bf16.msra.mxu1 %v13899_v61  ;;  %v5785_v61 = vld [vmem:[%s14830_s3 + $0x370] sm:$0xff]  ;;  %15353 = vst [vmem:[#allocation89_spill] sm:$0xff] %v13945_v24 }
 0x6d5   :  { %6547 = vmatprep.subr.bf16.mxu0 %v13903_v7  ;;  %6588 = vmatprep.subr.bf16.mxu1 %v13905_v28  ;;  %v13951_v28 = vcombine.high %v5781_v27, %v5785_v61  ;;  %v13953_v7 = vcombine.high %v5782_v5, %v5786_v49  ;;  %v5789_v9 = vld [vmem:[%s14830_s3 + $0x390] sm:$0xff]  ;;  %v13969_v25 = vcombine.low %v5781_v27, %v5785_v61  ;;  %v5798_v27 = vld [vmem:[%s14830_s3 + $0x3d8] sm:$0xff] }
 0x6d6   :  { %v5802_v61 = vld [vmem:[%s14830_s3 + $0x3f8] sm:$0xff]  ;;  %v13995_v49 = vcombine.low %v5790_v62, %v5794_v16 }
 0x6d7   :  { %15355 = vst [vmem:[#allocation91_spill] sm:$0xff] %v13951_v28  ;;  %15356 = vst [vmem:[#allocation92_spill] sm:$0xff] %v13953_v7 }
 0x6d8   :  { %6548 = vmatpush1.bf16.msra.mxu0 %v13921_v58  ;;  %6589 = vmatpush1.bf16.msra.mxu1 %v13923_v63  ;;  %v5793_v63 = vld [vmem:[%s14830_s3 + $0x3b0] sm:$0xff]  ;;  %15357 = vst [vmem:[#allocation93_spill] sm:$0xff] %v13969_v25 }
 0x6d9   :  { %6549 = vmatprep.subr.bf16.mxu0 %v13927_v1  ;;  %6590 = vmatprep.subr.bf16.mxu1 %v13929_v56  ;;  %v13975_v56 = vcombine.high %v5789_v9, %v5793_v63  ;;  %v13977_v1 = vcombine.high %v5790_v62, %v5794_v16  ;;  %v5797_v58 = vld [vmem:[%s14830_s3 + $0x3d0] sm:$0xff]  ;;  %v13993_v5 = vcombine.low %v5789_v9, %v5793_v63  ;;  %v6738_v63 = vld [vmem:[%s14830_s3 + $0x248] sm:$0xff] }
 0x6dc   :  { %6550 = vmatpush1.bf16.msra.mxu0 %v13945_v24  ;;  %6591 = vmatpush1.bf16.msra.mxu1 %v13947_v52  ;;  %v5801_v52 = vld [vmem:[%s14830_s3 + $0x3f0] sm:$0xff] }
 0x6dd   :  { %6551 = vmatprep.subr.bf16.mxu0 %v13951_v28  ;;  %6592 = vmatprep.subr.bf16.mxu1 %v13953_v7  ;;  %v13999_v7 = vcombine.high %v5797_v58, %v5801_v52  ;;  %v14001_v28 = vcombine.high %v5798_v27, %v5802_v61  ;;  %v14005_v24 = vcombine.low %v5797_v58, %v5801_v52  ;;  %v6742_v52 = vld [vmem:[%s14830_s3 + $0x268] sm:$0xff] }
 0x6de   :  { %v14162_v62 = vcombine.high %v6738_v63, %v6742_v52  ;;  %v14164_v16 = vcombine.low %v6738_v63, %v6742_v52 }
 0x6e0   :  { %6552 = vmatpush1.bf16.msra.mxu0 %v13969_v25  ;;  %6593 = vmatpush1.bf16.msra.mxu1 %v13971_v32  ;;  %v14007_v25 = vcombine.low %v5798_v27, %v5802_v61  ;;  %v15358_v27 = vld [vmem:[#allocation34_spill] sm:$0xff]  ;;  %v15359_v61 = vld [vmem:[#allocation7_spill] sm:$0xff] }
 0x6e1   :  { %6553 = vmatprep.subr.bf16.mxu0 %v13975_v56  ;;  %6594 = vmatprep.subr.bf16.mxu1 %v13977_v1 }
 0x6e4   :  { %6554 = vmatpush1.bf16.msra.mxu0 %v13993_v5  ;;  %6595 = vmatpush1.bf16.msra.mxu1 %v13995_v49 }
 0x6e5   :  { %6555 = vmatprep.subr.bf16.mxu0 %v13999_v7  ;;  %6596 = vmatprep.subr.bf16.mxu1 %v14001_v28 }
 0x6e8   :  { %6556 = vmatpush1.bf16.msra.mxu0 %v14005_v24  ;;  %6597 = vmatpush1.bf16.msra.mxu1 %v14007_v25 }
 0x6e9   :  { %7433 = vmatprep.subr.bf16.mxu0 %v13388_v40  ;;  %v6670_v40 = vld [vmem:[%s14830_s3 + $0x28] sm:$0xff] }
 0x6eb   :  { %6558 = vmatmul.mubr.bf16.vlgmr.msra.gmra.mrb[60].mxu0 %v13659_v26  ;;  %6599 = vmatmul.mubr.bf16.vlgmr.msra.gmra.mrb[92].mxu1 %v13659_v26  ;;  %v6734_v26 = vld [vmem:[%s14830_s3 + $0x228] sm:$0xff] }
 0x6ec   :  { %7434 = vmatpush1.bf16.msra.mxu0 %v13386_v21  ;;  %v6666_v21 = vld [vmem:[%s14830_s3 + $0x8] sm:$0xff] }
 0x6ed   :  { %7435 = vmatprep.subr.bf16.mxu0 %v13393_v53  ;;  %v6674_v53 = vld [vmem:[%s14830_s3 + $0x48] sm:$0xff] }
 0x6f0   :  { %7436 = vmatpush1.bf16.msra.mxu0 %v13403_v45  ;;  %v14047_v45 = vcombine.low %v6666_v21, %v6670_v40 }
 0x6f1   :  { %7437 = vmatprep.subr.bf16.mxu0 %v13406_v20  ;;  %v14049_v20 = vcombine.high %v6666_v21, %v6670_v40  ;;  %v6770_v21 = vld [vmem:[%s14830_s3 + $0x348] sm:$0xff] }
 0x6f2   :  { %v6774_v40 = vld [vmem:[%s14830_s3 + $0x368] sm:$0xff] }
 0x6f3   :  { %7474 = vmatprep.subr.bf16.mxu1 %v14049_v20 }
 0x6f4   :  { %7438 = vmatpush1.bf16.msra.mxu0 %v13415_v30  ;;  %v6678_v30 = vld [vmem:[%s14830_s3 + $0x68] sm:$0xff]  ;;  %7475 = vmatpush1.bf16.msra.mxu1 %v14047_v45 }
 0x6f5   :  { %7439 = vmatprep.subr.bf16.mxu0 %v13418_v36  ;;  %v14054_v36 = vcombine.high %v6674_v53, %v6678_v30 }
 0x6f7   :  { %7476 = vmatprep.subr.bf16.mxu1 %v14054_v36 }
 0x6f8   :  { %7440 = vmatpush1.bf16.msra.mxu0 %v13427_v22  ;;  %v6682_v22 = vld [vmem:[%s14830_s3 + $0x88] sm:$0xff] }
 0x6f9   :  { %7441 = vmatprep.subr.bf16.mxu0 %v13430_v31  ;;  %v6686_v31 = vld [vmem:[%s14830_s3 + $0xa8] sm:$0xff] }
 0x6fc   :  { %7442 = vmatpush1.bf16.msra.mxu0 %v13439_v4  ;;  %v14065_v4 = vcombine.low %v6674_v53, %v6678_v30  ;;  %v14180_v53 = vcombine.high %v6770_v21, %v6774_v40 }
 0x6fd   :  { %7443 = vmatprep.subr.bf16.mxu0 %v13442_v48  ;;  %v14068_v48 = vcombine.high %v6682_v22, %v6686_v31 }
 0x6fe   :  { %7477 = vmatpush1.bf16.msra.mxu1 %v14065_v4 }
 0x6ff   :  { %7478 = vmatprep.subr.bf16.mxu1 %v14068_v48 }
 0x700   :  { %7444 = vmatpush1.bf16.msra.mxu0 %v13451_v37  ;;  %v6690_v37 = vld [vmem:[%s14830_s3 + $0xc8] sm:$0xff] }
 0x701   :  { %7445 = vmatprep.subr.bf16.mxu0 %v13454_v11  ;;  %v6694_v11 = vld [vmem:[%s14830_s3 + $0xe8] sm:$0xff] }
 0x704   :  { %7446 = vmatpush1.bf16.msra.mxu0 %v13463_v17  ;;  %v14079_v17 = vcombine.low %v6682_v22, %v6686_v31  ;;  %v6786_v22 = vld [vmem:[%s14830_s3 + $0x3c8] sm:$0xff] }
 0x705   :  { %7447 = vmatprep.subr.bf16.mxu0 %v13466_v41  ;;  %v14083_v41 = vcombine.high %v6690_v37, %v6694_v11  ;;  %v6790_v31 = vld [vmem:[%s14830_s3 + $0x3e8] sm:$0xff] }
 0x706   :  { %7479 = vmatpush1.bf16.msra.mxu1 %v14079_v17 }
 0x707   :  { %7480 = vmatprep.subr.bf16.mxu1 %v14083_v41 }
 0x708   :  { %7448 = vmatpush1.bf16.msra.mxu0 %v13469_v47  ;;  %v6698_v47 = vld [vmem:[%s14830_s3 + $0x108] sm:$0xff] }
 0x709   :  { %7449 = vmatprep.subr.bf16.mxu0 %v13479_v35  ;;  %v6702_v35 = vld [vmem:[%s14830_s3 + $0x128] sm:$0xff] }
 0x70c   :  { %7450 = vmatpush1.bf16.msra.mxu0 %v13481_v10  ;;  %v14093_v10 = vcombine.low %v6690_v37, %v6694_v11  ;;  %v14204_v37 = vcombine.high %v6786_v22, %v6790_v31  ;;  %v14206_v11 = vcombine.low %v6786_v22, %v6790_v31 }
 0x70d   :  { %7451 = vmatprep.subr.bf16.mxu0 %v13491_v57  ;;  %v14097_v57 = vcombine.high %v6698_v47, %v6702_v35 }
 0x70e   :  { %7481 = vmatpush1.bf16.msra.mxu1 %v14093_v10  ;;  %15362 = vst [vmem:[#allocation96_spill] sm:$0xff] %v14204_v37  ;;  %15363 = vst [vmem:[#allocation97_spill] sm:$0xff] %v14206_v11 }
 0x70f   :  { %7482 = vmatprep.subr.bf16.mxu1 %v14097_v57 }
 0x710   :  { %7452 = vmatpush1.bf16.msra.mxu0 %v13493_v51  ;;  %v6706_v51 = vld [vmem:[%s14830_s3 + $0x148] sm:$0xff] }
 0x711   :  { %7453 = vmatprep.subr.bf16.mxu0 %v13506_v13  ;;  %v6710_v13 = vld [vmem:[%s14830_s3 + $0x168] sm:$0xff] }
 0x714   :  { %7454 = vmatpush1.bf16.msra.mxu0 %v13511_v43  ;;  %v14107_v43 = vcombine.low %v6698_v47, %v6702_v35  ;;  %v6668_v47 = vld [vmem:[%s14830_s3 + $0x18] sm:$0xff] }
 0x715   :  { %7455 = vmatprep.subr.bf16.mxu0 %v13530_v12  ;;  %v14111_v12 = vcombine.high %v6706_v51, %v6710_v13  ;;  %v6672_v35 = vld [vmem:[%s14830_s3 + $0x38] sm:$0xff] }
 0x716   :  { %7483 = vmatpush1.bf16.msra.mxu1 %v14107_v43 }
 0x717   :  { %7484 = vmatprep.subr.bf16.mxu1 %v14111_v12 }
 0x718   :  { %7456 = vmatpush1.bf16.msra.mxu0 %v13535_v33  ;;  %v6714_v33 = vld [vmem:[%s14830_s3 + $0x188] sm:$0xff] }
 0x719   :  { %7457 = vmatprep.subr.bf16.mxu0 %v13554_v2  ;;  %v6718_v2 = vld [vmem:[%s14830_s3 + $0x1a8] sm:$0xff] }
 0x71c   :  { %7458 = vmatpush1.bf16.msra.mxu0 %v13559_v50  ;;  %v14121_v50 = vcombine.low %v6706_v51, %v6710_v13  ;;  %v14216_v51 = vcombine.high %v6668_v47, %v6672_v35  ;;  %v14218_v13 = vcombine.low %v6668_v47, %v6672_v35 }
 0x71d   :  { %7459 = vmatprep.subr.bf16.mxu0 %v13575_v38  ;;  %v14125_v38 = vcombine.high %v6714_v33, %v6718_v2 }
 0x71e   :  { %7485 = vmatpush1.bf16.msra.mxu1 %v14121_v50  ;;  %15364 = vst [vmem:[#allocation98_spill] sm:$0xff] %v14216_v51 }
 0x71f   :  { %7486 = vmatprep.subr.bf16.mxu1 %v14125_v38 }
 0x720   :  { %7460 = vmatpush1.bf16.msra.mxu0 %v13577_v55  ;;  %v6722_v55 = vld [vmem:[%s14830_s3 + $0x1c8] sm:$0xff] }
 0x721   :  { %7461 = vmatprep.subr.bf16.mxu0 %v13589_v44  ;;  %v6726_v44 = vld [vmem:[%s14830_s3 + $0x1e8] sm:$0xff] }
 0x724   :  { %7462 = vmatpush1.bf16.msra.mxu0 %v13591_v15  ;;  %v14134_v15 = vcombine.low %v6714_v33, %v6718_v2 }
 0x725   :  { %7463 = vmatprep.subr.bf16.mxu0 %v13603_v59  ;;  %v14137_v59 = vcombine.high %v6722_v55, %v6726_v44 }
 0x726   :  { %7487 = vmatpush1.bf16.msra.mxu1 %v14134_v15 }
 0x727   :  { %7488 = vmatprep.subr.bf16.mxu1 %v14137_v59 }
 0x728   :  { %7464 = vmatpush1.bf16.msra.mxu0 %v13605_v34  ;;  %v14140_v34 = vcombine.low %v6722_v55, %v6726_v44  ;;  %v15365_v55 = vld [vmem:[#allocation19_spill] sm:$0xff] }
 0x729   :  { %7515 = vmatprep.subr.bf16.mxu0 %v13617_v6  ;;  %v6730_v6 = vld [vmem:[%s14830_s3 + $0x208] sm:$0xff] }
 0x72a   :  { %7489 = vmatpush1.bf16.msra.mxu1 %v14140_v34  ;;  %v14150_v9 = vcombine.high %v6730_v6, %v6734_v26  ;;  %v14152_v58 = vcombine.low %v6730_v6, %v6734_v26  ;;  %v15366_v6 = vld [vmem:[#allocation40_spill] sm:$0xff] }
 0x72c   :  { %7490 = vmatprep.subr.bf16.mxu1 %v14150_v9 }
 0x72e   :  { %7491 = vmatpush1.bf16.msra.mxu1 %v14152_v58 }
 0x72f   :  { %7492 = vmatprep.subr.bf16.mxu1 %v14162_v62 }
 0x732   :  { %7493 = vmatpush1.bf16.msra.mxu1 %v14164_v16 }
 0x733   :  { %7494 = vmatprep.subr.bf16.mxu1 %v13515_v60  ;;  %v14182_v60 = vcombine.low %v6770_v21, %v6774_v40  ;;  %v15368_v21 = vld [vmem:[#allocation41_spill] sm:$0xff] }
 0x736   :  { %7495 = vmatpush1.bf16.msra.mxu1 %v13513_v42  ;;  %v6778_v42 = vld [vmem:[%s14830_s3 + $0x388] sm:$0xff] }
 0x737   :  { %7496 = vmatprep.subr.bf16.mxu1 %v13539_v18 }
 0x73a   :  { %7497 = vmatpush1.bf16.msra.mxu1 %v13537_v3  ;;  %v6782_v3 = vld [vmem:[%s14830_s3 + $0x3a8] sm:$0xff] }
 0x73b   :  { %7498 = vmatprep.subr.bf16.mxu1 %v15358_v27  ;;  %v14192_v18 = vcombine.high %v6778_v42, %v6782_v3  ;;  %v14194_v30 = vcombine.low %v6778_v42, %v6782_v3  ;;  %v15367_v27 = vld [vmem:[#allocation21_spill] sm:$0xff] }
 0x73d   :  { %15360 = vst [vmem:[#allocation94_spill] sm:$0xff] %v14192_v18  ;;  %15361 = vst [vmem:[#allocation95_spill] sm:$0xff] %v14194_v30 }
 0x73e   :  { %7499 = vmatpush1.bf16.msra.mxu1 %v15359_v61 }
 0x73f   :  { %7500 = vmatprep.subr.bf16.mxu1 %v14180_v53 }
 0x742   :  { %7501 = vmatpush1.bf16.msra.mxu1 %v14182_v60 }
 0x743   :  { %7502 = vmatprep.subr.bf16.mxu1 %v14192_v18 }
 0x746   :  { %7503 = vmatpush1.bf16.msra.mxu1 %v14194_v30 }
 0x747   :  { %7504 = vmatprep.subr.bf16.mxu1 %v14204_v37  ;;  %v15370_v37 = vld [vmem:[#allocation57_spill] sm:$0xff] }
 0x74a   :  { %7505 = vmatpush1.bf16.msra.mxu1 %v14206_v11 }
 0x74b   :  { %7556 = vmatprep.subr.bf16.mxu1 %v14216_v51 }
 0x77e   :  { %v6477_v33 = vpop.f32.mrb[56].mxu0  ;;  %v6518_v2 = vpop.f32.mrb[88].mxu1 }
 0x77f   :  { %v6607_v44 = vadd.f32 %v6477_v33, %v15365_v55  ;;  %v6609_v26 = vadd.f32 %v6518_v2, %v15366_v6  ;;  %v6479_v63 = vpop.f32.mrb[57].mxu0  ;;  %v6520_v52 = vpop.f32.mrb[89].mxu1  ;;  %v15369_v55 = vld [vmem:[#allocation22_spill] sm:$0xff] }
 0x780   :  { %v6608_v61 = vadd.f32 %v6479_v63, %v15367_v27  ;;  %v6610_v40 = vadd.f32 %v6520_v52, %v15368_v21  ;;  %v6481_v42 = vpop.f32.mrb[58].mxu0  ;;  %v6522_v3 = vpop.f32.mrb[90].mxu1  ;;  %v15371_v21 = vld [vmem:[#allocation24_spill] sm:$0xff] }
 0x781   :  { %v6482_v22 = vpop.f32.mrb[59].mxu0  ;;  %v6523_v31 = vpop.f32.mrb[91].mxu1  ;;  %v6623_v47 = vmul.f32 0.5, %v6609_v26  ;;  %v6615_v11 = vmul.f32 0.5, %v6607_v44  ;;  %v15372_v3 = vld [vmem:[#allocation58_spill] sm:$0xff] }
 0x782   :  { %v6624_v35 = vmul.f32 0.5, %v6610_v40  ;;  %v6616_v51 = vmul.f32 0.5, %v6608_v61 }
 0x783   :  { %10149 = vtanh.f32 %v6623_v47 }
 0x784   :  { %10151 = vtanh.f32 %v6624_v35 }
 0x785   :  { %10153 = vtanh.f32 %v6615_v11 }
 0x786   :  { %10155 = vtanh.f32 %v6616_v51 }
 0x78d   :  { %v10150_v44 = vpop.eup %10149 }
 0x78e   :  { %v10152_v11 = vpop.eup %10151  ;;  %v6627_v35 = vmul.f32 0.5, %v10150_v44 }
 0x78f   :  { %v10154_v51 = vpop.eup %10153 }
 0x790   :  { %v10156_v47 = vpop.eup %10155  ;;  %v6629_v18 = vadd.f32 0.5, %v6627_v35 }
 0x791   :  { %v6620_v30 = vmul.f32 0.5, %v10156_v47 }
 0x7be   :  { %v6559_v33 = vpop.f32.mrb[60].mxu0  ;;  %v6600_v2 = vpop.f32.mrb[92].mxu1 }
 0x7bf   :  { %v6611_v6 = vadd.f32 %v6559_v33, %v15369_v55  ;;  %v6613_v63 = vadd.f32 %v6600_v2, %v15370_v37  ;;  %v6561_v27 = vpop.f32.mrb[61].mxu0  ;;  %v6602_v52 = vpop.f32.mrb[93].mxu1  ;;  %v6628_v55 = vmul.f32 0.5, %v10152_v11  ;;  %v6619_v2 = vmul.f32 0.5, %v10154_v51 }
 0x7c0   :  { %v6612_v42 = vadd.f32 %v6561_v27, %v15371_v21  ;;  %v6614_v22 = vadd.f32 %v6602_v52, %v15372_v3  ;;  %v6563_v26 = vpop.f32.mrb[62].mxu0  ;;  %v6604_v40 = vpop.f32.mrb[94].mxu1  ;;  %v6622_v3 = vadd.f32 0.5, %v6620_v30 }
 0x7c1   :  { %10157 = vtanh.f32 %v6611_v6  ;;  %v6564_v61 = vpop.f32.mrb[63].mxu0  ;;  %v6605_v31 = vpop.f32.mrb[95].mxu1  ;;  %v6633_v33 = vmul.f32 0.5, %v6613_v63  ;;  %v6630_v27 = vadd.f32 0.5, %v6628_v55  ;;  %v6621_v52 = vadd.f32 0.5, %v6619_v2  ;;  %v15374_v2 = vld [vmem:[#allocation49_spill] sm:$0xff] }
 0x7c2   :  { %10159 = vtanh.f32 %v6612_v42  ;;  %v6634_v37 = vmul.f32 0.5, %v6614_v22  ;;  %v6641_v26 = vmul.f32 %v6629_v18, %v13633_v0 }
 0x7c3   :  { %10161 = vtanh.f32 %v6633_v33  ;;  %v6642_v42 = vmul.f32 %v6630_v27, %v13635_v23  ;;  %v15376_v27 = vld [vmem:[#allocation50_spill] sm:$0xff] }
 0x7c4   :  { %10163 = vtanh.f32 %v6634_v37  ;;  %v15373_v37 = vld [vmem:[#allocation10_spill] sm:$0xff] }
 0x7cb   :  { %v10158_v21 = vpop.eup %10157 }
 0x7cc   :  { %v10160_v6 = vpop.eup %10159  ;;  %v6643_v40 = vmul.f32 %v10158_v21, %v6621_v52  ;;  %v15377_v52 = vld [vmem:[#allocation33_spill] sm:$0xff] }
 0x7cd   :  { %v6644_v61 = vmul.f32 %v10160_v6, %v6622_v3  ;;  %v10162_v22 = vpop.eup %10161  ;;  %v15384_v21 = vld [vmem:[#allocation53_spill] sm:$0xff]  ;;  %v15385_v3 = vld [vmem:[#allocation16_spill] sm:$0xff]  ;;  %v15386_v6 = vld [vmem:[#allocation54_spill] sm:$0xff] }
 0x7ce   :  { %v14231_v44 = vadd.f32 %v6643_v40, %v6641_v26  ;;  %v10164_v31 = vpop.eup %10163  ;;  %v6637_v11 = vmul.f32 0.5, %v10162_v22  ;;  %v15387_v26 = vld [vmem:[#allocation8_spill] sm:$0xff]  ;;  %v15388_v40 = vld [vmem:[#allocation47_spill] sm:$0xff] }
 0x7cf   :  { %v14233_v63 = vadd.f32 %v6644_v61, %v6642_v42  ;;  %v6638_v51 = vmul.f32 0.5, %v10164_v31  ;;  %v15389_v42 = vld [vmem:[#allocation65_spill] sm:$0xff]  ;;  %v15390_v61 = vld [vmem:[#allocation66_spill] sm:$0xff]  ;;  %v15391_v22 = vld [vmem:[#allocation67_spill] sm:$0xff] }
 0x7d0   :  { %10165 = vtanh.f32 %v14231_v44  ;;  %v6639_v30 = vadd.f32 0.5, %v6637_v11  ;;  %v15392_v31 = vld [vmem:[#allocation68_spill] sm:$0xff]  ;;  %v15393_v11 = vld [vmem:[#allocation69_spill] sm:$0xff] }
 0x7d1   :  { %10167 = vtanh.f32 %v14233_v63  ;;  %v6640_v35 = vadd.f32 0.5, %v6638_v51  ;;  %v15394_v51 = vld [vmem:[#allocation70_spill] sm:$0xff] }
 0x7da   :  { %v10166_v47 = vpop.eup %10165 }
 0x7db   :  { %v10168_v0 = vpop.eup %10167  ;;  %v14237_v18 = vmul.f32 %v10166_v47, %v6639_v30  ;;  %v15395_v30 = vld [vmem:[#allocation71_spill] sm:$0xff]  ;;  %v15396_v47 = vld [vmem:[#allocation72_spill] sm:$0xff] }
 0x7dc   :  { %v14239_v23 = vmul.f32 %v10168_v0, %v6640_v35  ;;  %v15397_v35 = vld [vmem:[#allocation73_spill] sm:$0xff]  ;;  %v15398_v0 = vld [vmem:[#allocation74_spill] sm:$0xff] }
 0x7dd   :  { %v14245_v55 = vpack.c.bf16 %v14237_v18, %v14237_v18 }
 0x7de   :  { %v6664_v33 = vpack.c.bf16 %v14239_v23, %v14239_v23 }
 0x7e0   :  { %7465 = vmatprep.mubr.bf16.mxu0 %v6664_v33  ;;  %7506 = vmatprep.mubr.bf16.mxu1 %v6664_v33 }
 0x7e1   :  { %7466 = vmatmul.mubr.bf16.vlgmr.msra.gmra.mrb[64].mxu0 %v14245_v55  ;;  %7507 = vmatmul.mubr.bf16.vlgmr.msra.gmra.mrb[96].mxu1 %v14245_v55 }
 0x7e2   :  { %7516 = vmatpush1.bf16.msra.mxu0 %v13619_v54  ;;  %7557 = vmatpush1.bf16.msra.mxu1 %v14218_v13  ;;  %v15375_v54 = vld [vmem:[#allocation12_spill] sm:$0xff] }
 0x7e3   :  { %7547 = vmatprep.mubr.bf16.mxu0 %v6664_v33  ;;  %7588 = vmatprep.mubr.bf16.mxu1 %v6664_v33  ;;  %v15399_v33 = vld [vmem:[#allocation75_spill] sm:$0xff] }
 0x7e4   :  { %7517 = vmatprep.subr.bf16.mxu0 %v13664_v19  ;;  %7558 = vmatprep.subr.bf16.mxu1 %v13666_v14  ;;  %v15378_v19 = vld [vmem:[#allocation5_spill] sm:$0xff]  ;;  %v15379_v14 = vld [vmem:[#allocation11_spill] sm:$0xff] }
 0x7e6   :  { %7518 = vmatpush1.bf16.msra.mxu0 %v13681_v39  ;;  %7559 = vmatpush1.bf16.msra.mxu1 %v13683_v8  ;;  %v15380_v39 = vld [vmem:[#allocation36_spill] sm:$0xff]  ;;  %v15381_v8 = vld [vmem:[#allocation13_spill] sm:$0xff] }
 0x7e7   :  { %7519 = vmatprep.subr.bf16.mxu0 %v13685_v29  ;;  %7560 = vmatprep.subr.bf16.mxu1 %v13687_v46  ;;  %v15382_v29 = vld [vmem:[#allocation37_spill] sm:$0xff]  ;;  %v15383_v46 = vld [vmem:[#allocation14_spill] sm:$0xff] }
 0x7ea   :  { %7520 = vmatpush1.bf16.msra.mxu0 %v15373_v37  ;;  %7561 = vmatpush1.bf16.msra.mxu1 %v15374_v2  ;;  %v15400_v37 = vld [vmem:[#allocation76_spill] sm:$0xff]  ;;  %v15401_v2 = vld [vmem:[#allocation77_spill] sm:$0xff] }
 0x7eb   :  { %7521 = vmatprep.subr.bf16.mxu0 %v15375_v54  ;;  %7562 = vmatprep.subr.bf16.mxu1 %v15376_v27  ;;  %v15402_v54 = vld [vmem:[#allocation78_spill] sm:$0xff]  ;;  %v15403_v27 = vld [vmem:[#allocation79_spill] sm:$0xff] }
 0x7ee   :  { %7522 = vmatpush1.bf16.msra.mxu0 %v15377_v52  ;;  %7563 = vmatpush1.bf16.msra.mxu1 %v15378_v19  ;;  %v15404_v52 = vld [vmem:[#allocation80_spill] sm:$0xff]  ;;  %v15405_v19 = vld [vmem:[#allocation81_spill] sm:$0xff] }
 0x7ef   :  { %7523 = vmatprep.subr.bf16.mxu0 %v15379_v14  ;;  %7564 = vmatprep.subr.bf16.mxu1 %v15380_v39  ;;  %v15406_v14 = vld [vmem:[#allocation82_spill] sm:$0xff]  ;;  %v15407_v39 = vld [vmem:[#allocation83_spill] sm:$0xff] }
 0x7f2   :  { %7524 = vmatpush1.bf16.msra.mxu0 %v15381_v8  ;;  %7565 = vmatpush1.bf16.msra.mxu1 %v15382_v29  ;;  %v15408_v8 = vld [vmem:[#allocation84_spill] sm:$0xff]  ;;  %v15409_v29 = vld [vmem:[#allocation85_spill] sm:$0xff] }
 0x7f3   :  { %7525 = vmatprep.subr.bf16.mxu0 %v15383_v46  ;;  %7566 = vmatprep.subr.bf16.mxu1 %v15384_v21  ;;  %v15410_v46 = vld [vmem:[#allocation86_spill] sm:$0xff]  ;;  %v15411_v21 = vld [vmem:[#allocation87_spill] sm:$0xff] }
 0x7f6   :  { %7526 = vmatpush1.bf16.msra.mxu0 %v15385_v3  ;;  %7567 = vmatpush1.bf16.msra.mxu1 %v15386_v6  ;;  %v15412_v3 = vld [vmem:[#allocation88_spill] sm:$0xff]  ;;  %v15413_v6 = vld [vmem:[#allocation89_spill] sm:$0xff] }
 0x7f7   :  { %7527 = vmatprep.subr.bf16.mxu0 %v15387_v26  ;;  %7568 = vmatprep.subr.bf16.mxu1 %v15388_v40  ;;  %v15414_v26 = vld [vmem:[#allocation90_spill] sm:$0xff]  ;;  %v15415_v40 = vld [vmem:[#allocation91_spill] sm:$0xff] }
 0x7fa   :  { %7528 = vmatpush1.bf16.msra.mxu0 %v15389_v42  ;;  %7569 = vmatpush1.bf16.msra.mxu1 %v15390_v61  ;;  %v15416_v42 = vld [vmem:[#allocation92_spill] sm:$0xff]  ;;  %v15417_v61 = vld [vmem:[#allocation93_spill] sm:$0xff] }
 0x7fb   :  { %7529 = vmatprep.subr.bf16.mxu0 %v15391_v22  ;;  %7570 = vmatprep.subr.bf16.mxu1 %v15392_v31 }
 0x7fe   :  { %7530 = vmatpush1.bf16.msra.mxu0 %v15393_v11  ;;  %7571 = vmatpush1.bf16.msra.mxu1 %v15394_v51  ;;  %v7719_v11 = vld [vmem:[%s14830_s3 + $0x200] sm:$0xff] }
 0x7ff   :  { %7531 = vmatprep.subr.bf16.mxu0 %v15395_v30  ;;  %7572 = vmatprep.subr.bf16.mxu1 %v15396_v47  ;;  %v7723_v51 = vld [vmem:[%s14830_s3 + $0x220] sm:$0xff] }
 0x800   :  { %v9767_v30 = vcombine.high %v7719_v11, %v7723_v51  ;;  %v9766_v47 = vcombine.low %v7719_v11, %v7723_v51 }
 0x802   :  { %7532 = vmatpush1.bf16.msra.mxu0 %v15397_v35  ;;  %7573 = vmatpush1.bf16.msra.mxu1 %v15398_v0  ;;  %v7727_v35 = vld [vmem:[%s14830_s3 + $0x240] sm:$0xff] }
 0x803   :  { %7533 = vmatprep.subr.bf16.mxu0 %v15399_v33  ;;  %7574 = vmatprep.subr.bf16.mxu1 %v15400_v37  ;;  %v7731_v0 = vld [vmem:[%s14830_s3 + $0x260] sm:$0xff] }
 0x804   :  { %v9775_v33 = vcombine.high %v7727_v35, %v7731_v0  ;;  %v9774_v37 = vcombine.low %v7727_v35, %v7731_v0  ;;  %v15426_v35 = vld [vmem:[#allocation43_spill] sm:$0xff] }
 0x806   :  { %7534 = vmatpush1.bf16.msra.mxu0 %v15401_v2  ;;  %7575 = vmatpush1.bf16.msra.mxu1 %v15402_v54  ;;  %v7735_v2 = vld [vmem:[%s14830_s3 + $0x280] sm:$0xff] }
 0x807   :  { %7535 = vmatprep.subr.bf16.mxu0 %v15403_v27  ;;  %7576 = vmatprep.subr.bf16.mxu1 %v15404_v52  ;;  %v7739_v54 = vld [vmem:[%s14830_s3 + $0x2a0] sm:$0xff]  ;;  %v7736_v27 = vld [vmem:[%s14830_s3 + $0x288] sm:$0xff] }
 0x808   :  { %v9783_v52 = vcombine.high %v7735_v2, %v7739_v54 }
 0x80a   :  { %7536 = vmatpush1.bf16.msra.mxu0 %v15405_v19  ;;  %7577 = vmatpush1.bf16.msra.mxu1 %v15406_v14  ;;  %v7740_v19 = vld [vmem:[%s14830_s3 + $0x2a8] sm:$0xff]  ;;  %v9782_v14 = vcombine.low %v7735_v2, %v7739_v54 }
 0x80b   :  { %7537 = vmatprep.subr.bf16.mxu0 %v15407_v39  ;;  %7578 = vmatprep.subr.bf16.mxu1 %v15408_v8  ;;  %v9784_v39 = vcombine.low %v7736_v27, %v7740_v19  ;;  %v9785_v8 = vcombine.high %v7736_v27, %v7740_v19 }
 0x80e   :  { %7538 = vmatpush1.bf16.msra.mxu0 %v15409_v29  ;;  %7579 = vmatpush1.bf16.msra.mxu1 %v15410_v46  ;;  %v7743_v29 = vld [vmem:[%s14830_s3 + $0x2c0] sm:$0xff] }
 0x80f   :  { %7539 = vmatprep.subr.bf16.mxu0 %v15411_v21  ;;  %7580 = vmatprep.subr.bf16.mxu1 %v15412_v3  ;;  %v7747_v46 = vld [vmem:[%s14830_s3 + $0x2e0] sm:$0xff]  ;;  %v7744_v21 = vld [vmem:[%s14830_s3 + $0x2c8] sm:$0xff] }
 0x810   :  { %v9791_v3 = vcombine.high %v7743_v29, %v7747_v46 }
 0x812   :  { %7540 = vmatpush1.bf16.msra.mxu0 %v15413_v6  ;;  %7581 = vmatpush1.bf16.msra.mxu1 %v15414_v26  ;;  %v7748_v6 = vld [vmem:[%s14830_s3 + $0x2e8] sm:$0xff]  ;;  %v9790_v26 = vcombine.low %v7743_v29, %v7747_v46  ;;  %v15427_v29 = vld [vmem:[#allocation26_spill] sm:$0xff] }
 0x813   :  { %7541 = vmatprep.subr.bf16.mxu0 %v15415_v40  ;;  %7582 = vmatprep.subr.bf16.mxu1 %v15416_v42  ;;  %v9792_v40 = vcombine.low %v7744_v21, %v7748_v6  ;;  %v9793_v42 = vcombine.high %v7744_v21, %v7748_v6  ;;  %v15428_v21 = vld [vmem:[#allocation59_spill] sm:$0xff] }
 0x816   :  { %7542 = vmatpush1.bf16.msra.mxu0 %v15417_v61  ;;  %7583 = vmatpush1.bf16.msra.mxu1 %v13971_v32  ;;  %v7751_v61 = vld [vmem:[%s14830_s3 + $0x300] sm:$0xff] }
 0x817   :  { %7543 = vmatprep.subr.bf16.mxu0 %v13975_v56  ;;  %7584 = vmatprep.subr.bf16.mxu1 %v13977_v1  ;;  %v7655_v56 = vld [vmem:[%s14830_s3] sm:$0xff] }
 0x81a   :  { %7544 = vmatpush1.bf16.msra.mxu0 %v13993_v5  ;;  %7585 = vmatpush1.bf16.msra.mxu1 %v13995_v49  ;;  %v7671_v5 = vld [vmem:[%s14830_s3 + $0x80] sm:$0xff] }
 0x81b   :  { %7545 = vmatprep.subr.bf16.mxu0 %v13999_v7  ;;  %7586 = vmatprep.subr.bf16.mxu1 %v14001_v28  ;;  %v7659_v7 = vld [vmem:[%s14830_s3 + $0x20] sm:$0xff] }
 0x81c   :  { %v7663_v28 = vld [vmem:[%s14830_s3 + $0x40] sm:$0xff]  ;;  %v9702_v1 = vcombine.low %v7655_v56, %v7659_v7 }
 0x81d   :  { %v7675_v49 = vld [vmem:[%s14830_s3 + $0xa0] sm:$0xff] }
 0x81e   :  { %7546 = vmatpush1.bf16.msra.mxu0 %v14005_v24  ;;  %7587 = vmatpush1.bf16.msra.mxu1 %v14007_v25  ;;  %v9703_v24 = vcombine.high %v7655_v56, %v7659_v7  ;;  %v7667_v25 = vld [vmem:[%s14830_s3 + $0x60] sm:$0xff]  ;;  %v7752_v7 = vld [vmem:[%s14830_s3 + $0x308] sm:$0xff] }
 0x81f   :  { %8464 = vmatprep.subr.bf16.mxu1 %v14049_v20  ;;  %v9711_v32 = vcombine.high %v7663_v28, %v7667_v25  ;;  %v9719_v20 = vcombine.high %v7671_v5, %v7675_v49  ;;  %v7755_v56 = vld [vmem:[%s14830_s3 + $0x320] sm:$0xff] }
 0x820   :  { %8423 = vmatprep.subr.bf16.mxu0 %v9703_v24  ;;  %v9798_v24 = vcombine.low %v7751_v61, %v7755_v56 }
 0x821   :  { %7548 = vmatmul.mubr.bf16.vlgmr.msra.gmra.mrb[68].mxu0 %v14245_v55  ;;  %7589 = vmatmul.mubr.bf16.vlgmr.msra.gmra.mrb[100].mxu1 %v14245_v55 }
 0x822   :  { %8465 = vmatpush1.bf16.msra.mxu1 %v14047_v45  ;;  %8424 = vmatpush1.bf16.msra.mxu0 %v9702_v1  ;;  %v9710_v45 = vcombine.low %v7663_v28, %v7667_v25  ;;  %v9799_v28 = vcombine.high %v7751_v61, %v7755_v56  ;;  %v7756_v1 = vld [vmem:[%s14830_s3 + $0x328] sm:$0xff]  ;;  %v15430_v61 = vld [vmem:[#allocation60_spill] sm:$0xff] }
 0x823   :  { %8466 = vmatprep.subr.bf16.mxu1 %v14054_v36  ;;  %8425 = vmatprep.subr.bf16.mxu0 %v9711_v32  ;;  %v7679_v36 = vld [vmem:[%s14830_s3 + $0xc0] sm:$0xff]  ;;  %v9800_v25 = vcombine.low %v7752_v7, %v7756_v1  ;;  %v9801_v32 = vcombine.high %v7752_v7, %v7756_v1 }
 0x826   :  { %8467 = vmatpush1.bf16.msra.mxu1 %v14065_v4  ;;  %v7683_v4 = vld [vmem:[%s14830_s3 + $0xe0] sm:$0xff]  ;;  %8426 = vmatpush1.bf16.msra.mxu0 %v9710_v45 }
 0x827   :  { %8468 = vmatprep.subr.bf16.mxu1 %v14068_v48  ;;  %v9718_v48 = vcombine.low %v7671_v5, %v7675_v49  ;;  %8427 = vmatprep.subr.bf16.mxu0 %v9719_v20  ;;  %v7759_v5 = vld [vmem:[%s14830_s3 + $0x340] sm:$0xff] }
 0x828   :  { %v7763_v49 = vld [vmem:[%s14830_s3 + $0x360] sm:$0xff] }
 0x829   :  { %v9807_v45 = vcombine.high %v7759_v5, %v7763_v49  ;;  %v9806_v20 = vcombine.low %v7759_v5, %v7763_v49 }
 0x82a   :  { %8469 = vmatpush1.bf16.msra.mxu1 %v14079_v17  ;;  %v9727_v17 = vcombine.high %v7679_v36, %v7683_v4  ;;  %8428 = vmatpush1.bf16.msra.mxu0 %v9718_v48 }
 0x82b   :  { %8470 = vmatprep.subr.bf16.mxu1 %v14083_v41  ;;  %v7687_v41 = vld [vmem:[%s14830_s3 + $0x100] sm:$0xff] }
 0x82c   :  { %8429 = vmatprep.subr.bf16.mxu0 %v9727_v17 }
 0x82e   :  { %8471 = vmatpush1.bf16.msra.mxu1 %v14093_v10  ;;  %v7691_v10 = vld [vmem:[%s14830_s3 + $0x120] sm:$0xff] }
 0x82f   :  { %8472 = vmatprep.subr.bf16.mxu1 %v14097_v57  ;;  %v9726_v57 = vcombine.low %v7679_v36, %v7683_v4  ;;  %v7767_v36 = vld [vmem:[%s14830_s3 + $0x380] sm:$0xff] }
 0x830   :  { %v7771_v4 = vld [vmem:[%s14830_s3 + $0x3a0] sm:$0xff] }
 0x831   :  { %8430 = vmatpush1.bf16.msra.mxu0 %v9726_v57  ;;  %v9815_v48 = vcombine.high %v7767_v36, %v7771_v4  ;;  %v9814_v17 = vcombine.low %v7767_v36, %v7771_v4  ;;  %v15419_v57 = vld [vmem:[#allocation95_spill] sm:$0xff] }
 0x832   :  { %8473 = vmatpush1.bf16.msra.mxu1 %v14107_v43  ;;  %v9735_v43 = vcombine.high %v7687_v41, %v7691_v10 }
 0x833   :  { %8474 = vmatprep.subr.bf16.mxu1 %v14111_v12  ;;  %v7695_v12 = vld [vmem:[%s14830_s3 + $0x140] sm:$0xff] }
 0x834   :  { %8431 = vmatprep.subr.bf16.mxu0 %v9735_v43 }
 0x836   :  { %8475 = vmatpush1.bf16.msra.mxu1 %v14121_v50  ;;  %v7699_v50 = vld [vmem:[%s14830_s3 + $0x160] sm:$0xff] }
 0x837   :  { %8476 = vmatprep.subr.bf16.mxu1 %v14125_v38  ;;  %v9734_v38 = vcombine.low %v7687_v41, %v7691_v10  ;;  %v15418_v41 = vld [vmem:[#allocation94_spill] sm:$0xff]  ;;  %v7779_v10 = vld [vmem:[%s14830_s3 + $0x3e0] sm:$0xff] }
 0x839   :  { %8432 = vmatpush1.bf16.msra.mxu0 %v9734_v38  ;;  %v14460_v38 = vld [vmem:[%s14830_s3 + $0x30] sm:$0xff] }
 0x83a   :  { %8477 = vmatpush1.bf16.msra.mxu1 %v14134_v15  ;;  %v9743_v15 = vcombine.high %v7695_v12, %v7699_v50 }
 0x83b   :  { %8478 = vmatprep.subr.bf16.mxu1 %v14137_v59  ;;  %v7703_v59 = vld [vmem:[%s14830_s3 + $0x180] sm:$0xff] }
 0x83c   :  { %8433 = vmatprep.subr.bf16.mxu0 %v9743_v15  ;;  %v15421_v15 = vld [vmem:[#allocation97_spill] sm:$0xff] }
 0x83e   :  { %8479 = vmatpush1.bf16.msra.mxu1 %v14140_v34  ;;  %v7707_v34 = vld [vmem:[%s14830_s3 + $0x1a0] sm:$0xff] }
 0x83f   :  { %8480 = vmatprep.subr.bf16.mxu1 %v14150_v9  ;;  %v9742_v9 = vcombine.low %v7695_v12, %v7699_v50  ;;  %v9750_v55 = vcombine.low %v7703_v59, %v7707_v34  ;;  %v15420_v50 = vld [vmem:[#allocation96_spill] sm:$0xff] }
 0x841   :  { %8434 = vmatpush1.bf16.msra.mxu0 %v9742_v9  ;;  %v15422_v9 = vld [vmem:[#allocation98_spill] sm:$0xff] }
 0x842   :  { %8481 = vmatpush1.bf16.msra.mxu1 %v14152_v58  ;;  %v9751_v58 = vcombine.high %v7703_v59, %v7707_v34 }
 0x843   :  { %8482 = vmatprep.subr.bf16.mxu1 %v14162_v62  ;;  %v7711_v62 = vld [vmem:[%s14830_s3 + $0x1c0] sm:$0xff] }
 0x844   :  { %8435 = vmatprep.subr.bf16.mxu0 %v9751_v58 }
 0x845   :  { %8436 = vmatpush1.bf16.msra.mxu0 %v9750_v55 }
 0x846   :  { %8483 = vmatpush1.bf16.msra.mxu1 %v14164_v16  ;;  %v7715_v16 = vld [vmem:[%s14830_s3 + $0x1e0] sm:$0xff] }
 0x847   :  { %v9759_v22 = vcombine.high %v7711_v62, %v7715_v16  ;;  %v9758_v31 = vcombine.low %v7711_v62, %v7715_v16  ;;  %8484 = vmatprep.subr.bf16.mxu1 %v9785_v8  ;;  %v15423_v16 = vld [vmem:[#allocation23_spill] sm:$0xff] }
 0x849   :  { %8437 = vmatprep.subr.bf16.mxu0 %v9759_v22  ;;  %v15424_v22 = vld [vmem:[#allocation42_spill] sm:$0xff] }
 0x84a   :  { %8438 = vmatpush1.bf16.msra.mxu0 %v9758_v31  ;;  %8485 = vmatpush1.bf16.msra.mxu1 %v9784_v39 }
 0x84b   :  { %8439 = vmatprep.subr.bf16.mxu0 %v9767_v30  ;;  %8486 = vmatprep.subr.bf16.mxu1 %v9793_v42  ;;  %v15425_v30 = vld [vmem:[#allocation25_spill] sm:$0xff] }
 0x84e   :  { %8440 = vmatpush1.bf16.msra.mxu0 %v9766_v47  ;;  %8487 = vmatpush1.bf16.msra.mxu1 %v9792_v40  ;;  %v15429_v40 = vld [vmem:[#allocation28_spill] sm:$0xff] }
 0x84f   :  { %8441 = vmatprep.subr.bf16.mxu0 %v9775_v33  ;;  %8488 = vmatprep.subr.bf16.mxu1 %v9801_v32 }
 0x852   :  { %8442 = vmatpush1.bf16.msra.mxu0 %v9774_v37  ;;  %8489 = vmatpush1.bf16.msra.mxu1 %v9800_v25 }
 0x853   :  { %8443 = vmatprep.subr.bf16.mxu0 %v9783_v52  ;;  %8490 = vmatprep.subr.bf16.mxu1 %v14180_v53  ;;  %v7775_v53 = vld [vmem:[%s14830_s3 + $0x3c0] sm:$0xff] }
 0x854   :  { %v9823_v43 = vcombine.high %v7775_v53, %v7779_v10  ;;  %v9822_v12 = vcombine.low %v7775_v53, %v7779_v10 }
 0x856   :  { %8444 = vmatpush1.bf16.msra.mxu0 %v9782_v14  ;;  %8491 = vmatpush1.bf16.msra.mxu1 %v14182_v60  ;;  %v14455_v60 = vld [vmem:[%s14830_s3 + $0x10] sm:$0xff] }
 0x857   :  { %8445 = vmatprep.subr.bf16.mxu0 %v9791_v3  ;;  %8492 = vmatprep.subr.bf16.mxu1 %v15418_v41  ;;  %v9707_v59 = vcombine.high %v14455_v60, %v14460_v38  ;;  %v9706_v34 = vcombine.low %v14455_v60, %v14460_v38  ;;  %v7686_v60 = vld [vmem:[%s14830_s3 + $0xf8] sm:$0xff] }
 0x85a   :  { %8446 = vmatpush1.bf16.msra.mxu0 %v9790_v26  ;;  %8493 = vmatpush1.bf16.msra.mxu1 %v15419_v57 }
 0x85b   :  { %8447 = vmatprep.subr.bf16.mxu0 %v9799_v28  ;;  %8494 = vmatprep.subr.bf16.mxu1 %v15420_v50 }
 0x85e   :  { %8448 = vmatpush1.bf16.msra.mxu0 %v9798_v24  ;;  %8495 = vmatpush1.bf16.msra.mxu1 %v15421_v15 }
 0x85f   :  { %8449 = vmatprep.subr.bf16.mxu0 %v9807_v45  ;;  %8546 = vmatprep.subr.bf16.mxu1 %v15422_v9 }
 0x862   :  { %8450 = vmatpush1.bf16.msra.mxu0 %v9806_v20 }
 0x863   :  { %8451 = vmatprep.subr.bf16.mxu0 %v9815_v48 }
 0x866   :  { %8452 = vmatpush1.bf16.msra.mxu0 %v9814_v17 }
 0x867   :  { %8453 = vmatprep.subr.bf16.mxu0 %v9823_v43 }
 0x86a   :  { %8454 = vmatpush1.bf16.msra.mxu0 %v9822_v12 }
 0x86b   :  { %8505 = vmatprep.subr.bf16.mxu0 %v9707_v59 }
 0x8b4   :  { %v7467_v58 = vpop.f32.mrb[64].mxu0  ;;  %v7508_v62 = vpop.f32.mrb[96].mxu1 }
 0x8b5   :  { %v7597_v55 = vadd.f32 %v7467_v58, %v15423_v16  ;;  %v7599_v31 = vadd.f32 %v7508_v62, %v15424_v22  ;;  %v7469_v11 = vpop.f32.mrb[65].mxu0  ;;  %v7510_v51 = vpop.f32.mrb[97].mxu1 }
 0x8b6   :  { %v7598_v47 = vadd.f32 %v7469_v11, %v15425_v30  ;;  %v7600_v0 = vadd.f32 %v7510_v51, %v15426_v35  ;;  %v7471_v33 = vpop.f32.mrb[66].mxu0  ;;  %v7512_v37 = vpop.f32.mrb[98].mxu1  ;;  %v7665_v35 = vld [vmem:[%s14830_s3 + $0x50] sm:$0xff] }
 0x8b7   :  { %v7472_v2 = vpop.f32.mrb[67].mxu0  ;;  %v7513_v54 = vpop.f32.mrb[99].mxu1  ;;  %v7613_v27 = vmul.f32 0.5, %v7599_v31  ;;  %v7605_v19 = vmul.f32 0.5, %v7597_v55  ;;  %v7666_v33 = vld [vmem:[%s14830_s3 + $0x58] sm:$0xff] }
 0x8b8   :  { %v7614_v52 = vmul.f32 0.5, %v7600_v0  ;;  %v7606_v14 = vmul.f32 0.5, %v7598_v47  ;;  %v7669_v0 = vld [vmem:[%s14830_s3 + $0x70] sm:$0xff]  ;;  %v7670_v37 = vld [vmem:[%s14830_s3 + $0x78] sm:$0xff] }
 0x8b9   :  { %10169 = vtanh.f32 %v7613_v27  ;;  %v7673_v27 = vld [vmem:[%s14830_s3 + $0x90] sm:$0xff] }
 0x8ba   :  { %10171 = vtanh.f32 %v7614_v52  ;;  %v9715_v52 = vcombine.high %v7665_v35, %v7669_v0 }
 0x8bb   :  { %10173 = vtanh.f32 %v7605_v19  ;;  %v9717_v19 = vcombine.high %v7666_v33, %v7670_v37 }
 0x8bc   :  { %10175 = vtanh.f32 %v7606_v14  ;;  %v7677_v14 = vld [vmem:[%s14830_s3 + $0xb0] sm:$0xff] }
 0x8bd   :  { %v9722_v38 = vcombine.low %v7673_v27, %v7677_v14 }
 0x8c3   :  { %v10170_v1 = vpop.eup %10169 }
 0x8c4   :  { %v10172_v32 = vpop.eup %10171  ;;  %v7617_v45 = vmul.f32 0.5, %v10170_v1 }
 0x8c5   :  { %v10174_v5 = vpop.eup %10173  ;;  %v7618_v36 = vmul.f32 0.5, %v10172_v32 }
 0x8c6   :  { %v10176_v49 = vpop.eup %10175  ;;  %v7609_v48 = vmul.f32 0.5, %v10174_v5  ;;  %v7619_v41 = vadd.f32 0.5, %v7617_v45  ;;  %v7697_v5 = vld [vmem:[%s14830_s3 + $0x150] sm:$0xff]  ;;  %v7698_v45 = vld [vmem:[%s14830_s3 + $0x158] sm:$0xff] }
 0x8c7   :  { %v7610_v17 = vmul.f32 0.5, %v10176_v49  ;;  %v7620_v53 = vadd.f32 0.5, %v7618_v36  ;;  %v7701_v49 = vld [vmem:[%s14830_s3 + $0x170] sm:$0xff] }
 0x8c8   :  { %v7611_v10 = vadd.f32 0.5, %v7609_v48  ;;  %v7631_v50 = vmul.f32 %v7619_v41, %v14231_v44  ;;  %v9747_v48 = vcombine.high %v7697_v5, %v7701_v49  ;;  %v7705_v41 = vld [vmem:[%s14830_s3 + $0x190] sm:$0xff] }
 0x8c9   :  { %v7612_v43 = vadd.f32 0.5, %v7610_v17  ;;  %v7632_v59 = vmul.f32 %v7620_v53, %v14233_v63  ;;  %v7709_v53 = vld [vmem:[%s14830_s3 + $0x1b0] sm:$0xff] }
 0x8f4   :  { %v7549_v39 = vpop.f32.mrb[68].mxu0  ;;  %v7590_v8 = vpop.f32.mrb[100].mxu1 }
 0x8f5   :  { %v7601_v46 = vadd.f32 %v7549_v39, %v15427_v29  ;;  %v7603_v3 = vadd.f32 %v7590_v8, %v15428_v21  ;;  %v7551_v6 = vpop.f32.mrb[69].mxu0  ;;  %v7592_v26 = vpop.f32.mrb[101].mxu1  ;;  %v7674_v39 = vld [vmem:[%s14830_s3 + $0x98] sm:$0xff]  ;;  %v9714_v29 = vcombine.low %v7665_v35, %v7669_v0  ;;  %v9723_v21 = vcombine.high %v7673_v27, %v7677_v14 }
 0x8f6   :  { %v7602_v42 = vadd.f32 %v7551_v6, %v15429_v40  ;;  %v7604_v56 = vadd.f32 %v7592_v26, %v15430_v61  ;;  %v7553_v7 = vpop.f32.mrb[70].mxu0  ;;  %v7594_v28 = vpop.f32.mrb[102].mxu1  ;;  %v7678_v8 = vld [vmem:[%s14830_s3 + $0xb8] sm:$0xff]  ;;  %v7681_v6 = vld [vmem:[%s14830_s3 + $0xd0] sm:$0xff] }
 0x8f7   :  { %10177 = vtanh.f32 %v7601_v46  ;;  %v7554_v24 = vpop.f32.mrb[71].mxu0  ;;  %v7595_v25 = vpop.f32.mrb[103].mxu1  ;;  %v7623_v20 = vmul.f32 0.5, %v7603_v3  ;;  %v9716_v46 = vcombine.low %v7666_v33, %v7670_v37  ;;  %v9725_v3 = vcombine.high %v7674_v39, %v7678_v8  ;;  %v7685_v26 = vld [vmem:[%s14830_s3 + $0xf0] sm:$0xff]  ;;  %v7690_v7 = vld [vmem:[%s14830_s3 + $0x118] sm:$0xff] }
 0x8f8   :  { %10179 = vtanh.f32 %v7602_v42  ;;  %v7624_v4 = vmul.f32 0.5, %v7604_v56  ;;  %v9731_v40 = vcombine.high %v7681_v6, %v7685_v26  ;;  %v7689_v61 = vld [vmem:[%s14830_s3 + $0x110] sm:$0xff]  ;;  %v7694_v28 = vld [vmem:[%s14830_s3 + $0x138] sm:$0xff]  ;;  %v9730_v1 = vcombine.low %v7681_v6, %v7685_v26 }
 0x8f9   :  { %10181 = vtanh.f32 %v7623_v20  ;;  %v7693_v56 = vld [vmem:[%s14830_s3 + $0x130] sm:$0xff]  ;;  %v9741_v32 = vcombine.high %v7690_v7, %v7694_v28  ;;  %v7702_v20 = vld [vmem:[%s14830_s3 + $0x178] sm:$0xff] }
 0x8fa   :  { %10183 = vtanh.f32 %v7624_v4  ;;  %v9739_v25 = vcombine.high %v7689_v61, %v7693_v56  ;;  %v9738_v36 = vcombine.low %v7689_v61, %v7693_v56  ;;  %v9740_v4 = vcombine.low %v7690_v7, %v7694_v28  ;;  %v7722_v35 = vld [vmem:[%s14830_s3 + $0x218] sm:$0xff]  ;;  %v7741_v6 = vld [vmem:[%s14830_s3 + $0x2b0] sm:$0xff] }
 0x8fb   :  { %v9749_v17 = vcombine.high %v7698_v45, %v7702_v20  ;;  %v7726_v0 = vld [vmem:[%s14830_s3 + $0x238] sm:$0xff]  ;;  %v7749_v61 = vld [vmem:[%s14830_s3 + $0x2f0] sm:$0xff] }
 0x8fc   :  { %v9773_v27 = vcombine.high %v7722_v35, %v7726_v0  ;;  %v7730_v14 = vld [vmem:[%s14830_s3 + $0x258] sm:$0xff] }
 0x8fd   :  { %v7738_v26 = vld [vmem:[%s14830_s3 + $0x298] sm:$0xff] }
 0x8fe   :  { %v7746_v56 = vld [vmem:[%s14830_s3 + $0x2d8] sm:$0xff] }
 0x8ff   :  { %v7750_v7 = vld [vmem:[%s14830_s3 + $0x2f8] sm:$0xff] }
 0x901   :  { %v10178_v57 = vpop.eup %10177 }
 0x902   :  { %v10180_v12 = vpop.eup %10179  ;;  %v7633_v15 = vmul.f32 %v10178_v57, %v7611_v10  ;;  %v7706_v10 = vld [vmem:[%s14830_s3 + $0x198] sm:$0xff] }
 0x903   :  { %v7634_v9 = vmul.f32 %v10180_v12, %v7612_v43  ;;  %v10182_v16 = vpop.eup %10181  ;;  %v7710_v57 = vld [vmem:[%s14830_s3 + $0x1b8] sm:$0xff]  ;;  %v9746_v43 = vcombine.low %v7697_v5, %v7701_v49  ;;  %v9748_v12 = vcombine.low %v7698_v45, %v7702_v20  ;;  %v7757_v5 = vld [vmem:[%s14830_s3 + $0x330] sm:$0xff] }
 0x904   :  { %v14478_v58 = vadd.f32 %v7633_v15, %v7631_v50  ;;  %v10184_v55 = vpop.eup %10183  ;;  %v7627_v22 = vmul.f32 0.5, %v10182_v16  ;;  %v9755_v50 = vcombine.high %v7705_v41, %v7709_v53  ;;  %v9757_v15 = vcombine.high %v7706_v10, %v7710_v57  ;;  %v7714_v16 = vld [vmem:[%s14830_s3 + $0x1d8] sm:$0xff] }
 0x905   :  { %v14480_v62 = vadd.f32 %v7634_v9, %v7632_v59  ;;  %v7628_v31 = vmul.f32 0.5, %v10184_v55  ;;  %v7713_v59 = vld [vmem:[%s14830_s3 + $0x1d0] sm:$0xff]  ;;  %v7718_v55 = vld [vmem:[%s14830_s3 + $0x1f8] sm:$0xff] }
 0x906   :  { %10185 = vtanh.f32 %v14478_v58  ;;  %v7629_v11 = vadd.f32 0.5, %v7627_v22  ;;  %v7717_v9 = vld [vmem:[%s14830_s3 + $0x1f0] sm:$0xff]  ;;  %v9754_v22 = vcombine.low %v7705_v41, %v7709_v53  ;;  %v9764_v37 = vcombine.low %v7714_v16, %v7718_v55  ;;  %v7754_v49 = vld [vmem:[%s14830_s3 + $0x318] sm:$0xff] }
 0x907   :  { %10187 = vtanh.f32 %v14480_v62  ;;  %v7630_v30 = vadd.f32 0.5, %v7628_v31  ;;  %v9756_v31 = vcombine.low %v7706_v10, %v7710_v57  ;;  %v9762_v33 = vcombine.low %v7713_v59, %v7717_v9  ;;  %v7758_v45 = vld [vmem:[%s14830_s3 + $0x338] sm:$0xff]  ;;  %v7765_v41 = vld [vmem:[%s14830_s3 + $0x370] sm:$0xff] }
 0x908   :  { %v7762_v53 = vld [vmem:[%s14830_s3 + $0x358] sm:$0xff] }
 0x909   :  { %v7766_v10 = vld [vmem:[%s14830_s3 + $0x378] sm:$0xff] }
 0x910   :  { %v10186_v51 = vpop.eup %10185 }
 0x911   :  { %v10188_v44 = vpop.eup %10187  ;;  %v14484_v47 = vmul.f32 %v10186_v51, %v7629_v11  ;;  %v9763_v11 = vcombine.high %v7713_v59, %v7717_v9  ;;  %v9765_v51 = vcombine.high %v7714_v16, %v7718_v55  ;;  %v7773_v59 = vld [vmem:[%s14830_s3 + $0x3b0] sm:$0xff]  ;;  %v7770_v9 = vld [vmem:[%s14830_s3 + $0x398] sm:$0xff] }
 0x912   :  { %v14486_v63 = vmul.f32 %v10188_v44, %v7630_v30  ;;  %v7721_v30 = vld [vmem:[%s14830_s3 + $0x210] sm:$0xff]  ;;  %v7774_v16 = vld [vmem:[%s14830_s3 + $0x3b8] sm:$0xff] }
 0x913   :  { %v14504_v54 = vpack.c.bf16 %v14484_v47, %v14484_v47  ;;  %v7725_v44 = vld [vmem:[%s14830_s3 + $0x230] sm:$0xff] }
 0x914   :  { %v7654_v2 = vpack.c.bf16 %v14486_v63, %v14486_v63 }
 0x916   :  { %8455 = vmatprep.mubr.bf16.mxu0 %v7654_v2  ;;  %8496 = vmatprep.mubr.bf16.mxu1 %v7654_v2 }
 0x917   :  { %8456 = vmatmul.mubr.bf16.vlgmr.msra.gmra.mrb[72].mxu0 %v14504_v54  ;;  %8497 = vmatmul.mubr.bf16.vlgmr.msra.gmra.mrb[104].mxu1 %v14504_v54 }
 0x918   :  { %8506 = vmatpush1.bf16.msra.mxu0 %v9706_v34  ;;  %8547 = vmatpush1.bf16.msra.mxu1 %v14218_v13  ;;  %v7682_v13 = vld [vmem:[%s14830_s3 + $0xd8] sm:$0xff]  ;;  %v9724_v34 = vcombine.low %v7674_v39, %v7678_v8  ;;  %v9770_v8 = vcombine.low %v7721_v30, %v7725_v44 }
 0x919   :  { %8537 = vmatprep.mubr.bf16.mxu0 %v7654_v2  ;;  %8578 = vmatprep.mubr.bf16.mxu1 %v7654_v2  ;;  %v9733_v42 = vcombine.high %v7682_v13, %v7686_v60  ;;  %v9732_v24 = vcombine.low %v7682_v13, %v7686_v60  ;;  %v9771_v2 = vcombine.high %v7721_v30, %v7725_v44  ;;  %v7734_v39 = vld [vmem:[%s14830_s3 + $0x278] sm:$0xff]  ;;  %v7781_v30 = vld [vmem:[%s14830_s3 + $0x3f0] sm:$0xff] }
 0x91a   :  { %8507 = vmatprep.subr.bf16.mxu0 %v9715_v52  ;;  %8548 = vmatprep.subr.bf16.mxu1 %v9717_v19  ;;  %v7729_v52 = vld [vmem:[%s14830_s3 + $0x250] sm:$0xff]  ;;  %v7742_v13 = vld [vmem:[%s14830_s3 + $0x2b8] sm:$0xff] }
 0x91b   :  { %v7733_v19 = vld [vmem:[%s14830_s3 + $0x270] sm:$0xff]  ;;  %v7778_v44 = vld [vmem:[%s14830_s3 + $0x3d8] sm:$0xff] }
 0x91c   :  { %8508 = vmatpush1.bf16.msra.mxu0 %v9714_v29  ;;  %8549 = vmatpush1.bf16.msra.mxu1 %v9716_v46  ;;  %v9772_v29 = vcombine.low %v7722_v35, %v7726_v0  ;;  %v9779_v46 = vcombine.high %v7729_v52, %v7733_v19  ;;  %v9778_v60 = vcombine.low %v7729_v52, %v7733_v19  ;;  %v7782_v35 = vld [vmem:[%s14830_s3 + $0x3f8] sm:$0xff]  ;;  %v8667_v52 = vld [vmem:[%s14833_s4 + $0x88] sm:$0xff] }
 0x91d   :  { %8509 = vmatprep.subr.bf16.mxu0 %v9723_v21  ;;  %8550 = vmatprep.subr.bf16.mxu1 %v9725_v3  ;;  %v9781_v21 = vcombine.high %v7730_v14, %v7734_v39  ;;  %v7737_v3 = vld [vmem:[%s14830_s3 + $0x290] sm:$0xff] }
 0x91e   :  { %v9786_v28 = vcombine.low %v7737_v3, %v7741_v6 }
 0x920   :  { %8510 = vmatpush1.bf16.msra.mxu0 %v9722_v38  ;;  %8551 = vmatpush1.bf16.msra.mxu1 %v9724_v34  ;;  %v9780_v38 = vcombine.low %v7730_v14, %v7734_v39  ;;  %v9787_v34 = vcombine.high %v7737_v3, %v7741_v6  ;;  %v9828_v14 = vcombine.low %v7778_v44, %v7782_v35 }
 0x921   :  { %8511 = vmatprep.subr.bf16.mxu0 %v9731_v40  ;;  %8552 = vmatprep.subr.bf16.mxu1 %v9733_v42  ;;  %v9789_v40 = vcombine.high %v7738_v26, %v7742_v13  ;;  %v7745_v42 = vld [vmem:[%s14830_s3 + $0x2d0] sm:$0xff] }
 0x922   :  { %v9794_v20 = vcombine.low %v7745_v42, %v7749_v61 }
 0x924   :  { %8512 = vmatpush1.bf16.msra.mxu0 %v9730_v1  ;;  %8553 = vmatpush1.bf16.msra.mxu1 %v9732_v24  ;;  %v9788_v1 = vcombine.low %v7738_v26, %v7742_v13  ;;  %v9795_v24 = vcombine.high %v7745_v42, %v7749_v61  ;;  %v8652_v26 = vld [vmem:[%s14833_s4 + $0x10] sm:$0xff]  ;;  %v8653_v13 = vld [vmem:[%s14833_s4 + $0x18] sm:$0xff]  ;;  %v8654_v61 = vld [vmem:[%s14833_s4 + $0x20] sm:$0xff] }
 0x925   :  { %8513 = vmatprep.subr.bf16.mxu0 %v9739_v25  ;;  %8554 = vmatprep.subr.bf16.mxu1 %v9741_v32  ;;  %v9797_v25 = vcombine.high %v7746_v56, %v7750_v7  ;;  %v7753_v32 = vld [vmem:[%s14830_s3 + $0x310] sm:$0xff] }
 0x926   :  { %v9802_v57 = vcombine.low %v7753_v32, %v7757_v5 }
 0x928   :  { %8514 = vmatpush1.bf16.msra.mxu0 %v9738_v36  ;;  %8555 = vmatpush1.bf16.msra.mxu1 %v9740_v4  ;;  %v9796_v36 = vcombine.low %v7746_v56, %v7750_v7  ;;  %v9803_v4 = vcombine.high %v7753_v32, %v7757_v5  ;;  %v8655_v56 = vld [vmem:[%s14833_s4 + $0x28] sm:$0xff]  ;;  %v8672_v7 = vld [vmem:[%s14833_s4 + $0xb0] sm:$0xff]  ;;  %v8674_v32 = vld [vmem:[%s14833_s4 + $0xc0] sm:$0xff] }
 0x929   :  { %8515 = vmatprep.subr.bf16.mxu0 %v9747_v48  ;;  %8556 = vmatprep.subr.bf16.mxu1 %v9749_v17  ;;  %v9805_v48 = vcombine.high %v7754_v49, %v7758_v45  ;;  %v7761_v17 = vld [vmem:[%s14830_s3 + $0x350] sm:$0xff]  ;;  %v8675_v5 = vld [vmem:[%s14833_s4 + $0xc8] sm:$0xff] }
 0x92a   :  { %v9810_v55 = vcombine.low %v7761_v17, %v7765_v41 }
 0x92c   :  { %8516 = vmatpush1.bf16.msra.mxu0 %v9746_v43  ;;  %8557 = vmatpush1.bf16.msra.mxu1 %v9748_v12  ;;  %v9804_v43 = vcombine.low %v7754_v49, %v7758_v45  ;;  %v9811_v12 = vcombine.high %v7761_v17, %v7765_v41  ;;  %v10031_v45 = vpack.c.bf16 %v8675_v5, %v8674_v32  ;;  %v15447_v32 = vld [vmem:[#allocation31_spill] sm:$0xff] }
 0x92d   :  { %8517 = vmatprep.subr.bf16.mxu0 %v9755_v50  ;;  %8558 = vmatprep.subr.bf16.mxu1 %v9757_v15  ;;  %v9813_v50 = vcombine.high %v7762_v53, %v7766_v10  ;;  %v7769_v15 = vld [vmem:[%s14830_s3 + $0x390] sm:$0xff] }
 0x92e   :  { %v9818_v0 = vcombine.low %v7769_v15, %v7773_v59 }
 0x930   :  { %8518 = vmatpush1.bf16.msra.mxu0 %v9754_v22  ;;  %8559 = vmatpush1.bf16.msra.mxu1 %v9756_v31  ;;  %v9812_v22 = vcombine.low %v7762_v53, %v7766_v10  ;;  %v9819_v31 = vcombine.high %v7769_v15, %v7773_v59  ;;  %v8660_v53 = vld [vmem:[%s14833_s4 + $0x50] sm:$0xff]  ;;  %v8661_v10 = vld [vmem:[%s14833_s4 + $0x58] sm:$0xff]  ;;  %v8662_v15 = vld [vmem:[%s14833_s4 + $0x60] sm:$0xff] }
 0x931   :  { %8519 = vmatprep.subr.bf16.mxu0 %v9763_v11  ;;  %8560 = vmatprep.subr.bf16.mxu1 %v9765_v51  ;;  %v9821_v11 = vcombine.high %v7770_v9, %v7774_v16  ;;  %v7777_v51 = vld [vmem:[%s14830_s3 + $0x3d0] sm:$0xff]  ;;  %v8663_v59 = vld [vmem:[%s14833_s4 + $0x68] sm:$0xff] }
 0x932   :  { %v9826_v19 = vcombine.low %v7777_v51, %v7781_v30 }
 0x934   :  { %8520 = vmatpush1.bf16.msra.mxu0 %v9762_v33  ;;  %8561 = vmatpush1.bf16.msra.mxu1 %v9764_v37  ;;  %v9820_v33 = vcombine.low %v7770_v9, %v7774_v16  ;;  %v9827_v37 = vcombine.high %v7777_v51, %v7781_v30  ;;  %v8680_v9 = vld [vmem:[%s14833_s4 + $0xf0] sm:$0xff]  ;;  %v8681_v16 = vld [vmem:[%s14833_s4 + $0xf8] sm:$0xff] }
 0x935   :  { %8521 = vmatprep.subr.bf16.mxu0 %v9771_v2  ;;  %8562 = vmatprep.subr.bf16.mxu1 %v9773_v27  ;;  %v9829_v2 = vcombine.high %v7778_v44, %v7782_v35  ;;  %v8666_v27 = vld [vmem:[%s14833_s4 + $0x80] sm:$0xff]  ;;  %v15432_v30 = vld [vmem:[#allocation63_spill] sm:$0xff] }
 0x936   :  { %v10015_v39 = vpack.c.bf16 %v8667_v52, %v8666_v27  ;;  %v15433_v44 = vld [vmem:[#allocation32_spill] sm:$0xff]  ;;  %v15439_v27 = vld [vmem:[#allocation35_spill] sm:$0xff]  ;;  %v15440_v52 = vld [vmem:[#allocation9_spill] sm:$0xff] }
 0x937   :  { %v15434_v35 = vld [vmem:[#allocation4_spill] sm:$0xff] }
 0x938   :  { %8522 = vmatpush1.bf16.msra.mxu0 %v9770_v8  ;;  %8563 = vmatpush1.bf16.msra.mxu1 %v9772_v29  ;;  %v8650_v8 = vld [vmem:[%s14833_s4] sm:$0xff]  ;;  %v8651_v29 = vld [vmem:[%s14833_s4 + $0x8] sm:$0xff] }
 0x939   :  { %8523 = vmatprep.subr.bf16.mxu0 %v9779_v46  ;;  %8564 = vmatprep.subr.bf16.mxu1 %v9781_v21  ;;  %v8668_v46 = vld [vmem:[%s14833_s4 + $0x90] sm:$0xff]  ;;  %v8669_v21 = vld [vmem:[%s14833_s4 + $0x98] sm:$0xff]  ;;  %v10017_v3 = vpack.c.bf16 %v8651_v29, %v8650_v8  ;;  %v15442_v29 = vld [vmem:[#allocation44_spill] sm:$0xff] }
 0x93a   :  { %v10019_v6 = vpack.c.bf16 %v8669_v21, %v8668_v46 }
 0x93c   :  { %8524 = vmatpush1.bf16.msra.mxu0 %v9778_v60  ;;  %8565 = vmatpush1.bf16.msra.mxu1 %v9780_v38  ;;  %v8670_v60 = vld [vmem:[%s14833_s4 + $0xa0] sm:$0xff]  ;;  %v8671_v38 = vld [vmem:[%s14833_s4 + $0xa8] sm:$0xff] }
 0x93d   :  { %8525 = vmatprep.subr.bf16.mxu0 %v9787_v34  ;;  %8566 = vmatprep.subr.bf16.mxu1 %v9789_v40  ;;  %v15431_v34 = vld [vmem:[#allocation64_spill] sm:$0xff]  ;;  %v10021_v40 = vpack.c.bf16 %v8653_v13, %v8652_v26  ;;  %v10023_v42 = vpack.c.bf16 %v8671_v38, %v8670_v60  ;;  %v15444_v13 = vld [vmem:[#allocation45_spill] sm:$0xff] }
 0x940   :  { %8526 = vmatpush1.bf16.msra.mxu0 %v9786_v28  ;;  %8567 = vmatpush1.bf16.msra.mxu1 %v9788_v1  ;;  %v10025_v28 = vpack.c.bf16 %v8655_v56, %v8654_v61 }
 0x941   :  { %8527 = vmatprep.subr.bf16.mxu0 %v9795_v24  ;;  %8568 = vmatprep.subr.bf16.mxu1 %v9797_v25  ;;  %v8656_v24 = vld [vmem:[%s14833_s4 + $0x30] sm:$0xff]  ;;  %v8657_v25 = vld [vmem:[%s14833_s4 + $0x38] sm:$0xff] }
 0x942   :  { %v10029_v49 = vpack.c.bf16 %v8657_v25, %v8656_v24 }
 0x944   :  { %8528 = vmatpush1.bf16.msra.mxu0 %v9794_v20  ;;  %8569 = vmatpush1.bf16.msra.mxu1 %v9796_v36  ;;  %v8658_v20 = vld [vmem:[%s14833_s4 + $0x40] sm:$0xff]  ;;  %v8659_v36 = vld [vmem:[%s14833_s4 + $0x48] sm:$0xff] }
 0x945   :  { %8529 = vmatprep.subr.bf16.mxu0 %v9803_v4  ;;  %8570 = vmatprep.subr.bf16.mxu1 %v9805_v48  ;;  %v8676_v4 = vld [vmem:[%s14833_s4 + $0xd0] sm:$0xff]  ;;  %v8677_v48 = vld [vmem:[%s14833_s4 + $0xd8] sm:$0xff]  ;;  %v10033_v17 = vpack.c.bf16 %v8659_v36, %v8658_v20 }
 0x946   :  { %v10035_v41 = vpack.c.bf16 %v8677_v48, %v8676_v4 }
 0x948   :  { %8530 = vmatpush1.bf16.msra.mxu0 %v9802_v57  ;;  %8571 = vmatpush1.bf16.msra.mxu1 %v9804_v43  ;;  %v8678_v57 = vld [vmem:[%s14833_s4 + $0xe0] sm:$0xff]  ;;  %v8679_v43 = vld [vmem:[%s14833_s4 + $0xe8] sm:$0xff] }
 0x949   :  { %8531 = vmatprep.subr.bf16.mxu0 %v9811_v12  ;;  %8572 = vmatprep.subr.bf16.mxu1 %v9813_v50  ;;  %v10037_v12 = vpack.c.bf16 %v8661_v10, %v8660_v53  ;;  %v10039_v50 = vpack.c.bf16 %v8679_v43, %v8678_v57 }
 0x94c   :  { %8532 = vmatpush1.bf16.msra.mxu0 %v9810_v55  ;;  %8573 = vmatpush1.bf16.msra.mxu1 %v9812_v22  ;;  %v10041_v55 = vpack.c.bf16 %v8663_v59, %v8662_v15  ;;  %v10043_v22 = vpack.c.bf16 %v8681_v16, %v8680_v9 }
 0x94d   :  { %8533 = vmatprep.subr.bf16.mxu0 %v9819_v31  ;;  %8574 = vmatprep.subr.bf16.mxu1 %v9821_v11  ;;  %v8664_v31 = vld [vmem:[%s14833_s4 + $0x70] sm:$0xff]  ;;  %v8665_v11 = vld [vmem:[%s14833_s4 + $0x78] sm:$0xff] }
 0x94e   :  { %v10045_v51 = vpack.c.bf16 %v8665_v11, %v8664_v31 }
 0x950   :  { %8534 = vmatpush1.bf16.msra.mxu0 %v9818_v0  ;;  %8575 = vmatpush1.bf16.msra.mxu1 %v9820_v33  ;;  %v15435_v0 = vld [vmem:[#allocation46_spill] sm:$0xff] }
 0x951   :  { %8535 = vmatprep.subr.bf16.mxu0 %v9827_v37  ;;  %8576 = vmatprep.subr.bf16.mxu1 %v9829_v2  ;;  %v15436_v33 = vld [vmem:[#allocation6_spill] sm:$0xff]  ;;  %v15437_v37 = vld [vmem:[#allocation111_spill] sm:$0xff]  ;;  %v15438_v2 = vld [vmem:[#allocation109_spill] sm:$0xff] }
 0x954   :  { %8536 = vmatpush1.bf16.msra.mxu0 %v9826_v19  ;;  %8577 = vmatpush1.bf16.msra.mxu1 %v9828_v14 }
 0x955   :  { %10016 = vmatprep.subr.bf16.mxu0 %v10015_v39  ;;  %v15441_v39 = vld [vmem:[#allocation27_spill] sm:$0xff] }
 0x957   :  { %8538 = vmatmul.mubr.bf16.vlgmr.msra.gmra.mrb[76].mxu0 %v14504_v54  ;;  %8579 = vmatmul.mubr.bf16.vlgmr.msra.gmra.mrb[108].mxu1 %v14504_v54  ;;  %v8673_v54 = vld [vmem:[%s14833_s4 + $0xb8] sm:$0xff] }
 0x958   :  { %10018 = vmatpush3.bf16.msra.mxu0 %v10017_v3  ;;  %8753 = vmatprep.mubr.f32.mxu0 %v15431_v34  ;;  %v10027_v1 = vpack.c.bf16 %v8673_v54, %v8672_v7  ;;  %v15445_v7 = vld [vmem:[#allocation30_spill] sm:$0xff] }
 0x959   :  { %10020 = vmatprep.subr.bf16.mxu0 %v10019_v6  ;;  %v15443_v6 = vld [vmem:[#allocation29_spill] sm:$0xff] }
 0x95c   :  { %10022 = vmatpush3.bf16.msra.mxu0 %v10021_v40 }
 0x95d   :  { %10024 = vmatprep.subr.bf16.mxu0 %v10023_v42 }
 0x960   :  { %10026 = vmatpush3.bf16.msra.mxu0 %v10025_v28  ;;  %v15446_v28 = vld [vmem:[#allocation61_spill] sm:$0xff] }
 0x961   :  { %10028 = vmatprep.subr.bf16.mxu0 %v10027_v1 }
 0x964   :  { %10030 = vmatpush3.bf16.msra.mxu0 %v10029_v49  ;;  %v15448_v49 = vld [vmem:[#allocation62_spill] sm:$0xff] }
 0x965   :  { %10032 = vmatprep.subr.bf16.mxu0 %v10031_v45 }
 0x968   :  { %10034 = vmatpush3.bf16.msra.mxu0 %v10033_v17 }
 0x969   :  { %10036 = vmatprep.subr.bf16.mxu0 %v10035_v41 }
 0x96c   :  { %10038 = vmatpush3.bf16.msra.mxu0 %v10037_v12 }
 0x96d   :  { %10040 = vmatprep.subr.bf16.mxu0 %v10039_v50 }
 0x970   :  { %10042 = vmatpush3.bf16.msra.mxu0 %v10041_v55 }
 0x971   :  { %10044 = vmatprep.subr.bf16.mxu0 %v10043_v22 }
 0x974   :  { %10046 = vmatpush3.bf16.msra.mxu0 %v10045_v51 }
 0x977   :  { %8754 = vmatmul.mubr.f32.vlgmr.msra.gmra.mrb[80].mxu0 %v15432_v30 }
 0x978   :  { %8758 = vmatprep.mubr.f32.mxu0 %v15433_v44 }
 0x97b   :  { %8759 = vmatmul.mubr.f32.gmra.mrb[82].mxu0 %v15434_v35 }
 0x97c   :  { %8763 = vmatprep.mubr.f32.mxu0 %v15435_v0 }
 0x97f   :  { %8764 = vmatmul.mubr.f32.gmra.mrb[84].mxu0 %v15436_v33 }
 0x980   :  { %8768 = vmatprep.mubr.f32.mxu0 %v15437_v37 }
 0x983   :  { %8769 = vmatmul.mubr.f32.gmra.mrb[86].mxu0 %v15438_v2 }
 0x984   :  { %8773 = vmatprep.mubr.f32.mxu0 %v15439_v27 }
 0x987   :  { %8774 = vmatmul.mubr.f32.gmra.mrb[88].mxu0 %v15440_v52 }
 0x988   :  { %8778 = vmatprep.mubr.f32.mxu0 %v14239_v23 }
 0x98b   :  { %8779 = vmatmul.mubr.f32.gmra.mrb[90].mxu0 %v14237_v18 }
 0x98c   :  { %8783 = vmatprep.mubr.f32.mxu0 %v14486_v63 }
 0x98f   :  { %8784 = vmatmul.mubr.f32.gmra.mrb[92].mxu0 %v14484_v47 }
 0x9ea   :  { %v8457_v19 = vpop.f32.mrb[72].mxu0  ;;  %v8498_v14 = vpop.f32.mrb[104].mxu1 }
 0x9eb   :  { %v8587_v8 = vadd.f32 %v8457_v19, %v15441_v39  ;;  %v8589_v46 = vadd.f32 %v8498_v14, %v15442_v29  ;;  %v8459_v21 = vpop.f32.mrb[73].mxu0  ;;  %v8500_v3 = vpop.f32.mrb[105].mxu1 }
 0x9ec   :  { %v8588_v26 = vadd.f32 %v8459_v21, %v15443_v6  ;;  %v8590_v60 = vadd.f32 %v8500_v3, %v15444_v13  ;;  %v8461_v38 = vpop.f32.mrb[74].mxu0  ;;  %v8502_v23 = vpop.f32.mrb[106].mxu1 }
 0x9ed   :  { %v8462_v34 = vpop.f32.mrb[75].mxu0  ;;  %v8503_v18 = vpop.f32.mrb[107].mxu1  ;;  %v8603_v40 = vmul.f32 0.5, %v8589_v46  ;;  %v8595_v42 = vmul.f32 0.5, %v8587_v8 }
 0x9ee   :  { %v8604_v63 = vmul.f32 0.5, %v8590_v60  ;;  %v8596_v47 = vmul.f32 0.5, %v8588_v26 }
 0x9ef   :  { %10189 = vtanh.f32 %v8603_v40 }
 0x9f0   :  { %10191 = vtanh.f32 %v8604_v63 }
 0x9f1   :  { %10193 = vtanh.f32 %v8595_v42 }
 0x9f2   :  { %10195 = vtanh.f32 %v8596_v47 }
 0x9f9   :  { %v10190_v4 = vpop.eup %10189 }
 0x9fa   :  { %v10192_v41 = vpop.eup %10191  ;;  %v8607_v57 = vmul.f32 0.5, %v10190_v4 }
 0x9fb   :  { %v10194_v53 = vpop.eup %10193  ;;  %v8608_v12 = vmul.f32 0.5, %v10192_v41 }
 0x9fc   :  { %v10196_v10 = vpop.eup %10195  ;;  %v8599_v15 = vmul.f32 0.5, %v10194_v53  ;;  %v8609_v9 = vadd.f32 0.5, %v8607_v57 }
 0x9fd   :  { %v8600_v59 = vmul.f32 0.5, %v10196_v10  ;;  %v8610_v16 = vadd.f32 0.5, %v8608_v12 }
 0x9fe   :  { %v8601_v55 = vadd.f32 0.5, %v8599_v15  ;;  %v8621_v51 = vmul.f32 %v8609_v9, %v14478_v58  ;;  %v9830_v58 = vld [vmem:[%s14834_s5] ss:$0 sm:$0xff] }
 0x9ff   :  { %v8602_v31 = vadd.f32 0.5, %v8600_v59  ;;  %v8622_v44 = vmul.f32 %v8610_v16, %v14480_v62 }
 0xa2a   :  { %v8539_v61 = vpop.f32.mrb[76].mxu0  ;;  %v8580_v56 = vpop.f32.mrb[108].mxu1 }
 0xa2b   :  { %v8591_v54 = vadd.f32 %v8539_v61, %v15445_v7  ;;  %v8593_v1 = vadd.f32 %v8580_v56, %v15446_v28  ;;  %v8541_v24 = vpop.f32.mrb[77].mxu0  ;;  %v8582_v25 = vpop.f32.mrb[109].mxu1 }
 0xa2c   :  { %v8592_v5 = vadd.f32 %v8541_v24, %v15447_v32  ;;  %v8594_v45 = vadd.f32 %v8582_v25, %v15448_v49  ;;  %v8543_v20 = vpop.f32.mrb[78].mxu0  ;;  %v8584_v36 = vpop.f32.mrb[110].mxu1 }
 0xa2d   :  { %10197 = vtanh.f32 %v8591_v54  ;;  %v8544_v48 = vpop.f32.mrb[79].mxu0  ;;  %v8585_v17 = vpop.f32.mrb[111].mxu1  ;;  %v8613_v43 = vmul.f32 0.5, %v8593_v1 }
 0xa2e   :  { %10199 = vtanh.f32 %v8592_v5  ;;  %v8614_v50 = vmul.f32 0.5, %v8594_v45 }
 0xa2f   :  { %10201 = vtanh.f32 %v8613_v43 }
 0xa30   :  { %10203 = vtanh.f32 %v8614_v50 }
 0xa37   :  { %v10198_v22 = vpop.eup %10197 }
 0xa38   :  { %v10200_v11 = vpop.eup %10199  ;;  %v8623_v30 = vmul.f32 %v10198_v22, %v8601_v55 }
 0xa39   :  { %v8624_v35 = vmul.f32 %v10200_v11, %v8602_v31  ;;  %v10202_v37 = vpop.eup %10201 }
 0xa3a   :  { %v8625_v0 = vadd.f32 %v8623_v30, %v8621_v51  ;;  %v10204_v2 = vpop.eup %10203  ;;  %v8617_v27 = vmul.f32 0.5, %v10202_v37 }
 0xa3b   :  { %v8626_v33 = vadd.f32 %v8624_v35, %v8622_v44  ;;  %v8618_v52 = vmul.f32 0.5, %v10204_v2 }
 0xa3c   :  { %10205 = vtanh.f32 %v8625_v0  ;;  %v8619_v19 = vadd.f32 0.5, %v8617_v27 }
 0xa3d   :  { %10207 = vtanh.f32 %v8626_v33  ;;  %v8620_v39 = vadd.f32 0.5, %v8618_v52 }
 0xa46   :  { %v10206_v14 = vpop.eup %10205 }
 0xa47   :  { %v10208_v8 = vpop.eup %10207  ;;  %v8629_v29 = vmul.f32 %v10206_v14, %v8619_v19 }
 0xa48   :  { %v8630_v46 = vmul.f32 %v10208_v8, %v8620_v39 }
 0xa4a   :  { %v9863_v21 = vpop.f32.mrb[80].mxu0  ;;  %8788 = vmatprep.mubr.f32.mxu0 %v8630_v46 }
 0xa4b   :  { %v9864_v62 = vpop.f32.mrb[81].mxu0  ;;  %8789 = vmatmul.mubr.f32.gmra.mrb[94].mxu0 %v8629_v29 }
 0xa4c   :  { %v9865_v3 = vadd.f32 %v9864_v62, %v9863_v21 }
 0xa4e   :  { %v8756_v6 = vadd.f32 %v9865_v3, %v9830_v58  ;;  %v9866_v26 = vpop.f32.mrb[82].mxu0 }
 0xa4f   :  { %v9867_v13 = vpop.f32.mrb[83].mxu0 }
 0xa50   :  { %8794 = vst [vmem:[%s14835_s6] sm:$0xff] %v8756_v6  ;;  %v9868_v60 = vadd.f32 %v9867_v13, %v9866_v26 }
 0xa52   :  { %v8761_v38 = vadd.f32 %v9868_v60, %v9830_v58  ;;  %v9869_v23 = vpop.f32.mrb[84].mxu0 }
 0xa53   :  { %v9870_v34 = vpop.f32.mrb[85].mxu0 }
 0xa54   :  { %8795 = vst [vmem:[%s14835_s6 + $0x8] sm:$0xff] %v8761_v38  ;;  %v9871_v18 = vadd.f32 %v9870_v34, %v9869_v23 }
 0xa56   :  { %v8766_v40 = vadd.f32 %v9871_v18, %v9830_v58  ;;  %v9872_v63 = vpop.f32.mrb[86].mxu0 }
 0xa57   :  { %v9873_v42 = vpop.f32.mrb[87].mxu0 }
 0xa58   :  { %8796 = vst [vmem:[%s14835_s6 + $0x10] sm:$0xff] %v8766_v40  ;;  %v9874_v47 = vadd.f32 %v9873_v42, %v9872_v63 }
 0xa5a   :  { %v8771_v61 = vadd.f32 %v9874_v47, %v9830_v58  ;;  %v9875_v56 = vpop.f32.mrb[88].mxu0 }
 0xa5b   :  { %v9876_v7 = vpop.f32.mrb[89].mxu0 }
 0xa5c   :  { %8797 = vst [vmem:[%s14835_s6 + $0x18] sm:$0xff] %v8771_v61  ;;  %v9877_v54 = vadd.f32 %v9876_v7, %v9875_v56 }
 0xa5e   :  { %v8776_v28 = vadd.f32 %v9877_v54, %v9830_v58  ;;  %v9878_v1 = vpop.f32.mrb[90].mxu0 }
 0xa5f   :  { %v9879_v24 = vpop.f32.mrb[91].mxu0 }
 0xa60   :  { %8798 = vst [vmem:[%s14835_s6 + $0x20] sm:$0xff] %v8776_v28  ;;  %v9880_v25 = vadd.f32 %v9879_v24, %v9878_v1 }
 0xa62   :  { %v8781_v32 = vadd.f32 %v9880_v25, %v9830_v58  ;;  %v9881_v5 = vpop.f32.mrb[92].mxu0 }
 0xa63   :  { %v9882_v49 = vpop.f32.mrb[93].mxu0 }
 0xa64   :  { %8799 = vst [vmem:[%s14835_s6 + $0x28] sm:$0xff] %v8781_v32  ;;  %v9883_v45 = vadd.f32 %v9882_v49, %v9881_v5 }
 0xa66   :  { %v8786_v20 = vadd.f32 %v9883_v45, %v9830_v58 }
 0xa68   :  { %8800 = vst [vmem:[%s14835_s6 + $0x30] sm:$0xff] %v8786_v20 }
 0xb1e   :  { %v9884_v36 = vpop.f32.mrb[94].mxu0 }
 0xb1f   :  { %v9885_v4 = vpop.f32.mrb[95].mxu0 }
 0xb20   :  { %v9886_v48 = vadd.f32 %v9885_v4, %v9884_v36 }
 0xb22   :  { %v8791_v17 = vadd.f32 %v9886_v48, %v9830_v58 }
 0xb24   :  { %8801 = vst [vmem:[%s14835_s6 + $0x38] sm:$0xff] %v8791_v17 }

</bundles_post_ra>
